<compile_context>
chip_gen: v7x
topology: tpu7x:2x2x1
jax: 0.10.0
libtpu: 0.0.40
codegen_flags: <defaults>
</compile_context>

<pallas_src>
import functools

import jax
import jax.numpy as jnp
from jax import lax
from jax.experimental import pallas as pl
from jax.experimental.pallas import tpu as pltpu


def _block_kernel(x_ref, w_ref, bias_ref, g1_ref, b1_ref, gmat_ref,
                  o_ref, xpad_ref, patch_ref, *, eps):
    # x_ref:    (BB, H, W, Cin)      unpadded NHWC input slab (BB batch elems)
    # w_ref:    (9*Cin, Cout)        conv weights, im2col layout (kh, kw, cin) x cout
    # bias_ref: (1, Cout)            conv bias (f32)
    # g1_ref:   (BB, 1, Cout)        fused gain  = gamma * (scale + 1)          (f32)
    # b1_ref:   (BB, 1, Cout)        fused shift = beta  * (scale + 1) + shift  (f32)
    # gmat_ref: (Cout, Cout)         group-averaging matrix, entries 1/(H*W*cg) (f32)
    # o_ref:    (BB, H*W, Cout)      output slab
    # xpad_ref: (BB, H+2, W+2, Cin)  VMEM scratch: zero-padded input
    # patch_ref:(BB*H*W, 9*Cin)      VMEM scratch: im2col patch matrix
    BB, H, W, Cin = x_ref.shape
    Cout = o_ref.shape[2]
    HW = H * W
    npix = jnp.float32(HW)

    # --- in-kernel zero padding (replaces jnp.pad: saves one HBM round-trip of
    #     the input). Scratch is re-zeroed every step so correctness does not
    #     depend on grid iteration order / megacore splitting.
    xpad_ref[...] = jnp.zeros(xpad_ref.shape, xpad_ref.dtype)
    xpad_ref[:, 1:H + 1, 1:W + 1, :] = x_ref[...]

    # --- im2col: assemble the (BB*H*W, 9*Cin) patch matrix in VMEM scratch ---
    for b in range(BB):                                   # BB is compile-time
        xp = xpad_ref[b]                                  # (H+2, W+2, Cin)
        for kh in range(3):
            for kw in range(3):
                t = kh * 3 + kw
                patch_ref[b * HW:(b + 1) * HW, t * Cin:(t + 1) * Cin] = (
                    xp[kh:kh + H, kw:kw + W, :].reshape(HW, Cin))

    # --- single MXU matmul, K = 9*Cin, f32 accumulation, full precision ---
    acc = jnp.dot(patch_ref[...], w_ref[...],
                  preferred_element_type=jnp.float32,
                  precision=lax.Precision.HIGHEST)        # (BB*HW, Cout)
    acc3 = acc.reshape(BB, HW, Cout)

    # --- GroupNorm stats; conv bias folded into the tiny (BB, Cout) vector math
    #     so the big tensor never sees a separate bias-add pass.
    s1 = jnp.sum(acc3, axis=1)                            # (BB, Cout) per-channel sum
    s2 = jnp.sum(acc3 * acc3, axis=1)                     # (BB, Cout) per-channel sumsq
    bias = bias_ref[...]                                  # (1, Cout) f32
    zsum = s1 + npix * bias                               # stats of z = acc + bias
    zsq = s2 + 2.0 * bias * s1 + npix * bias * bias
    gmat = gmat_ref[...]                                  # (Cout, Cout) f32
    mean = jnp.dot(zsum, gmat, preferred_element_type=jnp.float32,
                   precision=lax.Precision.HIGHEST)       # (BB, Cout) group mean
    ex2 = jnp.dot(zsq, gmat, preferred_element_type=jnp.float32,
                  precision=lax.Precision.HIGHEST)        # (BB, Cout) group E[z^2]
    var = jnp.maximum(ex2 - mean * mean, 0.0)             # clamp f32 cancellation
    rstd = lax.rsqrt(var + eps)                           # biased var (PyTorch)

    # --- fused GroupNorm-affine + FiLM: one FMA pass over the big tensor ---
    g1 = g1_ref[...][:, 0, :]                             # (BB, Cout)
    b1 = b1_ref[...][:, 0, :]                             # (BB, Cout)
    a_vec = rstd * g1
    b_vec = (bias - mean) * rstd * g1 + b1
    y = acc3 * a_vec[:, None, :] + b_vec[:, None, :]      # (BB, HW, Cout)

    # --- exact SiLU via tanh: y*sigmoid(y) = h + h*tanh(h), h = y/2 ---
    h = 0.5 * y
    y = h + h * jnp.tanh(h)

    o_ref[...] = y.astype(o_ref.dtype)


def _pick_batch_block(B, H, W, max_rows=2048):
    """Largest divisor of B keeping <= max_rows im2col rows per grid step."""
    bb = 1
    for cand in range(1, B + 1):
        if B % cand == 0 and cand * H * W <= max(max_rows, H * W):
            bb = cand
    return bb


def block_forward(x_nchw, w_oihw, bias, gamma, beta, scale_shift=None,
                  *, groups=8, eps=1e-5):
    """Pallas equivalent of Block.forward. x_nchw: (B, Cin, H, W), weights OIHW."""
    B, Cin, H, W = x_nchw.shape
    Cout = w_oihw.shape[0]
    assert Cout % groups == 0
    cg = Cout // groups
    HW = H * W

    x = jnp.transpose(x_nchw, (0, 2, 3, 1))               # NCHW -> NHWC (no pad)
    # OIHW -> HWIO -> (9*Cin, Cout) im2col weight matrix (free layout change).
    w_mat = jnp.transpose(w_oihw, (2, 3, 1, 0)).reshape(9 * Cin, Cout)

    f32 = jnp.float32
    gamma32 = gamma.astype(f32).reshape(1, Cout)
    beta32 = beta.astype(f32).reshape(1, Cout)
    bias32 = bias.astype(f32).reshape(1, Cout)

    # Fuse GroupNorm affine + FiLM into per-(sample, channel) gain/shift, f32.
    if scale_shift is not None:
        s, t = scale_shift
        sp1 = s.reshape(B, Cout).astype(f32) + 1.0
        shf = t.reshape(B, Cout).astype(f32)
        g1 = gamma32 * sp1
        b1 = beta32 * sp1 + shf
    else:
        g1 = jnp.broadcast_to(gamma32, (B, Cout))
        b1 = jnp.broadcast_to(beta32, (B, Cout))
    g1 = g1.reshape(B, 1, Cout)
    b1 = b1.reshape(B, 1, Cout)

    # Group-averaging matrix, hoisted out of the kernel (tiny constant input).
    gidx = jnp.arange(Cout) // cg
    gmat = (gidx[:, None] == gidx[None, :]).astype(f32) / f32(HW * cg)

    BB = _pick_batch_block(B, H, W)
    grid = (B // BB,)
    rows = BB * HW

    # VMEM limit sized to the working set; 48 MiB cap leaves headroom on v7x.
    itm = x.dtype.itemsize
    est = (2 * (BB * H * W * Cin * itm
                + rows * Cout * itm
                + 9 * Cin * Cout * w_mat.dtype.itemsize
                + (2 * BB + 1 + Cout) * Cout * 4)
           + BB * (H + 2) * (W + 2) * Cin * itm
           + rows * 9 * Cin * itm
           + 4 * rows * Cout * 4
           + (8 << 20))
    vmem_limit = int(min(max(est, 32 << 20), 48 << 20))

    kernel = functools.partial(_block_kernel, eps=eps)
    out3 = pl.pallas_call(
        kernel,
        out_shape=jax.ShapeDtypeStruct((B, HW, Cout), x.dtype),
        grid_spec=pltpu.PrefetchScalarGridSpec(
            num_scalar_prefetch=0,
            grid=grid,
            in_specs=[
                pl.BlockSpec((BB, H, W, Cin), lambda i: (i, 0, 0, 0)),
                pl.BlockSpec((9 * Cin, Cout), lambda i: (0, 0)),
                pl.BlockSpec((1, Cout), lambda i: (0, 0)),
                pl.BlockSpec((BB, 1, Cout), lambda i: (i, 0, 0)),
                pl.BlockSpec((BB, 1, Cout), lambda i: (i, 0, 0)),
                pl.BlockSpec((Cout, Cout), lambda i: (0, 0)),
            ],
            out_specs=pl.BlockSpec((BB, HW, Cout), lambda i: (i, 0, 0)),
            scratch_shapes=[
                pltpu.VMEM((BB, H + 2, W + 2, Cin), x.dtype),
                pltpu.VMEM((rows, 9 * Cin), x.dtype),
            ]),
        compiler_params=pltpu.CompilerParams(
            dimension_semantics=("parallel",),
            vmem_limit_bytes=vmem_limit),
    )(x, w_mat, bias32, g1, b1, gmat)

    out = out3.reshape(B, H, W, Cout)
    return jnp.transpose(out, (0, 3, 1, 2))               # NHWC -> NCHW


def _reference(x, w, b, gamma, beta, scale_shift, groups=8, eps=1e-5):
    """Plain-JAX reference matching the PyTorch module semantics (NCHW)."""
    with jax.default_matmul_precision("highest"):
        y = lax.conv_general_dilated(
            x, w, window_strides=(1, 1), padding=((1, 1), (1, 1)),
            dimension_numbers=("NCHW", "OIHW", "NCHW"))
    y = y + b.reshape(1, -1, 1, 1)
    B, C, H, W = y.shape
    yg = y.reshape(B, groups, C // groups, H, W)
    m = jnp.mean(yg, axis=(2, 3, 4), keepdims=True)
    v = jnp.mean((yg - m) ** 2, axis=(2, 3, 4), keepdims=True)
    y = ((yg - m) / jnp.sqrt(v + eps)).reshape(B, C, H, W)
    y = y * gamma.reshape(1, -1, 1, 1) + beta.reshape(1, -1, 1, 1)
    if scale_shift is not None:
        s, t = scale_shift
        y = y * (s + 1.0) + t
    return y * jax.nn.sigmoid(y)


if __name__ == "__main__":
    key = jax.random.PRNGKey(0)
    B, Cin, Cout, H, W, groups = 2, 4, 16, 16, 16, 8

    k = jax.random.split(key, 7)
    x = jax.random.normal(k[0], (B, Cin, H, W), jnp.float32)
    # Conv2d(dim, dim_out, 3) parameters (deterministic synthetic init).
    w = jax.random.normal(k[1], (Cout, Cin, 3, 3), jnp.float32) * 0.1
    bias = jax.random.normal(k[2], (Cout,), jnp.float32) * 0.1
    # GroupNorm affine params (module init is ones/zeros; perturb to exercise path).
    gamma = 1.0 + 0.1 * jax.random.normal(k[3], (Cout,), jnp.float32)
    beta = 0.1 * jax.random.normal(k[4], (Cout,), jnp.float32)
    # Optional scale_shift (e.g. time-embedding FiLM), shaped (B, Cout, 1, 1).
    scale = 0.5 * jax.random.normal(k[5], (B, Cout, 1, 1), jnp.float32)
    shift = 0.5 * jax.random.normal(k[6], (B, Cout, 1, 1), jnp.float32)
    scale_shift = (scale, shift)

    # Path 1: with FiLM scale_shift.
    out = jax.block_until_ready(
        block_forward(x, w, bias, gamma, beta, scale_shift, groups=groups))
    ref = jax.block_until_ready(
        _reference(x, w, bias, gamma, beta, scale_shift, groups))
    assert out.shape == (B, Cout, H, W)
    err = float(jnp.max(jnp.abs(out - ref)))
    assert err < 2e-2, f"mismatch vs reference (scale_shift): max abs err {err}"

    # Path 2: scale_shift=None.
    out2 = jax.block_until_ready(
        block_forward(x, w, bias, gamma, beta, None, groups=groups))
    ref2 = jax.block_until_ready(
        _reference(x, w, bias, gamma, beta, None, groups))
    err2 = float(jnp.max(jnp.abs(out2 - ref2)))
    assert err2 < 2e-2, f"mismatch vs reference (no scale_shift): max abs err {err2}"

    print("KERNEL_OK")
</pallas_src>

<mosaic_0001>
module attributes {stable_mosaic.version = 11 : i64} {
  func.func @_block_kernel(%arg0: i32, %arg1: memref<2x16x16x4xf32, #tpu.memory_space<vmem>>, %arg2: memref<36x16xf32, #tpu.memory_space<vmem>>, %arg3: memref<1x16xf32, #tpu.memory_space<vmem>>, %arg4: memref<2x1x16xf32, #tpu.memory_space<vmem>>, %arg5: memref<2x1x16xf32, #tpu.memory_space<vmem>>, %arg6: memref<16x16xf32, #tpu.memory_space<vmem>>, %arg7: memref<2x256x16xf32, #tpu.memory_space<vmem>>, %arg8: memref<2x18x18x4xf32, #tpu.memory_space<vmem>>, %arg9: memref<512x36xf32, #tpu.memory_space<vmem>>) attributes {dimension_semantics = [#tpu.dimension_semantics<parallel>], iteration_bounds = array<i64: 1>, scalar_prefetch = 0 : i64, scratch_operands = 2 : i64, tpu.core_type = #tpu.core_type<tc>, window_params = [{transform_indices = @transform_0, window_bounds = array<i64: 2, 16, 16, 4>}, {pipeline_mode = #tpu.pipeline_mode<synchronous>, transform_indices = @transform_1, window_bounds = array<i64: 36, 16>}, {pipeline_mode = #tpu.pipeline_mode<synchronous>, transform_indices = @transform_2, window_bounds = array<i64: 1, 16>}, {transform_indices = @transform_3, window_bounds = array<i64: 2, 1, 16>}, {transform_indices = @transform_4, window_bounds = array<i64: 2, 1, 16>}, {pipeline_mode = #tpu.pipeline_mode<synchronous>, transform_indices = @transform_5, window_bounds = array<i64: 16, 16>}, {transform_indices = @transform_6, window_bounds = array<i64: 2, 256, 16>}]} {
    %cst = arith.constant 0.000000e+00 : f32
    %0 = vector.broadcast %cst : f32 to vector<2x18x18x4xf32>
    %c0 = arith.constant 0 : index
    %c0_0 = arith.constant 0 : index
    %c0_1 = arith.constant 0 : index
    %c0_2 = arith.constant 0 : index
    %1 = vector.load %arg8[%c0, %c0_0, %c0_1, %c0_2] : memref<2x18x18x4xf32, #tpu.memory_space<vmem>>, vector<2x18x18x4xf32>
    tpu.vector_store %arg8[%c0, %c0_0, %c0_1, %c0_2], %0 {strides = array<i32>} : memref<2x18x18x4xf32, #tpu.memory_space<vmem>>, vector<2x18x18x4xf32>,
    %c0_3 = arith.constant 0 : index
    %c0_4 = arith.constant 0 : index
    %c0_5 = arith.constant 0 : index
    %c0_6 = arith.constant 0 : index
    %2 = vector.load %arg1[%c0_3, %c0_4, %c0_5, %c0_6] : memref<2x16x16x4xf32, #tpu.memory_space<vmem>>, vector<2x16x16x4xf32>
    %c0_7 = arith.constant 0 : index
    %c1 = arith.constant 1 : index
    %c1_8 = arith.constant 1 : index
    %c0_9 = arith.constant 0 : index
    %3 = vector.load %arg8[%c0_7, %c1, %c1_8, %c0_9] : memref<2x18x18x4xf32, #tpu.memory_space<vmem>>, vector<2x16x16x4xf32>
    tpu.vector_store %arg8[%c0_7, %c1, %c1_8, %c0_9], %2 {strides = array<i32>} : memref<2x18x18x4xf32, #tpu.memory_space<vmem>>, vector<2x16x16x4xf32>,
    %c0_10 = arith.constant 0 : index
    %c0_11 = arith.constant 0 : index
    %c0_12 = arith.constant 0 : index
    %c0_13 = arith.constant 0 : index
    %4 = vector.load %arg8[%c0_10, %c0_11, %c0_12, %c0_13] : memref<2x18x18x4xf32, #tpu.memory_space<vmem>>, vector<1x18x18x4xf32>
    %5 = vector.shape_cast %4 : vector<1x18x18x4xf32> to vector<18x18x4xf32>
    %6 = vector.extract_strided_slice %5 {offsets = [0, 0, 0], sizes = [16, 16, 4], strides = [1, 1, 1]} : vector<18x18x4xf32> to vector<16x16x4xf32>
    %7 = vector.shape_cast %6 : vector<16x16x4xf32> to vector<256x4xf32>
    %c0_14 = arith.constant 0 : index
    %c0_15 = arith.constant 0 : index
    %8 = vector.load %arg9[%c0_14, %c0_15] : memref<512x36xf32, #tpu.memory_space<vmem>>, vector<256x4xf32>
    tpu.vector_store %arg9[%c0_14, %c0_15], %7 {strides = array<i32>} : memref<512x36xf32, #tpu.memory_space<vmem>>, vector<256x4xf32>,
    %9 = vector.extract_strided_slice %5 {offsets = [0, 1, 0], sizes = [16, 16, 4], strides = [1, 1, 1]} : vector<18x18x4xf32> to vector<16x16x4xf32>
    %10 = vector.shape_cast %9 : vector<16x16x4xf32> to vector<256x4xf32>
    %c0_16 = arith.constant 0 : index
    %c4 = arith.constant 4 : index
    %11 = vector.load %arg9[%c0_16, %c4] : memref<512x36xf32, #tpu.memory_space<vmem>>, vector<256x4xf32>
    tpu.vector_store %arg9[%c0_16, %c4], %10 {strides = array<i32>} : memref<512x36xf32, #tpu.memory_space<vmem>>, vector<256x4xf32>,
    %12 = vector.extract_strided_slice %5 {offsets = [0, 2, 0], sizes = [16, 16, 4], strides = [1, 1, 1]} : vector<18x18x4xf32> to vector<16x16x4xf32>
    %13 = vector.shape_cast %12 : vector<16x16x4xf32> to vector<256x4xf32>
    %c0_17 = arith.constant 0 : index
    %c8 = arith.constant 8 : index
    %14 = vector.load %arg9[%c0_17, %c8] : memref<512x36xf32, #tpu.memory_space<vmem>>, vector<256x4xf32>
    tpu.vector_store %arg9[%c0_17, %c8], %13 {strides = array<i32>} : memref<512x36xf32, #tpu.memory_space<vmem>>, vector<256x4xf32>,
    %15 = vector.extract_strided_slice %5 {offsets = [1, 0, 0], sizes = [16, 16, 4], strides = [1, 1, 1]} : vector<18x18x4xf32> to vector<16x16x4xf32>
    %16 = vector.shape_cast %15 : vector<16x16x4xf32> to vector<256x4xf32>
    %c0_18 = arith.constant 0 : index
    %c12 = arith.constant 12 : index
    %17 = vector.load %arg9[%c0_18, %c12] : memref<512x36xf32, #tpu.memory_space<vmem>>, vector<256x4xf32>
    tpu.vector_store %arg9[%c0_18, %c12], %16 {strides = array<i32>} : memref<512x36xf32, #tpu.memory_space<vmem>>, vector<256x4xf32>,
    %18 = vector.extract_strided_slice %5 {offsets = [1, 1, 0], sizes = [16, 16, 4], strides = [1, 1, 1]} : vector<18x18x4xf32> to vector<16x16x4xf32>
    %19 = vector.shape_cast %18 : vector<16x16x4xf32> to vector<256x4xf32>
    %c0_19 = arith.constant 0 : index
    %c16 = arith.constant 16 : index
    %20 = vector.load %arg9[%c0_19, %c16] : memref<512x36xf32, #tpu.memory_space<vmem>>, vector<256x4xf32>
    tpu.vector_store %arg9[%c0_19, %c16], %19 {strides = array<i32>} : memref<512x36xf32, #tpu.memory_space<vmem>>, vector<256x4xf32>,
    %21 = vector.extract_strided_slice %5 {offsets = [1, 2, 0], sizes = [16, 16, 4], strides = [1, 1, 1]} : vector<18x18x4xf32> to vector<16x16x4xf32>
    %22 = vector.shape_cast %21 : vector<16x16x4xf32> to vector<256x4xf32>
    %c0_20 = arith.constant 0 : index
    %c20 = arith.constant 20 : index
    %23 = vector.load %arg9[%c0_20, %c20] : memref<512x36xf32, #tpu.memory_space<vmem>>, vector<256x4xf32>
    tpu.vector_store %arg9[%c0_20, %c20], %22 {strides = array<i32>} : memref<512x36xf32, #tpu.memory_space<vmem>>, vector<256x4xf32>,
    %24 = vector.extract_strided_slice %5 {offsets = [2, 0, 0], sizes = [16, 16, 4], strides = [1, 1, 1]} : vector<18x18x4xf32> to vector<16x16x4xf32>
    %25 = vector.shape_cast %24 : vector<16x16x4xf32> to vector<256x4xf32>
    %c0_21 = arith.constant 0 : index
    %c24 = arith.constant 24 : index
    %26 = vector.load %arg9[%c0_21, %c24] : memref<512x36xf32, #tpu.memory_space<vmem>>, vector<256x4xf32>
    tpu.vector_store %arg9[%c0_21, %c24], %25 {strides = array<i32>} : memref<512x36xf32, #tpu.memory_space<vmem>>, vector<256x4xf32>,
    %27 = vector.extract_strided_slice %5 {offsets = [2, 1, 0], sizes = [16, 16, 4], strides = [1, 1, 1]} : vector<18x18x4xf32> to vector<16x16x4xf32>
    %28 = vector.shape_cast %27 : vector<16x16x4xf32> to vector<256x4xf32>
    %c0_22 = arith.constant 0 : index
    %c28 = arith.constant 28 : index
    %29 = vector.load %arg9[%c0_22, %c28] : memref<512x36xf32, #tpu.memory_space<vmem>>, vector<256x4xf32>
    tpu.vector_store %arg9[%c0_22, %c28], %28 {strides = array<i32>} : memref<512x36xf32, #tpu.memory_space<vmem>>, vector<256x4xf32>,
    %30 = vector.extract_strided_slice %5 {offsets = [2, 2, 0], sizes = [16, 16, 4], strides = [1, 1, 1]} : vector<18x18x4xf32> to vector<16x16x4xf32>
    %31 = vector.shape_cast %30 : vector<16x16x4xf32> to vector<256x4xf32>
    %c0_23 = arith.constant 0 : index
    %c32 = arith.constant 32 : index
    %32 = vector.load %arg9[%c0_23, %c32] : memref<512x36xf32, #tpu.memory_space<vmem>>, vector<256x4xf32>
    tpu.vector_store %arg9[%c0_23, %c32], %31 {strides = array<i32>} : memref<512x36xf32, #tpu.memory_space<vmem>>, vector<256x4xf32>,
    %c1_24 = arith.constant 1 : index
    %c0_25 = arith.constant 0 : index
    %c0_26 = arith.constant 0 : index
    %c0_27 = arith.constant 0 : index
    %33 = vector.load %arg8[%c1_24, %c0_25, %c0_26, %c0_27] : memref<2x18x18x4xf32, #tpu.memory_space<vmem>>, vector<1x18x18x4xf32>
    %34 = vector.shape_cast %33 : vector<1x18x18x4xf32> to vector<18x18x4xf32>
    %35 = vector.extract_strided_slice %34 {offsets = [0, 0, 0], sizes = [16, 16, 4], strides = [1, 1, 1]} : vector<18x18x4xf32> to vector<16x16x4xf32>
    %36 = vector.shape_cast %35 : vector<16x16x4xf32> to vector<256x4xf32>
    %c256 = arith.constant 256 : index
    %c0_28 = arith.constant 0 : index
    %37 = vector.load %arg9[%c256, %c0_28] : memref<512x36xf32, #tpu.memory_space<vmem>>, vector<256x4xf32>
    tpu.vector_store %arg9[%c256, %c0_28], %36 {strides = array<i32>} : memref<512x36xf32, #tpu.memory_space<vmem>>, vector<256x4xf32>,
    %38 = vector.extract_strided_slice %34 {offsets = [0, 1, 0], sizes = [16, 16, 4], strides = [1, 1, 1]} : vector<18x18x4xf32> to vector<16x16x4xf32>
    %39 = vector.shape_cast %38 : vector<16x16x4xf32> to vector<256x4xf32>
    %c256_29 = arith.constant 256 : index
    %c4_30 = arith.constant 4 : index
    %40 = vector.load %arg9[%c256_29, %c4_30] : memref<512x36xf32, #tpu.memory_space<vmem>>, vector<256x4xf32>
    tpu.vector_store %arg9[%c256_29, %c4_30], %39 {strides = array<i32>} : memref<512x36xf32, #tpu.memory_space<vmem>>, vector<256x4xf32>,
    %41 = vector.extract_strided_slice %34 {offsets = [0, 2, 0], sizes = [16, 16, 4], strides = [1, 1, 1]} : vector<18x18x4xf32> to vector<16x16x4xf32>
    %42 = vector.shape_cast %41 : vector<16x16x4xf32> to vector<256x4xf32>
    %c256_31 = arith.constant 256 : index
    %c8_32 = arith.constant 8 : index
    %43 = vector.load %arg9[%c256_31, %c8_32] : memref<512x36xf32, #tpu.memory_space<vmem>>, vector<256x4xf32>
    tpu.vector_store %arg9[%c256_31, %c8_32], %42 {strides = array<i32>} : memref<512x36xf32, #tpu.memory_space<vmem>>, vector<256x4xf32>,
    %44 = vector.extract_strided_slice %34 {offsets = [1, 0, 0], sizes = [16, 16, 4], strides = [1, 1, 1]} : vector<18x18x4xf32> to vector<16x16x4xf32>
    %45 = vector.shape_cast %44 : vector<16x16x4xf32> to vector<256x4xf32>
    %c256_33 = arith.constant 256 : index
    %c12_34 = arith.constant 12 : index
    %46 = vector.load %arg9[%c256_33, %c12_34] : memref<512x36xf32, #tpu.memory_space<vmem>>, vector<256x4xf32>
    tpu.vector_store %arg9[%c256_33, %c12_34], %45 {strides = array<i32>} : memref<512x36xf32, #tpu.memory_space<vmem>>, vector<256x4xf32>,
    %47 = vector.extract_strided_slice %34 {offsets = [1, 1, 0], sizes = [16, 16, 4], strides = [1, 1, 1]} : vector<18x18x4xf32> to vector<16x16x4xf32>
    %48 = vector.shape_cast %47 : vector<16x16x4xf32> to vector<256x4xf32>
    %c256_35 = arith.constant 256 : index
    %c16_36 = arith.constant 16 : index
    %49 = vector.load %arg9[%c256_35, %c16_36] : memref<512x36xf32, #tpu.memory_space<vmem>>, vector<256x4xf32>
    tpu.vector_store %arg9[%c256_35, %c16_36], %48 {strides = array<i32>} : memref<512x36xf32, #tpu.memory_space<vmem>>, vector<256x4xf32>,
    %50 = vector.extract_strided_slice %34 {offsets = [1, 2, 0], sizes = [16, 16, 4], strides = [1, 1, 1]} : vector<18x18x4xf32> to vector<16x16x4xf32>
    %51 = vector.shape_cast %50 : vector<16x16x4xf32> to vector<256x4xf32>
    %c256_37 = arith.constant 256 : index
    %c20_38 = arith.constant 20 : index
    %52 = vector.load %arg9[%c256_37, %c20_38] : memref<512x36xf32, #tpu.memory_space<vmem>>, vector<256x4xf32>
    tpu.vector_store %arg9[%c256_37, %c20_38], %51 {strides = array<i32>} : memref<512x36xf32, #tpu.memory_space<vmem>>, vector<256x4xf32>,
    %53 = vector.extract_strided_slice %34 {offsets = [2, 0, 0], sizes = [16, 16, 4], strides = [1, 1, 1]} : vector<18x18x4xf32> to vector<16x16x4xf32>
    %54 = vector.shape_cast %53 : vector<16x16x4xf32> to vector<256x4xf32>
    %c256_39 = arith.constant 256 : index
    %c24_40 = arith.constant 24 : index
    %55 = vector.load %arg9[%c256_39, %c24_40] : memref<512x36xf32, #tpu.memory_space<vmem>>, vector<256x4xf32>
    tpu.vector_store %arg9[%c256_39, %c24_40], %54 {strides = array<i32>} : memref<512x36xf32, #tpu.memory_space<vmem>>, vector<256x4xf32>,
    %56 = vector.extract_strided_slice %34 {offsets = [2, 1, 0], sizes = [16, 16, 4], strides = [1, 1, 1]} : vector<18x18x4xf32> to vector<16x16x4xf32>
    %57 = vector.shape_cast %56 : vector<16x16x4xf32> to vector<256x4xf32>
    %c256_41 = arith.constant 256 : index
    %c28_42 = arith.constant 28 : index
    %58 = vector.load %arg9[%c256_41, %c28_42] : memref<512x36xf32, #tpu.memory_space<vmem>>, vector<256x4xf32>
    tpu.vector_store %arg9[%c256_41, %c28_42], %57 {strides = array<i32>} : memref<512x36xf32, #tpu.memory_space<vmem>>, vector<256x4xf32>,
    %59 = vector.extract_strided_slice %34 {offsets = [2, 2, 0], sizes = [16, 16, 4], strides = [1, 1, 1]} : vector<18x18x4xf32> to vector<16x16x4xf32>
    %60 = vector.shape_cast %59 : vector<16x16x4xf32> to vector<256x4xf32>
    %c256_43 = arith.constant 256 : index
    %c32_44 = arith.constant 32 : index
    %61 = vector.load %arg9[%c256_43, %c32_44] : memref<512x36xf32, #tpu.memory_space<vmem>>, vector<256x4xf32>
    tpu.vector_store %arg9[%c256_43, %c32_44], %60 {strides = array<i32>} : memref<512x36xf32, #tpu.memory_space<vmem>>, vector<256x4xf32>,
    %c0_45 = arith.constant 0 : index
    %c0_46 = arith.constant 0 : index
    %62 = vector.load %arg9[%c0_45, %c0_46] : memref<512x36xf32, #tpu.memory_space<vmem>>, vector<512x36xf32>
    %c0_47 = arith.constant 0 : index
    %c0_48 = arith.constant 0 : index
    %63 = vector.load %arg2[%c0_47, %c0_48] : memref<36x16xf32, #tpu.memory_space<vmem>>, vector<36x16xf32>
    %cst_49 = arith.constant dense<0.000000e+00> : vector<512x16xf32>
    %64 = tpu.matmul %62, %63, %cst_49 {dimension_numbers = #tpu.dot_dimension_numbers<[1], [0], [0], [1], [0, 0, 1, 1], [], []>, precision = #tpu.contract_precision<fp32>} : vector<512x36xf32>, vector<36x16xf32>, vector<512x16xf32> -> vector<512x16xf32>
    %65 = vector.shape_cast %64 : vector<512x16xf32> to vector<2x256x16xf32>
    %cst_50 = arith.constant dense<0.000000e+00> : vector<2x16xf32>
    %66 = vector.multi_reduction <add>, %65, %cst_50 [1] : vector<2x256x16xf32> to vector<2x16xf32>
    %67 = arith.mulf %65, %65 : vector<2x256x16xf32>
    %cst_51 = arith.constant dense<0.000000e+00> : vector<2x16xf32>
    %68 = vector.multi_reduction <add>, %67, %cst_51 [1] : vector<2x256x16xf32> to vector<2x16xf32>
    %c0_52 = arith.constant 0 : index
    %c0_53 = arith.constant 0 : index
    %69 = vector.load %arg3[%c0_52, %c0_53] : memref<1x16xf32, #tpu.memory_space<vmem>>, vector<1x16xf32>
    %cst_54 = arith.constant 2.560000e+02 : f32
    %70 = vector.broadcast %cst_54 : f32 to vector<1x16xf32>
    %71 = arith.mulf %70, %69 : vector<1x16xf32>
    %72 = vector.broadcast %71 : vector<1x16xf32> to vector<2x16xf32>
    %73 = arith.addf %66, %72 : vector<2x16xf32>
    %cst_55 = arith.constant 2.000000e+00 : f32
    %74 = vector.broadcast %cst_55 : f32 to vector<1x16xf32>
    %75 = arith.mulf %74, %69 : vector<1x16xf32>
    %76 = vector.broadcast %75 : vector<1x16xf32> to vector<2x16xf32>
    %77 = arith.mulf %76, %66 : vector<2x16xf32>
    %78 = arith.addf %68, %77 : vector<2x16xf32>
    %cst_56 = arith.constant 2.560000e+02 : f32
    %79 = vector.broadcast %cst_56 : f32 to vector<1x16xf32>
    %80 = arith.mulf %79, %69 : vector<1x16xf32>
    %81 = arith.mulf %80, %69 : vector<1x16xf32>
    %82 = vector.broadcast %81 : vector<1x16xf32> to vector<2x16xf32>
    %83 = arith.addf %78, %82 : vector<2x16xf32>
    %c0_57 = arith.constant 0 : index
    %c0_58 = arith.constant 0 : index
    %84 = vector.load %arg6[%c0_57, %c0_58] : memref<16x16xf32, #tpu.memory_space<vmem>>, vector<16x16xf32>
    %cst_59 = arith.constant dense<0.000000e+00> : vector<2x16xf32>
    %85 = tpu.matmul %73, %84, %cst_59 {dimension_numbers = #tpu.dot_dimension_numbers<[1], [0], [0], [1], [0, 0, 1, 1], [], []>, precision = #tpu.contract_precision<fp32>} : vector<2x16xf32>, vector<16x16xf32>, vector<2x16xf32> -> vector<2x16xf32>
    %cst_60 = arith.constant dense<0.000000e+00> : vector<2x16xf32>
    %86 = tpu.matmul %83, %84, %cst_60 {dimension_numbers = #tpu.dot_dimension_numbers<[1], [0], [0], [1], [0, 0, 1, 1], [], []>, precision = #tpu.contract_precision<fp32>} : vector<2x16xf32>, vector<16x16xf32>, vector<2x16xf32> -> vector<2x16xf32>
    %87 = arith.mulf %85, %85 : vector<2x16xf32>
    %88 = arith.subf %86, %87 : vector<2x16xf32>
    %cst_61 = arith.constant 0.000000e+00 : f32
    %89 = vector.broadcast %cst_61 : f32 to vector<2x16xf32>
    %90 = arith.maximumf %88, %89 : vector<2x16xf32>
    %cst_62 = arith.constant 9.99999974E-6 : f32
    %91 = vector.broadcast %cst_62 : f32 to vector<2x16xf32>
    %92 = arith.addf %90, %91 : vector<2x16xf32>
    %93 = math.rsqrt %92 : vector<2x16xf32>
    %c0_63 = arith.constant 0 : index
    %c0_64 = arith.constant 0 : index
    %c0_65 = arith.constant 0 : index
    %94 = vector.load %arg4[%c0_63, %c0_64, %c0_65] : memref<2x1x16xf32, #tpu.memory_space<vmem>>, vector<2x1x16xf32>
    %95 = vector.shape_cast %94 : vector<2x1x16xf32> to vector<2x16xf32>
    %c0_66 = arith.constant 0 : index
    %c0_67 = arith.constant 0 : index
    %c0_68 = arith.constant 0 : index
    %96 = vector.load %arg5[%c0_66, %c0_67, %c0_68] : memref<2x1x16xf32, #tpu.memory_space<vmem>>, vector<2x1x16xf32>
    %97 = vector.shape_cast %96 : vector<2x1x16xf32> to vector<2x16xf32>
    %98 = arith.mulf %93, %95 : vector<2x16xf32>
    %99 = vector.broadcast %69 : vector<1x16xf32> to vector<2x16xf32>
    %100 = arith.subf %99, %85 : vector<2x16xf32>
    %101 = arith.mulf %100, %93 : vector<2x16xf32>
    %102 = arith.mulf %101, %95 : vector<2x16xf32>
    %103 = arith.addf %102, %97 : vector<2x16xf32>
    %104 = vector.shape_cast %98 : vector<2x16xf32> to vector<2x1x16xf32>
    %105 = vector.broadcast %104 : vector<2x1x16xf32> to vector<2x256x16xf32>
    %106 = arith.mulf %65, %105 : vector<2x256x16xf32>
    %107 = vector.shape_cast %103 : vector<2x16xf32> to vector<2x1x16xf32>
    %108 = vector.broadcast %107 : vector<2x1x16xf32> to vector<2x256x16xf32>
    %109 = arith.addf %106, %108 : vector<2x256x16xf32>
    %cst_69 = arith.constant 5.000000e-01 : f32
    %110 = vector.broadcast %cst_69 : f32 to vector<2x256x16xf32>
    %111 = arith.mulf %110, %109 : vector<2x256x16xf32>
    %112 = math.tanh %111 : vector<2x256x16xf32>
    %113 = arith.mulf %111, %112 : vector<2x256x16xf32>
    %114 = arith.addf %111, %113 : vector<2x256x16xf32>
    %c0_70 = arith.constant 0 : index
    %c0_71 = arith.constant 0 : index
    %c0_72 = arith.constant 0 : index
    %115 = vector.load %arg7[%c0_70, %c0_71, %c0_72] : memref<2x256x16xf32, #tpu.memory_space<vmem>>, vector<2x256x16xf32>
    tpu.vector_store %arg7[%c0_70, %c0_71, %c0_72], %114 {strides = array<i32>} : memref<2x256x16xf32, #tpu.memory_space<vmem>>, vector<2x256x16xf32>,
    return
  }
  func.func @transform_0(%arg0: i32) -> (i32, i32, i32, i32) {
    %c0_i32 = arith.constant 0 : i32
    %c0_i32_0 = arith.constant 0 : i32
    %c0_i32_1 = arith.constant 0 : i32
    %c0_i32_2 = arith.constant 0 : i32
    return %arg0, %c0_i32, %c0_i32_0, %c0_i32_1 : i32, i32, i32, i32
  }
  func.func @transform_1(%arg0: i32) -> (i32, i32) {
    %c0_i32 = arith.constant 0 : i32
    %c0_i32_0 = arith.constant 0 : i32
    %c0_i32_1 = arith.constant 0 : i32
    return %c0_i32, %c0_i32_0 : i32, i32
  }
  func.func @transform_2(%arg0: i32) -> (i32, i32) {
    %c0_i32 = arith.constant 0 : i32
    %c0_i32_0 = arith.constant 0 : i32
    %c0_i32_1 = arith.constant 0 : i32
    return %c0_i32, %c0_i32_0 : i32, i32
  }
  func.func @transform_3(%arg0: i32) -> (i32, i32, i32) {
    %c0_i32 = arith.constant 0 : i32
    %c0_i32_0 = arith.constant 0 : i32
    %c0_i32_1 = arith.constant 0 : i32
    return %arg0, %c0_i32, %c0_i32_0 : i32, i32, i32
  }
  func.func @transform_4(%arg0: i32) -> (i32, i32, i32) {
    %c0_i32 = arith.constant 0 : i32
    %c0_i32_0 = arith.constant 0 : i32
    %c0_i32_1 = arith.constant 0 : i32
    return %arg0, %c0_i32, %c0_i32_0 : i32, i32, i32
  }
  func.func @transform_5(%arg0: i32) -> (i32, i32) {
    %c0_i32 = arith.constant 0 : i32
    %c0_i32_0 = arith.constant 0 : i32
    %c0_i32_1 = arith.constant 0 : i32
    return %c0_i32, %c0_i32_0 : i32, i32
  }
  func.func @transform_6(%arg0: i32) -> (i32, i32, i32) {
    %c0_i32 = arith.constant 0 : i32
    %c0_i32_0 = arith.constant 0 : i32
    %c0_i32_1 = arith.constant 0 : i32
    return %arg0, %c0_i32, %c0_i32_0 : i32, i32, i32
  }
}

</mosaic_0001>

<bundles_post_ra>
// kernel: tpu_custom_call.1
= control target key start
LH: loop header
LB: loop body
LE: loop exit
PB: predicated region body
PF: predicated region fallthrough
CT: control target
= control target key end

     0   :  { %vm23_vm0 = vcmask 31744   ;;  %vm26_vm1 = vcmask 25600   ;;  %v14967_v0 = vmov 0.0   ;;  %vm606_vm2 = vcmask 1045504   ;;  %s10064_s17 = smov 12   ;;  %s10065_s18 = smov 8   ;;  %s14960_s0 = inlined_call_operand.vmem [shape: f32[2,16,16,4], index: 0, kind: input, shape index: {}]   ;;  %s14961_s1 = inlined_call_operand.vmem [shape: f32[36,16], index: 1, kind: input, shape index: {}]   ;;  %s14962_s5 = inlined_call_operand.vmem [shape: f32[16,16], index: 5, kind: input, shape index: {}]   ;;  %s14963_s2 = inlined_call_operand.vmem [shape: f32[1,16], index: 2, kind: input, shape index: {}]   ;;  %s14964_s3 = inlined_call_operand.vmem [shape: f32[2,1,16], index: 3, kind: input, shape index: {}]   ;;  %s14965_s4 = inlined_call_operand.vmem [shape: f32[2,1,16], index: 4, kind: input, shape index: {}]   ;;  %s14966_s6 = inlined_call_operand.vmem [shape: f32[2,256,16], index: 6, kind: output, shape index: {}]  }
   0x1   :  { %28 = vst.msk [vmem:[#allocation2 + $0x18] sm:$0xff] %vm23_vm0, %v14967_v0  ;;  %29 = vst.msk [vmem:[#allocation2 + $0x20] sm:$0xff] %vm23_vm0, %v14967_v0  ;;  %v10119_v1 = vld [vmem:[%s14960_s0] sm:$0xff]  ;;  %v10124_v2 = vld [vmem:[%s14960_s0 + $0x8] sm:$0xff]  ;;  %vm396_vm3 = vcmask 1046528   ;;  %s10066_s19 = smov 4  }
   0x2   :  { %30 = vst.msk [vmem:[#allocation2 + $0x28] sm:$0x3] %vm26_vm1, %v14967_v0  ;;  %27 = vst.msk [vmem:[#allocation2 + $0x10] sm:$0x3] %vm26_vm1, %v14967_v0  ;;  %v135_v3 = vld [vmem:[%s14960_s0 + $0x10] sm:$0xff]  ;;  %v136_v4 = vld [vmem:[%s14960_s0 + $0x18] sm:$0xff] }
   0x3   :  { %24 = vst.msk [vmem:[#allocation2] sm:$0xff] %vm23_vm0, %v14967_v0  ;;  %25 = vst.msk [vmem:[#allocation2 + $0x8] sm:$0xff] %vm23_vm0, %v14967_v0  ;;  %v137_v5 = vld [vmem:[%s14960_s0 + $0x20] sm:$0xff]  ;;  %v138_v6 = vld [vmem:[%s14960_s0 + $0x28] sm:$0xff]  ;;  %s10067_s20 = smov 16   ;;  %s10068_s23 = smov 20  }
   0x4   :  { %31 = vst.msk [vmem:[#allocation2 + $0x30] sm:$0xff] %vm23_vm0, %v14967_v0  ;;  %32 = vst.msk [vmem:[#allocation2 + $0x38] sm:$0xff] %vm23_vm0, %v14967_v0  ;;  %v139_v7 = vld [vmem:[%s14960_s0 + $0x30] sm:$0xff]  ;;  %v140_v8 = vld [vmem:[%s14960_s0 + $0x38] sm:$0xff]  ;;  %s10069_s26 = smov 24   ;;  %s10070_s7 = smov 28  }
   0x5   :  { %33 = vst.msk [vmem:[#allocation2 + $0x40] sm:$0x3] %vm26_vm1, %v14967_v0  ;;  %36 = vst.msk [vmem:[#allocation2 + $0x58] sm:$0x3] %vm26_vm1, %v14967_v0  ;;  %v141_v9 = vld [vmem:[%s14960_s0 + $0x40] sm:$0xff]  ;;  %v142_v10 = vld [vmem:[%s14960_s0 + $0x48] sm:$0xff] }
   0x6   :  { %34 = vst.msk [vmem:[#allocation2 + $0x48] sm:$0xff] %vm23_vm0, %v14967_v0  ;;  %35 = vst.msk [vmem:[#allocation2 + $0x50] sm:$0xff] %vm23_vm0, %v14967_v0  ;;  %v143_v43 = vld [vmem:[%s14960_s0 + $0x50] sm:$0xff]  ;;  %v144_v45 = vld [vmem:[%s14960_s0 + $0x58] sm:$0xff]  ;;  %s10071_s12 = smov 32   ;;  %vm3223_vm4 = vcmask 1043456  }
   0x7   :  { %37 = vst.msk [vmem:[#allocation2 + $0x60] sm:$0xff] %vm23_vm0, %v14967_v0  ;;  %38 = vst.msk [vmem:[#allocation2 + $0x68] sm:$0xff] %vm23_vm0, %v14967_v0  ;;  %v3025_v53 = vld [vmem:[%s14961_s1] sm:$0xff]  ;;  %v3026_v54 = vld [vmem:[%s14961_s1 + $0x8] sm:$0xff]  ;;  %vm573_vm5 = vcmask 64544   ;;  %vm783_vm6 = vcmask 97344  }
   0x8   :  { %39 = vst.msk [vmem:[#allocation2 + $0x70] sm:$0x3] %vm26_vm1, %v14967_v0  ;;  %42 = vst.msk [vmem:[#allocation2 + $0x88] sm:$0x3] %vm26_vm1, %v14967_v0  ;;  %v3228_v55 = vand.u32 4294901760, %v3025_v53  ;;  %v3231_v56 = vand.u32 4294901760, %v3026_v54 }
   0x9   :  { %40 = vst.msk [vmem:[#allocation2 + $0x78] sm:$0xff] %vm23_vm0, %v14967_v0  ;;  %41 = vst.msk [vmem:[#allocation2 + $0x80] sm:$0xff] %vm23_vm0, %v14967_v0  ;;  %v264_v13 = vld [vmem:[#allocation2 + $0x10] sm:$0x3]  ;;  %vm914_vm7 = vcmask 130144   ;;  %vm1049_vm8 = vcmask 162944  }
   0xa   :  { %43 = vst.msk [vmem:[#allocation2 + $0x90] sm:$0xff] %vm23_vm0, %v14967_v0  ;;  %44 = vst.msk [vmem:[#allocation2 + $0x98] sm:$0xff] %vm23_vm0, %v14967_v0  ;;  %v262_v11 = vld [vmem:[#allocation2] sm:$0xff]  ;;  %v263_v12 = vld [vmem:[#allocation2 + $0x8] sm:$0xff]  ;;  %v610_v22 = vrot.slane %v264_v13, 2  ;;  %v400_v23 = vrot.slane %v264_v13, 1  ;;  %v10470_v60 = vsub.f32 %v3025_v53, %v3228_v55  ;;  %v10472_v61 = vsub.f32 %v3026_v54, %v3231_v56 }
   0xb   :  { %45 = vst.msk [vmem:[#allocation2 + $0xa0] sm:$0x3] %vm26_vm1, %v14967_v0  ;;  %48 = vst.msk [vmem:[#allocation2 + $0xb8] sm:$0x3] %vm26_vm1, %v14967_v0  ;;  %v607_v16 = vrot.slane %v262_v11, 2  ;;  %v608_v17 = vrot.slane %v263_v12, 2  ;;  %v10477_v62 = vpack.c.bf16 %v3231_v56, %v3228_v55 }
   0xc   :  { %46 = vst.msk [vmem:[#allocation2 + $0xa8] sm:$0xff] %vm23_vm0, %v14967_v0  ;;  %47 = vst.msk [vmem:[#allocation2 + $0xb0] sm:$0xff] %vm23_vm0, %v14967_v0  ;;  %v397_v18 = vrot.slane %v262_v11, 1  ;;  %v398_v19 = vrot.slane %v263_v12, 1  ;;  %v10481_v63 = vpack.c.bf16 %v10472_v61, %v10470_v60  ;;  %v150_v54 = vld [vmem:[%s14960_s0 + $0x88] sm:$0xff]  ;;  %vm1183_vm9 = vcmask 195744  }
   0xd   :  { %49 = vst.msk [vmem:[#allocation2 + $0xc0] sm:$0xff] %vm23_vm0, %v14967_v0  ;;  %50 = vst.msk [vmem:[#allocation2 + $0xc8] sm:$0xff] %vm23_vm0, %v14967_v0  ;;  %v609_v20 = vsel %vm606_vm2, %v607_v16, %v608_v17  ;;  %v611_v32 = vsel %vm606_vm2, %v608_v17, %v610_v22  ;;  %9490 = vmatprep.subr.bf16.mxu1 %v10477_v62  ;;  %v146_v16 = vld [vmem:[%s14960_s0 + $0x68] sm:$0xff]  ;;  %vm1314_vm10 = vcmask 228544   ;;  %vm1449_vm11 = vcmask 261344  }
   0xe   :  { %51 = vst.msk [vmem:[#allocation2 + $0xd0] sm:$0x3] %vm26_vm1, %v14967_v0  ;;  %54 = vst.msk [vmem:[#allocation2 + $0xe8] sm:$0x3] %vm26_vm1, %v14967_v0  ;;  %v399_v21 = vsel %vm396_vm3, %v397_v18, %v398_v19  ;;  %v401_v33 = vsel %vm396_vm3, %v398_v19, %v400_v23  ;;  %9506 = vmatprep.subr.bf16.mxu0 %v10481_v63  ;;  %9492 = vmatpush3.bf16.msra.mxu1 %v10477_v62  ;;  %vm1583_vm12 = vcmask 294144   ;;  %vm3030_vm13 = vcmask 293888  }
   0xf   :  { %52 = vst.msk [vmem:[#allocation2 + $0xd8] sm:$0xff] %vm23_vm0, %v14967_v0  ;;  %53 = vst.msk [vmem:[#allocation2 + $0xe0] sm:$0xff] %vm23_vm0, %v14967_v0  ;;  %9508 = vmatpush3.bf16.msra.mxu0 %v10481_v63  ;;  %vm6434_vm14 = vcmask 130048   ;;  %vm10073_vm15 = vmmov 0  }
  0x10   :  { %55 = vst.msk [vmem:[#allocation2 + $0xf0] sm:$0xff] %vm23_vm0, %v14967_v0  ;;  %56 = vst.msk [vmem:[#allocation2 + $0xf8] sm:$0xff] %vm23_vm0, %v14967_v0 }
  0x11   :  { %57 = vst.msk [vmem:[#allocation2 + $0x100] sm:$0x3] %vm26_vm1, %v14967_v0  ;;  %60 = vst.msk [vmem:[#allocation2 + $0x118] sm:$0x3] %vm26_vm1, %v14967_v0 }
  0x12   :  { %58 = vst.msk [vmem:[#allocation2 + $0x108] sm:$0xff] %vm23_vm0, %v14967_v0  ;;  %59 = vst.msk [vmem:[#allocation2 + $0x110] sm:$0xff] %vm23_vm0, %v14967_v0 }
  0x13   :  { %61 = vst.msk [vmem:[#allocation2 + $0x120] sm:$0xff] %vm23_vm0, %v14967_v0  ;;  %62 = vst.msk [vmem:[#allocation2 + $0x128] sm:$0xff] %vm23_vm0, %v14967_v0 }
  0x14   :  { %63 = vst.msk [vmem:[#allocation2 + $0x130] sm:$0x3] %vm26_vm1, %v14967_v0  ;;  %66 = vst.msk [vmem:[#allocation2 + $0x148] sm:$0x3] %vm26_vm1, %v14967_v0 }
  0x15   :  { %64 = vst.msk [vmem:[#allocation2 + $0x138] sm:$0xff] %vm23_vm0, %v14967_v0  ;;  %65 = vst.msk [vmem:[#allocation2 + $0x140] sm:$0xff] %vm23_vm0, %v14967_v0 }
  0x16   :  { %67 = vst.msk [vmem:[#allocation2 + $0x150] sm:$0xff] %vm23_vm0, %v14967_v0  ;;  %68 = vst.msk [vmem:[#allocation2 + $0x158] sm:$0xff] %vm23_vm0, %v14967_v0 }
  0x17   :  { %69 = vst.msk [vmem:[#allocation2 + $0x160] sm:$0x3] %vm26_vm1, %v14967_v0  ;;  %72 = vst.msk [vmem:[#allocation2 + $0x178] sm:$0x3] %vm26_vm1, %v14967_v0 }
  0x18   :  { %70 = vst.msk [vmem:[#allocation2 + $0x168] sm:$0xff] %vm23_vm0, %v14967_v0  ;;  %71 = vst.msk [vmem:[#allocation2 + $0x170] sm:$0xff] %vm23_vm0, %v14967_v0 }
  0x19   :  { %73 = vst.msk [vmem:[#allocation2 + $0x180] sm:$0xff] %vm23_vm0, %v14967_v0  ;;  %74 = vst.msk [vmem:[#allocation2 + $0x188] sm:$0xff] %vm23_vm0, %v14967_v0 }
  0x1a   :  { %75 = vst.msk [vmem:[#allocation2 + $0x190] sm:$0x3] %vm26_vm1, %v14967_v0  ;;  %78 = vst.msk [vmem:[#allocation2 + $0x1a8] sm:$0x3] %vm26_vm1, %v14967_v0 }
  0x1b   :  { %76 = vst.msk [vmem:[#allocation2 + $0x198] sm:$0xff] %vm23_vm0, %v14967_v0  ;;  %77 = vst.msk [vmem:[#allocation2 + $0x1a0] sm:$0xff] %vm23_vm0, %v14967_v0 }
  0x1c   :  { %79 = vst.msk [vmem:[#allocation2 + $0x1b0] sm:$0xff] %vm23_vm0, %v14967_v0  ;;  %80 = vst.msk [vmem:[#allocation2 + $0x1b8] sm:$0xff] %vm23_vm0, %v14967_v0 }
  0x1d   :  { %81 = vst.msk [vmem:[#allocation2 + $0x1c0] sm:$0x3] %vm26_vm1, %v14967_v0  ;;  %84 = vst.msk [vmem:[#allocation2 + $0x1d8] sm:$0x3] %vm26_vm1, %v14967_v0 }
  0x1e   :  { %82 = vst.msk [vmem:[#allocation2 + $0x1c8] sm:$0xff] %vm23_vm0, %v14967_v0  ;;  %83 = vst.msk [vmem:[#allocation2 + $0x1d0] sm:$0xff] %vm23_vm0, %v14967_v0 }
  0x1f   :  { %85 = vst.msk [vmem:[#allocation2 + $0x1e0] sm:$0xff] %vm23_vm0, %v14967_v0  ;;  %86 = vst.msk [vmem:[#allocation2 + $0x1e8] sm:$0xff] %vm23_vm0, %v14967_v0 }
  0x20   :  { %87 = vst.msk [vmem:[#allocation2 + $0x1f0] sm:$0x3] %vm26_vm1, %v14967_v0  ;;  %90 = vst.msk [vmem:[#allocation2 + $0x208] sm:$0x3] %vm26_vm1, %v14967_v0 }
  0x21   :  { %88 = vst.msk [vmem:[#allocation2 + $0x1f8] sm:$0xff] %vm23_vm0, %v14967_v0  ;;  %89 = vst.msk [vmem:[#allocation2 + $0x200] sm:$0xff] %vm23_vm0, %v14967_v0 }
  0x22   :  { %91 = vst.msk [vmem:[#allocation2 + $0x210] sm:$0xff] %vm23_vm0, %v14967_v0  ;;  %92 = vst.msk [vmem:[#allocation2 + $0x218] sm:$0xff] %vm23_vm0, %v14967_v0 }
  0x23   :  { %93 = vst.msk [vmem:[#allocation2 + $0x220] sm:$0x3] %vm26_vm1, %v14967_v0  ;;  %96 = vst.msk [vmem:[#allocation2 + $0x238] sm:$0x3] %vm26_vm1, %v14967_v0 }
  0x24   :  { %94 = vst.msk [vmem:[#allocation2 + $0x228] sm:$0xff] %vm23_vm0, %v14967_v0  ;;  %95 = vst.msk [vmem:[#allocation2 + $0x230] sm:$0xff] %vm23_vm0, %v14967_v0 }
  0x25   :  { %97 = vst.msk [vmem:[#allocation2 + $0x240] sm:$0xff] %vm23_vm0, %v14967_v0  ;;  %98 = vst.msk [vmem:[#allocation2 + $0x248] sm:$0xff] %vm23_vm0, %v14967_v0 }
  0x26   :  { %99 = vst.msk [vmem:[#allocation2 + $0x250] sm:$0x3] %vm26_vm1, %v14967_v0  ;;  %102 = vst.msk [vmem:[#allocation2 + $0x268] sm:$0x3] %vm26_vm1, %v14967_v0 }
  0x27   :  { %100 = vst.msk [vmem:[#allocation2 + $0x258] sm:$0xff] %vm23_vm0, %v14967_v0  ;;  %101 = vst.msk [vmem:[#allocation2 + $0x260] sm:$0xff] %vm23_vm0, %v14967_v0 }
  0x28   :  { %103 = vst.msk [vmem:[#allocation2 + $0x270] sm:$0xff] %vm23_vm0, %v14967_v0  ;;  %104 = vst.msk [vmem:[#allocation2 + $0x278] sm:$0xff] %vm23_vm0, %v14967_v0 }
  0x29   :  { %105 = vst.msk [vmem:[#allocation2 + $0x280] sm:$0x3] %vm26_vm1, %v14967_v0  ;;  %108 = vst.msk [vmem:[#allocation2 + $0x298] sm:$0x3] %vm26_vm1, %v14967_v0 }
  0x2a   :  { %106 = vst.msk [vmem:[#allocation2 + $0x288] sm:$0xff] %vm23_vm0, %v14967_v0  ;;  %107 = vst.msk [vmem:[#allocation2 + $0x290] sm:$0xff] %vm23_vm0, %v14967_v0 }
  0x2b   :  { %109 = vst.msk [vmem:[#allocation2 + $0x2a0] sm:$0xff] %vm23_vm0, %v14967_v0  ;;  %110 = vst.msk [vmem:[#allocation2 + $0x2a8] sm:$0xff] %vm23_vm0, %v14967_v0 }
  0x2c   :  { %111 = vst.msk [vmem:[#allocation2 + $0x2b0] sm:$0x3] %vm26_vm1, %v14967_v0  ;;  %114 = vst.msk [vmem:[#allocation2 + $0x2c8] sm:$0x3] %vm26_vm1, %v14967_v0 }
  0x2d   :  { %112 = vst.msk [vmem:[#allocation2 + $0x2b8] sm:$0xff] %vm23_vm0, %v14967_v0  ;;  %113 = vst.msk [vmem:[#allocation2 + $0x2c0] sm:$0xff] %vm23_vm0, %v14967_v0 }
  0x2e   :  { %115 = vst.msk [vmem:[#allocation2 + $0x2d0] sm:$0xff] %vm23_vm0, %v14967_v0  ;;  %116 = vst.msk [vmem:[#allocation2 + $0x2d8] sm:$0xff] %vm23_vm0, %v14967_v0 }
  0x2f   :  { %117 = vst.msk [vmem:[#allocation2 + $0x2e0] sm:$0x3] %vm26_vm1, %v14967_v0  ;;  %120 = vst.msk [vmem:[#allocation2 + $0x2f8] sm:$0x3] %vm26_vm1, %v14967_v0 }
  0x30   :  { %118 = vst.msk [vmem:[#allocation2 + $0x2e8] sm:$0xff] %vm23_vm0, %v14967_v0  ;;  %119 = vst.msk [vmem:[#allocation2 + $0x2f0] sm:$0xff] %vm23_vm0, %v14967_v0 }
  0x31   :  { %121 = vst.msk [vmem:[#allocation2 + $0x300] sm:$0xff] %vm23_vm0, %v14967_v0  ;;  %122 = vst.msk [vmem:[#allocation2 + $0x308] sm:$0xff] %vm23_vm0, %v14967_v0 }
  0x32   :  { %123 = vst.msk [vmem:[#allocation2 + $0x310] sm:$0x3] %vm26_vm1, %v14967_v0  ;;  %126 = vst.msk [vmem:[#allocation2 + $0x328] sm:$0x3] %vm26_vm1, %v14967_v0 }
  0x33   :  { %124 = vst.msk [vmem:[#allocation2 + $0x318] sm:$0xff] %vm23_vm0, %v14967_v0  ;;  %125 = vst.msk [vmem:[#allocation2 + $0x320] sm:$0xff] %vm23_vm0, %v14967_v0 }
  0x34   :  { %127 = vst.msk [vmem:[#allocation2 + $0x330] sm:$0xff] %vm23_vm0, %v14967_v0  ;;  %128 = vst.msk [vmem:[#allocation2 + $0x338] sm:$0xff] %vm23_vm0, %v14967_v0 }
  0x35   :  { %129 = vst.msk [vmem:[#allocation2 + $0x340] sm:$0x3] %vm26_vm1, %v14967_v0  ;;  %132 = vst.msk [vmem:[#allocation2 + $0x358] sm:$0x3] %vm26_vm1, %v14967_v0 }
  0x36   :  { %130 = vst.msk [vmem:[#allocation2 + $0x348] sm:$0xff] %vm23_vm0, %v14967_v0  ;;  %131 = vst.msk [vmem:[#allocation2 + $0x350] sm:$0xff] %vm23_vm0, %v14967_v0 }
  0x37   :  { %198 = vst.msk [vmem:[#allocation2 + $0x19] sm:$0xff] %vm23_vm0, %v10119_v1  ;;  %199 = vst.msk [vmem:[#allocation2 + $0x21] sm:$0xff] %vm23_vm0, %v10124_v2  ;;  %v3027_v1 = vld [vmem:[%s14961_s1 + $0x10] sm:$0xff]  ;;  %v3028_v2 = vld [vmem:[%s14961_s1 + $0x18] sm:$0xff] }
  0x38   :  { %200 = vst.msk [vmem:[#allocation2 + $0x31] sm:$0xff] %vm23_vm0, %v135_v3  ;;  %201 = vst.msk [vmem:[#allocation2 + $0x39] sm:$0xff] %vm23_vm0, %v136_v4 }
  0x39   :  { %202 = vst.msk [vmem:[#allocation2 + $0x49] sm:$0xff] %vm23_vm0, %v137_v5  ;;  %203 = vst.msk [vmem:[#allocation2 + $0x51] sm:$0xff] %vm23_vm0, %v138_v6  ;;  %v3234_v5 = vand.u32 4294901760, %v3027_v1  ;;  %v3237_v6 = vand.u32 4294901760, %v3028_v2 }
  0x3a   :  { %204 = vst.msk [vmem:[#allocation2 + $0x61] sm:$0xff] %vm23_vm0, %v139_v7  ;;  %205 = vst.msk [vmem:[#allocation2 + $0x69] sm:$0xff] %vm23_vm0, %v140_v8 }
  0x3b   :  { %206 = vst.msk [vmem:[#allocation2 + $0x79] sm:$0xff] %vm23_vm0, %v141_v9  ;;  %207 = vst.msk [vmem:[#allocation2 + $0x81] sm:$0xff] %vm23_vm0, %v142_v10  ;;  %v10494_v7 = vsub.f32 %v3027_v1, %v3234_v5  ;;  %v10499_v8 = vsub.f32 %v3028_v2, %v3237_v6  ;;  %v10501_v10 = vpack.c.bf16 %v3237_v6, %v3234_v5 }
  0x3c   :  { %316 = vst.msk [vmem:[#allocation3] sm:$0xff] %vm23_vm0, %v262_v11  ;;  %317 = vst.msk [vmem:[#allocation3 + $0x8] sm:$0xff] %vm23_vm0, %v263_v12  ;;  %v3029_v11 = vld [vmem:[%s14961_s1 + $0x20] sm:$0xf] }
  0x3d   :  { %208 = vst.msk [vmem:[#allocation2 + $0x91] sm:$0xff] %vm23_vm0, %v143_v43  ;;  %209 = vst.msk [vmem:[#allocation2 + $0x99] sm:$0xff] %vm23_vm0, %v144_v45  ;;  %v10508_v12 = vpack.c.bf16 %v10499_v8, %v10494_v7  ;;  %v3225_v13 = vsel %vm3223_vm4, %v3029_v11, 0  ;;  %9494 = vmatprep.subr.bf16.mxu1 %v10501_v10 }
  0x3e   :  { %v10372_v14 = vld [vmem:[#allocation2 + $0x20] sm:$0xff]  ;;  %v265_v15 = vld [vmem:[#allocation2 + $0x18] sm:$0xff]  ;;  %v267_v36 = vld [vmem:[#allocation2 + $0x28] sm:$0x3]  ;;  %9496 = vmatpush3.bf16.msra.mxu1 %v10501_v10  ;;  %211 = vst.msk [vmem:[#allocation2 + $0xb1] sm:$0xff] %vm23_vm0, %v146_v16 }
  0x3f   :  { %820 = vrot.lane.b32.xlu1 %v10372_v14, %s10064_s17  ;;  %319 = vst.msk [vmem:[#allocation3 + $0x18] sm:$0xff] %vm23_vm0, %v10372_v14  ;;  %818 = vrot.lane.b32.xlu0 %v265_v15, %s10064_s17  ;;  %318 = vst.msk [vmem:[#allocation3 + $0x10] sm:$0xff] %vm23_vm0, %v265_v15  ;;  %v10384_v24 = vld [vmem:[#allocation2 + $0x30] sm:$0xff]  ;;  %v10386_v25 = vld [vmem:[#allocation2 + $0x38] sm:$0xff]  ;;  %v402_v34 = vrot.slane %v265_v15, 1  ;;  %v403_v35 = vrot.slane %v10372_v14, 1 }
  0x40   :  { %320 = vst.msk [vmem:[#allocation3 + $0x20] sm:$0xff] %vm23_vm0, %v10384_v24  ;;  %321 = vst.msk [vmem:[#allocation3 + $0x28] sm:$0xff] %vm23_vm0, %v10386_v25  ;;  %v10392_v26 = vld [vmem:[#allocation2 + $0x48] sm:$0xff]  ;;  %v10394_v27 = vld [vmem:[#allocation2 + $0x50] sm:$0xff]  ;;  %v612_v38 = vrot.slane %v265_v15, 2  ;;  %v613_v39 = vrot.slane %v10372_v14, 2  ;;  %9510 = vmatprep.subr.bf16.mxu0 %v10508_v12 }
  0x41   :  { %322 = vst.msk [vmem:[#allocation3 + $0x30] sm:$0xff] %vm23_vm0, %v10392_v26  ;;  %323 = vst.msk [vmem:[#allocation3 + $0x38] sm:$0xff] %vm23_vm0, %v10394_v27  ;;  %v10400_v28 = vld [vmem:[#allocation2 + $0x60] sm:$0xff]  ;;  %v10402_v29 = vld [vmem:[#allocation2 + $0x68] sm:$0xff]  ;;  %v404_v37 = vsel %vm396_vm3, %v402_v34, %v403_v35  ;;  %v405_v40 = vrot.slane %v267_v36, 1  ;;  %v615_v44 = vrot.slane %v267_v36, 2  ;;  %9512 = vmatpush3.bf16.msra.mxu0 %v10508_v12 }
  0x42   :  { %v10404_v30 = vld [vmem:[#allocation2 + $0x78] sm:$0xff]  ;;  %324 = vst.msk [vmem:[#allocation3 + $0x40] sm:$0xff] %vm23_vm0, %v10400_v28  ;;  %325 = vst.msk [vmem:[#allocation3 + $0x48] sm:$0xff] %vm23_vm0, %v10402_v29  ;;  %v10414_v31 = vld [vmem:[#allocation2 + $0x80] sm:$0xff]  ;;  %v614_v41 = vsel %vm606_vm2, %v612_v38, %v613_v39  ;;  %v407_v48 = vrot.slane %v10384_v24, 1  ;;  %v408_v49 = vrot.slane %v10386_v25, 1 }
  0x43   :  { %687 = vrot.lane.b32.xlu1 %v609_v20, %s10065_s18  ;;  %477 = vrot.lane.b32.xlu0 %v399_v21, %s10066_s19  ;;  %326 = vst.msk [vmem:[#allocation3 + $0x50] sm:$0xff] %vm23_vm0, %v10404_v30  ;;  %327 = vst.msk [vmem:[#allocation3 + $0x58] sm:$0xff] %vm23_vm0, %v10414_v31  ;;  %v406_v42 = vsel %vm396_vm3, %v403_v35, %v405_v40  ;;  %v616_v46 = vsel %vm606_vm2, %v613_v39, %v615_v44  ;;  %v270_v52 = vld [vmem:[#allocation2 + $0x40] sm:$0x3]  ;;  %v617_v57 = vrot.slane %v10384_v24, 2 }
  0x44   :  { %v10442_v47 = vld [vmem:[#allocation2 + $0x90] sm:$0xff]  ;;  %v10454_v50 = vld [vmem:[#allocation2 + $0x98] sm:$0xff]  ;;  %v409_v51 = vsel %vm396_vm3, %v407_v48, %v408_v49  ;;  %v618_v58 = vrot.slane %v10386_v25, 2  ;;  %v410_v59 = vrot.slane %v270_v52, 1  ;;  %v620_v9 = vrot.slane %v270_v52, 2  ;;  %v145_v15 = vld [vmem:[%s14960_s0 + $0x60] sm:$0xff] }
  0x45   :  { %328 = vst.msk [vmem:[#allocation3 + $0x60] sm:$0xff] %vm23_vm0, %v10442_v47  ;;  %329 = vst.msk [vmem:[#allocation3 + $0x68] sm:$0xff] %vm23_vm0, %v10454_v50  ;;  %v10510_v14 = vand.u32 4294901760, %v3225_v13  ;;  %v412_v21 = vrot.slane %v10392_v26, 1  ;;  %v413_v22 = vrot.slane %v10394_v27, 1  ;;  %v417_v39 = vrot.slane %v10400_v28, 1 }
  0x46   :  { %v619_v3 = vsel %vm606_vm2, %v617_v57, %v618_v58  ;;  %v411_v4 = vsel %vm396_vm3, %v408_v49, %v410_v59  ;;  %v621_v17 = vsel %vm606_vm2, %v618_v58, %v620_v9  ;;  %210 = vst.msk [vmem:[#allocation2 + $0xa9] sm:$0xff] %vm23_vm0, %v145_v15  ;;  %v418_v40 = vrot.slane %v10402_v29, 1  ;;  %v276_v43 = vld [vmem:[#allocation2 + $0x70] sm:$0x3]  ;;  %215 = vst.msk [vmem:[#allocation2 + $0xe1] sm:$0xff] %vm23_vm0, %v150_v54 }
  0x47   :  { %689 = vrot.lane.b32.xlu1 %v611_v32, %s10065_s18  ;;  %479 = vrot.lane.b32.xlu0 %v401_v33, %s10066_s19  ;;  %v10524_v18 = vsub.f32 %v3225_v13, %v10510_v14  ;;  %v414_v23 = vsel %vm396_vm3, %v412_v21, %v413_v22  ;;  %v623_v32 = vrot.slane %v10394_v27, 2  ;;  %v627_v44 = vrot.slane %v10400_v28, 2  ;;  %v279_v9 = vld [vmem:[#allocation2 + $0x88] sm:$0x3] }
  0x48   :  { %8777 = vmatprep.subr.mxu1 %v10510_v14  ;;  %v628_v45 = vrot.slane %v10402_v29, 2  ;;  %v422_v58 = vrot.slane %v10404_v30, 1  ;;  %v423_v59 = vrot.slane %v10414_v31, 1  ;;  %v632_v11 = vrot.slane %v10404_v30, 2 }
  0x49   :  { %8989 = vmatprep.subr.mxu0 %v10524_v18  ;;  %8778 = vmatpush3.msra.mxu1 %v10510_v14  ;;  %v633_v13 = vrot.slane %v10414_v31, 2  ;;  %v425_v15 = vrot.slane %v279_v9, 1 }
  0x4a   :  { %8990 = vmatpush3.msra.mxu0 %v10524_v18  ;;  %v629_v48 = vsel %vm606_vm2, %v627_v44, %v628_v45 }
  0x4b   :  { %481 = vrot.lane.b32.xlu1 %v404_v37, %s10066_s19  ;;  %953 = vrot.lane.b32.xlu0 %v404_v37, %s10067_s20  ;;  %v148_v37 = vld [vmem:[%s14960_s0 + $0x78] sm:$0xff]  ;;  %v634_v21 = vsel %vm606_vm2, %v632_v11, %v633_v13 }
  0x4c   :  { %9514 = vmatprep.subr.bf16.mxu0 %v10477_v62  ;;  %213 = vst.msk [vmem:[#allocation2 + $0xc9] sm:$0xff] %vm23_vm0, %v148_v37 }
  0x4d   :  { %v10539_v19 = vld [vmem:[#allocation2 + $0xb0] sm:$0xff]  ;;  %v10541_v20 = vld [vmem:[#allocation2 + $0xa8] sm:$0xff] }
  0x4e   :  { %331 = vst.msk [vmem:[#allocation3 + $0x78] sm:$0xff] %vm23_vm0, %v10539_v19  ;;  %330 = vst.msk [vmem:[#allocation3 + $0x70] sm:$0xff] %vm23_vm0, %v10541_v20 }
  0x4f   :  { %1087 = vrot.lane.b32.xlu1 %v614_v41, %s10068_s23  ;;  %955 = vrot.lane.b32.xlu0 %v406_v42, %s10067_s20 }
  0x53   :  { %691 = vrot.lane.b32.xlu1 %v614_v41, %s10065_s18  ;;  %483 = vrot.lane.b32.xlu0 %v406_v42, %s10066_s19  ;;  %v419_v41 = vsel %vm396_vm3, %v417_v39, %v418_v40 }
  0x57   :  { %1218 = vrot.lane.b32.xlu1 %v10384_v24, %s10069_s26  ;;  %1089 = vrot.lane.b32.xlu0 %v616_v46, %s10068_s23 }
  0x5b   :  { %822 = vrot.lane.b32.xlu1 %v10384_v24, %s10064_s17  ;;  %693 = vrot.lane.b32.xlu0 %v616_v46, %s10065_s18  ;;  %v273_v24 = vld [vmem:[#allocation2 + $0x58] sm:$0x3]  ;;  %v420_v46 = vrot.slane %v276_v43, 1 }
  0x5c   :  { %v415_v33 = vrot.slane %v273_v24, 1  ;;  %v625_v36 = vrot.slane %v273_v24, 2  ;;  %v635_v24 = vrot.slane %v279_v9, 2 }
  0x5d   :  { %v421_v49 = vsel %vm396_vm3, %v418_v40, %v420_v46 }
  0x5e   :  { %v416_v35 = vsel %vm396_vm3, %v413_v22, %v415_v33  ;;  %v426_v22 = vsel %vm396_vm3, %v423_v59, %v425_v15 }
  0x5f   :  { %1353 = vrot.lane.b32.xlu1 %v409_v51, %s10070_s7  ;;  %1220 = vrot.lane.b32.xlu0 %v10386_v25, %s10069_s26 }
  0x63   :  { %957 = vrot.lane.b32.xlu1 %v409_v51, %s10067_s20  ;;  %824 = vrot.lane.b32.xlu0 %v10386_v25, %s10064_s17  ;;  %v622_v25 = vrot.slane %v10392_v26, 2 }
  0x65   :  { %v624_v34 = vsel %vm606_vm2, %v622_v25, %v623_v32 }
  0x67   :  { %1487 = vrot.lane.b32.xlu1 %v619_v3, %s10071_s12  ;;  %1355 = vrot.lane.b32.xlu0 %v411_v4, %s10070_s7 }
  0x6b   :  { %959 = vrot.lane.b32.xlu1 %v411_v4, %s10067_s20  ;;  %485 = vrot.lane.b32.xlu0 %v409_v51, %s10066_s19  ;;  %v630_v51 = vrot.slane %v276_v43, 2  ;;  %v428_v43 = vrot.slane %v10454_v50, 1 }
  0x6f   :  { %1489 = vrot.lane.b32.xlu1 %v621_v17, %s10071_s12  ;;  %1091 = vrot.lane.b32.xlu0 %v619_v3, %s10068_s23 }
  0x73   :  { %695 = vrot.lane.b32.xlu1 %v619_v3, %s10065_s18  ;;  %487 = vrot.lane.b32.xlu0 %v411_v4, %s10066_s19  ;;  %v424_v3 = vsel %vm396_vm3, %v422_v58, %v423_v59 }
  0x77   :  { %1222 = vrot.lane.b32.xlu1 %v10392_v26, %s10069_s26  ;;  %1093 = vrot.lane.b32.xlu0 %v621_v17, %s10068_s23 }
  0x7b   :  { %826 = vrot.lane.b32.xlu1 %v10392_v26, %s10064_s17  ;;  %697 = vrot.lane.b32.xlu0 %v621_v17, %s10065_s18  ;;  %v626_v26 = vsel %vm606_vm2, %v623_v32, %v625_v36 }
  0x7f   :  { %1357 = vrot.lane.b32.xlu1 %v414_v23, %s10070_s7  ;;  %1224 = vrot.lane.b32.xlu0 %v10394_v27, %s10069_s26 }
  0x83   :  { %961 = vrot.lane.b32.xlu1 %v414_v23, %s10067_s20  ;;  %828 = vrot.lane.b32.xlu0 %v10394_v27, %s10064_s17  ;;  %v147_v27 = vld [vmem:[%s14960_s0 + $0x70] sm:$0xff] }
  0x84   :  { %212 = vst.msk [vmem:[#allocation2 + $0xc1] sm:$0xff] %vm23_vm0, %v147_v27  ;;  %v152_v27 = vld [vmem:[%s14960_s0 + $0x98] sm:$0xff] }
  0x85   :  { %217 = vst.msk [vmem:[#allocation2 + $0xf9] sm:$0xff] %vm23_vm0, %v152_v27 }
  0x87   :  { %1491 = vrot.lane.b32.xlu1 %v624_v34, %s10071_s12  ;;  %1359 = vrot.lane.b32.xlu0 %v416_v35, %s10070_s7 }
  0x8b   :  { %963 = vrot.lane.b32.xlu1 %v416_v35, %s10067_s20  ;;  %489 = vrot.lane.b32.xlu0 %v414_v23, %s10066_s19  ;;  %v10586_v38 = vld [vmem:[#allocation2 + $0xc0] sm:$0xff]  ;;  %v10596_v42 = vld [vmem:[#allocation2 + $0xc8] sm:$0xff] }
  0x8c   :  { %332 = vst.msk [vmem:[#allocation3 + $0x80] sm:$0xff] %vm23_vm0, %v10586_v38  ;;  %333 = vst.msk [vmem:[#allocation3 + $0x88] sm:$0xff] %vm23_vm0, %v10596_v42 }
  0x8f   :  { %1493 = vrot.lane.b32.xlu1 %v626_v26, %s10071_s12  ;;  %1095 = vrot.lane.b32.xlu0 %v624_v34, %s10068_s23 }
  0x93   :  { %699 = vrot.lane.b32.xlu1 %v624_v34, %s10065_s18  ;;  %491 = vrot.lane.b32.xlu0 %v416_v35, %s10066_s19  ;;  %v151_v35 = vld [vmem:[%s14960_s0 + $0x90] sm:$0xff] }
  0x94   :  { %216 = vst.msk [vmem:[#allocation2 + $0xf1] sm:$0xff] %vm23_vm0, %v151_v35  ;;  %v432_v35 = vrot.slane %v10541_v20, 1 }
  0x97   :  { %1226 = vrot.lane.b32.xlu1 %v10400_v28, %s10069_s26  ;;  %1097 = vrot.lane.b32.xlu0 %v626_v26, %s10068_s23 }
  0x9b   :  { %830 = vrot.lane.b32.xlu1 %v10400_v28, %s10064_s17  ;;  %701 = vrot.lane.b32.xlu0 %v626_v26, %s10065_s18  ;;  %v631_v28 = vsel %vm606_vm2, %v628_v45, %v630_v51  ;;  %v10694_v40 = vld [vmem:[#allocation2 + $0xf0] sm:$0xff] }
  0x9c   :  { %336 = vst.msk [vmem:[#allocation3 + $0xa0] sm:$0xff] %vm23_vm0, %v10694_v40 }
  0x9f   :  { %1361 = vrot.lane.b32.xlu1 %v419_v41, %s10070_s7  ;;  %1228 = vrot.lane.b32.xlu0 %v10402_v29, %s10069_s26 }
  0xa3   :  { %965 = vrot.lane.b32.xlu1 %v419_v41, %s10067_s20  ;;  %832 = vrot.lane.b32.xlu0 %v10402_v29, %s10064_s17  ;;  %v149_v29 = vld [vmem:[%s14960_s0 + $0x80] sm:$0xff] }
  0xa4   :  { %214 = vst.msk [vmem:[#allocation2 + $0xd9] sm:$0xff] %vm23_vm0, %v149_v29  ;;  %v637_v29 = vrot.slane %v10442_v47, 2 }
  0xa7   :  { %1495 = vrot.lane.b32.xlu1 %v629_v48, %s10071_s12  ;;  %1363 = vrot.lane.b32.xlu0 %v421_v49, %s10070_s7 }
  0xab   :  { %967 = vrot.lane.b32.xlu1 %v421_v49, %s10067_s20  ;;  %493 = vrot.lane.b32.xlu0 %v419_v41, %s10066_s19  ;;  %v10632_v57 = vld [vmem:[#allocation2 + $0xd8] sm:$0xff]  ;;  %v10646_v4 = vld [vmem:[#allocation2 + $0xe0] sm:$0xff]  ;;  %v427_v41 = vrot.slane %v10442_v47, 1 }
  0xac   :  { %334 = vst.msk [vmem:[#allocation3 + $0x90] sm:$0xff] %vm23_vm0, %v10632_v57  ;;  %335 = vst.msk [vmem:[#allocation3 + $0x98] sm:$0xff] %vm23_vm0, %v10646_v4 }
  0xad   :  { %v10706_v46 = vsel %vm396_vm3, %v427_v41, %v428_v43 }
  0xaf   :  { %1497 = vrot.lane.b32.xlu1 %v631_v28, %s10071_s12  ;;  %1099 = vrot.lane.b32.xlu0 %v629_v48, %s10068_s23 }
  0xb1   :  { %v821_v52 = vpop.permute.xlu1 %820  ;;  %v819_v53 = vpop.permute.xlu0 %818 }
  0xb3   :  { %703 = vrot.lane.b32.xlu1 %v629_v48, %s10065_s18  ;;  %495 = vrot.lane.b32.xlu0 %v421_v49, %s10066_s19  ;;  %v10708_v48 = vld [vmem:[#allocation2 + $0xf8] sm:$0xff] }
  0xb4   :  { %337 = vst.msk [vmem:[#allocation3 + $0xa8] sm:$0xff] %vm23_vm0, %v10708_v48 }
  0xb5   :  { %v688_v55 = vpop.permute.xlu1 %687  ;;  %v478_v56 = vpop.permute.xlu0 %477 }
  0xb6   :  { %574 = vst.msk [vmem:[#allocation3] sm:$0xff] %vm573_vm5, %v478_v56 }
  0xb7   :  { %784 = vst.msk [vmem:[#allocation3] sm:$0xff] %vm783_vm6, %v688_v55  ;;  %1230 = vrot.lane.b32.xlu1 %v10404_v30, %s10069_s26  ;;  %1101 = vrot.lane.b32.xlu0 %v631_v28, %s10068_s23 }
  0xb8   :  { %915 = vst.msk [vmem:[#allocation3] sm:$0xff] %vm914_vm7, %v819_v53 }
  0xb9   :  { %v690_v1 = vpop.permute.xlu1 %689  ;;  %v480_v2 = vpop.permute.xlu0 %479 }
  0xba   :  { %575 = vst.msk [vmem:[#allocation3 + $0x8] sm:$0xff] %vm573_vm5, %v480_v2 }
  0xbb   :  { %785 = vst.msk [vmem:[#allocation3 + $0x8] sm:$0xff] %vm783_vm6, %v690_v1  ;;  %834 = vrot.lane.b32.xlu1 %v10404_v30, %s10064_s17  ;;  %705 = vrot.lane.b32.xlu0 %v631_v28, %s10065_s18  ;;  %v282_v28 = vld [vmem:[#allocation2 + $0xa0] sm:$0x3] }
  0xbc   :  { %916 = vst.msk [vmem:[#allocation3 + $0x8] sm:$0xff] %vm914_vm7, %v821_v52  ;;  %v638_v52 = vrot.slane %v10454_v50, 2  ;;  %v430_v53 = vrot.slane %v282_v28, 1 }
  0xbd   :  { %v482_v5 = vpop.permute.xlu1 %481  ;;  %v954_v6 = vpop.permute.xlu0 %953 }
  0xbe   :  { %576 = vst.msk [vmem:[#allocation3 + $0x10] sm:$0xff] %vm573_vm5, %v482_v5  ;;  %v10733_v1 = vsel %vm396_vm3, %v428_v43, %v430_v53  ;;  %v643_v43 = vrot.slane %v10539_v19, 2 }
  0xbf   :  { %1050 = vst.msk [vmem:[#allocation3] sm:$0xff] %vm1049_vm8, %v954_v6  ;;  %1365 = vrot.lane.b32.xlu1 %v424_v3, %s10070_s7  ;;  %1232 = vrot.lane.b32.xlu0 %v10414_v31, %s10069_s26  ;;  %v640_v6 = vrot.slane %v282_v28, 2 }
  0xc1   :  { %v1088_v16 = vpop.permute.xlu1 %1087  ;;  %v956_v17 = vpop.permute.xlu0 %955 }
  0xc2   :  { %1184 = vst.msk [vmem:[#allocation3] sm:$0xff] %vm1183_vm9, %v1088_v16 }
  0xc3   :  { %1051 = vst.msk [vmem:[#allocation3 + $0x8] sm:$0xff] %vm1049_vm8, %v956_v17  ;;  %969 = vrot.lane.b32.xlu1 %v424_v3, %s10067_s20  ;;  %836 = vrot.lane.b32.xlu0 %v10414_v31, %s10064_s17  ;;  %v636_v31 = vsel %vm606_vm2, %v633_v13, %v635_v24 }
  0xc5   :  { %v692_v23 = vpop.permute.xlu1 %691  ;;  %v484_v30 = vpop.permute.xlu0 %483 }
  0xc6   :  { %786 = vst.msk [vmem:[#allocation3 + $0x10] sm:$0xff] %vm783_vm6, %v692_v23  ;;  %v285_v23 = vld [vmem:[#allocation2 + $0xb8] sm:$0x3] }
  0xc7   :  { %577 = vst.msk [vmem:[#allocation3 + $0x18] sm:$0xff] %vm573_vm5, %v484_v30  ;;  %1499 = vrot.lane.b32.xlu1 %v634_v21, %s10071_s12  ;;  %1367 = vrot.lane.b32.xlu0 %v426_v22, %s10070_s7 }
  0xc9   :  { %v1219_v25 = vpop.permute.xlu1 %1218  ;;  %v1090_v32 = vpop.permute.xlu0 %1089 }
  0xca   :  { %1315 = vst.msk [vmem:[#allocation3] sm:$0xff] %vm1314_vm10, %v1219_v25 }
  0xcb   :  { %1185 = vst.msk [vmem:[#allocation3 + $0x8] sm:$0xff] %vm1183_vm9, %v1090_v32  ;;  %971 = vrot.lane.b32.xlu1 %v426_v22, %s10067_s20  ;;  %497 = vrot.lane.b32.xlu0 %v424_v3, %s10066_s19 }
  0xcd   :  { %v823_v33 = vpop.permute.xlu1 %822  ;;  %v694_v34 = vpop.permute.xlu0 %693 }
  0xce   :  { %917 = vst.msk [vmem:[#allocation3 + $0x10] sm:$0xff] %vm914_vm7, %v823_v33  ;;  %v435_v33 = vrot.slane %v285_v23, 1 }
  0xcf   :  { %787 = vst.msk [vmem:[#allocation3 + $0x18] sm:$0xff] %vm783_vm6, %v694_v34  ;;  %1501 = vrot.lane.b32.xlu1 %v636_v31, %s10071_s12  ;;  %1103 = vrot.lane.b32.xlu0 %v634_v21, %s10068_s23  ;;  %v153_v34 = vld [vmem:[%s14960_s0 + $0xa0] sm:$0xff] }
  0xd0   :  { %218 = vst.msk [vmem:[#allocation2 + $0x109] sm:$0xff] %vm23_vm0, %v153_v34 }
  0xd1   :  { %v1354_v36 = vpop.permute.xlu1 %1353  ;;  %v1221_v26 = vpop.permute.xlu0 %1220 }
  0xd2   :  { %1450 = vst.msk [vmem:[#allocation3] sm:$0xff] %vm1449_vm11, %v1354_v36 }
  0xd3   :  { %1316 = vst.msk [vmem:[#allocation3 + $0x8] sm:$0xff] %vm1314_vm10, %v1221_v26  ;;  %707 = vrot.lane.b32.xlu1 %v634_v21, %s10065_s18  ;;  %499 = vrot.lane.b32.xlu0 %v426_v22, %s10066_s19  ;;  %v10759_v22 = vsel %vm606_vm2, %v638_v52, %v640_v6 }
  0xd5   :  { %v958_v37 = vpop.permute.xlu1 %957  ;;  %v825_v39 = vpop.permute.xlu0 %824 }
  0xd6   :  { %1052 = vst.msk [vmem:[#allocation3 + $0x10] sm:$0xff] %vm1049_vm8, %v958_v37 }
  0xd7   :  { %918 = vst.msk [vmem:[#allocation3 + $0x18] sm:$0xff] %vm914_vm7, %v825_v39  ;;  %1234 = vrot.lane.b32.xlu1 %v10442_v47, %s10069_s26  ;;  %1105 = vrot.lane.b32.xlu0 %v636_v31, %s10068_s23 }
  0xd9   :  { %v1488_v44 = vpop.permute.xlu1 %1487  ;;  %v1356_v45 = vpop.permute.xlu0 %1355 }
  0xda   :  { %1584 = vst.msk [vmem:[#allocation3] sm:$0xff] %vm1583_vm12, %v1488_v44  ;;  %v645_v44 = vrot.slane %v285_v23, 2 }
  0xdb   :  { %1451 = vst.msk [vmem:[#allocation3 + $0x8] sm:$0xff] %vm1449_vm11, %v1356_v45  ;;  %838 = vrot.lane.b32.xlu1 %v10442_v47, %s10064_s17  ;;  %709 = vrot.lane.b32.xlu0 %v636_v31, %s10065_s18  ;;  %v10730_v47 = vsel %vm606_vm2, %v637_v29, %v638_v52  ;;  %v433_v31 = vrot.slane %v10539_v19, 1  ;;  %v642_v45 = vrot.slane %v10541_v20, 2  ;;  %v10806_v29 = vld [vmem:[#allocation2 + $0x108] sm:$0xff] }
  0xdc   :  { %v10809_v52 = vsel %vm606_vm2, %v643_v43, %v645_v44  ;;  %338 = vst.msk [vmem:[#allocation3 + $0xb0] sm:$0xff] %vm23_vm0, %v10806_v29 }
  0xdd   :  { %v960_v49 = vpop.permute.xlu1 %959  ;;  %v486_v51 = vpop.permute.xlu0 %485  ;;  %v10790_v39 = vsel %vm396_vm3, %v433_v31, %v435_v33  ;;  %v434_v41 = vsel %vm396_vm3, %v432_v35, %v433_v31  ;;  %v10812_v53 = vsel %vm606_vm2, %v642_v45, %v643_v43  ;;  %v155_v35 = vld [vmem:[%s14960_s0 + $0xb0] sm:$0xff]  ;;  %v437_v45 = vrot.slane %v10586_v38, 1 }
  0xde   :  { %1053 = vst.msk [vmem:[#allocation3 + $0x18] sm:$0xff] %vm1049_vm8, %v960_v49  ;;  %v154_v49 = vld [vmem:[%s14960_s0 + $0xa8] sm:$0xff] }
  0xdf   :  { %578 = vst.msk [vmem:[#allocation3 + $0x20] sm:$0xff] %vm573_vm5, %v486_v51  ;;  %1369 = vrot.lane.b32.xlu1 %v10706_v46, %s10070_s7  ;;  %1236 = vrot.lane.b32.xlu0 %v10454_v50, %s10069_s26 }
  0xe0   :  { %219 = vst.msk [vmem:[#allocation2 + $0x111] sm:$0xff] %vm23_vm0, %v154_v49  ;;  %220 = vst.msk [vmem:[#allocation2 + $0x121] sm:$0xff] %vm23_vm0, %v155_v35  ;;  %v438_v49 = vrot.slane %v10596_v42, 1 }
  0xe1   :  { %v1490_v54 = vpop.permute.xlu1 %1489  ;;  %v1092_v55 = vpop.permute.xlu0 %1091  ;;  %v2961_v56 = vld [vmem:[#allocation3] sm:$0xff] }
  0xe2   :  { %1585 = vst.msk [vmem:[#allocation3 + $0x8] sm:$0xff] %vm1583_vm12, %v1490_v54  ;;  %v3032_v58 = vsel %vm3030_vm13, %v2961_v56, 0 }
  0xe3   :  { %1186 = vst.msk [vmem:[#allocation3 + $0x10] sm:$0xff] %vm1183_vm9, %v1092_v55  ;;  %973 = vrot.lane.b32.xlu1 %v10706_v46, %s10067_s20  ;;  %840 = vrot.lane.b32.xlu0 %v10454_v50, %s10064_s17  ;;  %v10727_v59 = vand.u32 4294901760, %v3032_v58 }
  0xe5   :  { %v696_v2 = vpop.permute.xlu1 %695  ;;  %v488_v3 = vpop.permute.xlu0 %487  ;;  %v10736_v5 = vsub.f32 %v3032_v58, %v10727_v59 }
  0xe6   :  { %788 = vst.msk [vmem:[#allocation3 + $0x20] sm:$0xff] %vm783_vm6, %v696_v2 }
  0xe7   :  { %579 = vst.msk [vmem:[#allocation3 + $0x28] sm:$0xff] %vm573_vm5, %v488_v3  ;;  %1503 = vrot.lane.b32.xlu1 %v10730_v47, %s10071_s12  ;;  %1371 = vrot.lane.b32.xlu0 %v10733_v1, %s10070_s7  ;;  %v3299_v50 = vand.u32 4294901760, %v10736_v5  ;;  %v10823_v56 = vld [vmem:[#allocation2 + $0x110] sm:$0xff]  ;;  %v297_v0 = vld [vmem:[#allocation2 + $0x118] sm:$0x3] }
  0xe8   :  { %8991 = vmatprep.mubr.f32.mxu0 %v10736_v5  ;;  %339 = vst.msk [vmem:[#allocation3 + $0xb8] sm:$0xff] %vm23_vm0, %v10823_v56 }
  0xe9   :  { %v1223_v9 = vpop.permute.xlu1 %1222  ;;  %v1094_v11 = vpop.permute.xlu0 %1093  ;;  %v3300_v13 = vsub.f32 %v10736_v5, %v3299_v50  ;;  %v2962_v15 = vld [vmem:[#allocation3 + $0x8] sm:$0xff] }
  0xea   :  { %1317 = vst.msk [vmem:[#allocation3 + $0x10] sm:$0xff] %vm1314_vm10, %v1223_v9  ;;  %v3035_v16 = vsel %vm3030_vm13, %v2962_v15, 0 }
  0xeb   :  { %1187 = vst.msk [vmem:[#allocation3 + $0x18] sm:$0xff] %vm1183_vm9, %v1094_v11  ;;  %1107 = vrot.lane.b32.xlu1 %v10730_v47, %s10068_s23  ;;  %975 = vrot.lane.b32.xlu0 %v10733_v1, %s10067_s20  ;;  %v3301_v17 = vand.u32 4294901760, %v3300_v13  ;;  %v10756_v21 = vand.u32 4294901760, %v3035_v16 }
  0xed   :  { %v827_v30 = vpop.permute.xlu1 %826  ;;  %8779 = vmatprep.mubr.f32.mxu1 %v3301_v17  ;;  %v698_v24 = vpop.permute.xlu0 %697  ;;  %v10762_v25 = vsub.f32 %v3035_v16, %v10756_v21 }
  0xee   :  { %919 = vst.msk [vmem:[#allocation3 + $0x20] sm:$0xff] %vm914_vm7, %v827_v30 }
  0xef   :  { %789 = vst.msk [vmem:[#allocation3 + $0x28] sm:$0xff] %vm783_vm6, %v698_v24  ;;  %1109 = vrot.lane.b32.xlu1 %v10759_v22, %s10068_s23  ;;  %1505 = vrot.lane.b32.xlu0 %v10759_v22, %s10071_s12  ;;  %v3309_v32 = vand.u32 4294901760, %v10762_v25 }
  0xf0   :  { %8992 = vmatmul.mubr.f32.vlgmr.msra.gmra.mrb[0].mxu0 %v10762_v25 }
  0xf1   :  { %v1358_v36 = vpop.permute.xlu1 %1357  ;;  %v1225_v26 = vpop.permute.xlu0 %1224  ;;  %v3310_v27 = vsub.f32 %v10762_v25, %v3309_v32  ;;  %9516 = vmatpush3.bf16.msra.mxu0 %v10477_v62 }
  0xf2   :  { %1452 = vst.msk [vmem:[#allocation3 + $0x10] sm:$0xff] %vm1449_vm11, %v1358_v36  ;;  %9518 = vmatprep.subr.bf16.mxu0 %v10501_v10 }
  0xf3   :  { %1318 = vst.msk [vmem:[#allocation3 + $0x18] sm:$0xff] %vm1314_vm10, %v1225_v26  ;;  %1240 = vrot.lane.b32.xlu1 %v10539_v19, %s10069_s26  ;;  %1238 = vrot.lane.b32.xlu0 %v10541_v20, %s10069_s26  ;;  %v3311_v37 = vand.u32 4294901760, %v3310_v27 }
  0xf5   :  { %v962_v51 = vpop.permute.xlu1 %961  ;;  %8780 = vmatmul.mubr.f32.vlgmr.msra.gmra.mrb[0].mxu1 %v3311_v37  ;;  %v829_v28 = vpop.permute.xlu0 %828  ;;  %9520 = vmatpush3.bf16.msra.mxu0 %v10501_v10 }
  0xf6   :  { %1054 = vst.msk [vmem:[#allocation3 + $0x20] sm:$0xff] %vm1049_vm8, %v962_v51  ;;  %9095 = vmatprep.subr.mxu0 %v10510_v14 }
  0xf7   :  { %920 = vst.msk [vmem:[#allocation3 + $0x28] sm:$0xff] %vm914_vm7, %v829_v28  ;;  %1375 = vrot.lane.b32.xlu1 %v10790_v39, %s10070_s7  ;;  %1373 = vrot.lane.b32.xlu0 %v434_v41, %s10070_s7 }
  0xf9   :  { %v1492_v54 = vpop.permute.xlu1 %1491  ;;  %v1360_v55 = vpop.permute.xlu0 %1359  ;;  %9096 = vmatpush3.msra.mxu0 %v10510_v14 }
  0xfa   :  { %1586 = vst.msk [vmem:[#allocation3 + $0x10] sm:$0xff] %vm1583_vm12, %v1492_v54 }
  0xfb   :  { %1453 = vst.msk [vmem:[#allocation3 + $0x18] sm:$0xff] %vm1449_vm11, %v1360_v55  ;;  %1509 = vrot.lane.b32.xlu1 %v10809_v52, %s10071_s12  ;;  %1507 = vrot.lane.b32.xlu0 %v10812_v53, %s10071_s12 }
  0xfd   :  { %v964_v58 = vpop.permute.xlu1 %963  ;;  %v490_v2 = vpop.permute.xlu0 %489 }
  0xfe   :  { %1055 = vst.msk [vmem:[#allocation3 + $0x28] sm:$0xff] %vm1049_vm8, %v964_v58 }
  0xff   :  { %580 = vst.msk [vmem:[#allocation3 + $0x30] sm:$0xff] %vm573_vm5, %v490_v2  ;;  %503 = vrot.lane.b32.xlu1 %v10733_v1, %s10066_s19  ;;  %501 = vrot.lane.b32.xlu0 %v10706_v46, %s10066_s19  ;;  %v288_v2 = vld [vmem:[#allocation2 + $0xd0] sm:$0x3] }
 0x101   :  { %v1494_v3 = vpop.permute.xlu1 %1493  ;;  %v1096_v6 = vpop.permute.xlu0 %1095  ;;  %v2963_v9 = vld [vmem:[#allocation3 + $0x10] sm:$0xff] }
 0x102   :  { %1587 = vst.msk [vmem:[#allocation3 + $0x18] sm:$0xff] %vm1583_vm12, %v1494_v3  ;;  %v3038_v11 = vsel %vm3030_vm13, %v2963_v9, 0  ;;  %v648_v3 = vrot.slane %v10596_v42, 2 }
 0x103   :  { %1188 = vst.msk [vmem:[#allocation3 + $0x20] sm:$0xff] %vm1183_vm9, %v1096_v6  ;;  %713 = vrot.lane.b32.xlu1 %v10759_v22, %s10065_s18  ;;  %711 = vrot.lane.b32.xlu0 %v10730_v47, %s10065_s18  ;;  %v10840_v13 = vand.u32 4294901760, %v3038_v11  ;;  %v440_v6 = vrot.slane %v288_v2, 1 }
 0x105   :  { %v700_v1 = vpop.permute.xlu1 %699  ;;  %v492_v15 = vpop.permute.xlu0 %491  ;;  %v10843_v46 = vsub.f32 %v3038_v11, %v10840_v13 }
 0x106   :  { %790 = vst.msk [vmem:[#allocation3 + $0x30] sm:$0xff] %vm783_vm6, %v700_v1 }
 0x107   :  { %581 = vst.msk [vmem:[#allocation3 + $0x38] sm:$0xff] %vm573_vm5, %v492_v15  ;;  %844 = vrot.lane.b32.xlu1 %v10539_v19, %s10064_s17  ;;  %842 = vrot.lane.b32.xlu0 %v10541_v20, %s10064_s17  ;;  %v3319_v16 = vand.u32 4294901760, %v10843_v46 }
 0x108   :  { %8994 = vmatprep.mubr.f32.mxu0 %v10843_v46 }
 0x109   :  { %v1227_v47 = vpop.permute.xlu1 %1226  ;;  %v1098_v17 = vpop.permute.xlu0 %1097  ;;  %v3320_v22 = vsub.f32 %v10843_v46, %v3319_v16  ;;  %v2964_v23 = vld [vmem:[#allocation3 + $0x18] sm:$0xff] }
 0x10a   :  { %1319 = vst.msk [vmem:[#allocation3 + $0x20] sm:$0xff] %vm1314_vm10, %v1227_v47  ;;  %v3041_v19 = vsel %vm3030_vm13, %v2964_v23, 0 }
 0x10b   :  { %1189 = vst.msk [vmem:[#allocation3 + $0x28] sm:$0xff] %vm1183_vm9, %v1098_v17  ;;  %505 = vrot.lane.b32.xlu1 %v434_v41, %s10066_s19  ;;  %977 = vrot.lane.b32.xlu0 %v434_v41, %s10067_s20  ;;  %v3321_v20 = vand.u32 4294901760, %v3320_v22  ;;  %v10861_v30 = vand.u32 4294901760, %v3041_v19  ;;  %v156_v41 = vld [vmem:[%s14960_s0 + $0xb8] sm:$0xff]  ;;  %v441_v17 = vsel %vm396_vm3, %v438_v49, %v440_v6 }
 0x10c   :  { %221 = vst.msk [vmem:[#allocation2 + $0x129] sm:$0xff] %vm23_vm0, %v156_v41 }
 0x10d   :  { %v831_v24 = vpop.permute.xlu1 %830  ;;  %v702_v31 = vpop.permute.xlu0 %701  ;;  %8782 = vmatprep.mubr.f32.mxu1 %v3321_v20  ;;  %v10864_v33 = vsub.f32 %v3041_v19, %v10861_v30  ;;  %v650_v20 = vrot.slane %v288_v2, 2  ;;  %v158_v2 = vld [vmem:[%s14960_s0 + $0xc8] sm:$0xff] }
 0x10e   :  { %921 = vst.msk [vmem:[#allocation3 + $0x30] sm:$0xff] %vm914_vm7, %v831_v24 }
 0x10f   :  { %791 = vst.msk [vmem:[#allocation3 + $0x38] sm:$0xff] %vm783_vm6, %v702_v31  ;;  %1111 = vrot.lane.b32.xlu1 %v10812_v53, %s10068_s23  ;;  %979 = vrot.lane.b32.xlu0 %v10790_v39, %s10067_s20  ;;  %v3329_v34 = vand.u32 4294901760, %v10864_v33  ;;  %v651_v41 = vsel %vm606_vm2, %v648_v3, %v650_v20  ;;  %v291_v20 = vld [vmem:[#allocation2 + $0xe8] sm:$0x3] }
 0x110   :  { %8995 = vmatmul.mubr.f32.gmra.mrb[2].mxu0 %v10864_v33  ;;  %223 = vst.msk [vmem:[#allocation2 + $0x141] sm:$0xff] %vm23_vm0, %v158_v2 }
 0x111   :  { %v1362_v36 = vpop.permute.xlu1 %1361  ;;  %v1229_v26 = vpop.permute.xlu0 %1228  ;;  %v3330_v27 = vsub.f32 %v10864_v33, %v3329_v34 }
 0x112   :  { %1454 = vst.msk [vmem:[#allocation3 + $0x20] sm:$0xff] %vm1449_vm11, %v1362_v36 }
 0x113   :  { %1320 = vst.msk [vmem:[#allocation3 + $0x28] sm:$0xff] %vm1314_vm10, %v1229_v26  ;;  %715 = vrot.lane.b32.xlu1 %v10812_v53, %s10065_s18  ;;  %507 = vrot.lane.b32.xlu0 %v10790_v39, %s10066_s19  ;;  %v3331_v37 = vand.u32 4294901760, %v3330_v27  ;;  %v10897_v39 = vld [vmem:[#allocation2 + $0x120] sm:$0xff]  ;;  %v439_v53 = vsel %vm396_vm3, %v437_v45, %v438_v49  ;;  %v10910_v54 = vld [vmem:[#allocation2 + $0x128] sm:$0xff] }
 0x114   :  { %340 = vst.msk [vmem:[#allocation3 + $0xc0] sm:$0xff] %vm23_vm0, %v10897_v39  ;;  %341 = vst.msk [vmem:[#allocation3 + $0xc8] sm:$0xff] %vm23_vm0, %v10910_v54 }
 0x115   :  { %v966_v43 = vpop.permute.xlu1 %965  ;;  %v833_v44 = vpop.permute.xlu0 %832  ;;  %8783 = vmatmul.mubr.f32.gmra.mrb[2].mxu1 %v3331_v37 }
 0x116   :  { %1056 = vst.msk [vmem:[#allocation3 + $0x30] sm:$0xff] %vm1049_vm8, %v966_v43 }
 0x117   :  { %922 = vst.msk [vmem:[#allocation3 + $0x38] sm:$0xff] %vm914_vm7, %v833_v44  ;;  %1242 = vrot.lane.b32.xlu1 %v10586_v38, %s10069_s26  ;;  %1113 = vrot.lane.b32.xlu0 %v10809_v52, %s10068_s23 }
 0x119   :  { %v1496_v51 = vpop.permute.xlu1 %1495  ;;  %v1364_v28 = vpop.permute.xlu0 %1363 }
 0x11a   :  { %1588 = vst.msk [vmem:[#allocation3 + $0x20] sm:$0xff] %vm1583_vm12, %v1496_v51  ;;  %v157_v51 = vld [vmem:[%s14960_s0 + $0xc0] sm:$0xff] }
 0x11b   :  { %1455 = vst.msk [vmem:[#allocation3 + $0x28] sm:$0xff] %vm1449_vm11, %v1364_v28  ;;  %846 = vrot.lane.b32.xlu1 %v10586_v38, %s10064_s17  ;;  %717 = vrot.lane.b32.xlu0 %v10809_v52, %s10065_s18  ;;  %v647_v52 = vrot.slane %v10586_v38, 2 }
 0x11c   :  { %222 = vst.msk [vmem:[#allocation2 + $0x139] sm:$0xff] %vm23_vm0, %v157_v51 }
 0x11d   :  { %v968_v55 = vpop.permute.xlu1 %967  ;;  %v494_v58 = vpop.permute.xlu0 %493  ;;  %v649_v38 = vsel %vm606_vm2, %v647_v52, %v648_v3 }
 0x11e   :  { %1057 = vst.msk [vmem:[#allocation3 + $0x38] sm:$0xff] %vm1049_vm8, %v968_v55 }
 0x11f   :  { %582 = vst.msk [vmem:[#allocation3 + $0x40] sm:$0xff] %vm573_vm5, %v494_v58  ;;  %1377 = vrot.lane.b32.xlu1 %v439_v53, %s10070_s7  ;;  %1244 = vrot.lane.b32.xlu0 %v10596_v42, %s10069_s26 }
 0x121   :  { %v1498_v9 = vpop.permute.xlu1 %1497  ;;  %v1100_v11 = vpop.permute.xlu0 %1099  ;;  %v2965_v1 = vld [vmem:[#allocation3 + $0x20] sm:$0xff] }
 0x122   :  { %1589 = vst.msk [vmem:[#allocation3 + $0x28] sm:$0xff] %vm1583_vm12, %v1498_v9  ;;  %v3044_v15 = vsel %vm3030_vm13, %v2965_v1, 0  ;;  %v442_v9 = vrot.slane %v10632_v57, 1 }
 0x123   :  { %1190 = vst.msk [vmem:[#allocation3 + $0x30] sm:$0xff] %vm1183_vm9, %v1100_v11  ;;  %981 = vrot.lane.b32.xlu1 %v439_v53, %s10067_s20  ;;  %848 = vrot.lane.b32.xlu0 %v10596_v42, %s10064_s17  ;;  %v10927_v47 = vand.u32 4294901760, %v3044_v15  ;;  %v10980_v6 = vld [vmem:[#allocation2 + $0x138] sm:$0xff]  ;;  %v443_v11 = vrot.slane %v10646_v4, 1 }
 0x124   :  { %342 = vst.msk [vmem:[#allocation3 + $0xd0] sm:$0xff] %vm23_vm0, %v10980_v6 }
 0x125   :  { %v704_v22 = vpop.permute.xlu1 %703  ;;  %v496_v23 = vpop.permute.xlu0 %495  ;;  %v10932_v19 = vsub.f32 %v3044_v15, %v10927_v47 }
 0x126   :  { %792 = vst.msk [vmem:[#allocation3 + $0x40] sm:$0xff] %vm783_vm6, %v704_v22 }
 0x127   :  { %583 = vst.msk [vmem:[#allocation3 + $0x48] sm:$0xff] %vm573_vm5, %v496_v23  ;;  %1511 = vrot.lane.b32.xlu1 %v649_v38, %s10071_s12  ;;  %1379 = vrot.lane.b32.xlu0 %v441_v17, %s10070_s7  ;;  %v3339_v42 = vand.u32 4294901760, %v10932_v19 }
 0x128   :  { %8997 = vmatprep.mubr.f32.mxu0 %v10932_v19 }
 0x129   :  { %v1231_v24 = vpop.permute.xlu1 %1230  ;;  %v1102_v31 = vpop.permute.xlu0 %1101  ;;  %v3340_v35 = vsub.f32 %v10932_v19, %v3339_v42  ;;  %v2966_v36 = vld [vmem:[#allocation3 + $0x28] sm:$0xff]  ;;  %v163_v19 = vld [vmem:[%s14960_s0 + $0xf0] sm:$0xff] }
 0x12a   :  { %1321 = vst.msk [vmem:[#allocation3 + $0x30] sm:$0xff] %vm1314_vm10, %v1231_v24  ;;  %v3047_v26 = vsel %vm3030_vm13, %v2966_v36, 0  ;;  %v652_v24 = vrot.slane %v10632_v57, 2 }
 0x12b   :  { %1191 = vst.msk [vmem:[#allocation3 + $0x38] sm:$0xff] %vm1183_vm9, %v1102_v31  ;;  %983 = vrot.lane.b32.xlu1 %v441_v17, %s10067_s20  ;;  %509 = vrot.lane.b32.xlu0 %v439_v53, %s10066_s19  ;;  %v3341_v27 = vand.u32 4294901760, %v3340_v35  ;;  %v10948_v37 = vand.u32 4294901760, %v3047_v26  ;;  %v653_v31 = vrot.slane %v10646_v4, 2  ;;  %v445_v35 = vrot.slane %v291_v20, 1 }
 0x12c   :  { %228 = vst.msk [vmem:[#allocation2 + $0x181] sm:$0xff] %vm23_vm0, %v163_v19 }
 0x12d   :  { %v835_v43 = vpop.permute.xlu1 %834  ;;  %v706_v44 = vpop.permute.xlu0 %705  ;;  %8785 = vmatprep.mubr.f32.mxu1 %v3341_v27  ;;  %v10952_v45 = vsub.f32 %v3047_v26, %v10948_v37 }
 0x12e   :  { %923 = vst.msk [vmem:[#allocation3 + $0x40] sm:$0xff] %vm914_vm7, %v835_v43 }
 0x12f   :  { %793 = vst.msk [vmem:[#allocation3 + $0x48] sm:$0xff] %vm783_vm6, %v706_v44  ;;  %1513 = vrot.lane.b32.xlu1 %v651_v41, %s10071_s12  ;;  %1115 = vrot.lane.b32.xlu0 %v649_v38, %s10068_s23  ;;  %v3349_v49 = vand.u32 4294901760, %v10952_v45  ;;  %v446_v44 = vsel %vm396_vm3, %v443_v11, %v445_v35 }
 0x130   :  { %8998 = vmatmul.mubr.f32.gmra.mrb[4].mxu0 %v10952_v45 }
 0x131   :  { %v1366_v28 = vpop.permute.xlu1 %1365  ;;  %v1233_v53 = vpop.permute.xlu0 %1232  ;;  %v3350_v55 = vsub.f32 %v10952_v45, %v3349_v49 }
 0x132   :  { %1456 = vst.msk [vmem:[#allocation3 + $0x30] sm:$0xff] %vm1449_vm11, %v1366_v28 }
 0x133   :  { %1322 = vst.msk [vmem:[#allocation3 + $0x38] sm:$0xff] %vm1314_vm10, %v1233_v53  ;;  %719 = vrot.lane.b32.xlu1 %v649_v38, %s10065_s18  ;;  %511 = vrot.lane.b32.xlu0 %v441_v17, %s10066_s19  ;;  %v3351_v58 = vand.u32 4294901760, %v3350_v55  ;;  %v444_v38 = vsel %vm396_vm3, %v442_v9, %v443_v11  ;;  %v10992_v17 = vld [vmem:[#allocation2 + $0x140] sm:$0xff]  ;;  %v655_v55 = vrot.slane %v291_v20, 2 }
 0x134   :  { %343 = vst.msk [vmem:[#allocation3 + $0xd8] sm:$0xff] %vm23_vm0, %v10992_v17 }
 0x135   :  { %v970_v52 = vpop.permute.xlu1 %969  ;;  %v837_v3 = vpop.permute.xlu0 %836  ;;  %8786 = vmatmul.mubr.f32.gmra.mrb[4].mxu1 %v3351_v58 }
 0x136   :  { %1058 = vst.msk [vmem:[#allocation3 + $0x40] sm:$0xff] %vm1049_vm8, %v970_v52 }
 0x137   :  { %924 = vst.msk [vmem:[#allocation3 + $0x48] sm:$0xff] %vm914_vm7, %v837_v3  ;;  %1246 = vrot.lane.b32.xlu1 %v10632_v57, %s10069_s26  ;;  %1117 = vrot.lane.b32.xlu0 %v651_v41, %s10068_s23 }
 0x139   :  { %v1500_v1 = vpop.permute.xlu1 %1499  ;;  %v1368_v15 = vpop.permute.xlu0 %1367 }
 0x13a   :  { %1590 = vst.msk [vmem:[#allocation3 + $0x30] sm:$0xff] %vm1583_vm12, %v1500_v1 }
 0x13b   :  { %1457 = vst.msk [vmem:[#allocation3 + $0x38] sm:$0xff] %vm1449_vm11, %v1368_v15  ;;  %850 = vrot.lane.b32.xlu1 %v10632_v57, %s10064_s17  ;;  %721 = vrot.lane.b32.xlu0 %v651_v41, %s10065_s18  ;;  %v654_v57 = vsel %vm606_vm2, %v652_v24, %v653_v31  ;;  %v656_v15 = vsel %vm606_vm2, %v653_v31, %v655_v55  ;;  %v159_v24 = vld [vmem:[%s14960_s0 + $0xd0] sm:$0xff] }
 0x13c   :  { %224 = vst.msk [vmem:[#allocation2 + $0x151] sm:$0xff] %vm23_vm0, %v159_v24 }
 0x13d   :  { %v972_v22 = vpop.permute.xlu1 %971  ;;  %v498_v23 = vpop.permute.xlu0 %497 }
 0x13e   :  { %1059 = vst.msk [vmem:[#allocation3 + $0x48] sm:$0xff] %vm1049_vm8, %v972_v22 }
 0x13f   :  { %584 = vst.msk [vmem:[#allocation3 + $0x50] sm:$0xff] %vm573_vm5, %v498_v23  ;;  %1381 = vrot.lane.b32.xlu1 %v444_v38, %s10070_s7  ;;  %1248 = vrot.lane.b32.xlu0 %v10646_v4, %s10069_s26 }
 0x141   :  { %v1502_v36 = vpop.permute.xlu1 %1501  ;;  %v1104_v26 = vpop.permute.xlu0 %1103  ;;  %v2967_v27 = vld [vmem:[#allocation3 + $0x30] sm:$0xff] }
 0x142   :  { %1591 = vst.msk [vmem:[#allocation3 + $0x38] sm:$0xff] %vm1583_vm12, %v1502_v36  ;;  %v3050_v41 = vsel %vm3030_vm13, %v2967_v27, 0  ;;  %v160_v27 = vld [vmem:[%s14960_s0 + $0xd8] sm:$0xff] }
 0x143   :  { %1192 = vst.msk [vmem:[#allocation3 + $0x40] sm:$0xff] %vm1183_vm9, %v1104_v26  ;;  %985 = vrot.lane.b32.xlu1 %v444_v38, %s10067_s20  ;;  %852 = vrot.lane.b32.xlu0 %v10646_v4, %s10064_s17  ;;  %v11009_v43 = vand.u32 4294901760, %v3050_v41 }
 0x144   :  { %225 = vst.msk [vmem:[#allocation2 + $0x159] sm:$0xff] %vm23_vm0, %v160_v27 }
 0x145   :  { %v708_v51 = vpop.permute.xlu1 %707  ;;  %v500_v28 = vpop.permute.xlu0 %499  ;;  %v11014_v53 = vsub.f32 %v3050_v41, %v11009_v43 }
 0x146   :  { %794 = vst.msk [vmem:[#allocation3 + $0x50] sm:$0xff] %vm783_vm6, %v708_v51 }
 0x147   :  { %585 = vst.msk [vmem:[#allocation3 + $0x58] sm:$0xff] %vm573_vm5, %v500_v28  ;;  %1515 = vrot.lane.b32.xlu1 %v654_v57, %s10071_s12  ;;  %1383 = vrot.lane.b32.xlu0 %v446_v44, %s10070_s7  ;;  %v3359_v4 = vand.u32 4294901760, %v11014_v53  ;;  %v448_v28 = vrot.slane %v10708_v48, 1 }
 0x148   :  { %9000 = vmatprep.mubr.f32.mxu0 %v11014_v53 }
 0x149   :  { %v1235_v58 = vpop.permute.xlu1 %1234  ;;  %v1106_v2 = vpop.permute.xlu0 %1105  ;;  %v3360_v52 = vsub.f32 %v11014_v53, %v3359_v4  ;;  %v2968_v3 = vld [vmem:[#allocation3 + $0x38] sm:$0xff] }
 0x14a   :  { %1323 = vst.msk [vmem:[#allocation3 + $0x40] sm:$0xff] %vm1314_vm10, %v1235_v58  ;;  %v3053_v9 = vsel %vm3030_vm13, %v2968_v3, 0 }
 0x14b   :  { %1193 = vst.msk [vmem:[#allocation3 + $0x48] sm:$0xff] %vm1183_vm9, %v1106_v2  ;;  %987 = vrot.lane.b32.xlu1 %v446_v44, %s10067_s20  ;;  %513 = vrot.lane.b32.xlu0 %v444_v38, %s10066_s19  ;;  %v3361_v11 = vand.u32 4294901760, %v3360_v52  ;;  %v11030_v1 = vand.u32 4294901760, %v3053_v9  ;;  %v11074_v52 = vld [vmem:[#allocation2 + $0x158] sm:$0xff] }
 0x14c   :  { %345 = vst.msk [vmem:[#allocation3 + $0xe8] sm:$0xff] %vm23_vm0, %v11074_v52 }
 0x14d   :  { %v839_v22 = vpop.permute.xlu1 %838  ;;  %v710_v23 = vpop.permute.xlu0 %709  ;;  %8788 = vmatprep.mubr.f32.mxu1 %v3361_v11  ;;  %v11034_v20 = vsub.f32 %v3053_v9, %v11030_v1  ;;  %v294_v11 = vld [vmem:[#allocation2 + $0x100] sm:$0x3] }
 0x14e   :  { %925 = vst.msk [vmem:[#allocation3 + $0x50] sm:$0xff] %vm914_vm7, %v839_v22  ;;  %v658_v22 = vrot.slane %v10708_v48, 2 }
 0x14f   :  { %795 = vst.msk [vmem:[#allocation3 + $0x58] sm:$0xff] %vm783_vm6, %v710_v23  ;;  %1517 = vrot.lane.b32.xlu1 %v656_v15, %s10071_s12  ;;  %1119 = vrot.lane.b32.xlu0 %v654_v57, %s10068_s23  ;;  %v3369_v38 = vand.u32 4294901760, %v11034_v20  ;;  %v450_v23 = vrot.slane %v294_v11, 1 }
 0x150   :  { %9001 = vmatmul.mubr.f32.gmra.mrb[6].mxu0 %v11034_v20 }
 0x151   :  { %v1370_v31 = vpop.permute.xlu1 %1369  ;;  %v1237_v35 = vpop.permute.xlu0 %1236  ;;  %v3370_v36 = vsub.f32 %v11034_v20, %v3369_v38  ;;  %v451_v27 = vsel %vm396_vm3, %v448_v28, %v450_v23 }
 0x152   :  { %1458 = vst.msk [vmem:[#allocation3 + $0x40] sm:$0xff] %vm1449_vm11, %v1370_v31 }
 0x153   :  { %1324 = vst.msk [vmem:[#allocation3 + $0x48] sm:$0xff] %vm1314_vm10, %v1237_v35  ;;  %723 = vrot.lane.b32.xlu1 %v654_v57, %s10065_s18  ;;  %515 = vrot.lane.b32.xlu0 %v446_v44, %s10066_s19  ;;  %v3371_v26 = vand.u32 4294901760, %v3370_v36  ;;  %v11062_v57 = vld [vmem:[#allocation2 + $0x150] sm:$0xff]  ;;  %v447_v44 = vrot.slane %v10694_v40, 1 }
 0x154   :  { %344 = vst.msk [vmem:[#allocation3 + $0xe0] sm:$0xff] %vm23_vm0, %v11062_v57 }
 0x155   :  { %v974_v41 = vpop.permute.xlu1 %973  ;;  %v841_v51 = vpop.permute.xlu0 %840  ;;  %8789 = vmatmul.mubr.f32.gmra.mrb[6].mxu1 %v3371_v26  ;;  %v449_v2 = vsel %vm396_vm3, %v447_v44, %v448_v28 }
 0x156   :  { %1060 = vst.msk [vmem:[#allocation3 + $0x50] sm:$0xff] %vm1049_vm8, %v974_v41 }
 0x157   :  { %926 = vst.msk [vmem:[#allocation3 + $0x58] sm:$0xff] %vm914_vm7, %v841_v51  ;;  %1250 = vrot.lane.b32.xlu1 %v10694_v40, %s10069_s26  ;;  %1121 = vrot.lane.b32.xlu0 %v656_v15, %s10068_s23 }
 0x159   :  { %v1504_v55 = vpop.permute.xlu1 %1503  ;;  %v1372_v58 = vpop.permute.xlu0 %1371 }
 0x15a   :  { %1592 = vst.msk [vmem:[#allocation3 + $0x40] sm:$0xff] %vm1583_vm12, %v1504_v55  ;;  %v660_v55 = vrot.slane %v294_v11, 2 }
 0x15b   :  { %1459 = vst.msk [vmem:[#allocation3 + $0x48] sm:$0xff] %vm1449_vm11, %v1372_v58  ;;  %854 = vrot.lane.b32.xlu1 %v10694_v40, %s10064_s17  ;;  %725 = vrot.lane.b32.xlu0 %v656_v15, %s10065_s18  ;;  %v657_v15 = vrot.slane %v10694_v40, 2 }
 0x15c   :  { %v661_v11 = vsel %vm606_vm2, %v658_v22, %v660_v55 }
 0x15d   :  { %v1108_v3 = vpop.permute.xlu1 %1107  ;;  %v976_v9 = vpop.permute.xlu0 %975  ;;  %v659_v40 = vsel %vm606_vm2, %v657_v15, %v658_v22  ;;  %v161_v22 = vld [vmem:[%s14960_s0 + $0xe0] sm:$0xff] }
 0x15e   :  { %1194 = vst.msk [vmem:[#allocation3 + $0x50] sm:$0xff] %vm1183_vm9, %v1108_v3 }
 0x15f   :  { %1061 = vst.msk [vmem:[#allocation3 + $0x58] sm:$0xff] %vm1049_vm8, %v976_v9  ;;  %1385 = vrot.lane.b32.xlu1 %v449_v2, %s10070_s7  ;;  %1252 = vrot.lane.b32.xlu0 %v10708_v48, %s10069_s26 }
 0x160   :  { %226 = vst.msk [vmem:[#allocation2 + $0x169] sm:$0xff] %vm23_vm0, %v161_v22 }
 0x161   :  { %v1110_v24 = vpop.permute.xlu1 %1109  ;;  %v1506_v31 = vpop.permute.xlu0 %1505  ;;  %v2969_v35 = vld [vmem:[#allocation3 + $0x40] sm:$0xff] }
 0x162   :  { %1195 = vst.msk [vmem:[#allocation3 + $0x58] sm:$0xff] %vm1183_vm9, %v1110_v24  ;;  %v3056_v36 = vsel %vm3030_vm13, %v2969_v35, 0 }
 0x163   :  { %1593 = vst.msk [vmem:[#allocation3 + $0x48] sm:$0xff] %vm1583_vm12, %v1506_v31  ;;  %989 = vrot.lane.b32.xlu1 %v449_v2, %s10067_s20  ;;  %856 = vrot.lane.b32.xlu0 %v10708_v48, %s10064_s17  ;;  %v11091_v26 = vand.u32 4294901760, %v3056_v36 }
 0x165   :  { %v1241_v41 = vpop.permute.xlu1 %1240  ;;  %v1239_v51 = vpop.permute.xlu0 %1238  ;;  %v11096_v44 = vsub.f32 %v3056_v36, %v11091_v26 }
 0x166   :  { %1326 = vst.msk [vmem:[#allocation3 + $0x58] sm:$0xff] %vm1314_vm10, %v1241_v41  ;;  %1325 = vst.msk [vmem:[#allocation3 + $0x50] sm:$0xff] %vm1314_vm10, %v1239_v51 }
 0x167   :  { %1519 = vrot.lane.b32.xlu1 %v659_v40, %s10071_s12  ;;  %1387 = vrot.lane.b32.xlu0 %v451_v27, %s10070_s7  ;;  %v14972_v48 = vand.u32 4294901760, %v11096_v44  ;;  %v11150_v22 = vld [vmem:[#allocation2 + $0x168] sm:$0xff] }
 0x168   :  { %9003 = vmatprep.mubr.f32.mxu0 %v11096_v44  ;;  %346 = vst.msk [vmem:[#allocation3 + $0xf0] sm:$0xff] %vm23_vm0, %v11150_v22 }
 0x169   :  { %v1376_v58 = vpop.permute.xlu1 %1375  ;;  %v1374_v28 = vpop.permute.xlu0 %1373  ;;  %v3380_v3 = vsub.f32 %v11096_v44, %v14972_v48  ;;  %v455_v48 = vrot.slane %v297_v0, 1 }
 0x16a   :  { %v2970_v9 = vld [vmem:[#allocation3 + $0x48] sm:$0xff]  ;;  %1461 = vst.msk [vmem:[#allocation3 + $0x58] sm:$0xff] %vm1449_vm11, %v1376_v58  ;;  %1460 = vst.msk [vmem:[#allocation3 + $0x50] sm:$0xff] %vm1449_vm11, %v1374_v28 }
 0x16b   :  { %v3059_v15 = vsel %vm3030_vm13, %v2970_v9, 0  ;;  %991 = vrot.lane.b32.xlu1 %v451_v27, %s10067_s20  ;;  %517 = vrot.lane.b32.xlu0 %v449_v2, %s10066_s19  ;;  %v3381_v23 = vand.u32 4294901760, %v3380_v3  ;;  %v162_v28 = vld [vmem:[%s14960_s0 + $0xe8] sm:$0xff] }
 0x16c   :  { %v11112_v24 = vand.u32 4294901760, %v3059_v15  ;;  %227 = vst.msk [vmem:[#allocation2 + $0x171] sm:$0xff] %vm23_vm0, %v162_v28 }
 0x16d   :  { %v1510_v31 = vpop.permute.xlu1 %1509  ;;  %v1508_v35 = vpop.permute.xlu0 %1507  ;;  %8791 = vmatprep.mubr.f32.mxu1 %v3381_v23 }
 0x16e   :  { %v11116_v36 = vsub.f32 %v3059_v15, %v11112_v24  ;;  %1595 = vst.msk [vmem:[#allocation3 + $0x58] sm:$0xff] %vm1583_vm12, %v1510_v31  ;;  %1594 = vst.msk [vmem:[#allocation3 + $0x50] sm:$0xff] %vm1583_vm12, %v1508_v35 }
 0x16f   :  { %1521 = vrot.lane.b32.xlu1 %v661_v11, %s10071_s12  ;;  %1123 = vrot.lane.b32.xlu0 %v659_v40, %s10068_s23 }
 0x170   :  { %v14971_v2 = vand.u32 4294901760, %v11116_v36  ;;  %9004 = vmatmul.mubr.f32.gmra.mrb[8].mxu0 %v11116_v36 }
 0x171   :  { %v504_v41 = vpop.permute.xlu1 %503  ;;  %v502_v51 = vpop.permute.xlu0 %501 }
 0x172   :  { %v3390_v55 = vsub.f32 %v11116_v36, %v14971_v2  ;;  %587 = vst.msk [vmem:[#allocation3 + $0x68] sm:$0xff] %vm573_vm5, %v504_v41  ;;  %586 = vst.msk [vmem:[#allocation3 + $0x60] sm:$0xff] %vm573_vm5, %v502_v51  ;;  %v452_v41 = vrot.slane %v10806_v29, 1  ;;  %v453_v51 = vrot.slane %v10823_v56, 1  ;;  %v663_v2 = vrot.slane %v10823_v56, 2 }
 0x173   :  { %727 = vrot.lane.b32.xlu1 %v659_v40, %s10065_s18  ;;  %519 = vrot.lane.b32.xlu0 %v451_v27, %s10066_s19 }
 0x174   :  { %v3391_v58 = vand.u32 4294901760, %v3390_v55 }
 0x175   :  { %v714_v3 = vpop.permute.xlu1 %713  ;;  %v712_v9 = vpop.permute.xlu0 %711  ;;  %v2971_v15 = vld [vmem:[#allocation3 + $0x50] sm:$0xff]  ;;  %v2972_v23 = vld [vmem:[#allocation3 + $0x58] sm:$0xff] }
 0x176   :  { %8792 = vmatmul.mubr.f32.gmra.mrb[8].mxu1 %v3391_v58  ;;  %797 = vst.msk [vmem:[#allocation3 + $0x68] sm:$0xff] %vm783_vm6, %v714_v3  ;;  %796 = vst.msk [vmem:[#allocation3 + $0x60] sm:$0xff] %vm783_vm6, %v712_v9  ;;  %v3062_v40 = vsel %vm3030_vm13, %v2971_v15, 0  ;;  %v3065_v27 = vsel %vm3030_vm13, %v2972_v23, 0  ;;  %v454_v23 = vsel %vm396_vm3, %v452_v41, %v453_v51 }
 0x177   :  { %1254 = vrot.lane.b32.xlu1 %v10806_v29, %s10069_s26  ;;  %1125 = vrot.lane.b32.xlu0 %v661_v11, %s10068_s23  ;;  %v11146_v31 = vand.u32 4294901760, %v3062_v40  ;;  %v11148_v35 = vand.u32 4294901760, %v3065_v27 }
 0x179   :  { %v845_v55 = vpop.permute.xlu1 %844  ;;  %v843_v58 = vpop.permute.xlu0 %842  ;;  %v11157_v28 = vsub.f32 %v3062_v40, %v11146_v31  ;;  %v11160_v3 = vsub.f32 %v3065_v27, %v11148_v35  ;;  %v11171_v40 = vld [vmem:[#allocation2 + $0x170] sm:$0xff] }
 0x17a   :  { %928 = vst.msk [vmem:[#allocation3 + $0x68] sm:$0xff] %vm914_vm7, %v845_v55  ;;  %927 = vst.msk [vmem:[#allocation3 + $0x60] sm:$0xff] %vm914_vm7, %v843_v58 }
 0x17b   :  { %858 = vrot.lane.b32.xlu1 %v10806_v29, %s10064_s17  ;;  %729 = vrot.lane.b32.xlu0 %v661_v11, %s10065_s18  ;;  %v14969_v9 = vand.u32 4294901760, %v11157_v28  ;;  %v14970_v15 = vand.u32 4294901760, %v11160_v3  ;;  %347 = vst.msk [vmem:[#allocation3 + $0xf8] sm:$0xff] %vm23_vm0, %v11171_v40  ;;  %v15104_v53 = vand.u32 4294901760, %v11157_v28  ;;  %v15105_v20 = vand.u32 4294901760, %v11160_v3 }
 0x17c   :  { %9006 = vmatprep.mubr.f32.mxu0 %v11157_v28 }
 0x17d   :  { %9007 = vmatmul.mubr.f32.gmra.mrb[10].mxu0 %v11160_v3  ;;  %v506_v27 = vpop.permute.xlu1 %505  ;;  %v978_v55 = vpop.permute.xlu0 %977  ;;  %v3400_v58 = vsub.f32 %v11157_v28, %v14969_v9  ;;  %v3410_v11 = vsub.f32 %v11160_v3, %v14970_v15  ;;  %v662_v15 = vrot.slane %v10806_v29, 2  ;;  %v665_v29 = vrot.slane %v297_v0, 2 }
 0x17e   :  { %588 = vst.msk [vmem:[#allocation3 + $0x70] sm:$0xff] %vm573_vm5, %v506_v27  ;;  %9097 = vmatprep.mubr.f32.mxu0 %v3299_v50  ;;  %v456_v50 = vsel %vm396_vm3, %v453_v51, %v455_v48  ;;  %v457_v48 = vrot.slane %v10897_v39, 1 }
 0x17f   :  { %1062 = vst.msk [vmem:[#allocation3 + $0x60] sm:$0xff] %vm1049_vm8, %v978_v55  ;;  %1389 = vrot.lane.b32.xlu1 %v454_v23, %s10070_s7  ;;  %1256 = vrot.lane.b32.xlu0 %v10823_v56, %s10069_s26  ;;  %v3401_v41 = vand.u32 4294901760, %v3400_v58  ;;  %v3411_v9 = vand.u32 4294901760, %v3410_v11  ;;  %v664_v5 = vsel %vm606_vm2, %v662_v15, %v663_v2  ;;  %v300_v15 = vld [vmem:[#allocation2 + $0x130] sm:$0x3]  ;;  %v668_v58 = vrot.slane %v10910_v54, 2 }
 0x180   :  { %v460_v11 = vrot.slane %v300_v15, 1 }
 0x181   :  { %9098 = vmatmul.mubr.f32.vlgmr.msra.gmra.mrb[0].mxu0 %v3309_v32  ;;  %v1112_v27 = vpop.permute.xlu1 %1111  ;;  %v980_v55 = vpop.permute.xlu0 %979  ;;  %8794 = vmatprep.mubr.f32.mxu1 %v3401_v41 }
 0x182   :  { %1196 = vst.msk [vmem:[#allocation3 + $0x60] sm:$0xff] %vm1183_vm9, %v1112_v27  ;;  %9100 = vmatprep.mubr.f32.mxu0 %v3319_v16  ;;  %8795 = vmatmul.mubr.f32.gmra.mrb[10].mxu1 %v3411_v9  ;;  %v666_v16 = vsel %vm606_vm2, %v663_v2, %v665_v29 }
 0x183   :  { %1063 = vst.msk [vmem:[#allocation3 + $0x68] sm:$0xff] %vm1049_vm8, %v980_v55  ;;  %993 = vrot.lane.b32.xlu1 %v454_v23, %s10067_s20  ;;  %860 = vrot.lane.b32.xlu0 %v10823_v56, %s10064_s17 }
 0x185   :  { %9101 = vmatmul.mubr.f32.gmra.mrb[2].mxu0 %v3329_v34  ;;  %v716_v25 = vpop.permute.xlu1 %715  ;;  %v508_v32 = vpop.permute.xlu0 %507  ;;  %v15102_v34 = vand.u32 4294901760, %v11096_v44 }
 0x186   :  { %798 = vst.msk [vmem:[#allocation3 + $0x70] sm:$0xff] %vm783_vm6, %v716_v25  ;;  %9103 = vmatprep.mubr.f32.mxu0 %v3339_v42  ;;  %v15103_v42 = vand.u32 4294901760, %v11116_v36  ;;  %v458_v36 = vrot.slane %v10910_v54, 1 }
 0x187   :  { %589 = vst.msk [vmem:[#allocation3 + $0x78] sm:$0xff] %vm573_vm5, %v508_v32  ;;  %1523 = vrot.lane.b32.xlu1 %v664_v5, %s10071_s12  ;;  %1391 = vrot.lane.b32.xlu0 %v456_v50, %s10070_s7 }
 0x188   :  { %v459_v28 = vsel %vm396_vm3, %v457_v48, %v458_v36  ;;  %v461_v25 = vsel %vm396_vm3, %v458_v36, %v460_v11 }
 0x189   :  { %9104 = vmatmul.mubr.f32.gmra.mrb[4].mxu0 %v3349_v49  ;;  %v1243_v56 = vpop.permute.xlu1 %1242  ;;  %v1114_v46 = vpop.permute.xlu0 %1113 }
 0x18a   :  { %1327 = vst.msk [vmem:[#allocation3 + $0x60] sm:$0xff] %vm1314_vm10, %v1243_v56  ;;  %9106 = vmatprep.mubr.f32.mxu0 %v3359_v4  ;;  %v164_v4 = vld [vmem:[%s14960_s0 + $0xf8] sm:$0xff] }
 0x18b   :  { %1197 = vst.msk [vmem:[#allocation3 + $0x68] sm:$0xff] %vm1183_vm9, %v1114_v46  ;;  %995 = vrot.lane.b32.xlu1 %v456_v50, %s10067_s20  ;;  %521 = vrot.lane.b32.xlu0 %v454_v23, %s10066_s19  ;;  %v667_v23 = vrot.slane %v10897_v39, 2  ;;  %v670_v46 = vrot.slane %v300_v15, 2 }
 0x18c   :  { %229 = vst.msk [vmem:[#allocation2 + $0x189] sm:$0xff] %vm23_vm0, %v164_v4  ;;  %v11292_v4 = vld [vmem:[#allocation2 + $0x1b8] sm:$0xff] }
 0x18d   :  { %9107 = vmatmul.mubr.f32.gmra.mrb[6].mxu0 %v3369_v38  ;;  %v847_v0 = vpop.permute.xlu1 %846  ;;  %v718_v33 = vpop.permute.xlu0 %717  ;;  %v14974_v36 = vrot.slane %v11292_v4, 1  ;;  %1672 = vst.msk [vmem:[#allocation3 + $0x108] sm:$0xff] %vm23_vm0, %v11292_v4 }
 0x18e   :  { %929 = vst.msk [vmem:[#allocation3 + $0x70] sm:$0xff] %vm914_vm7, %v847_v0  ;;  %9109 = vmatprep.mubr.f32.mxu0 %v15102_v34 }
 0x18f   :  { %799 = vst.msk [vmem:[#allocation3 + $0x78] sm:$0xff] %vm783_vm6, %v718_v33  ;;  %1525 = vrot.lane.b32.xlu1 %v666_v16, %s10071_s12  ;;  %1127 = vrot.lane.b32.xlu0 %v664_v5, %s10068_s23 }
 0x191   :  { %9110 = vmatmul.mubr.f32.gmra.mrb[8].mxu0 %v15103_v42  ;;  %v1378_v45 = vpop.permute.xlu1 %1377  ;;  %v1245_v49 = vpop.permute.xlu0 %1244 }
 0x192   :  { %1462 = vst.msk [vmem:[#allocation3 + $0x60] sm:$0xff] %vm1449_vm11, %v1378_v45  ;;  %9112 = vmatprep.mubr.f32.mxu0 %v15104_v53  ;;  %v1617_v53 = vld [vmem:[#allocation2 + $0x1b0] sm:$0xff] }
 0x193   :  { %1328 = vst.msk [vmem:[#allocation3 + $0x68] sm:$0xff] %vm1314_vm10, %v1245_v49  ;;  %731 = vrot.lane.b32.xlu1 %v664_v5, %s10065_s18  ;;  %523 = vrot.lane.b32.xlu0 %v456_v50, %s10066_s19  ;;  %v671_v49 = vsel %vm606_vm2, %v668_v58, %v670_v46  ;;  %v1751_v48 = vrot.slane %v1617_v53, 1  ;;  %v1959_v11 = vrot.slane %v1617_v53, 2 }
 0x194   :  { %1671 = vst.msk [vmem:[#allocation3 + $0x100] sm:$0xff] %vm23_vm0, %v1617_v53 }
 0x195   :  { %9113 = vmatmul.mubr.f32.gmra.mrb[10].mxu0 %v15105_v20  ;;  %v982_v38 = vpop.permute.xlu1 %981  ;;  %v849_v44 = vpop.permute.xlu0 %848 }
 0x196   :  { %1064 = vst.msk [vmem:[#allocation3 + $0x70] sm:$0xff] %vm1049_vm8, %v982_v38 }
 0x197   :  { %930 = vst.msk [vmem:[#allocation3 + $0x78] sm:$0xff] %vm914_vm7, %v849_v44  ;;  %1258 = vrot.lane.b32.xlu1 %v10897_v39, %s10069_s26  ;;  %1129 = vrot.lane.b32.xlu0 %v666_v16, %s10068_s23 }
 0x199   :  { %v1512_v2 = vpop.permute.xlu1 %1511  ;;  %v1380_v51 = vpop.permute.xlu0 %1379 }
 0x19a   :  { %1596 = vst.msk [vmem:[#allocation3 + $0x60] sm:$0xff] %vm1583_vm12, %v1512_v2 }
 0x19b   :  { %1463 = vst.msk [vmem:[#allocation3 + $0x68] sm:$0xff] %vm1449_vm11, %v1380_v51  ;;  %862 = vrot.lane.b32.xlu1 %v10897_v39, %s10064_s17  ;;  %733 = vrot.lane.b32.xlu0 %v666_v16, %s10065_s18  ;;  %v669_v39 = vsel %vm606_vm2, %v667_v23, %v668_v58  ;;  %v11309_v51 = vsel %vm396_vm3, %v1751_v48, %v14974_v36 }
 0x19d   :  { %v984_v3 = vpop.permute.xlu1 %983  ;;  %v510_v9 = vpop.permute.xlu0 %509 }
 0x19e   :  { %1065 = vst.msk [vmem:[#allocation3 + $0x78] sm:$0xff] %vm1049_vm8, %v984_v3 }
 0x19f   :  { %590 = vst.msk [vmem:[#allocation3 + $0x80] sm:$0xff] %vm573_vm5, %v510_v9  ;;  %1393 = vrot.lane.b32.xlu1 %v459_v28, %s10070_s7  ;;  %1260 = vrot.lane.b32.xlu0 %v10910_v54, %s10069_s26 }
 0x1a1   :  { %v1514_v41 = vpop.permute.xlu1 %1513  ;;  %v1116_v27 = vpop.permute.xlu0 %1115  ;;  %v2973_v55 = vld [vmem:[#allocation3 + $0x60] sm:$0xff] }
 0x1a2   :  { %1597 = vst.msk [vmem:[#allocation3 + $0x68] sm:$0xff] %vm1583_vm12, %v1514_v41  ;;  %v3068_v5 = vsel %vm3030_vm13, %v2973_v55, 0  ;;  %v14973_v41 = vrot.slane %v11292_v4, 2  ;;  %v165_v55 = vld [vmem:[%s14960_s0 + $0x100] sm:$0xff] }
 0x1a3   :  { %1198 = vst.msk [vmem:[#allocation3 + $0x70] sm:$0xff] %vm1183_vm9, %v1116_v27  ;;  %997 = vrot.lane.b32.xlu1 %v459_v28, %s10067_s20  ;;  %864 = vrot.lane.b32.xlu0 %v10910_v54, %s10064_s17  ;;  %v11271_v50 = vand.u32 4294901760, %v3068_v5 }
 0x1a4   :  { %v11325_v27 = vsel %vm606_vm2, %v1959_v11, %v14973_v41  ;;  %230 = vst.msk [vmem:[#allocation2 + $0x1c9] sm:$0xff] %vm23_vm0, %v165_v55 }
 0x1a5   :  { %v720_v32 = vpop.permute.xlu1 %719  ;;  %v512_v29 = vpop.permute.xlu0 %511  ;;  %v11276_v56 = vsub.f32 %v3068_v5, %v11271_v50  ;;  %v462_v5 = vrot.slane %v10980_v6, 1 }
 0x1a6   :  { %800 = vst.msk [vmem:[#allocation3 + $0x80] sm:$0xff] %vm783_vm6, %v720_v32 }
 0x1a7   :  { %15106 = vst [vmem:[#allocation4_spill] sm:$0xff] %v11276_v56  ;;  %591 = vst.msk [vmem:[#allocation3 + $0x88] sm:$0xff] %vm573_vm5, %v512_v29  ;;  %1527 = vrot.lane.b32.xlu1 %v669_v39, %s10071_s12  ;;  %1395 = vrot.lane.b32.xlu0 %v461_v25, %s10070_s7  ;;  %v3419_v54 = vand.u32 4294901760, %v11276_v56 }
 0x1a9   :  { %v1247_v16 = vpop.permute.xlu1 %1246  ;;  %v1118_v0 = vpop.permute.xlu0 %1117  ;;  %9115 = vmatprep.mubr.f32.mxu0 %v3419_v54  ;;  %v3420_v33 = vsub.f32 %v11276_v56, %v3419_v54  ;;  %v2974_v34 = vld [vmem:[#allocation3 + $0x68] sm:$0xff] }
 0x1aa   :  { %1329 = vst.msk [vmem:[#allocation3 + $0x70] sm:$0xff] %vm1314_vm10, %v1247_v16  ;;  %v3071_v19 = vsel %vm3030_vm13, %v2974_v34, 0  ;;  %v166_v54 = vld [vmem:[%s14960_s0 + $0x108] sm:$0xff]  ;;  %v672_v34 = vrot.slane %v10980_v6, 2 }
 0x1ab   :  { %1199 = vst.msk [vmem:[#allocation3 + $0x78] sm:$0xff] %vm1183_vm9, %v1118_v0  ;;  %999 = vrot.lane.b32.xlu1 %v461_v25, %s10067_s20  ;;  %525 = vrot.lane.b32.xlu0 %v459_v28, %s10066_s19  ;;  %v3421_v42 = vand.u32 4294901760, %v3420_v33  ;;  %v11289_v45 = vand.u32 4294901760, %v3071_v19  ;;  %v303_v0 = vld [vmem:[#allocation2 + $0x148] sm:$0x3] }
 0x1ac   :  { %231 = vst.msk [vmem:[#allocation2 + $0x1d1] sm:$0xff] %vm23_vm0, %v166_v54  ;;  %v11348_v33 = vld [vmem:[#allocation2 + $0x1c8] sm:$0xff] }
 0x1ad   :  { %v851_v20 = vpop.permute.xlu1 %850  ;;  %v722_v38 = vpop.permute.xlu0 %721  ;;  %8797 = vmatprep.mubr.f32.mxu1 %v3421_v42  ;;  %v11295_v44 = vsub.f32 %v3071_v19, %v11289_v45  ;;  %v673_v19 = vrot.slane %v10992_v17, 2  ;;  %v465_v42 = vrot.slane %v303_v0, 1  ;;  %1673 = vst.msk [vmem:[#allocation3 + $0x110] sm:$0xff] %vm23_vm0, %v11348_v33 }
 0x1ae   :  { %931 = vst.msk [vmem:[#allocation3 + $0x80] sm:$0xff] %vm914_vm7, %v851_v20 }
 0x1af   :  { %15107 = vst [vmem:[#allocation5_spill] sm:$0xff] %v11295_v44  ;;  %801 = vst.msk [vmem:[#allocation3 + $0x88] sm:$0xff] %vm783_vm6, %v722_v38  ;;  %1529 = vrot.lane.b32.xlu1 %v671_v49, %s10071_s12  ;;  %1131 = vrot.lane.b32.xlu0 %v669_v39, %s10068_s23  ;;  %v3429_v2 = vand.u32 4294901760, %v11295_v44  ;;  %v674_v48 = vsel %vm606_vm2, %v672_v34, %v673_v19  ;;  %v167_v34 = vld [vmem:[%s14960_s0 + $0x110] sm:$0xff] }
 0x1b0   :  { %232 = vst.msk [vmem:[#allocation2 + $0x1e1] sm:$0xff] %vm23_vm0, %v167_v34 }
 0x1b1   :  { %v1382_v28 = vpop.permute.xlu1 %1381  ;;  %v1249_v3 = vpop.permute.xlu0 %1248  ;;  %9116 = vmatmul.mubr.f32.gmra.mrb[12].mxu0 %v3429_v2  ;;  %v3430_v9 = vsub.f32 %v11295_v44, %v3429_v2 }
 0x1b2   :  { %1464 = vst.msk [vmem:[#allocation3 + $0x70] sm:$0xff] %vm1449_vm11, %v1382_v28 }
 0x1b3   :  { %1330 = vst.msk [vmem:[#allocation3 + $0x78] sm:$0xff] %vm1314_vm10, %v1249_v3  ;;  %735 = vrot.lane.b32.xlu1 %v669_v39, %s10065_s18  ;;  %527 = vrot.lane.b32.xlu0 %v461_v25, %s10066_s19  ;;  %v3431_v15 = vand.u32 4294901760, %v3430_v9  ;;  %v463_v39 = vrot.slane %v10992_v17, 1  ;;  %v11364_v28 = vld [vmem:[#allocation2 + $0x1d0] sm:$0xff] }
 0x1b4   :  { %1674 = vst.msk [vmem:[#allocation3 + $0x118] sm:$0xff] %vm23_vm0, %v11364_v28 }
 0x1b5   :  { %v986_v23 = vpop.permute.xlu1 %985  ;;  %v853_v58 = vpop.permute.xlu0 %852  ;;  %8798 = vmatmul.mubr.f32.gmra.mrb[12].mxu1 %v3431_v15  ;;  %v464_v29 = vsel %vm396_vm3, %v462_v5, %v463_v39  ;;  %v466_v2 = vsel %vm396_vm3, %v463_v39, %v465_v42 }
 0x1b6   :  { %1066 = vst.msk [vmem:[#allocation3 + $0x80] sm:$0xff] %vm1049_vm8, %v986_v23  ;;  %v675_v23 = vrot.slane %v303_v0, 2 }
 0x1b7   :  { %932 = vst.msk [vmem:[#allocation3 + $0x88] sm:$0xff] %vm914_vm7, %v853_v58  ;;  %1262 = vrot.lane.b32.xlu1 %v10980_v6, %s10069_s26  ;;  %1133 = vrot.lane.b32.xlu0 %v671_v49, %s10068_s23 }
 0x1b8   :  { %v676_v54 = vsel %vm606_vm2, %v673_v19, %v675_v23 }
 0x1b9   :  { %v1516_v25 = vpop.permute.xlu1 %1515  ;;  %v1384_v32 = vpop.permute.xlu0 %1383 }
 0x1ba   :  { %1598 = vst.msk [vmem:[#allocation3 + $0x70] sm:$0xff] %vm1583_vm12, %v1516_v25 }
 0x1bb   :  { %1465 = vst.msk [vmem:[#allocation3 + $0x78] sm:$0xff] %vm1449_vm11, %v1384_v32  ;;  %866 = vrot.lane.b32.xlu1 %v10980_v6, %s10064_s17  ;;  %737 = vrot.lane.b32.xlu0 %v671_v49, %s10065_s18 }
 0x1bd   :  { %v988_v46 = vpop.permute.xlu1 %987  ;;  %v514_v16 = vpop.permute.xlu0 %513 }
 0x1be   :  { %1067 = vst.msk [vmem:[#allocation3 + $0x88] sm:$0xff] %vm1049_vm8, %v988_v46 }
 0x1bf   :  { %592 = vst.msk [vmem:[#allocation3 + $0x90] sm:$0xff] %vm573_vm5, %v514_v16  ;;  %1397 = vrot.lane.b32.xlu1 %v464_v29, %s10070_s7  ;;  %1264 = vrot.lane.b32.xlu0 %v10992_v17, %s10069_s26 }
 0x1c1   :  { %v1518_v49 = vpop.permute.xlu1 %1517  ;;  %v1120_v53 = vpop.permute.xlu0 %1119  ;;  %v2975_v20 = vld [vmem:[#allocation3 + $0x70] sm:$0xff] }
 0x1c2   :  { %1599 = vst.msk [vmem:[#allocation3 + $0x78] sm:$0xff] %vm1583_vm12, %v1518_v49  ;;  %v3074_v38 = vsel %vm3030_vm13, %v2975_v20, 0  ;;  %v168_v20 = vld [vmem:[%s14960_s0 + $0x118] sm:$0xff] }
 0x1c3   :  { %1200 = vst.msk [vmem:[#allocation3 + $0x80] sm:$0xff] %vm1183_vm9, %v1120_v53  ;;  %1001 = vrot.lane.b32.xlu1 %v464_v29, %s10067_s20  ;;  %868 = vrot.lane.b32.xlu0 %v10992_v17, %s10064_s17  ;;  %v11360_v6 = vand.u32 4294901760, %v3074_v38 }
 0x1c4   :  { %233 = vst.msk [vmem:[#allocation2 + $0x1e9] sm:$0xff] %vm23_vm0, %v168_v20 }
 0x1c5   :  { %v724_v3 = vpop.permute.xlu1 %723  ;;  %v516_v9 = vpop.permute.xlu0 %515  ;;  %v11367_v15 = vsub.f32 %v3074_v38, %v11360_v6 }
 0x1c6   :  { %802 = vst.msk [vmem:[#allocation3 + $0x90] sm:$0xff] %vm783_vm6, %v724_v3 }
 0x1c7   :  { %15108 = vst [vmem:[#allocation6_spill] sm:$0xff] %v11367_v15  ;;  %593 = vst.msk [vmem:[#allocation3 + $0x98] sm:$0xff] %vm573_vm5, %v516_v9  ;;  %1531 = vrot.lane.b32.xlu1 %v674_v48, %s10071_s12  ;;  %1399 = vrot.lane.b32.xlu0 %v466_v2, %s10070_s7  ;;  %v3439_v17 = vand.u32 4294901760, %v11367_v15  ;;  %v468_v9 = vrot.slane %v11074_v52, 1 }
 0x1c9   :  { %v1251_v58 = vpop.permute.xlu1 %1250  ;;  %v1122_v11 = vpop.permute.xlu0 %1121  ;;  %9118 = vmatprep.mubr.f32.mxu0 %v3439_v17  ;;  %v3440_v55 = vsub.f32 %v11367_v15, %v3439_v17  ;;  %v2976_v5 = vld [vmem:[#allocation3 + $0x78] sm:$0xff] }
 0x1ca   :  { %1331 = vst.msk [vmem:[#allocation3 + $0x80] sm:$0xff] %vm1314_vm10, %v1251_v58  ;;  %v3077_v39 = vsel %vm3030_vm13, %v2976_v5, 0 }
 0x1cb   :  { %1201 = vst.msk [vmem:[#allocation3 + $0x88] sm:$0xff] %vm1183_vm9, %v1122_v11  ;;  %1003 = vrot.lane.b32.xlu1 %v466_v2, %s10067_s20  ;;  %529 = vrot.lane.b32.xlu0 %v464_v29, %s10066_s19  ;;  %v3441_v25 = vand.u32 4294901760, %v3440_v55  ;;  %v11382_v32 = vand.u32 4294901760, %v3077_v39  ;;  %v11423_v11 = vld [vmem:[#allocation2 + $0x1e8] sm:$0xff] }
 0x1cc   :  { %1676 = vst.msk [vmem:[#allocation3 + $0x128] sm:$0xff] %vm23_vm0, %v11423_v11 }
 0x1cd   :  { %v855_v46 = vpop.permute.xlu1 %854  ;;  %v726_v16 = vpop.permute.xlu0 %725  ;;  %8800 = vmatprep.mubr.f32.mxu1 %v3441_v25  ;;  %v11386_v0 = vsub.f32 %v3077_v39, %v11382_v32  ;;  %v306_v39 = vld [vmem:[#allocation2 + $0x160] sm:$0x3]  ;;  %v677_v25 = vrot.slane %v11062_v57, 2 }
 0x1ce   :  { %933 = vst.msk [vmem:[#allocation3 + $0x90] sm:$0xff] %vm914_vm7, %v855_v46  ;;  %v470_v46 = vrot.slane %v306_v39, 1 }
 0x1cf   :  { %15109 = vst [vmem:[#allocation7_spill] sm:$0xff] %v11386_v0  ;;  %803 = vst.msk [vmem:[#allocation3 + $0x98] sm:$0xff] %vm783_vm6, %v726_v16  ;;  %1533 = vrot.lane.b32.xlu1 %v676_v54, %s10071_s12  ;;  %1135 = vrot.lane.b32.xlu0 %v674_v48, %s10068_s23  ;;  %v3449_v29 = vand.u32 4294901760, %v11386_v0 }
 0x1d1   :  { %v1386_v19 = vpop.permute.xlu1 %1385  ;;  %v1253_v42 = vpop.permute.xlu0 %1252  ;;  %9119 = vmatmul.mubr.f32.gmra.mrb[14].mxu0 %v3449_v29  ;;  %v3450_v49 = vsub.f32 %v11386_v0, %v3449_v29 }
 0x1d2   :  { %1466 = vst.msk [vmem:[#allocation3 + $0x80] sm:$0xff] %vm1449_vm11, %v1386_v19 }
 0x1d3   :  { %1332 = vst.msk [vmem:[#allocation3 + $0x88] sm:$0xff] %vm1314_vm10, %v1253_v42  ;;  %739 = vrot.lane.b32.xlu1 %v674_v48, %s10065_s18  ;;  %531 = vrot.lane.b32.xlu0 %v466_v2, %s10066_s19  ;;  %v3451_v53 = vand.u32 4294901760, %v3450_v49  ;;  %v11411_v48 = vld [vmem:[#allocation2 + $0x1e0] sm:$0xff]  ;;  %v467_v2 = vrot.slane %v11062_v57, 1  ;;  %v471_v49 = vsel %vm396_vm3, %v468_v9, %v470_v46 }
 0x1d4   :  { %1675 = vst.msk [vmem:[#allocation3 + $0x120] sm:$0xff] %vm23_vm0, %v11411_v48 }
 0x1d5   :  { %v990_v38 = vpop.permute.xlu1 %989  ;;  %v857_v3 = vpop.permute.xlu0 %856  ;;  %8801 = vmatmul.mubr.f32.gmra.mrb[14].mxu1 %v3451_v53  ;;  %v469_v58 = vsel %vm396_vm3, %v467_v2, %v468_v9 }
 0x1d6   :  { %1068 = vst.msk [vmem:[#allocation3 + $0x90] sm:$0xff] %vm1049_vm8, %v990_v38 }
 0x1d7   :  { %934 = vst.msk [vmem:[#allocation3 + $0x98] sm:$0xff] %vm914_vm7, %v857_v3  ;;  %1266 = vrot.lane.b32.xlu1 %v11062_v57, %s10069_s26  ;;  %1137 = vrot.lane.b32.xlu0 %v676_v54, %s10068_s23  ;;  %v680_v3 = vrot.slane %v306_v39, 2 }
 0x1d9   :  { %v1520_v17 = vpop.permute.xlu1 %1519  ;;  %v1388_v23 = vpop.permute.xlu0 %1387 }
 0x1da   :  { %1600 = vst.msk [vmem:[#allocation3 + $0x80] sm:$0xff] %vm1583_vm12, %v1520_v17 }
 0x1db   :  { %1467 = vst.msk [vmem:[#allocation3 + $0x88] sm:$0xff] %vm1449_vm11, %v1388_v23  ;;  %870 = vrot.lane.b32.xlu1 %v11062_v57, %s10064_s17  ;;  %741 = vrot.lane.b32.xlu0 %v676_v54, %s10065_s18  ;;  %v678_v54 = vrot.slane %v11074_v52, 2 }
 0x1dd   :  { %v992_v55 = vpop.permute.xlu1 %991  ;;  %v518_v5 = vpop.permute.xlu0 %517  ;;  %v679_v57 = vsel %vm606_vm2, %v677_v25, %v678_v54  ;;  %v681_v39 = vsel %vm606_vm2, %v678_v54, %v680_v3  ;;  %v169_v54 = vld [vmem:[%s14960_s0 + $0x120] sm:$0xff] }
 0x1de   :  { %1069 = vst.msk [vmem:[#allocation3 + $0x98] sm:$0xff] %vm1049_vm8, %v992_v55 }
 0x1df   :  { %594 = vst.msk [vmem:[#allocation3 + $0xa0] sm:$0xff] %vm573_vm5, %v518_v5  ;;  %1401 = vrot.lane.b32.xlu1 %v469_v58, %s10070_s7  ;;  %1268 = vrot.lane.b32.xlu0 %v11074_v52, %s10069_s26 }
 0x1e0   :  { %234 = vst.msk [vmem:[#allocation2 + $0x1f9] sm:$0xff] %vm23_vm0, %v169_v54  ;;  %v683_v54 = vrot.slane %v11171_v40, 2 }
 0x1e1   :  { %v1522_v16 = vpop.permute.xlu1 %1521  ;;  %v1124_v29 = vpop.permute.xlu0 %1123  ;;  %v2977_v34 = vld [vmem:[#allocation3 + $0x80] sm:$0xff] }
 0x1e2   :  { %1601 = vst.msk [vmem:[#allocation3 + $0x88] sm:$0xff] %vm1583_vm12, %v1522_v16  ;;  %v3080_v19 = vsel %vm3030_vm13, %v2977_v34, 0 }
 0x1e3   :  { %1202 = vst.msk [vmem:[#allocation3 + $0x90] sm:$0xff] %vm1183_vm9, %v1124_v29  ;;  %1005 = vrot.lane.b32.xlu1 %v469_v58, %s10067_s20  ;;  %872 = vrot.lane.b32.xlu0 %v11074_v52, %s10064_s17  ;;  %v11440_v42 = vand.u32 4294901760, %v3080_v19 }
 0x1e5   :  { %v728_v53 = vpop.permute.xlu1 %727  ;;  %v520_v20 = vpop.permute.xlu0 %519  ;;  %v11445_v38 = vsub.f32 %v3080_v19, %v11440_v42 }
 0x1e6   :  { %804 = vst.msk [vmem:[#allocation3 + $0xa0] sm:$0xff] %vm783_vm6, %v728_v53 }
 0x1e7   :  { %15110 = vst [vmem:[#allocation8_spill] sm:$0xff] %v11445_v38  ;;  %595 = vst.msk [vmem:[#allocation3 + $0xa8] sm:$0xff] %vm573_vm5, %v520_v20  ;;  %1535 = vrot.lane.b32.xlu1 %v679_v57, %s10071_s12  ;;  %1403 = vrot.lane.b32.xlu0 %v471_v49, %s10070_s7  ;;  %v3459_v52 = vand.u32 4294901760, %v11445_v38 }
 0x1e9   :  { %v1255_v2 = vpop.permute.xlu1 %1254  ;;  %v1126_v17 = vpop.permute.xlu0 %1125  ;;  %9121 = vmatprep.mubr.f32.mxu0 %v3459_v52  ;;  %v3460_v9 = vsub.f32 %v11445_v38, %v3459_v52  ;;  %v2978_v23 = vld [vmem:[#allocation3 + $0x88] sm:$0xff] }
 0x1ea   :  { %1333 = vst.msk [vmem:[#allocation3 + $0x90] sm:$0xff] %vm1314_vm10, %v1255_v2  ;;  %v3083_v55 = vsel %vm3030_vm13, %v2978_v23, 0  ;;  %v170_v52 = vld [vmem:[%s14960_s0 + $0x128] sm:$0xff] }
 0x1eb   :  { %1203 = vst.msk [vmem:[#allocation3 + $0x98] sm:$0xff] %vm1183_vm9, %v1126_v17  ;;  %1007 = vrot.lane.b32.xlu1 %v471_v49, %s10067_s20  ;;  %533 = vrot.lane.b32.xlu0 %v469_v58, %s10066_s19  ;;  %v3461_v5 = vand.u32 4294901760, %v3460_v9  ;;  %v11458_v25 = vand.u32 4294901760, %v3083_v55  ;;  %v473_v17 = vrot.slane %v11171_v40, 1 }
 0x1ec   :  { %235 = vst.msk [vmem:[#allocation2 + $0x201] sm:$0xff] %vm23_vm0, %v170_v52 }
 0x1ed   :  { %v859_v46 = vpop.permute.xlu1 %858  ;;  %v730_v16 = vpop.permute.xlu0 %729  ;;  %8803 = vmatprep.mubr.f32.mxu1 %v3461_v5  ;;  %v11462_v29 = vsub.f32 %v3083_v55, %v11458_v25 }
 0x1ee   :  { %935 = vst.msk [vmem:[#allocation3 + $0xa0] sm:$0xff] %vm914_vm7, %v859_v46 }
 0x1ef   :  { %15111 = vst [vmem:[#allocation9_spill] sm:$0xff] %v11462_v29  ;;  %805 = vst.msk [vmem:[#allocation3 + $0xa8] sm:$0xff] %vm783_vm6, %v730_v16  ;;  %1537 = vrot.lane.b32.xlu1 %v681_v39, %s10071_s12  ;;  %1139 = vrot.lane.b32.xlu0 %v679_v57, %s10068_s23  ;;  %v3469_v58 = vand.u32 4294901760, %v11462_v29 }
 0x1f1   :  { %v1390_v34 = vpop.permute.xlu1 %1389  ;;  %v1257_v19 = vpop.permute.xlu0 %1256  ;;  %9122 = vmatmul.mubr.f32.gmra.mrb[16].mxu0 %v3469_v58  ;;  %v3470_v53 = vsub.f32 %v11462_v29, %v3469_v58  ;;  %v309_v58 = vld [vmem:[#allocation2 + $0x178] sm:$0x3] }
 0x1f2   :  { %1468 = vst.msk [vmem:[#allocation3 + $0x90] sm:$0xff] %vm1449_vm11, %v1390_v34  ;;  %v475_v34 = vrot.slane %v309_v58, 1  ;;  %v1622_v29 = vld [vmem:[#allocation2 + $0x1d8] sm:$0x3] }
 0x1f3   :  { %1334 = vst.msk [vmem:[#allocation3 + $0x98] sm:$0xff] %vm1314_vm10, %v1257_v19  ;;  %743 = vrot.lane.b32.xlu1 %v679_v57, %s10065_s18  ;;  %535 = vrot.lane.b32.xlu0 %v471_v49, %s10066_s19  ;;  %v3471_v20 = vand.u32 4294901760, %v3470_v53  ;;  %v11487_v57 = vld [vmem:[#allocation2 + $0x1f8] sm:$0xff]  ;;  %v472_v49 = vrot.slane %v11150_v22, 1  ;;  %v11499_v5 = vld [vmem:[#allocation2 + $0x200] sm:$0xff] }
 0x1f4   :  { %1677 = vst.msk [vmem:[#allocation3 + $0x130] sm:$0xff] %vm23_vm0, %v11487_v57  ;;  %1678 = vst.msk [vmem:[#allocation3 + $0x138] sm:$0xff] %vm23_vm0, %v11499_v5 }
 0x1f5   :  { %v994_v3 = vpop.permute.xlu1 %993  ;;  %v861_v2 = vpop.permute.xlu0 %860  ;;  %8804 = vmatmul.mubr.f32.gmra.mrb[16].mxu1 %v3471_v20  ;;  %v474_v55 = vsel %vm396_vm3, %v472_v49, %v473_v17 }
 0x1f6   :  { %1070 = vst.msk [vmem:[#allocation3 + $0xa0] sm:$0xff] %vm1049_vm8, %v994_v3 }
 0x1f7   :  { %936 = vst.msk [vmem:[#allocation3 + $0xa8] sm:$0xff] %vm914_vm7, %v861_v2  ;;  %1270 = vrot.lane.b32.xlu1 %v11150_v22, %s10069_s26  ;;  %1141 = vrot.lane.b32.xlu0 %v681_v39, %s10068_s23  ;;  %v476_v2 = vsel %vm396_vm3, %v473_v17, %v475_v34 }
 0x1f9   :  { %v1524_v9 = vpop.permute.xlu1 %1523  ;;  %v1392_v23 = vpop.permute.xlu0 %1391 }
 0x1fa   :  { %1602 = vst.msk [vmem:[#allocation3 + $0x90] sm:$0xff] %vm1583_vm12, %v1524_v9 }
 0x1fb   :  { %1469 = vst.msk [vmem:[#allocation3 + $0x98] sm:$0xff] %vm1449_vm11, %v1392_v23  ;;  %874 = vrot.lane.b32.xlu1 %v11150_v22, %s10064_s17  ;;  %745 = vrot.lane.b32.xlu0 %v681_v39, %s10065_s18  ;;  %v682_v39 = vrot.slane %v11150_v22, 2 }
 0x1fd   :  { %v996_v46 = vpop.permute.xlu1 %995  ;;  %v522_v16 = vpop.permute.xlu0 %521  ;;  %v684_v22 = vsel %vm606_vm2, %v682_v39, %v683_v54 }
 0x1fe   :  { %1071 = vst.msk [vmem:[#allocation3 + $0xa8] sm:$0xff] %vm1049_vm8, %v996_v46  ;;  %v685_v46 = vrot.slane %v309_v58, 2 }
 0x1ff   :  { %596 = vst.msk [vmem:[#allocation3 + $0xb0] sm:$0xff] %vm573_vm5, %v522_v16  ;;  %1405 = vrot.lane.b32.xlu1 %v474_v55, %s10070_s7  ;;  %1272 = vrot.lane.b32.xlu0 %v11171_v40, %s10069_s26 }
 0x200   :  { %v686_v58 = vsel %vm606_vm2, %v683_v54, %v685_v46  ;;  %v171_v54 = vld [vmem:[%s14960_s0 + $0x130] sm:$0xff] }
 0x201   :  { %v1526_v19 = vpop.permute.xlu1 %1525  ;;  %v1128_v53 = vpop.permute.xlu0 %1127  ;;  %v2979_v20 = vld [vmem:[#allocation3 + $0x90] sm:$0xff]  ;;  %236 = vst.msk [vmem:[#allocation2 + $0x211] sm:$0xff] %vm23_vm0, %v171_v54 }
 0x202   :  { %1603 = vst.msk [vmem:[#allocation3 + $0x98] sm:$0xff] %vm1583_vm12, %v1526_v19  ;;  %v3086_v52 = vsel %vm3030_vm13, %v2979_v20, 0 }
 0x203   :  { %1204 = vst.msk [vmem:[#allocation3 + $0xa0] sm:$0xff] %vm1183_vm9, %v1128_v53  ;;  %1009 = vrot.lane.b32.xlu1 %v474_v55, %s10067_s20  ;;  %876 = vrot.lane.b32.xlu0 %v11171_v40, %s10064_s17  ;;  %v11516_v3 = vand.u32 4294901760, %v3086_v52 }
 0x205   :  { %v732_v49 = vpop.permute.xlu1 %731  ;;  %v524_v9 = vpop.permute.xlu0 %523  ;;  %v11521_v23 = vsub.f32 %v3086_v52, %v11516_v3 }
 0x206   :  { %806 = vst.msk [vmem:[#allocation3 + $0xb0] sm:$0xff] %vm783_vm6, %v732_v49 }
 0x207   :  { %15112 = vst [vmem:[#allocation10_spill] sm:$0xff] %v11521_v23  ;;  %597 = vst.msk [vmem:[#allocation3 + $0xb8] sm:$0xff] %vm573_vm5, %v524_v9  ;;  %1539 = vrot.lane.b32.xlu1 %v684_v22, %s10071_s12  ;;  %1407 = vrot.lane.b32.xlu0 %v476_v2, %s10070_s7  ;;  %v3479_v40 = vand.u32 4294901760, %v11521_v23 }
 0x209   :  { %v1259_v16 = vpop.permute.xlu1 %1258  ;;  %v1130_v39 = vpop.permute.xlu0 %1129  ;;  %9124 = vmatprep.mubr.f32.mxu0 %v3479_v40  ;;  %v3480_v17 = vsub.f32 %v11521_v23, %v3479_v40  ;;  %v2980_v34 = vld [vmem:[#allocation3 + $0x98] sm:$0xff] }
 0x20a   :  { %1335 = vst.msk [vmem:[#allocation3 + $0xa0] sm:$0xff] %vm1314_vm10, %v1259_v16  ;;  %v3089_v19 = vsel %vm3030_vm13, %v2980_v34, 0  ;;  %v172_v34 = vld [vmem:[%s14960_s0 + $0x138] sm:$0xff] }
 0x20b   :  { %1205 = vst.msk [vmem:[#allocation3 + $0xa8] sm:$0xff] %vm1183_vm9, %v1130_v39  ;;  %1011 = vrot.lane.b32.xlu1 %v476_v2, %s10067_s20  ;;  %537 = vrot.lane.b32.xlu0 %v474_v55, %s10066_s19  ;;  %v3481_v53 = vand.u32 4294901760, %v3480_v17  ;;  %v11534_v20 = vand.u32 4294901760, %v3089_v19  ;;  %v310_v17 = vld [vmem:[#allocation2 + $0x180] sm:$0xff] }
 0x20c   :  { %237 = vst.msk [vmem:[#allocation2 + $0x219] sm:$0xff] %vm23_vm0, %v172_v34  ;;  %v312_v34 = vld [vmem:[#allocation2 + $0x190] sm:$0x3] }
 0x20d   :  { %v863_v52 = vpop.permute.xlu1 %862  ;;  %v734_v49 = vpop.permute.xlu0 %733  ;;  %8806 = vmatprep.mubr.f32.mxu1 %v3481_v53  ;;  %v11538_v9 = vsub.f32 %v3089_v19, %v11534_v20 }
 0x20e   :  { %937 = vst.msk [vmem:[#allocation3 + $0xb0] sm:$0xff] %vm914_vm7, %v863_v52  ;;  %v11557_v52 = vld [vmem:[#allocation2 + $0x188] sm:$0xff] }
 0x20f   :  { %15113 = vst [vmem:[#allocation11_spill] sm:$0xff] %v11538_v9  ;;  %807 = vst.msk [vmem:[#allocation3 + $0xb8] sm:$0xff] %vm783_vm6, %v734_v49  ;;  %1541 = vrot.lane.b32.xlu1 %v686_v58, %s10071_s12  ;;  %1143 = vrot.lane.b32.xlu0 %v684_v22, %s10068_s23  ;;  %v3489_v55 = vand.u32 4294901760, %v11538_v9  ;;  %v949_v49 = vrot.slane %v11557_v52, 1 }
 0x211   :  { %v1394_v40 = vpop.permute.xlu1 %1393  ;;  %v1261_v46 = vpop.permute.xlu0 %1260  ;;  %9125 = vmatmul.mubr.f32.gmra.mrb[18].mxu0 %v3489_v55  ;;  %v3490_v16 = vsub.f32 %v11538_v9, %v3489_v55 }
 0x212   :  { %1470 = vst.msk [vmem:[#allocation3 + $0xa0] sm:$0xff] %vm1449_vm11, %v1394_v40 }
 0x213   :  { %1336 = vst.msk [vmem:[#allocation3 + $0xa8] sm:$0xff] %vm1314_vm10, %v1261_v46  ;;  %747 = vrot.lane.b32.xlu1 %v684_v22, %s10065_s18  ;;  %539 = vrot.lane.b32.xlu0 %v476_v2, %s10066_s19  ;;  %v3491_v39 = vand.u32 4294901760, %v3490_v16  ;;  %v11564_v22 = vld [vmem:[#allocation2 + $0x210] sm:$0xff]  ;;  %v948_v2 = vrot.slane %v310_v17, 1  ;;  %v11574_v46 = vld [vmem:[#allocation2 + $0x218] sm:$0xff] }
 0x214   :  { %1679 = vst.msk [vmem:[#allocation3 + $0x140] sm:$0xff] %vm23_vm0, %v11564_v22  ;;  %1680 = vst.msk [vmem:[#allocation3 + $0x148] sm:$0xff] %vm23_vm0, %v11574_v46 }
 0x215   :  { %v998_v19 = vpop.permute.xlu1 %997  ;;  %v865_v53 = vpop.permute.xlu0 %864  ;;  %8807 = vmatmul.mubr.f32.gmra.mrb[18].mxu1 %v3491_v39  ;;  %v950_v40 = vsel %vm396_vm3, %v948_v2, %v949_v49 }
 0x216   :  { %1072 = vst.msk [vmem:[#allocation3 + $0xb0] sm:$0xff] %vm1049_vm8, %v998_v19  ;;  %v1083_v19 = vrot.slane %v11557_v52, 2 }
 0x217   :  { %938 = vst.msk [vmem:[#allocation3 + $0xb8] sm:$0xff] %vm914_vm7, %v865_v53  ;;  %1274 = vrot.lane.b32.xlu1 %v310_v17, %s10069_s26  ;;  %1145 = vrot.lane.b32.xlu0 %v686_v58, %s10068_s23  ;;  %v951_v53 = vrot.slane %v312_v34, 1 }
 0x219   :  { %v1528_v55 = vpop.permute.xlu1 %1527  ;;  %v1396_v54 = vpop.permute.xlu0 %1395  ;;  %v952_v41 = vsel %vm396_vm3, %v949_v49, %v951_v53 }
 0x21a   :  { %1604 = vst.msk [vmem:[#allocation3 + $0xa0] sm:$0xff] %vm1583_vm12, %v1528_v55 }
 0x21b   :  { %1471 = vst.msk [vmem:[#allocation3 + $0xa8] sm:$0xff] %vm1449_vm11, %v1396_v54  ;;  %878 = vrot.lane.b32.xlu1 %v310_v17, %s10064_s17  ;;  %749 = vrot.lane.b32.xlu0 %v686_v58, %s10065_s18  ;;  %v1082_v58 = vrot.slane %v310_v17, 2 }
 0x21d   :  { %v1000_v16 = vpop.permute.xlu1 %999  ;;  %v526_v39 = vpop.permute.xlu0 %525  ;;  %v1084_v17 = vsel %vm606_vm2, %v1082_v58, %v1083_v19 }
 0x21e   :  { %1073 = vst.msk [vmem:[#allocation3 + $0xb8] sm:$0xff] %vm1049_vm8, %v1000_v16 }
 0x21f   :  { %598 = vst.msk [vmem:[#allocation3 + $0xc0] sm:$0xff] %vm573_vm5, %v526_v39  ;;  %1409 = vrot.lane.b32.xlu1 %v950_v40, %s10070_s7  ;;  %1276 = vrot.lane.b32.xlu0 %v11557_v52, %s10069_s26 }
 0x221   :  { %v1530_v2 = vpop.permute.xlu1 %1529  ;;  %v1132_v55 = vpop.permute.xlu0 %1131  ;;  %v2981_v54 = vld [vmem:[#allocation3 + $0xa0] sm:$0xff] }
 0x222   :  { %1605 = vst.msk [vmem:[#allocation3 + $0xa8] sm:$0xff] %vm1583_vm12, %v1530_v2  ;;  %v3092_v16 = vsel %vm3030_vm13, %v2981_v54, 0 }
 0x223   :  { %1206 = vst.msk [vmem:[#allocation3 + $0xb0] sm:$0xff] %vm1183_vm9, %v1132_v55  ;;  %1013 = vrot.lane.b32.xlu1 %v950_v40, %s10067_s20  ;;  %880 = vrot.lane.b32.xlu0 %v11557_v52, %s10064_s17  ;;  %v11590_v39 = vand.u32 4294901760, %v3092_v16  ;;  %v1085_v40 = vrot.slane %v312_v34, 2 }
 0x225   :  { %v736_v36 = vpop.permute.xlu1 %735  ;;  %v528_v9 = vpop.permute.xlu0 %527  ;;  %v11595_v23 = vsub.f32 %v3092_v16, %v11590_v39  ;;  %v1086_v34 = vsel %vm606_vm2, %v1083_v19, %v1085_v40  ;;  %v173_v19 = vld [vmem:[%s14960_s0 + $0x140] sm:$0xff] }
 0x226   :  { %808 = vst.msk [vmem:[#allocation3 + $0xc0] sm:$0xff] %vm783_vm6, %v736_v36 }
 0x227   :  { %15114 = vst [vmem:[#allocation12_spill] sm:$0xff] %v11595_v23  ;;  %599 = vst.msk [vmem:[#allocation3 + $0xc8] sm:$0xff] %vm573_vm5, %v528_v9  ;;  %1543 = vrot.lane.b32.xlu1 %v1084_v17, %s10071_s12  ;;  %1411 = vrot.lane.b32.xlu0 %v952_v41, %s10070_s7  ;;  %v3499_v52 = vand.u32 4294901760, %v11595_v23 }
 0x228   :  { %238 = vst.msk [vmem:[#allocation2 + $0x229] sm:$0xff] %vm23_vm0, %v173_v19 }
 0x229   :  { %v1263_v2 = vpop.permute.xlu1 %1262  ;;  %v1134_v58 = vpop.permute.xlu0 %1133  ;;  %9127 = vmatprep.mubr.f32.mxu0 %v3499_v52  ;;  %v3500_v49 = vsub.f32 %v11595_v23, %v3499_v52  ;;  %v2982_v53 = vld [vmem:[#allocation3 + $0xa8] sm:$0xff] }
 0x22a   :  { %1337 = vst.msk [vmem:[#allocation3 + $0xb0] sm:$0xff] %vm1314_vm10, %v1263_v2  ;;  %v3095_v36 = vsel %vm3030_vm13, %v2982_v53, 0  ;;  %v1619_v2 = vld [vmem:[#allocation2 + $0x1c0] sm:$0x3] }
 0x22b   :  { %1207 = vst.msk [vmem:[#allocation3 + $0xb8] sm:$0xff] %vm1183_vm9, %v1134_v58  ;;  %1147 = vrot.lane.b32.xlu1 %v1084_v17, %s10068_s23  ;;  %1015 = vrot.lane.b32.xlu0 %v952_v41, %s10067_s20  ;;  %v3501_v9 = vand.u32 4294901760, %v3500_v49  ;;  %v11608_v55 = vand.u32 4294901760, %v3095_v36  ;;  %v313_v17 = vld [vmem:[#allocation2 + $0x198] sm:$0xff]  ;;  %v1754_v40 = vrot.slane %v1619_v2, 1 }
 0x22d   :  { %v867_v54 = vpop.permute.xlu1 %866  ;;  %v738_v16 = vpop.permute.xlu0 %737  ;;  %8809 = vmatprep.mubr.f32.mxu1 %v3501_v9  ;;  %v11612_v52 = vsub.f32 %v3095_v36, %v11608_v55  ;;  %v11625_v36 = vld [vmem:[#allocation2 + $0x1a0] sm:$0xff]  ;;  %v1348_v9 = vrot.slane %v313_v17, 1 }
 0x22e   :  { %939 = vst.msk [vmem:[#allocation3 + $0xc0] sm:$0xff] %vm914_vm7, %v867_v54  ;;  %v15116_v54 = vrot.slane %v11292_v4, 1  ;;  %v1349_v19 = vrot.slane %v11625_v36, 1 }
 0x22f   :  { %15115 = vst [vmem:[#allocation13_spill] sm:$0xff] %v11612_v52  ;;  %809 = vst.msk [vmem:[#allocation3 + $0xc8] sm:$0xff] %vm783_vm6, %v738_v16  ;;  %1831 = vrot.lane.b32.xlu1 %v11309_v51, %s10066_s19  ;;  %1545 = vrot.lane.b32.xlu0 %v1086_v34, %s10071_s12  ;;  %v3509_v41 = vand.u32 4294901760, %v11612_v52 }
 0x230   :  { %v1755_v16 = vsel %vm396_vm3, %v15116_v54, %v1754_v40  ;;  %v1350_v40 = vsel %vm396_vm3, %v1348_v9, %v1349_v19  ;;  %v315_v54 = vld [vmem:[#allocation2 + $0x1a8] sm:$0x3]  ;;  %v1483_v9 = vrot.slane %v11625_v36, 2 }
 0x231   :  { %v1398_v58 = vpop.permute.xlu1 %1397  ;;  %v1265_v49 = vpop.permute.xlu0 %1264  ;;  %9128 = vmatmul.mubr.f32.gmra.mrb[20].mxu0 %v3509_v41  ;;  %v3510_v53 = vsub.f32 %v11612_v52, %v3509_v41  ;;  %v174_v41 = vld [vmem:[%s14960_s0 + $0x148] sm:$0xff] }
 0x232   :  { %1472 = vst.msk [vmem:[#allocation3 + $0xb0] sm:$0xff] %vm1449_vm11, %v1398_v58 }
 0x233   :  { %1338 = vst.msk [vmem:[#allocation3 + $0xb8] sm:$0xff] %vm1314_vm10, %v1265_v49  ;;  %1278 = vrot.lane.b32.xlu1 %v313_v17, %s10069_s26  ;;  %1149 = vrot.lane.b32.xlu0 %v1086_v34, %s10068_s23  ;;  %v3511_v51 = vand.u32 4294901760, %v3510_v53  ;;  %v11644_v34 = vld [vmem:[#allocation2 + $0x228] sm:$0xff]  ;;  %v1962_v49 = vrot.slane %v1619_v2, 2 }
 0x234   :  { %239 = vst.msk [vmem:[#allocation2 + $0x231] sm:$0xff] %vm23_vm0, %v174_v41  ;;  %1681 = vst.msk [vmem:[#allocation3 + $0x150] sm:$0xff] %vm23_vm0, %v11644_v34 }
 0x235   :  { %v1002_v52 = vpop.permute.xlu1 %1001  ;;  %v869_v58 = vpop.permute.xlu0 %868  ;;  %8810 = vmatmul.mubr.f32.gmra.mrb[20].mxu1 %v3511_v51 }
 0x236   :  { %1074 = vst.msk [vmem:[#allocation3 + $0xc0] sm:$0xff] %vm1049_vm8, %v1002_v52  ;;  %v15117_v52 = vrot.slane %v11292_v4, 2  ;;  %v1756_v4 = vrot.slane %v11348_v33, 1 }
 0x237   :  { %940 = vst.msk [vmem:[#allocation3 + $0xc8] sm:$0xff] %vm914_vm7, %v869_v58  ;;  %2039 = vrot.lane.b32.xlu1 %v11325_v27, %s10065_s18  ;;  %1833 = vrot.lane.b32.xlu0 %v1755_v16, %s10066_s19  ;;  %v1482_v27 = vrot.slane %v313_v17, 2  ;;  %v1351_v16 = vrot.slane %v315_v54, 1 }
 0x238   :  { %v1963_v2 = vsel %vm606_vm2, %v15117_v52, %v1962_v49 }
 0x239   :  { %v1532_v53 = vpop.permute.xlu1 %1531  ;;  %v1400_v51 = vpop.permute.xlu0 %1399  ;;  %v1484_v17 = vsel %vm606_vm2, %v1482_v27, %v1483_v9 }
 0x23a   :  { %1606 = vst.msk [vmem:[#allocation3 + $0xb0] sm:$0xff] %vm1583_vm12, %v1532_v53 }
 0x23b   :  { %1473 = vst.msk [vmem:[#allocation3 + $0xb8] sm:$0xff] %vm1449_vm11, %v1400_v51  ;;  %1413 = vrot.lane.b32.xlu1 %v1350_v40, %s10070_s7  ;;  %1280 = vrot.lane.b32.xlu0 %v11625_v36, %s10069_s26  ;;  %v11658_v41 = vld [vmem:[#allocation2 + $0x230] sm:$0xff]  ;;  %v1352_v36 = vsel %vm396_vm3, %v1349_v19, %v1351_v16  ;;  %v1757_v40 = vrot.slane %v11364_v28, 1  ;;  %v1485_v19 = vrot.slane %v315_v54, 2 }
 0x23c   :  { %1682 = vst.msk [vmem:[#allocation3 + $0x158] sm:$0xff] %vm23_vm0, %v11658_v41 }
 0x23d   :  { %v1004_v58 = vpop.permute.xlu1 %1003  ;;  %v530_v23 = vpop.permute.xlu0 %529  ;;  %v1758_v27 = vsel %vm396_vm3, %v1756_v4, %v1757_v40  ;;  %v1964_v4 = vrot.slane %v11348_v33, 2  ;;  %v1486_v54 = vsel %vm606_vm2, %v1483_v9, %v1485_v19 }
 0x23e   :  { %1075 = vst.msk [vmem:[#allocation3 + $0xc8] sm:$0xff] %vm1049_vm8, %v1004_v58 }
 0x23f   :  { %600 = vst.msk [vmem:[#allocation3 + $0xd0] sm:$0xff] %vm573_vm5, %v530_v23  ;;  %2169 = vrot.lane.b32.xlu1 %v11348_v33, %s10064_s17  ;;  %2041 = vrot.lane.b32.xlu0 %v1963_v2, %s10065_s18 }
 0x241   :  { %v1534_v49 = vpop.permute.xlu1 %1533  ;;  %v1136_v53 = vpop.permute.xlu0 %1135  ;;  %v2983_v51 = vld [vmem:[#allocation3 + $0xb0] sm:$0xff] }
 0x242   :  { %1607 = vst.msk [vmem:[#allocation3 + $0xb8] sm:$0xff] %vm1583_vm12, %v1534_v49  ;;  %v3098_v23 = vsel %vm3030_vm13, %v2983_v51, 0  ;;  %v1759_v49 = vrot.slane %v1622_v29, 1 }
 0x243   :  { %1208 = vst.msk [vmem:[#allocation3 + $0xc0] sm:$0xff] %vm1183_vm9, %v1136_v53  ;;  %1547 = vrot.lane.b32.xlu1 %v1484_v17, %s10071_s12  ;;  %1415 = vrot.lane.b32.xlu0 %v1352_v36, %s10070_s7  ;;  %v11676_v52 = vand.u32 4294901760, %v3098_v23  ;;  %v1965_v36 = vrot.slane %v11364_v28, 2 }
 0x244   :  { %v1760_v19 = vsel %vm396_vm3, %v1757_v40, %v1759_v49  ;;  %v175_v40 = vld [vmem:[%s14960_s0 + $0x150] sm:$0xff] }
 0x245   :  { %v740_v2 = vpop.permute.xlu1 %739  ;;  %v532_v16 = vpop.permute.xlu0 %531  ;;  %v11680_v58 = vsub.f32 %v3098_v23, %v11676_v52  ;;  %240 = vst.msk [vmem:[#allocation2 + $0x241] sm:$0xff] %vm23_vm0, %v175_v40 }
 0x246   :  { %810 = vst.msk [vmem:[#allocation3 + $0xd0] sm:$0xff] %vm783_vm6, %v740_v2 }
 0x247   :  { %15118 = vst [vmem:[#allocation14_spill] sm:$0xff] %v11680_v58  ;;  %601 = vst.msk [vmem:[#allocation3 + $0xd8] sm:$0xff] %vm573_vm5, %v532_v16  ;;  %2303 = vrot.lane.b32.xlu1 %v1758_v27, %s10067_s20  ;;  %2171 = vrot.lane.b32.xlu0 %v11364_v28, %s10064_s17  ;;  %v3519_v17 = vand.u32 4294901760, %v11680_v58  ;;  %v1966_v28 = vsel %vm606_vm2, %v1964_v4, %v1965_v36  ;;  %v1967_v4 = vrot.slane %v1622_v29, 2  ;;  %v176_v29 = vld [vmem:[%s14960_s0 + $0x158] sm:$0xff] }
 0x248   :  { %241 = vst.msk [vmem:[#allocation2 + $0x249] sm:$0xff] %vm23_vm0, %v176_v29 }
 0x249   :  { %v1267_v53 = vpop.permute.xlu1 %1266  ;;  %v1138_v51 = vpop.permute.xlu0 %1137  ;;  %9130 = vmatprep.mubr.f32.mxu0 %v3519_v17  ;;  %v3520_v23 = vsub.f32 %v11680_v58, %v3519_v17  ;;  %v2984_v2 = vld [vmem:[#allocation3 + $0xb8] sm:$0xff] }
 0x24a   :  { %1339 = vst.msk [vmem:[#allocation3 + $0xc0] sm:$0xff] %vm1314_vm10, %v1267_v53  ;;  %v3101_v16 = vsel %vm3030_vm13, %v2984_v2, 0 }
 0x24b   :  { %1209 = vst.msk [vmem:[#allocation3 + $0xc8] sm:$0xff] %vm1183_vm9, %v1138_v51  ;;  %1835 = vrot.lane.b32.xlu1 %v1758_v27, %s10066_s19  ;;  %1549 = vrot.lane.b32.xlu0 %v1486_v54, %s10071_s12  ;;  %v3521_v33 = vand.u32 4294901760, %v3520_v23  ;;  %v11697_v9 = vand.u32 4294901760, %v3101_v16  ;;  %v1968_v23 = vsel %vm606_vm2, %v1965_v36, %v1967_v4  ;;  %v1761_v36 = vrot.slane %v11411_v48, 1 }
 0x24d   :  { %v871_v38 = vpop.permute.xlu1 %870  ;;  %v742_v17 = vpop.permute.xlu0 %741  ;;  %8812 = vmatprep.mubr.f32.mxu1 %v3521_v33  ;;  %v11702_v53 = vsub.f32 %v3101_v16, %v11697_v9  ;;  %v11728_v33 = vld [vmem:[#allocation2 + $0x240] sm:$0xff] }
 0x24e   :  { %941 = vst.msk [vmem:[#allocation3 + $0xd0] sm:$0xff] %vm914_vm7, %v871_v38 }
 0x24f   :  { %15119 = vst [vmem:[#allocation15_spill] sm:$0xff] %v11702_v53  ;;  %811 = vst.msk [vmem:[#allocation3 + $0xd8] sm:$0xff] %vm783_vm6, %v742_v17  ;;  %2436 = vrot.lane.b32.xlu1 %v1966_v28, %s10068_s23  ;;  %2305 = vrot.lane.b32.xlu0 %v1760_v19, %s10067_s20  ;;  %v3529_v27 = vand.u32 4294901760, %v11702_v53  ;;  %v11740_v40 = vld [vmem:[#allocation2 + $0x248] sm:$0xff] }
 0x250   :  { %1683 = vst.msk [vmem:[#allocation3 + $0x160] sm:$0xff] %vm23_vm0, %v11728_v33  ;;  %1684 = vst.msk [vmem:[#allocation3 + $0x168] sm:$0xff] %vm23_vm0, %v11740_v40 }
 0x251   :  { %v1402_v54 = vpop.permute.xlu1 %1401  ;;  %v1269_v49 = vpop.permute.xlu0 %1268  ;;  %9131 = vmatmul.mubr.f32.gmra.mrb[22].mxu0 %v3529_v27  ;;  %v3530_v38 = vsub.f32 %v11702_v53, %v3529_v27 }
 0x252   :  { %1474 = vst.msk [vmem:[#allocation3 + $0xc0] sm:$0xff] %vm1449_vm11, %v1402_v54 }
 0x253   :  { %1340 = vst.msk [vmem:[#allocation3 + $0xc8] sm:$0xff] %vm1314_vm10, %v1269_v49  ;;  %2043 = vrot.lane.b32.xlu1 %v1966_v28, %s10065_s18  ;;  %1837 = vrot.lane.b32.xlu0 %v1760_v19, %s10066_s19  ;;  %v3531_v51 = vand.u32 4294901760, %v3530_v38  ;;  %v1762_v28 = vrot.slane %v11423_v11, 1  ;;  %v1625_v49 = vld [vmem:[#allocation2 + $0x1f0] sm:$0x3]  ;;  %v1969_v38 = vrot.slane %v11411_v48, 2 }
 0x255   :  { %v1006_v2 = vpop.permute.xlu1 %1005  ;;  %v873_v16 = vpop.permute.xlu0 %872  ;;  %8813 = vmatmul.mubr.f32.gmra.mrb[22].mxu1 %v3531_v51  ;;  %v1763_v27 = vsel %vm396_vm3, %v1761_v36, %v1762_v28  ;;  %v1970_v51 = vrot.slane %v11423_v11, 2 }
 0x256   :  { %1076 = vst.msk [vmem:[#allocation3 + $0xd0] sm:$0xff] %vm1049_vm8, %v1006_v2 }
 0x257   :  { %942 = vst.msk [vmem:[#allocation3 + $0xd8] sm:$0xff] %vm914_vm7, %v873_v16  ;;  %2566 = vrot.lane.b32.xlu1 %v11411_v48, %s10069_s26  ;;  %2438 = vrot.lane.b32.xlu0 %v1968_v23, %s10068_s23 }
 0x259   :  { %v1536_v19 = vpop.permute.xlu1 %1535  ;;  %v1404_v17 = vpop.permute.xlu0 %1403 }
 0x25a   :  { %1608 = vst.msk [vmem:[#allocation3 + $0xc0] sm:$0xff] %vm1583_vm12, %v1536_v19 }
 0x25b   :  { %1475 = vst.msk [vmem:[#allocation3 + $0xc8] sm:$0xff] %vm1449_vm11, %v1404_v17  ;;  %2173 = vrot.lane.b32.xlu1 %v11411_v48, %s10064_s17  ;;  %2045 = vrot.lane.b32.xlu0 %v1968_v23, %s10065_s18  ;;  %v1764_v23 = vrot.slane %v1625_v49, 1  ;;  %v1971_v48 = vsel %vm606_vm2, %v1969_v38, %v1970_v51 }
 0x25d   :  { %v1008_v4 = vpop.permute.xlu1 %1007  ;;  %v534_v54 = vpop.permute.xlu0 %533  ;;  %v1765_v17 = vsel %vm396_vm3, %v1762_v28, %v1764_v23 }
 0x25e   :  { %1077 = vst.msk [vmem:[#allocation3 + $0xd8] sm:$0xff] %vm1049_vm8, %v1008_v4 }
 0x25f   :  { %602 = vst.msk [vmem:[#allocation3 + $0xe0] sm:$0xff] %vm573_vm5, %v534_v54  ;;  %2700 = vrot.lane.b32.xlu1 %v1763_v27, %s10070_s7  ;;  %2568 = vrot.lane.b32.xlu0 %v11423_v11, %s10069_s26 }
 0x261   :  { %v1538_v29 = vpop.permute.xlu1 %1537  ;;  %v1140_v2 = vpop.permute.xlu0 %1139  ;;  %v2985_v16 = vld [vmem:[#allocation3 + $0xc0] sm:$0xff] }
 0x262   :  { %1609 = vst.msk [vmem:[#allocation3 + $0xc8] sm:$0xff] %vm1583_vm12, %v1538_v29  ;;  %v3104_v36 = vsel %vm3030_vm13, %v2985_v16, 0  ;;  %v1972_v29 = vrot.slane %v1625_v49, 2 }
 0x263   :  { %1210 = vst.msk [vmem:[#allocation3 + $0xd0] sm:$0xff] %vm1183_vm9, %v1140_v2  ;;  %2307 = vrot.lane.b32.xlu1 %v1763_v27, %s10067_s20  ;;  %2175 = vrot.lane.b32.xlu0 %v11423_v11, %s10064_s17  ;;  %v11757_v19 = vand.u32 4294901760, %v3104_v36 }
 0x264   :  { %v1973_v49 = vsel %vm606_vm2, %v1970_v51, %v1972_v29  ;;  %v177_v51 = vld [vmem:[%s14960_s0 + $0x160] sm:$0xff] }
 0x265   :  { %v744_v4 = vpop.permute.xlu1 %743  ;;  %v536_v54 = vpop.permute.xlu0 %535  ;;  %v11762_v53 = vsub.f32 %v3104_v36, %v11757_v19  ;;  %242 = vst.msk [vmem:[#allocation2 + $0x259] sm:$0xff] %vm23_vm0, %v177_v51 }
 0x266   :  { %812 = vst.msk [vmem:[#allocation3 + $0xe0] sm:$0xff] %vm783_vm6, %v744_v4 }
 0x267   :  { %15120 = vst [vmem:[#allocation16_spill] sm:$0xff] %v11762_v53  ;;  %603 = vst.msk [vmem:[#allocation3 + $0xe8] sm:$0xff] %vm573_vm5, %v536_v54  ;;  %2833 = vrot.lane.b32.xlu1 %v1971_v48, %s10071_s12  ;;  %2702 = vrot.lane.b32.xlu0 %v1765_v17, %s10070_s7  ;;  %v3539_v11 = vand.u32 4294901760, %v11762_v53 }
 0x269   :  { %v1271_v2 = vpop.permute.xlu1 %1270  ;;  %v1142_v38 = vpop.permute.xlu0 %1141  ;;  %9133 = vmatprep.mubr.f32.mxu0 %v3539_v11  ;;  %v3540_v28 = vsub.f32 %v11762_v53, %v3539_v11  ;;  %v2986_v23 = vld [vmem:[#allocation3 + $0xc8] sm:$0xff] }
 0x26a   :  { %1341 = vst.msk [vmem:[#allocation3 + $0xd0] sm:$0xff] %vm1314_vm10, %v1271_v2  ;;  %v3107_v16 = vsel %vm3030_vm13, %v2986_v23, 0 }
 0x26b   :  { %1211 = vst.msk [vmem:[#allocation3 + $0xd8] sm:$0xff] %vm1183_vm9, %v1142_v38  ;;  %2309 = vrot.lane.b32.xlu1 %v1765_v17, %s10067_s20  ;;  %1839 = vrot.lane.b32.xlu0 %v1763_v27, %s10066_s19  ;;  %v3541_v36 = vand.u32 4294901760, %v3540_v28  ;;  %v11775_v4 = vand.u32 4294901760, %v3107_v16  ;;  %v178_v28 = vld [vmem:[%s14960_s0 + $0x168] sm:$0xff] }
 0x26c   :  { %243 = vst.msk [vmem:[#allocation2 + $0x261] sm:$0xff] %vm23_vm0, %v178_v28  ;;  %v1975_v28 = vrot.slane %v11499_v5, 2 }
 0x26d   :  { %v875_v54 = vpop.permute.xlu1 %874  ;;  %v746_v58 = vpop.permute.xlu0 %745  ;;  %8815 = vmatprep.mubr.f32.mxu1 %v3541_v36  ;;  %v11779_v11 = vsub.f32 %v3107_v16, %v11775_v4  ;;  %v1767_v36 = vrot.slane %v11499_v5, 1 }
 0x26e   :  { %943 = vst.msk [vmem:[#allocation3 + $0xe0] sm:$0xff] %vm914_vm7, %v875_v54 }
 0x26f   :  { %15121 = vst [vmem:[#allocation17_spill] sm:$0xff] %v11779_v11  ;;  %813 = vst.msk [vmem:[#allocation3 + $0xe8] sm:$0xff] %vm783_vm6, %v746_v58  ;;  %2835 = vrot.lane.b32.xlu1 %v1973_v49, %s10071_s12  ;;  %2440 = vrot.lane.b32.xlu0 %v1971_v48, %s10068_s23  ;;  %v3549_v27 = vand.u32 4294901760, %v11779_v11 }
 0x271   :  { %v1406_v29 = vpop.permute.xlu1 %1405  ;;  %v1273_v2 = vpop.permute.xlu0 %1272  ;;  %9134 = vmatmul.mubr.f32.gmra.mrb[24].mxu0 %v3549_v27  ;;  %v3550_v38 = vsub.f32 %v11779_v11, %v3549_v27 }
 0x272   :  { %1476 = vst.msk [vmem:[#allocation3 + $0xd0] sm:$0xff] %vm1449_vm11, %v1406_v29 }
 0x273   :  { %1342 = vst.msk [vmem:[#allocation3 + $0xd8] sm:$0xff] %vm1314_vm10, %v1273_v2  ;;  %2047 = vrot.lane.b32.xlu1 %v1971_v48, %s10065_s18  ;;  %1841 = vrot.lane.b32.xlu0 %v1765_v17, %s10066_s19  ;;  %v3551_v58 = vand.u32 4294901760, %v3550_v38  ;;  %v11804_v48 = vld [vmem:[#allocation2 + $0x258] sm:$0xff]  ;;  %v1766_v17 = vrot.slane %v11487_v57, 1  ;;  %v11816_v29 = vld [vmem:[#allocation2 + $0x260] sm:$0xff] }
 0x274   :  { %1685 = vst.msk [vmem:[#allocation3 + $0x170] sm:$0xff] %vm23_vm0, %v11804_v48  ;;  %1686 = vst.msk [vmem:[#allocation3 + $0x178] sm:$0xff] %vm23_vm0, %v11816_v29 }
 0x275   :  { %v1010_v23 = vpop.permute.xlu1 %1009  ;;  %v877_v16 = vpop.permute.xlu0 %876  ;;  %8816 = vmatmul.mubr.f32.gmra.mrb[24].mxu1 %v3551_v58  ;;  %v1768_v51 = vsel %vm396_vm3, %v1766_v17, %v1767_v36  ;;  %v1628_v58 = vld [vmem:[#allocation2 + $0x208] sm:$0x3] }
 0x276   :  { %1078 = vst.msk [vmem:[#allocation3 + $0xe0] sm:$0xff] %vm1049_vm8, %v1010_v23  ;;  %v1769_v23 = vrot.slane %v1628_v58, 1 }
 0x277   :  { %944 = vst.msk [vmem:[#allocation3 + $0xe8] sm:$0xff] %vm914_vm7, %v877_v16  ;;  %2570 = vrot.lane.b32.xlu1 %v11487_v57, %s10069_s26  ;;  %2442 = vrot.lane.b32.xlu0 %v1973_v49, %s10068_s23 }
 0x279   :  { %v1540_v54 = vpop.permute.xlu1 %1539  ;;  %v1408_v27 = vpop.permute.xlu0 %1407 }
 0x27a   :  { %1610 = vst.msk [vmem:[#allocation3 + $0xd0] sm:$0xff] %vm1583_vm12, %v1540_v54 }
 0x27b   :  { %1477 = vst.msk [vmem:[#allocation3 + $0xd8] sm:$0xff] %vm1449_vm11, %v1408_v27  ;;  %2177 = vrot.lane.b32.xlu1 %v11487_v57, %s10064_s17  ;;  %2049 = vrot.lane.b32.xlu0 %v1973_v49, %s10065_s18  ;;  %v1974_v49 = vrot.slane %v11487_v57, 2 }
 0x27d   :  { %v1012_v2 = vpop.permute.xlu1 %1011  ;;  %v538_v38 = vpop.permute.xlu0 %537  ;;  %v1976_v57 = vsel %vm606_vm2, %v1974_v49, %v1975_v28 }
 0x27e   :  { %1079 = vst.msk [vmem:[#allocation3 + $0xe8] sm:$0xff] %vm1049_vm8, %v1012_v2 }
 0x27f   :  { %604 = vst.msk [vmem:[#allocation3 + $0xf0] sm:$0xff] %vm573_vm5, %v538_v38  ;;  %2704 = vrot.lane.b32.xlu1 %v1768_v51, %s10070_s7  ;;  %2572 = vrot.lane.b32.xlu0 %v11499_v5, %s10069_s26  ;;  %v1770_v38 = vsel %vm396_vm3, %v1767_v36, %v1769_v23 }
 0x281   :  { %v1542_v16 = vpop.permute.xlu1 %1541  ;;  %v1144_v17 = vpop.permute.xlu0 %1143  ;;  %v2987_v54 = vld [vmem:[#allocation3 + $0xd0] sm:$0xff] }
 0x282   :  { %1611 = vst.msk [vmem:[#allocation3 + $0xd8] sm:$0xff] %vm1583_vm12, %v1542_v16  ;;  %v3110_v27 = vsel %vm3030_vm13, %v2987_v54, 0  ;;  %v1977_v16 = vrot.slane %v1628_v58, 2 }
 0x283   :  { %1212 = vst.msk [vmem:[#allocation3 + $0xe0] sm:$0xff] %vm1183_vm9, %v1144_v17  ;;  %2311 = vrot.lane.b32.xlu1 %v1768_v51, %s10067_s20  ;;  %2179 = vrot.lane.b32.xlu0 %v11499_v5, %s10064_s17  ;;  %v11833_v2 = vand.u32 4294901760, %v3110_v27 }
 0x284   :  { %v1978_v58 = vsel %vm606_vm2, %v1975_v28, %v1977_v16  ;;  %v179_v28 = vld [vmem:[%s14960_s0 + $0x170] sm:$0xff] }
 0x285   :  { %v748_v11 = vpop.permute.xlu1 %747  ;;  %v540_v53 = vpop.permute.xlu0 %539  ;;  %v11838_v0 = vsub.f32 %v3110_v27, %v11833_v2  ;;  %244 = vst.msk [vmem:[#allocation2 + $0x271] sm:$0xff] %vm23_vm0, %v179_v28 }
 0x286   :  { %814 = vst.msk [vmem:[#allocation3 + $0xf0] sm:$0xff] %vm783_vm6, %v748_v11 }
 0x287   :  { %15122 = vst [vmem:[#allocation18_spill] sm:$0xff] %v11838_v0  ;;  %605 = vst.msk [vmem:[#allocation3 + $0xf8] sm:$0xff] %vm573_vm5, %v540_v53  ;;  %2837 = vrot.lane.b32.xlu1 %v1976_v57, %s10071_s12  ;;  %2706 = vrot.lane.b32.xlu0 %v1770_v38, %s10070_s7  ;;  %v3559_v5 = vand.u32 4294901760, %v11838_v0 }
 0x289   :  { %v1275_v17 = vpop.permute.xlu1 %1274  ;;  %v1146_v49 = vpop.permute.xlu0 %1145  ;;  %9136 = vmatprep.mubr.f32.mxu0 %v3559_v5  ;;  %v3560_v36 = vsub.f32 %v11838_v0, %v3559_v5  ;;  %v2988_v23 = vld [vmem:[#allocation3 + $0xd8] sm:$0xff] }
 0x28a   :  { %1343 = vst.msk [vmem:[#allocation3 + $0xe0] sm:$0xff] %vm1314_vm10, %v1275_v17  ;;  %v3113_v11 = vsel %vm3030_vm13, %v2988_v23, 0 }
 0x28b   :  { %1213 = vst.msk [vmem:[#allocation3 + $0xe8] sm:$0xff] %vm1183_vm9, %v1146_v49  ;;  %2313 = vrot.lane.b32.xlu1 %v1770_v38, %s10067_s20  ;;  %1843 = vrot.lane.b32.xlu0 %v1768_v51, %s10066_s19  ;;  %v3561_v53 = vand.u32 4294901760, %v3560_v36  ;;  %v11851_v54 = vand.u32 4294901760, %v3113_v11  ;;  %v180_v36 = vld [vmem:[%s14960_s0 + $0x178] sm:$0xff] }
 0x28c   :  { %245 = vst.msk [vmem:[#allocation2 + $0x279] sm:$0xff] %vm23_vm0, %v180_v36  ;;  %v1980_v36 = vrot.slane %v11574_v46, 2 }
 0x28d   :  { %v879_v27 = vpop.permute.xlu1 %878  ;;  %v750_v15 = vpop.permute.xlu0 %749  ;;  %8818 = vmatprep.mubr.f32.mxu1 %v3561_v53  ;;  %v11855_v5 = vsub.f32 %v3113_v11, %v11851_v54  ;;  %v1772_v53 = vrot.slane %v11574_v46, 1 }
 0x28e   :  { %945 = vst.msk [vmem:[#allocation3 + $0xf0] sm:$0xff] %vm914_vm7, %v879_v27 }
 0x28f   :  { %15123 = vst [vmem:[#allocation19_spill] sm:$0xff] %v11855_v5  ;;  %815 = vst.msk [vmem:[#allocation3 + $0xf8] sm:$0xff] %vm783_vm6, %v750_v15  ;;  %2839 = vrot.lane.b32.xlu1 %v1978_v58, %s10071_s12  ;;  %2444 = vrot.lane.b32.xlu0 %v1976_v57, %s10068_s23  ;;  %v3569_v51 = vand.u32 4294901760, %v11855_v5 }
 0x291   :  { %v1410_v16 = vpop.permute.xlu1 %1409  ;;  %v1277_v17 = vpop.permute.xlu0 %1276  ;;  %9137 = vmatmul.mubr.f32.gmra.mrb[26].mxu0 %v3569_v51  ;;  %v3570_v49 = vsub.f32 %v11855_v5, %v3569_v51 }
 0x292   :  { %1478 = vst.msk [vmem:[#allocation3 + $0xe0] sm:$0xff] %vm1449_vm11, %v1410_v16 }
 0x293   :  { %1344 = vst.msk [vmem:[#allocation3 + $0xe8] sm:$0xff] %vm1314_vm10, %v1277_v17  ;;  %2051 = vrot.lane.b32.xlu1 %v1976_v57, %s10065_s18  ;;  %1845 = vrot.lane.b32.xlu0 %v1770_v38, %s10066_s19  ;;  %v3571_v15 = vand.u32 4294901760, %v3570_v49  ;;  %v11880_v57 = vld [vmem:[#allocation2 + $0x270] sm:$0xff]  ;;  %v1771_v38 = vrot.slane %v11564_v22, 1  ;;  %v11892_v16 = vld [vmem:[#allocation2 + $0x278] sm:$0xff] }
 0x294   :  { %1687 = vst.msk [vmem:[#allocation3 + $0x180] sm:$0xff] %vm23_vm0, %v11880_v57  ;;  %1688 = vst.msk [vmem:[#allocation3 + $0x188] sm:$0xff] %vm23_vm0, %v11892_v16 }
 0x295   :  { %v1014_v23 = vpop.permute.xlu1 %1013  ;;  %v881_v11 = vpop.permute.xlu0 %880  ;;  %8819 = vmatmul.mubr.f32.gmra.mrb[26].mxu1 %v3571_v15  ;;  %v1773_v28 = vsel %vm396_vm3, %v1771_v38, %v1772_v53  ;;  %v1631_v15 = vld [vmem:[#allocation2 + $0x220] sm:$0x3] }
 0x296   :  { %1080 = vst.msk [vmem:[#allocation3 + $0xf0] sm:$0xff] %vm1049_vm8, %v1014_v23  ;;  %v1774_v23 = vrot.slane %v1631_v15, 1 }
 0x297   :  { %946 = vst.msk [vmem:[#allocation3 + $0xf8] sm:$0xff] %vm914_vm7, %v881_v11  ;;  %2574 = vrot.lane.b32.xlu1 %v11564_v22, %s10069_s26  ;;  %2446 = vrot.lane.b32.xlu0 %v1978_v58, %s10068_s23 }
 0x299   :  { %v1544_v27 = vpop.permute.xlu1 %1543  ;;  %v1412_v51 = vpop.permute.xlu0 %1411 }
 0x29a   :  { %1612 = vst.msk [vmem:[#allocation3 + $0xe0] sm:$0xff] %vm1583_vm12, %v1544_v27 }
 0x29b   :  { %1479 = vst.msk [vmem:[#allocation3 + $0xe8] sm:$0xff] %vm1449_vm11, %v1412_v51  ;;  %2181 = vrot.lane.b32.xlu1 %v11564_v22, %s10064_s17  ;;  %2053 = vrot.lane.b32.xlu0 %v1978_v58, %s10065_s18  ;;  %v1979_v58 = vrot.slane %v11564_v22, 2 }
 0x29d   :  { %v1148_v17 = vpop.permute.xlu1 %1147  ;;  %v1016_v49 = vpop.permute.xlu0 %1015  ;;  %v1981_v22 = vsel %vm606_vm2, %v1979_v58, %v1980_v36 }
 0x29e   :  { %1214 = vst.msk [vmem:[#allocation3 + $0xf0] sm:$0xff] %vm1183_vm9, %v1148_v17 }
 0x29f   :  { %1081 = vst.msk [vmem:[#allocation3 + $0xf8] sm:$0xff] %vm1049_vm8, %v1016_v49  ;;  %2708 = vrot.lane.b32.xlu1 %v1773_v28, %s10070_s7  ;;  %2576 = vrot.lane.b32.xlu0 %v11574_v46, %s10069_s26  ;;  %v1775_v49 = vsel %vm396_vm3, %v1772_v53, %v1774_v23 }
 0x2a1   :  { %v1832_v11 = vpop.permute.xlu1 %1831  ;;  %v1546_v38 = vpop.permute.xlu0 %1545  ;;  %v2989_v27 = vld [vmem:[#allocation3 + $0xe0] sm:$0xff] }
 0x2a2   :  { %1927 = vst.msk [vmem:[#allocation3 + $0x100] sm:$0xff] %vm573_vm5, %v1832_v11  ;;  %v3116_v51 = vsel %vm3030_vm13, %v2989_v27, 0  ;;  %v1982_v11 = vrot.slane %v1631_v15, 2 }
 0x2a3   :  { %1613 = vst.msk [vmem:[#allocation3 + $0xe8] sm:$0xff] %vm1583_vm12, %v1546_v38  ;;  %2315 = vrot.lane.b32.xlu1 %v1773_v28, %s10067_s20  ;;  %2183 = vrot.lane.b32.xlu0 %v11574_v46, %s10064_s17  ;;  %v11909_v17 = vand.u32 4294901760, %v3116_v51 }
 0x2a4   :  { %v1983_v15 = vsel %vm606_vm2, %v1980_v36, %v1982_v11  ;;  %v181_v36 = vld [vmem:[%s14960_s0 + $0x180] sm:$0xff] }
 0x2a5   :  { %v1279_v5 = vpop.permute.xlu1 %1278  ;;  %v1150_v0 = vpop.permute.xlu0 %1149  ;;  %v11914_v44 = vsub.f32 %v3116_v51, %v11909_v17  ;;  %246 = vst.msk [vmem:[#allocation2 + $0x289] sm:$0xff] %vm23_vm0, %v181_v36 }
 0x2a6   :  { %1345 = vst.msk [vmem:[#allocation3 + $0xf0] sm:$0xff] %vm1314_vm10, %v1279_v5 }
 0x2a7   :  { %15124 = vst [vmem:[#allocation20_spill] sm:$0xff] %v11914_v44  ;;  %1215 = vst.msk [vmem:[#allocation3 + $0xf8] sm:$0xff] %vm1183_vm9, %v1150_v0  ;;  %2841 = vrot.lane.b32.xlu1 %v1981_v22, %s10071_s12  ;;  %2710 = vrot.lane.b32.xlu0 %v1775_v49, %s10070_s7  ;;  %v3579_v46 = vand.u32 4294901760, %v11914_v44 }
 0x2a9   :  { %v2040_v38 = vpop.permute.xlu1 %2039  ;;  %v1834_v58 = vpop.permute.xlu0 %1833  ;;  %9139 = vmatprep.mubr.f32.mxu0 %v3579_v46  ;;  %v3580_v53 = vsub.f32 %v11914_v44, %v3579_v46 }
 0x2aa   :  { %v2990_v23 = vld [vmem:[#allocation3 + $0xe8] sm:$0xff]  ;;  %2135 = vst.msk [vmem:[#allocation3 + $0x100] sm:$0xff] %vm783_vm6, %v2040_v38 }
 0x2ab   :  { %1928 = vst.msk [vmem:[#allocation3 + $0x108] sm:$0xff] %vm573_vm5, %v1834_v58  ;;  %v3119_v5 = vsel %vm3030_vm13, %v2990_v23, 0  ;;  %2317 = vrot.lane.b32.xlu1 %v1775_v49, %s10067_s20  ;;  %1847 = vrot.lane.b32.xlu0 %v1773_v28, %s10066_s19  ;;  %v3581_v0 = vand.u32 4294901760, %v3580_v53  ;;  %v182_v53 = vld [vmem:[%s14960_s0 + $0x188] sm:$0xff] }
 0x2ac   :  { %v11927_v27 = vand.u32 4294901760, %v3119_v5  ;;  %247 = vst.msk [vmem:[#allocation2 + $0x291] sm:$0xff] %vm23_vm0, %v182_v53  ;;  %v1634_v53 = vld [vmem:[#allocation2 + $0x238] sm:$0x3] }
 0x2ad   :  { %v1414_v51 = vpop.permute.xlu1 %1413  ;;  %v1281_v56 = vpop.permute.xlu0 %1280  ;;  %8821 = vmatprep.mubr.f32.mxu1 %v3581_v0  ;;  %v1777_v0 = vrot.slane %v11658_v41, 1 }
 0x2ae   :  { %15125 = vst [vmem:[#allocation21_spill] sm:$0xff] %v11927_v27  ;;  %v11931_v46 = vsub.f32 %v3119_v5, %v11927_v27  ;;  %1480 = vst.msk [vmem:[#allocation3 + $0xf0] sm:$0xff] %vm1449_vm11, %v1414_v51 }
 0x2af   :  { %1346 = vst.msk [vmem:[#allocation3 + $0xf8] sm:$0xff] %vm1314_vm10, %v1281_v56  ;;  %2843 = vrot.lane.b32.xlu1 %v1983_v15, %s10071_s12  ;;  %2448 = vrot.lane.b32.xlu0 %v1981_v22, %s10068_s23 }
 0x2b0   :  { %15126 = vst [vmem:[#allocation22_spill] sm:$0xff] %v11931_v46  ;;  %v3589_v28 = vand.u32 4294901760, %v11931_v46 }
 0x2b1   :  { %v2170_v11 = vpop.permute.xlu1 %2169  ;;  %v2042_v38 = vpop.permute.xlu0 %2041 }
 0x2b2   :  { %9140 = vmatmul.mubr.f32.gmra.mrb[28].mxu0 %v3589_v28  ;;  %v3590_v58 = vsub.f32 %v11931_v46, %v3589_v28  ;;  %2265 = vst.msk [vmem:[#allocation3 + $0x100] sm:$0xff] %vm914_vm7, %v2170_v11 }
 0x2b3   :  { %2136 = vst.msk [vmem:[#allocation3 + $0x108] sm:$0xff] %vm783_vm6, %v2042_v38  ;;  %2055 = vrot.lane.b32.xlu1 %v1981_v22, %s10065_s18  ;;  %1849 = vrot.lane.b32.xlu0 %v1775_v49, %s10066_s19  ;;  %v11956_v22 = vld [vmem:[#allocation2 + $0x288] sm:$0xff]  ;;  %v1776_v49 = vrot.slane %v11644_v34, 1  ;;  %v11968_v11 = vld [vmem:[#allocation2 + $0x290] sm:$0xff] }
 0x2b4   :  { %v3591_v56 = vand.u32 4294901760, %v3590_v58  ;;  %1689 = vst.msk [vmem:[#allocation3 + $0x190] sm:$0xff] %vm23_vm0, %v11956_v22  ;;  %1690 = vst.msk [vmem:[#allocation3 + $0x198] sm:$0xff] %vm23_vm0, %v11968_v11 }
 0x2b5   :  { %v1548_v23 = vpop.permute.xlu1 %1547  ;;  %v1416_v5 = vpop.permute.xlu0 %1415  ;;  %v1778_v36 = vsel %vm396_vm3, %v1776_v49, %v1777_v0  ;;  %v1985_v49 = vrot.slane %v11658_v41, 2 }
 0x2b6   :  { %8822 = vmatmul.mubr.f32.gmra.mrb[28].mxu1 %v3591_v56  ;;  %1614 = vst.msk [vmem:[#allocation3 + $0xf0] sm:$0xff] %vm1583_vm12, %v1548_v23 }
 0x2b7   :  { %1481 = vst.msk [vmem:[#allocation3 + $0xf8] sm:$0xff] %vm1449_vm11, %v1416_v5  ;;  %2578 = vrot.lane.b32.xlu1 %v11644_v34, %s10069_s26  ;;  %2450 = vrot.lane.b32.xlu0 %v1983_v15, %s10068_s23  ;;  %v1984_v5 = vrot.slane %v11644_v34, 2 }
 0x2b9   :  { %v2304_v51 = vpop.permute.xlu1 %2303  ;;  %v2172_v28 = vpop.permute.xlu0 %2171 }
 0x2ba   :  { %2399 = vst.msk [vmem:[#allocation3 + $0x100] sm:$0xff] %vm1049_vm8, %v2304_v51  ;;  %v1779_v51 = vrot.slane %v1634_v53, 1 }
 0x2bb   :  { %2266 = vst.msk [vmem:[#allocation3 + $0x108] sm:$0xff] %vm914_vm7, %v2172_v28  ;;  %2185 = vrot.lane.b32.xlu1 %v11644_v34, %s10064_s17  ;;  %2057 = vrot.lane.b32.xlu0 %v1983_v15, %s10065_s18  ;;  %v1986_v34 = vsel %vm606_vm2, %v1984_v5, %v1985_v49 }
 0x2bd   :  { %v1836_v38 = vpop.permute.xlu1 %1835  ;;  %v1550_v58 = vpop.permute.xlu0 %1549  ;;  %v2991_v56 = vld [vmem:[#allocation3 + $0xf0] sm:$0xff] }
 0x2be   :  { %1929 = vst.msk [vmem:[#allocation3 + $0x110] sm:$0xff] %vm573_vm5, %v1836_v38  ;;  %v3122_v23 = vsel %vm3030_vm13, %v2991_v56, 0  ;;  %v1780_v56 = vsel %vm396_vm3, %v1777_v0, %v1779_v51  ;;  %v1987_v0 = vrot.slane %v1634_v53, 2 }
 0x2bf   :  { %1615 = vst.msk [vmem:[#allocation3 + $0xf8] sm:$0xff] %vm1583_vm12, %v1550_v58  ;;  %2712 = vrot.lane.b32.xlu1 %v1778_v36, %s10070_s7  ;;  %2580 = vrot.lane.b32.xlu0 %v11658_v41, %s10069_s26  ;;  %v11978_v15 = vand.u32 4294901760, %v3122_v23 }
 0x2c1   :  { %15127 = vst [vmem:[#allocation23_spill] sm:$0xff] %v11978_v15  ;;  %v2437_v28 = vpop.permute.xlu1 %2436  ;;  %v2306_v46 = vpop.permute.xlu0 %2305  ;;  %v11983_v38 = vsub.f32 %v3122_v23, %v11978_v15 }
 0x2c2   :  { %2532 = vst.msk [vmem:[#allocation3 + $0x100] sm:$0xff] %vm1183_vm9, %v2437_v28 }
 0x2c3   :  { %15128 = vst [vmem:[#allocation24_spill] sm:$0xff] %v11983_v38  ;;  %2400 = vst.msk [vmem:[#allocation3 + $0x108] sm:$0xff] %vm1049_vm8, %v2306_v46  ;;  %2319 = vrot.lane.b32.xlu1 %v1778_v36, %s10067_s20  ;;  %2187 = vrot.lane.b32.xlu0 %v11658_v41, %s10064_s17  ;;  %v3599_v58 = vand.u32 4294901760, %v11983_v38 }
 0x2c5   :  { %v2044_v44 = vpop.permute.xlu1 %2043  ;;  %v1838_v27 = vpop.permute.xlu0 %1837  ;;  %9142 = vmatprep.mubr.f32.mxu0 %v3599_v58  ;;  %v3600_v23 = vsub.f32 %v11983_v38, %v3599_v58 }
 0x2c6   :  { %v2992_v15 = vld [vmem:[#allocation3 + $0xf8] sm:$0xff]  ;;  %2137 = vst.msk [vmem:[#allocation3 + $0x110] sm:$0xff] %vm783_vm6, %v2044_v44 }
 0x2c7   :  { %1930 = vst.msk [vmem:[#allocation3 + $0x118] sm:$0xff] %vm573_vm5, %v1838_v27  ;;  %v3125_v46 = vsel %vm3030_vm13, %v2992_v15, 0  ;;  %2845 = vrot.lane.b32.xlu1 %v1986_v34, %s10071_s12  ;;  %2714 = vrot.lane.b32.xlu0 %v1780_v56, %s10070_s7  ;;  %v3601_v41 = vand.u32 4294901760, %v3600_v23  ;;  %v1988_v27 = vsel %vm606_vm2, %v1985_v49, %v1987_v0  ;;  %v184_v0 = vld [vmem:[%s14960_s0 + $0x198] sm:$0xff] }
 0x2c8   :  { %v11999_v5 = vand.u32 4294901760, %v3125_v46  ;;  %249 = vst.msk [vmem:[#allocation2 + $0x2a9] sm:$0xff] %vm23_vm0, %v184_v0  ;;  %v1990_v0 = vrot.slane %v11740_v40, 2 }
 0x2c9   :  { %v2567_v51 = vpop.permute.xlu1 %2566  ;;  %v2439_v28 = vpop.permute.xlu0 %2438  ;;  %8824 = vmatprep.mubr.f32.mxu1 %v3601_v41 }
 0x2ca   :  { %15129 = vst [vmem:[#allocation25_spill] sm:$0xff] %v11999_v5  ;;  %v12002_v58 = vsub.f32 %v3125_v46, %v11999_v5  ;;  %2662 = vst.msk [vmem:[#allocation3 + $0x100] sm:$0xff] %vm1314_vm10, %v2567_v51 }
 0x2cb   :  { %2533 = vst.msk [vmem:[#allocation3 + $0x108] sm:$0xff] %vm1183_vm9, %v2439_v28  ;;  %2321 = vrot.lane.b32.xlu1 %v1780_v56, %s10067_s20  ;;  %1851 = vrot.lane.b32.xlu0 %v1778_v36, %s10066_s19  ;;  %v183_v36 = vld [vmem:[%s14960_s0 + $0x190] sm:$0xff] }
 0x2cc   :  { %15130 = vst [vmem:[#allocation26_spill] sm:$0xff] %v12002_v58  ;;  %v3609_v44 = vand.u32 4294901760, %v12002_v58  ;;  %248 = vst.msk [vmem:[#allocation2 + $0x2a1] sm:$0xff] %vm23_vm0, %v183_v36 }
 0x2cd   :  { %v2174_v15 = vpop.permute.xlu1 %2173  ;;  %v2046_v53 = vpop.permute.xlu0 %2045 }
 0x2ce   :  { %9143 = vmatmul.mubr.f32.gmra.mrb[30].mxu0 %v3609_v44  ;;  %v3610_v23 = vsub.f32 %v12002_v58, %v3609_v44  ;;  %2267 = vst.msk [vmem:[#allocation3 + $0x110] sm:$0xff] %vm914_vm7, %v2174_v15  ;;  %v1782_v44 = vrot.slane %v11740_v40, 1 }
 0x2cf   :  { %2138 = vst.msk [vmem:[#allocation3 + $0x118] sm:$0xff] %vm783_vm6, %v2046_v53  ;;  %2847 = vrot.lane.b32.xlu1 %v1988_v27, %s10071_s12  ;;  %2452 = vrot.lane.b32.xlu0 %v1986_v34, %s10068_s23 }
 0x2d0   :  { %v3611_v46 = vand.u32 4294901760, %v3610_v23 }
 0x2d1   :  { %v2701_v49 = vpop.permute.xlu1 %2700  ;;  %v2569_v41 = vpop.permute.xlu0 %2568 }
 0x2d2   :  { %8825 = vmatmul.mubr.f32.gmra.mrb[30].mxu1 %v3611_v46  ;;  %2796 = vst.msk [vmem:[#allocation3 + $0x100] sm:$0xff] %vm1449_vm11, %v2701_v49 }
 0x2d3   :  { %2663 = vst.msk [vmem:[#allocation3 + $0x108] sm:$0xff] %vm1314_vm10, %v2569_v41  ;;  %2059 = vrot.lane.b32.xlu1 %v1986_v34, %s10065_s18  ;;  %1853 = vrot.lane.b32.xlu0 %v1780_v56, %s10066_s19  ;;  %v12032_v34 = vld [vmem:[#allocation2 + $0x2a0] sm:$0xff]  ;;  %v1781_v56 = vrot.slane %v11728_v33, 1  ;;  %v12044_v46 = vld [vmem:[#allocation2 + $0x2a8] sm:$0xff]  ;;  %v1637_v41 = vld [vmem:[#allocation2 + $0x250] sm:$0x3] }
 0x2d4   :  { %1691 = vst.msk [vmem:[#allocation3 + $0x1a0] sm:$0xff] %vm23_vm0, %v12032_v34  ;;  %1692 = vst.msk [vmem:[#allocation3 + $0x1a8] sm:$0xff] %vm23_vm0, %v12044_v46 }
 0x2d5   :  { %v2308_v51 = vpop.permute.xlu1 %2307  ;;  %v2176_v28 = vpop.permute.xlu0 %2175  ;;  %v1783_v23 = vsel %vm396_vm3, %v1781_v56, %v1782_v44 }
 0x2d6   :  { %2401 = vst.msk [vmem:[#allocation3 + $0x110] sm:$0xff] %vm1049_vm8, %v2308_v51  ;;  %v1784_v51 = vrot.slane %v1637_v41, 1 }
 0x2d7   :  { %2268 = vst.msk [vmem:[#allocation3 + $0x118] sm:$0xff] %vm914_vm7, %v2176_v28  ;;  %2582 = vrot.lane.b32.xlu1 %v11728_v33, %s10069_s26  ;;  %2454 = vrot.lane.b32.xlu0 %v1988_v27, %s10068_s23 }
 0x2d9   :  { %v2834_v15 = vpop.permute.xlu1 %2833  ;;  %v2703_v53 = vpop.permute.xlu0 %2702 }
 0x2da   :  { %2929 = vst.msk [vmem:[#allocation3 + $0x100] sm:$0xff] %vm1583_vm12, %v2834_v15 }
 0x2db   :  { %2797 = vst.msk [vmem:[#allocation3 + $0x108] sm:$0xff] %vm1449_vm11, %v2703_v53  ;;  %2189 = vrot.lane.b32.xlu1 %v11728_v33, %s10064_s17  ;;  %2061 = vrot.lane.b32.xlu0 %v1988_v27, %s10065_s18  ;;  %v1989_v27 = vrot.slane %v11728_v33, 2 }
 0x2dd   :  { %v2310_v36 = vpop.permute.xlu1 %2309  ;;  %v1840_v49 = vpop.permute.xlu0 %1839  ;;  %v1991_v33 = vsel %vm606_vm2, %v1989_v27, %v1990_v0 }
 0x2de   :  { %2402 = vst.msk [vmem:[#allocation3 + $0x118] sm:$0xff] %vm1049_vm8, %v2310_v36 }
 0x2df   :  { %1931 = vst.msk [vmem:[#allocation3 + $0x120] sm:$0xff] %vm573_vm5, %v1840_v49  ;;  %2716 = vrot.lane.b32.xlu1 %v1783_v23, %s10070_s7  ;;  %2584 = vrot.lane.b32.xlu0 %v11740_v40, %s10069_s26  ;;  %v1785_v49 = vsel %vm396_vm3, %v1782_v44, %v1784_v51 }
 0x2e1   :  { %v2836_v28 = vpop.permute.xlu1 %2835  ;;  %v2441_v56 = vpop.permute.xlu0 %2440  ;;  %v2993_v15 = vld [vmem:[#allocation3 + $0x100] sm:$0xff] }
 0x2e2   :  { %2930 = vst.msk [vmem:[#allocation3 + $0x108] sm:$0xff] %vm1583_vm12, %v2836_v28  ;;  %v3128_v53 = vsel %vm3030_vm13, %v2993_v15, 0  ;;  %v1992_v28 = vrot.slane %v1637_v41, 2 }
 0x2e3   :  { %2534 = vst.msk [vmem:[#allocation3 + $0x110] sm:$0xff] %vm1183_vm9, %v2441_v56  ;;  %2323 = vrot.lane.b32.xlu1 %v1783_v23, %s10067_s20  ;;  %2191 = vrot.lane.b32.xlu0 %v11740_v40, %s10064_s17  ;;  %v12061_v36 = vand.u32 4294901760, %v3128_v53 }
 0x2e4   :  { %v1993_v41 = vsel %vm606_vm2, %v1990_v0, %v1992_v28  ;;  %v185_v0 = vld [vmem:[%s14960_s0 + $0x1a0] sm:$0xff] }
 0x2e5   :  { %15131 = vst [vmem:[#allocation27_spill] sm:$0xff] %v12061_v36  ;;  %v2048_v58 = vpop.permute.xlu1 %2047  ;;  %v1842_v38 = vpop.permute.xlu0 %1841  ;;  %v12066_v5 = vsub.f32 %v3128_v53, %v12061_v36  ;;  %250 = vst.msk [vmem:[#allocation2 + $0x2b9] sm:$0xff] %vm23_vm0, %v185_v0 }
 0x2e6   :  { %2139 = vst.msk [vmem:[#allocation3 + $0x120] sm:$0xff] %vm783_vm6, %v2048_v58 }
 0x2e7   :  { %15132 = vst [vmem:[#allocation28_spill] sm:$0xff] %v12066_v5  ;;  %1932 = vst.msk [vmem:[#allocation3 + $0x128] sm:$0xff] %vm573_vm5, %v1842_v38  ;;  %2849 = vrot.lane.b32.xlu1 %v1991_v33, %s10071_s12  ;;  %2718 = vrot.lane.b32.xlu0 %v1785_v49, %s10070_s7  ;;  %v3619_v40 = vand.u32 4294901760, %v12066_v5 }
 0x2e9   :  { %v2571_v56 = vpop.permute.xlu1 %2570  ;;  %v2443_v27 = vpop.permute.xlu0 %2442  ;;  %9145 = vmatprep.mubr.f32.mxu0 %v3619_v40  ;;  %v3620_v44 = vsub.f32 %v12066_v5, %v3619_v40  ;;  %v2994_v51 = vld [vmem:[#allocation3 + $0x108] sm:$0xff] }
 0x2ea   :  { %2664 = vst.msk [vmem:[#allocation3 + $0x110] sm:$0xff] %vm1314_vm10, %v2571_v56  ;;  %v3131_v58 = vsel %vm3030_vm13, %v2994_v51, 0 }
 0x2eb   :  { %2535 = vst.msk [vmem:[#allocation3 + $0x118] sm:$0xff] %vm1183_vm9, %v2443_v27  ;;  %2325 = vrot.lane.b32.xlu1 %v1785_v49, %s10067_s20  ;;  %1855 = vrot.lane.b32.xlu0 %v1783_v23, %s10066_s19  ;;  %v3621_v38 = vand.u32 4294901760, %v3620_v44  ;;  %v12079_v15 = vand.u32 4294901760, %v3131_v58  ;;  %v186_v44 = vld [vmem:[%s14960_s0 + $0x1a8] sm:$0xff] }
 0x2ec   :  { %251 = vst.msk [vmem:[#allocation2 + $0x2c1] sm:$0xff] %vm23_vm0, %v186_v44  ;;  %v1995_v44 = vrot.slane %v11816_v29, 2 }
 0x2ed   :  { %15133 = vst [vmem:[#allocation29_spill] sm:$0xff] %v12079_v15  ;;  %v2178_v53 = vpop.permute.xlu1 %2177  ;;  %v2050_v36 = vpop.permute.xlu0 %2049  ;;  %8827 = vmatprep.mubr.f32.mxu1 %v3621_v38  ;;  %v12083_v40 = vsub.f32 %v3131_v58, %v12079_v15  ;;  %v1787_v38 = vrot.slane %v11816_v29, 1 }
 0x2ee   :  { %2269 = vst.msk [vmem:[#allocation3 + $0x120] sm:$0xff] %vm914_vm7, %v2178_v53 }
 0x2ef   :  { %15134 = vst [vmem:[#allocation30_spill] sm:$0xff] %v12083_v40  ;;  %2140 = vst.msk [vmem:[#allocation3 + $0x128] sm:$0xff] %vm783_vm6, %v2050_v36  ;;  %2851 = vrot.lane.b32.xlu1 %v1993_v41, %s10071_s12  ;;  %2456 = vrot.lane.b32.xlu0 %v1991_v33, %s10068_s23  ;;  %v3629_v23 = vand.u32 4294901760, %v12083_v40 }
 0x2f1   :  { %v2705_v28 = vpop.permute.xlu1 %2704  ;;  %v2573_v56 = vpop.permute.xlu0 %2572  ;;  %9146 = vmatmul.mubr.f32.gmra.mrb[32].mxu0 %v3629_v23  ;;  %v3630_v27 = vsub.f32 %v12083_v40, %v3629_v23 }
 0x2f2   :  { %2798 = vst.msk [vmem:[#allocation3 + $0x110] sm:$0xff] %vm1449_vm11, %v2705_v28 }
 0x2f3   :  { %2665 = vst.msk [vmem:[#allocation3 + $0x118] sm:$0xff] %vm1314_vm10, %v2573_v56  ;;  %2063 = vrot.lane.b32.xlu1 %v1991_v33, %s10065_s18  ;;  %1857 = vrot.lane.b32.xlu0 %v1785_v49, %s10066_s19  ;;  %v3631_v36 = vand.u32 4294901760, %v3630_v27  ;;  %v12108_v33 = vld [vmem:[#allocation2 + $0x2b8] sm:$0xff]  ;;  %v1786_v49 = vrot.slane %v11804_v48, 1  ;;  %v12120_v28 = vld [vmem:[#allocation2 + $0x2c0] sm:$0xff] }
 0x2f4   :  { %1693 = vst.msk [vmem:[#allocation3 + $0x1b0] sm:$0xff] %vm23_vm0, %v12108_v33  ;;  %1694 = vst.msk [vmem:[#allocation3 + $0x1b8] sm:$0xff] %vm23_vm0, %v12120_v28 }
 0x2f5   :  { %v2312_v51 = vpop.permute.xlu1 %2311  ;;  %v2180_v58 = vpop.permute.xlu0 %2179  ;;  %8828 = vmatmul.mubr.f32.gmra.mrb[32].mxu1 %v3631_v36  ;;  %v1788_v0 = vsel %vm396_vm3, %v1786_v49, %v1787_v38  ;;  %v1640_v36 = vld [vmem:[#allocation2 + $0x268] sm:$0x3] }
 0x2f6   :  { %2403 = vst.msk [vmem:[#allocation3 + $0x120] sm:$0xff] %vm1049_vm8, %v2312_v51  ;;  %v1789_v51 = vrot.slane %v1640_v36, 1 }
 0x2f7   :  { %2270 = vst.msk [vmem:[#allocation3 + $0x128] sm:$0xff] %vm914_vm7, %v2180_v58  ;;  %2586 = vrot.lane.b32.xlu1 %v11804_v48, %s10069_s26  ;;  %2458 = vrot.lane.b32.xlu0 %v1993_v41, %s10068_s23 }
 0x2f9   :  { %v2838_v53 = vpop.permute.xlu1 %2837  ;;  %v2707_v23 = vpop.permute.xlu0 %2706 }
 0x2fa   :  { %2931 = vst.msk [vmem:[#allocation3 + $0x110] sm:$0xff] %vm1583_vm12, %v2838_v53 }
 0x2fb   :  { %2799 = vst.msk [vmem:[#allocation3 + $0x118] sm:$0xff] %vm1449_vm11, %v2707_v23  ;;  %2193 = vrot.lane.b32.xlu1 %v11804_v48, %s10064_s17  ;;  %2065 = vrot.lane.b32.xlu0 %v1993_v41, %s10065_s18  ;;  %v1994_v41 = vrot.slane %v11804_v48, 2 }
 0x2fd   :  { %v2314_v56 = vpop.permute.xlu1 %2313  ;;  %v1844_v27 = vpop.permute.xlu0 %1843  ;;  %v1996_v48 = vsel %vm606_vm2, %v1994_v41, %v1995_v44 }
 0x2fe   :  { %2404 = vst.msk [vmem:[#allocation3 + $0x128] sm:$0xff] %vm1049_vm8, %v2314_v56 }
 0x2ff   :  { %1933 = vst.msk [vmem:[#allocation3 + $0x130] sm:$0xff] %vm573_vm5, %v1844_v27  ;;  %2720 = vrot.lane.b32.xlu1 %v1788_v0, %s10070_s7  ;;  %2588 = vrot.lane.b32.xlu0 %v11816_v29, %s10069_s26  ;;  %v1790_v27 = vsel %vm396_vm3, %v1787_v38, %v1789_v51 }
 0x301   :  { %v2840_v58 = vpop.permute.xlu1 %2839  ;;  %v2445_v49 = vpop.permute.xlu0 %2444  ;;  %v2995_v53 = vld [vmem:[#allocation3 + $0x110] sm:$0xff] }
 0x302   :  { %2932 = vst.msk [vmem:[#allocation3 + $0x118] sm:$0xff] %vm1583_vm12, %v2840_v58  ;;  %v3134_v23 = vsel %vm3030_vm13, %v2995_v53, 0  ;;  %v1997_v58 = vrot.slane %v1640_v36, 2 }
 0x303   :  { %2536 = vst.msk [vmem:[#allocation3 + $0x120] sm:$0xff] %vm1183_vm9, %v2445_v49  ;;  %2327 = vrot.lane.b32.xlu1 %v1788_v0, %s10067_s20  ;;  %2195 = vrot.lane.b32.xlu0 %v11816_v29, %s10064_s17  ;;  %v12137_v56 = vand.u32 4294901760, %v3134_v23 }
 0x304   :  { %v1998_v36 = vsel %vm606_vm2, %v1995_v44, %v1997_v58  ;;  %v187_v44 = vld [vmem:[%s14960_s0 + $0x1b0] sm:$0xff] }
 0x305   :  { %15135 = vst [vmem:[#allocation31_spill] sm:$0xff] %v12137_v56  ;;  %v2052_v40 = vpop.permute.xlu1 %2051  ;;  %v1846_v5 = vpop.permute.xlu0 %1845  ;;  %v12142_v15 = vsub.f32 %v3134_v23, %v12137_v56  ;;  %252 = vst.msk [vmem:[#allocation2 + $0x2d1] sm:$0xff] %vm23_vm0, %v187_v44 }
 0x306   :  { %2141 = vst.msk [vmem:[#allocation3 + $0x130] sm:$0xff] %vm783_vm6, %v2052_v40 }
 0x307   :  { %15136 = vst [vmem:[#allocation32_spill] sm:$0xff] %v12142_v15  ;;  %1934 = vst.msk [vmem:[#allocation3 + $0x138] sm:$0xff] %vm573_vm5, %v1846_v5  ;;  %2853 = vrot.lane.b32.xlu1 %v1996_v48, %s10071_s12  ;;  %2722 = vrot.lane.b32.xlu0 %v1790_v27, %s10070_s7  ;;  %v3639_v29 = vand.u32 4294901760, %v12142_v15 }
 0x309   :  { %v2575_v49 = vpop.permute.xlu1 %2574  ;;  %v2447_v41 = vpop.permute.xlu0 %2446  ;;  %9148 = vmatprep.mubr.f32.mxu0 %v3639_v29  ;;  %v3640_v38 = vsub.f32 %v12142_v15, %v3639_v29  ;;  %v2996_v51 = vld [vmem:[#allocation3 + $0x118] sm:$0xff] }
 0x30a   :  { %2666 = vst.msk [vmem:[#allocation3 + $0x120] sm:$0xff] %vm1314_vm10, %v2575_v49  ;;  %v3137_v40 = vsel %vm3030_vm13, %v2996_v51, 0 }
 0x30b   :  { %2537 = vst.msk [vmem:[#allocation3 + $0x128] sm:$0xff] %vm1183_vm9, %v2447_v41  ;;  %2329 = vrot.lane.b32.xlu1 %v1790_v27, %s10067_s20  ;;  %1859 = vrot.lane.b32.xlu0 %v1788_v0, %s10066_s19  ;;  %v3641_v5 = vand.u32 4294901760, %v3640_v38  ;;  %v12155_v53 = vand.u32 4294901760, %v3137_v40  ;;  %v188_v38 = vld [vmem:[%s14960_s0 + $0x1b8] sm:$0xff] }
 0x30c   :  { %253 = vst.msk [vmem:[#allocation2 + $0x2d9] sm:$0xff] %vm23_vm0, %v188_v38  ;;  %v2000_v38 = vrot.slane %v11892_v16, 2 }
 0x30d   :  { %15137 = vst [vmem:[#allocation33_spill] sm:$0xff] %v12155_v53  ;;  %v2182_v23 = vpop.permute.xlu1 %2181  ;;  %v2054_v56 = vpop.permute.xlu0 %2053  ;;  %8830 = vmatprep.mubr.f32.mxu1 %v3641_v5  ;;  %v12159_v29 = vsub.f32 %v3137_v40, %v12155_v53  ;;  %v1792_v5 = vrot.slane %v11892_v16, 1 }
 0x30e   :  { %2271 = vst.msk [vmem:[#allocation3 + $0x130] sm:$0xff] %vm914_vm7, %v2182_v23 }
 0x30f   :  { %15138 = vst [vmem:[#allocation34_spill] sm:$0xff] %v12159_v29  ;;  %2142 = vst.msk [vmem:[#allocation3 + $0x138] sm:$0xff] %vm783_vm6, %v2054_v56  ;;  %2855 = vrot.lane.b32.xlu1 %v1998_v36, %s10071_s12  ;;  %2460 = vrot.lane.b32.xlu0 %v1996_v48, %s10068_s23  ;;  %v3649_v0 = vand.u32 4294901760, %v12159_v29 }
 0x311   :  { %v2709_v58 = vpop.permute.xlu1 %2708  ;;  %v2577_v49 = vpop.permute.xlu0 %2576  ;;  %9149 = vmatmul.mubr.f32.gmra.mrb[34].mxu0 %v3649_v0  ;;  %v3650_v41 = vsub.f32 %v12159_v29, %v3649_v0 }
 0x312   :  { %2800 = vst.msk [vmem:[#allocation3 + $0x120] sm:$0xff] %vm1449_vm11, %v2709_v58 }
 0x313   :  { %2667 = vst.msk [vmem:[#allocation3 + $0x128] sm:$0xff] %vm1314_vm10, %v2577_v49  ;;  %2067 = vrot.lane.b32.xlu1 %v1996_v48, %s10065_s18  ;;  %1861 = vrot.lane.b32.xlu0 %v1790_v27, %s10066_s19  ;;  %v3651_v56 = vand.u32 4294901760, %v3650_v41  ;;  %v12184_v48 = vld [vmem:[#allocation2 + $0x2d0] sm:$0xff]  ;;  %v1791_v27 = vrot.slane %v11880_v57, 1  ;;  %v12196_v58 = vld [vmem:[#allocation2 + $0x2d8] sm:$0xff] }
 0x314   :  { %1695 = vst.msk [vmem:[#allocation3 + $0x1c0] sm:$0xff] %vm23_vm0, %v12184_v48  ;;  %1696 = vst.msk [vmem:[#allocation3 + $0x1c8] sm:$0xff] %vm23_vm0, %v12196_v58 }
 0x315   :  { %v2316_v51 = vpop.permute.xlu1 %2315  ;;  %v2184_v40 = vpop.permute.xlu0 %2183  ;;  %8831 = vmatmul.mubr.f32.gmra.mrb[34].mxu1 %v3651_v56  ;;  %v1793_v44 = vsel %vm396_vm3, %v1791_v27, %v1792_v5  ;;  %v1643_v56 = vld [vmem:[#allocation2 + $0x280] sm:$0x3] }
 0x316   :  { %2405 = vst.msk [vmem:[#allocation3 + $0x130] sm:$0xff] %vm1049_vm8, %v2316_v51  ;;  %v1794_v51 = vrot.slane %v1643_v56, 1 }
 0x317   :  { %2272 = vst.msk [vmem:[#allocation3 + $0x138] sm:$0xff] %vm914_vm7, %v2184_v40  ;;  %2590 = vrot.lane.b32.xlu1 %v11880_v57, %s10069_s26  ;;  %2462 = vrot.lane.b32.xlu0 %v1998_v36, %s10068_s23 }
 0x319   :  { %v2842_v23 = vpop.permute.xlu1 %2841  ;;  %v2711_v0 = vpop.permute.xlu0 %2710 }
 0x31a   :  { %2933 = vst.msk [vmem:[#allocation3 + $0x120] sm:$0xff] %vm1583_vm12, %v2842_v23 }
 0x31b   :  { %2801 = vst.msk [vmem:[#allocation3 + $0x128] sm:$0xff] %vm1449_vm11, %v2711_v0  ;;  %2197 = vrot.lane.b32.xlu1 %v11880_v57, %s10064_s17  ;;  %2069 = vrot.lane.b32.xlu0 %v1998_v36, %s10065_s18  ;;  %v1999_v36 = vrot.slane %v11880_v57, 2 }
 0x31d   :  { %v2318_v49 = vpop.permute.xlu1 %2317  ;;  %v1848_v41 = vpop.permute.xlu0 %1847  ;;  %v2001_v57 = vsel %vm606_vm2, %v1999_v36, %v2000_v38 }
 0x31e   :  { %2406 = vst.msk [vmem:[#allocation3 + $0x138] sm:$0xff] %vm1049_vm8, %v2318_v49 }
 0x31f   :  { %1935 = vst.msk [vmem:[#allocation3 + $0x140] sm:$0xff] %vm573_vm5, %v1848_v41  ;;  %2724 = vrot.lane.b32.xlu1 %v1793_v44, %s10070_s7  ;;  %2592 = vrot.lane.b32.xlu0 %v11892_v16, %s10069_s26  ;;  %v1795_v41 = vsel %vm396_vm3, %v1792_v5, %v1794_v51 }
 0x321   :  { %v2844_v40 = vpop.permute.xlu1 %2843  ;;  %v2449_v27 = vpop.permute.xlu0 %2448  ;;  %v2997_v23 = vld [vmem:[#allocation3 + $0x120] sm:$0xff] }
 0x322   :  { %2934 = vst.msk [vmem:[#allocation3 + $0x128] sm:$0xff] %vm1583_vm12, %v2844_v40  ;;  %v3140_v0 = vsel %vm3030_vm13, %v2997_v23, 0  ;;  %v2002_v40 = vrot.slane %v1643_v56, 2 }
 0x323   :  { %2538 = vst.msk [vmem:[#allocation3 + $0x130] sm:$0xff] %vm1183_vm9, %v2449_v27  ;;  %2331 = vrot.lane.b32.xlu1 %v1793_v44, %s10067_s20  ;;  %2199 = vrot.lane.b32.xlu0 %v11892_v16, %s10064_s17  ;;  %v12213_v49 = vand.u32 4294901760, %v3140_v0 }
 0x324   :  { %v2003_v56 = vsel %vm606_vm2, %v2000_v38, %v2002_v40  ;;  %v189_v38 = vld [vmem:[%s14960_s0 + $0x1c0] sm:$0xff] }
 0x325   :  { %15139 = vst [vmem:[#allocation35_spill] sm:$0xff] %v12213_v49  ;;  %v2056_v29 = vpop.permute.xlu1 %2055  ;;  %v1850_v15 = vpop.permute.xlu0 %1849  ;;  %v12218_v53 = vsub.f32 %v3140_v0, %v12213_v49  ;;  %254 = vst.msk [vmem:[#allocation2 + $0x2e9] sm:$0xff] %vm23_vm0, %v189_v38 }
 0x326   :  { %2143 = vst.msk [vmem:[#allocation3 + $0x140] sm:$0xff] %vm783_vm6, %v2056_v29 }
 0x327   :  { %15140 = vst [vmem:[#allocation36_spill] sm:$0xff] %v12218_v53  ;;  %1936 = vst.msk [vmem:[#allocation3 + $0x148] sm:$0xff] %vm573_vm5, %v1850_v15  ;;  %2857 = vrot.lane.b32.xlu1 %v2001_v57, %s10071_s12  ;;  %2726 = vrot.lane.b32.xlu0 %v1795_v41, %s10070_s7  ;;  %v3659_v16 = vand.u32 4294901760, %v12218_v53 }
 0x329   :  { %v2579_v27 = vpop.permute.xlu1 %2578  ;;  %v2451_v36 = vpop.permute.xlu0 %2450  ;;  %9151 = vmatprep.mubr.f32.mxu0 %v3659_v16  ;;  %v3660_v5 = vsub.f32 %v12218_v53, %v3659_v16  ;;  %v2998_v51 = vld [vmem:[#allocation3 + $0x128] sm:$0xff] }
 0x32a   :  { %2668 = vst.msk [vmem:[#allocation3 + $0x130] sm:$0xff] %vm1314_vm10, %v2579_v27  ;;  %v3143_v29 = vsel %vm3030_vm13, %v2998_v51, 0 }
 0x32b   :  { %2539 = vst.msk [vmem:[#allocation3 + $0x138] sm:$0xff] %vm1183_vm9, %v2451_v36  ;;  %2333 = vrot.lane.b32.xlu1 %v1795_v41, %s10067_s20  ;;  %1863 = vrot.lane.b32.xlu0 %v1793_v44, %s10066_s19  ;;  %v3661_v15 = vand.u32 4294901760, %v3660_v5  ;;  %v12231_v23 = vand.u32 4294901760, %v3143_v29  ;;  %v190_v5 = vld [vmem:[%s14960_s0 + $0x1c8] sm:$0xff] }
 0x32c   :  { %255 = vst.msk [vmem:[#allocation2 + $0x2f1] sm:$0xff] %vm23_vm0, %v190_v5  ;;  %v2005_v5 = vrot.slane %v11968_v11, 2 }
 0x32d   :  { %15141 = vst [vmem:[#allocation37_spill] sm:$0xff] %v12231_v23  ;;  %v2186_v0 = vpop.permute.xlu1 %2185  ;;  %v2058_v49 = vpop.permute.xlu0 %2057  ;;  %8833 = vmatprep.mubr.f32.mxu1 %v3661_v15  ;;  %v12235_v16 = vsub.f32 %v3143_v29, %v12231_v23  ;;  %v1797_v15 = vrot.slane %v11968_v11, 1 }
 0x32e   :  { %2273 = vst.msk [vmem:[#allocation3 + $0x140] sm:$0xff] %vm914_vm7, %v2186_v0 }
 0x32f   :  { %15142 = vst [vmem:[#allocation38_spill] sm:$0xff] %v12235_v16  ;;  %2144 = vst.msk [vmem:[#allocation3 + $0x148] sm:$0xff] %vm783_vm6, %v2058_v49  ;;  %2859 = vrot.lane.b32.xlu1 %v2003_v56, %s10071_s12  ;;  %2464 = vrot.lane.b32.xlu0 %v2001_v57, %s10068_s23  ;;  %v3669_v44 = vand.u32 4294901760, %v12235_v16 }
 0x331   :  { %v2713_v40 = vpop.permute.xlu1 %2712  ;;  %v2581_v27 = vpop.permute.xlu0 %2580  ;;  %9152 = vmatmul.mubr.f32.gmra.mrb[36].mxu0 %v3669_v44  ;;  %v3670_v36 = vsub.f32 %v12235_v16, %v3669_v44 }
 0x332   :  { %2802 = vst.msk [vmem:[#allocation3 + $0x130] sm:$0xff] %vm1449_vm11, %v2713_v40 }
 0x333   :  { %2669 = vst.msk [vmem:[#allocation3 + $0x138] sm:$0xff] %vm1314_vm10, %v2581_v27  ;;  %2071 = vrot.lane.b32.xlu1 %v2001_v57, %s10065_s18  ;;  %1865 = vrot.lane.b32.xlu0 %v1795_v41, %s10066_s19  ;;  %v3671_v49 = vand.u32 4294901760, %v3670_v36  ;;  %v12260_v57 = vld [vmem:[#allocation2 + $0x2e8] sm:$0xff]  ;;  %v1796_v41 = vrot.slane %v11956_v22, 1  ;;  %v12272_v40 = vld [vmem:[#allocation2 + $0x2f0] sm:$0xff] }
 0x334   :  { %1697 = vst.msk [vmem:[#allocation3 + $0x1d0] sm:$0xff] %vm23_vm0, %v12260_v57  ;;  %1698 = vst.msk [vmem:[#allocation3 + $0x1d8] sm:$0xff] %vm23_vm0, %v12272_v40 }
 0x335   :  { %v2320_v51 = vpop.permute.xlu1 %2319  ;;  %v2188_v29 = vpop.permute.xlu0 %2187  ;;  %8834 = vmatmul.mubr.f32.gmra.mrb[36].mxu1 %v3671_v49  ;;  %v1798_v38 = vsel %vm396_vm3, %v1796_v41, %v1797_v15  ;;  %v1646_v49 = vld [vmem:[#allocation2 + $0x298] sm:$0x3] }
 0x336   :  { %2407 = vst.msk [vmem:[#allocation3 + $0x140] sm:$0xff] %vm1049_vm8, %v2320_v51  ;;  %v1799_v51 = vrot.slane %v1646_v49, 1 }
 0x337   :  { %2274 = vst.msk [vmem:[#allocation3 + $0x148] sm:$0xff] %vm914_vm7, %v2188_v29  ;;  %2594 = vrot.lane.b32.xlu1 %v11956_v22, %s10069_s26  ;;  %2466 = vrot.lane.b32.xlu0 %v2003_v56, %s10068_s23 }
 0x339   :  { %v2846_v0 = vpop.permute.xlu1 %2845  ;;  %v2715_v44 = vpop.permute.xlu0 %2714 }
 0x33a   :  { %2935 = vst.msk [vmem:[#allocation3 + $0x130] sm:$0xff] %vm1583_vm12, %v2846_v0 }
 0x33b   :  { %2803 = vst.msk [vmem:[#allocation3 + $0x138] sm:$0xff] %vm1449_vm11, %v2715_v44  ;;  %2201 = vrot.lane.b32.xlu1 %v11956_v22, %s10064_s17  ;;  %2073 = vrot.lane.b32.xlu0 %v2003_v56, %s10065_s18  ;;  %v2004_v56 = vrot.slane %v11956_v22, 2 }
 0x33d   :  { %v2322_v27 = vpop.permute.xlu1 %2321  ;;  %v1852_v36 = vpop.permute.xlu0 %1851  ;;  %v2006_v22 = vsel %vm606_vm2, %v2004_v56, %v2005_v5 }
 0x33e   :  { %2408 = vst.msk [vmem:[#allocation3 + $0x148] sm:$0xff] %vm1049_vm8, %v2322_v27 }
 0x33f   :  { %1937 = vst.msk [vmem:[#allocation3 + $0x150] sm:$0xff] %vm573_vm5, %v1852_v36  ;;  %2728 = vrot.lane.b32.xlu1 %v1798_v38, %s10070_s7  ;;  %2596 = vrot.lane.b32.xlu0 %v11968_v11, %s10069_s26  ;;  %v1800_v36 = vsel %vm396_vm3, %v1797_v15, %v1799_v51 }
 0x341   :  { %v2848_v29 = vpop.permute.xlu1 %2847  ;;  %v2453_v41 = vpop.permute.xlu0 %2452  ;;  %v2999_v0 = vld [vmem:[#allocation3 + $0x130] sm:$0xff] }
 0x342   :  { %2936 = vst.msk [vmem:[#allocation3 + $0x138] sm:$0xff] %vm1583_vm12, %v2848_v29  ;;  %v3146_v44 = vsel %vm3030_vm13, %v2999_v0, 0  ;;  %v2007_v29 = vrot.slane %v1646_v49, 2 }
 0x343   :  { %2540 = vst.msk [vmem:[#allocation3 + $0x140] sm:$0xff] %vm1183_vm9, %v2453_v41  ;;  %2335 = vrot.lane.b32.xlu1 %v1798_v38, %s10067_s20  ;;  %2203 = vrot.lane.b32.xlu0 %v11968_v11, %s10064_s17  ;;  %v12289_v27 = vand.u32 4294901760, %v3146_v44 }
 0x344   :  { %v2008_v49 = vsel %vm606_vm2, %v2005_v5, %v2007_v29  ;;  %v191_v5 = vld [vmem:[%s14960_s0 + $0x1d0] sm:$0xff] }
 0x345   :  { %15143 = vst [vmem:[#allocation39_spill] sm:$0xff] %v12289_v27  ;;  %v2060_v16 = vpop.permute.xlu1 %2059  ;;  %v1854_v53 = vpop.permute.xlu0 %1853  ;;  %v12294_v23 = vsub.f32 %v3146_v44, %v12289_v27  ;;  %256 = vst.msk [vmem:[#allocation2 + $0x301] sm:$0xff] %vm23_vm0, %v191_v5 }
 0x346   :  { %2145 = vst.msk [vmem:[#allocation3 + $0x150] sm:$0xff] %vm783_vm6, %v2060_v16 }
 0x347   :  { %15144 = vst [vmem:[#allocation40_spill] sm:$0xff] %v12294_v23  ;;  %1938 = vst.msk [vmem:[#allocation3 + $0x158] sm:$0xff] %vm573_vm5, %v1854_v53  ;;  %2861 = vrot.lane.b32.xlu1 %v2006_v22, %s10071_s12  ;;  %2730 = vrot.lane.b32.xlu0 %v1800_v36, %s10070_s7  ;;  %v3679_v11 = vand.u32 4294901760, %v12294_v23 }
 0x349   :  { %v2583_v41 = vpop.permute.xlu1 %2582  ;;  %v2455_v56 = vpop.permute.xlu0 %2454  ;;  %9154 = vmatprep.mubr.f32.mxu0 %v3679_v11  ;;  %v3680_v15 = vsub.f32 %v12294_v23, %v3679_v11  ;;  %v3000_v51 = vld [vmem:[#allocation3 + $0x138] sm:$0xff] }
 0x34a   :  { %2670 = vst.msk [vmem:[#allocation3 + $0x140] sm:$0xff] %vm1314_vm10, %v2583_v41  ;;  %v3149_v16 = vsel %vm3030_vm13, %v3000_v51, 0 }
 0x34b   :  { %2541 = vst.msk [vmem:[#allocation3 + $0x148] sm:$0xff] %vm1183_vm9, %v2455_v56  ;;  %2337 = vrot.lane.b32.xlu1 %v1800_v36, %s10067_s20  ;;  %1867 = vrot.lane.b32.xlu0 %v1798_v38, %s10066_s19  ;;  %v3681_v53 = vand.u32 4294901760, %v3680_v15  ;;  %v12307_v0 = vand.u32 4294901760, %v3149_v16  ;;  %v192_v15 = vld [vmem:[%s14960_s0 + $0x1d8] sm:$0xff] }
 0x34c   :  { %257 = vst.msk [vmem:[#allocation2 + $0x309] sm:$0xff] %vm23_vm0, %v192_v15  ;;  %v2010_v15 = vrot.slane %v12044_v46, 2 }
 0x34d   :  { %15145 = vst [vmem:[#allocation41_spill] sm:$0xff] %v12307_v0  ;;  %v2190_v44 = vpop.permute.xlu1 %2189  ;;  %v2062_v27 = vpop.permute.xlu0 %2061  ;;  %8836 = vmatprep.mubr.f32.mxu1 %v3681_v53  ;;  %v12311_v11 = vsub.f32 %v3149_v16, %v12307_v0  ;;  %v1802_v53 = vrot.slane %v12044_v46, 1 }
 0x34e   :  { %2275 = vst.msk [vmem:[#allocation3 + $0x150] sm:$0xff] %vm914_vm7, %v2190_v44 }
 0x34f   :  { %15146 = vst [vmem:[#allocation42_spill] sm:$0xff] %v12311_v11  ;;  %2146 = vst.msk [vmem:[#allocation3 + $0x158] sm:$0xff] %vm783_vm6, %v2062_v27  ;;  %2863 = vrot.lane.b32.xlu1 %v2008_v49, %s10071_s12  ;;  %2468 = vrot.lane.b32.xlu0 %v2006_v22, %s10068_s23  ;;  %v3689_v38 = vand.u32 4294901760, %v12311_v11 }
 0x351   :  { %v2717_v29 = vpop.permute.xlu1 %2716  ;;  %v2585_v41 = vpop.permute.xlu0 %2584  ;;  %9155 = vmatmul.mubr.f32.gmra.mrb[38].mxu0 %v3689_v38  ;;  %v3690_v56 = vsub.f32 %v12311_v11, %v3689_v38 }
 0x352   :  { %2804 = vst.msk [vmem:[#allocation3 + $0x140] sm:$0xff] %vm1449_vm11, %v2717_v29 }
 0x353   :  { %2671 = vst.msk [vmem:[#allocation3 + $0x148] sm:$0xff] %vm1314_vm10, %v2585_v41  ;;  %2075 = vrot.lane.b32.xlu1 %v2006_v22, %s10065_s18  ;;  %1869 = vrot.lane.b32.xlu0 %v1800_v36, %s10066_s19  ;;  %v3691_v27 = vand.u32 4294901760, %v3690_v56  ;;  %v12336_v22 = vld [vmem:[#allocation2 + $0x300] sm:$0xff]  ;;  %v1801_v36 = vrot.slane %v12032_v34, 1  ;;  %v12348_v29 = vld [vmem:[#allocation2 + $0x308] sm:$0xff] }
 0x354   :  { %1699 = vst.msk [vmem:[#allocation3 + $0x1e0] sm:$0xff] %vm23_vm0, %v12336_v22  ;;  %1700 = vst.msk [vmem:[#allocation3 + $0x1e8] sm:$0xff] %vm23_vm0, %v12348_v29 }
 0x355   :  { %v2324_v51 = vpop.permute.xlu1 %2323  ;;  %v2192_v16 = vpop.permute.xlu0 %2191  ;;  %8837 = vmatmul.mubr.f32.gmra.mrb[38].mxu1 %v3691_v27  ;;  %v1803_v5 = vsel %vm396_vm3, %v1801_v36, %v1802_v53  ;;  %v1649_v27 = vld [vmem:[#allocation2 + $0x2b0] sm:$0x3] }
 0x356   :  { %2409 = vst.msk [vmem:[#allocation3 + $0x150] sm:$0xff] %vm1049_vm8, %v2324_v51  ;;  %v1804_v51 = vrot.slane %v1649_v27, 1 }
 0x357   :  { %2276 = vst.msk [vmem:[#allocation3 + $0x158] sm:$0xff] %vm914_vm7, %v2192_v16  ;;  %2598 = vrot.lane.b32.xlu1 %v12032_v34, %s10069_s26  ;;  %2470 = vrot.lane.b32.xlu0 %v2008_v49, %s10068_s23 }
 0x359   :  { %v2850_v44 = vpop.permute.xlu1 %2849  ;;  %v2719_v38 = vpop.permute.xlu0 %2718 }
 0x35a   :  { %2937 = vst.msk [vmem:[#allocation3 + $0x140] sm:$0xff] %vm1583_vm12, %v2850_v44 }
 0x35b   :  { %2805 = vst.msk [vmem:[#allocation3 + $0x148] sm:$0xff] %vm1449_vm11, %v2719_v38  ;;  %2205 = vrot.lane.b32.xlu1 %v12032_v34, %s10064_s17  ;;  %2077 = vrot.lane.b32.xlu0 %v2008_v49, %s10065_s18  ;;  %v2009_v49 = vrot.slane %v12032_v34, 2 }
 0x35d   :  { %v2326_v41 = vpop.permute.xlu1 %2325  ;;  %v1856_v56 = vpop.permute.xlu0 %1855  ;;  %v2011_v34 = vsel %vm606_vm2, %v2009_v49, %v2010_v15 }
 0x35e   :  { %2410 = vst.msk [vmem:[#allocation3 + $0x158] sm:$0xff] %vm1049_vm8, %v2326_v41 }
 0x35f   :  { %1939 = vst.msk [vmem:[#allocation3 + $0x160] sm:$0xff] %vm573_vm5, %v1856_v56  ;;  %2732 = vrot.lane.b32.xlu1 %v1803_v5, %s10070_s7  ;;  %2600 = vrot.lane.b32.xlu0 %v12044_v46, %s10069_s26  ;;  %v1805_v56 = vsel %vm396_vm3, %v1802_v53, %v1804_v51 }
 0x361   :  { %v2852_v16 = vpop.permute.xlu1 %2851  ;;  %v2457_v36 = vpop.permute.xlu0 %2456  ;;  %v3001_v44 = vld [vmem:[#allocation3 + $0x140] sm:$0xff] }
 0x362   :  { %2938 = vst.msk [vmem:[#allocation3 + $0x148] sm:$0xff] %vm1583_vm12, %v2852_v16  ;;  %v3152_v38 = vsel %vm3030_vm13, %v3001_v44, 0  ;;  %v2012_v16 = vrot.slane %v1649_v27, 2 }
 0x363   :  { %2542 = vst.msk [vmem:[#allocation3 + $0x150] sm:$0xff] %vm1183_vm9, %v2457_v36  ;;  %2339 = vrot.lane.b32.xlu1 %v1803_v5, %s10067_s20  ;;  %2207 = vrot.lane.b32.xlu0 %v12044_v46, %s10064_s17  ;;  %v12365_v41 = vand.u32 4294901760, %v3152_v38 }
 0x364   :  { %v2013_v27 = vsel %vm606_vm2, %v2010_v15, %v2012_v16  ;;  %v193_v15 = vld [vmem:[%s14960_s0 + $0x1e0] sm:$0xff] }
 0x365   :  { %15147 = vst [vmem:[#allocation43_spill] sm:$0xff] %v12365_v41  ;;  %v2064_v11 = vpop.permute.xlu1 %2063  ;;  %v1858_v23 = vpop.permute.xlu0 %1857  ;;  %v12370_v0 = vsub.f32 %v3152_v38, %v12365_v41  ;;  %258 = vst.msk [vmem:[#allocation2 + $0x319] sm:$0xff] %vm23_vm0, %v193_v15 }
 0x366   :  { %2147 = vst.msk [vmem:[#allocation3 + $0x160] sm:$0xff] %vm783_vm6, %v2064_v11 }
 0x367   :  { %15148 = vst [vmem:[#allocation44_spill] sm:$0xff] %v12370_v0  ;;  %1940 = vst.msk [vmem:[#allocation3 + $0x168] sm:$0xff] %vm573_vm5, %v1858_v23  ;;  %2865 = vrot.lane.b32.xlu1 %v2011_v34, %s10071_s12  ;;  %2734 = vrot.lane.b32.xlu0 %v1805_v56, %s10070_s7  ;;  %v3699_v46 = vand.u32 4294901760, %v12370_v0 }
 0x369   :  { %v2587_v36 = vpop.permute.xlu1 %2586  ;;  %v2459_v49 = vpop.permute.xlu0 %2458  ;;  %9157 = vmatprep.mubr.f32.mxu0 %v3699_v46  ;;  %v3700_v53 = vsub.f32 %v12370_v0, %v3699_v46  ;;  %v3002_v51 = vld [vmem:[#allocation3 + $0x148] sm:$0xff] }
 0x36a   :  { %2672 = vst.msk [vmem:[#allocation3 + $0x150] sm:$0xff] %vm1314_vm10, %v2587_v36  ;;  %v3155_v11 = vsel %vm3030_vm13, %v3002_v51, 0 }
 0x36b   :  { %2543 = vst.msk [vmem:[#allocation3 + $0x158] sm:$0xff] %vm1183_vm9, %v2459_v49  ;;  %2341 = vrot.lane.b32.xlu1 %v1805_v56, %s10067_s20  ;;  %1871 = vrot.lane.b32.xlu0 %v1803_v5, %s10066_s19  ;;  %v3701_v23 = vand.u32 4294901760, %v3700_v53  ;;  %v12383_v44 = vand.u32 4294901760, %v3155_v11  ;;  %v194_v53 = vld [vmem:[%s14960_s0 + $0x1e8] sm:$0xff] }
 0x36c   :  { %259 = vst.msk [vmem:[#allocation2 + $0x321] sm:$0xff] %vm23_vm0, %v194_v53  ;;  %v2015_v53 = vrot.slane %v12120_v28, 2 }
 0x36d   :  { %15149 = vst [vmem:[#allocation45_spill] sm:$0xff] %v12383_v44  ;;  %v2194_v38 = vpop.permute.xlu1 %2193  ;;  %v2066_v41 = vpop.permute.xlu0 %2065  ;;  %8839 = vmatprep.mubr.f32.mxu1 %v3701_v23  ;;  %v12387_v46 = vsub.f32 %v3155_v11, %v12383_v44  ;;  %v1807_v23 = vrot.slane %v12120_v28, 1 }
 0x36e   :  { %2277 = vst.msk [vmem:[#allocation3 + $0x160] sm:$0xff] %vm914_vm7, %v2194_v38 }
 0x36f   :  { %15150 = vst [vmem:[#allocation46_spill] sm:$0xff] %v12387_v46  ;;  %2148 = vst.msk [vmem:[#allocation3 + $0x168] sm:$0xff] %vm783_vm6, %v2066_v41  ;;  %2867 = vrot.lane.b32.xlu1 %v2013_v27, %s10071_s12  ;;  %2472 = vrot.lane.b32.xlu0 %v2011_v34, %s10068_s23  ;;  %v3709_v5 = vand.u32 4294901760, %v12387_v46 }
 0x371   :  { %v2721_v16 = vpop.permute.xlu1 %2720  ;;  %v2589_v36 = vpop.permute.xlu0 %2588  ;;  %9158 = vmatmul.mubr.f32.gmra.mrb[40].mxu0 %v3709_v5  ;;  %v3710_v49 = vsub.f32 %v12387_v46, %v3709_v5 }
 0x372   :  { %2806 = vst.msk [vmem:[#allocation3 + $0x150] sm:$0xff] %vm1449_vm11, %v2721_v16 }
 0x373   :  { %2673 = vst.msk [vmem:[#allocation3 + $0x158] sm:$0xff] %vm1314_vm10, %v2589_v36  ;;  %2079 = vrot.lane.b32.xlu1 %v2011_v34, %s10065_s18  ;;  %1873 = vrot.lane.b32.xlu0 %v1805_v56, %s10066_s19  ;;  %v3711_v41 = vand.u32 4294901760, %v3710_v49  ;;  %v12412_v34 = vld [vmem:[#allocation2 + $0x318] sm:$0xff]  ;;  %v1806_v56 = vrot.slane %v12108_v33, 1  ;;  %v12424_v16 = vld [vmem:[#allocation2 + $0x320] sm:$0xff] }
 0x374   :  { %1701 = vst.msk [vmem:[#allocation3 + $0x1f0] sm:$0xff] %vm23_vm0, %v12412_v34  ;;  %1702 = vst.msk [vmem:[#allocation3 + $0x1f8] sm:$0xff] %vm23_vm0, %v12424_v16 }
 0x375   :  { %v2328_v51 = vpop.permute.xlu1 %2327  ;;  %v2196_v11 = vpop.permute.xlu0 %2195  ;;  %8840 = vmatmul.mubr.f32.gmra.mrb[40].mxu1 %v3711_v41  ;;  %v1808_v15 = vsel %vm396_vm3, %v1806_v56, %v1807_v23  ;;  %v1652_v41 = vld [vmem:[#allocation2 + $0x2c8] sm:$0x3] }
 0x376   :  { %2411 = vst.msk [vmem:[#allocation3 + $0x160] sm:$0xff] %vm1049_vm8, %v2328_v51  ;;  %v1809_v51 = vrot.slane %v1652_v41, 1 }
 0x377   :  { %2278 = vst.msk [vmem:[#allocation3 + $0x168] sm:$0xff] %vm914_vm7, %v2196_v11  ;;  %2602 = vrot.lane.b32.xlu1 %v12108_v33, %s10069_s26  ;;  %2474 = vrot.lane.b32.xlu0 %v2013_v27, %s10068_s23 }
 0x379   :  { %v2854_v38 = vpop.permute.xlu1 %2853  ;;  %v2723_v5 = vpop.permute.xlu0 %2722 }
 0x37a   :  { %2939 = vst.msk [vmem:[#allocation3 + $0x150] sm:$0xff] %vm1583_vm12, %v2854_v38 }
 0x37b   :  { %2807 = vst.msk [vmem:[#allocation3 + $0x158] sm:$0xff] %vm1449_vm11, %v2723_v5  ;;  %2209 = vrot.lane.b32.xlu1 %v12108_v33, %s10064_s17  ;;  %2081 = vrot.lane.b32.xlu0 %v2013_v27, %s10065_s18  ;;  %v2014_v27 = vrot.slane %v12108_v33, 2 }
 0x37d   :  { %v2330_v36 = vpop.permute.xlu1 %2329  ;;  %v1860_v49 = vpop.permute.xlu0 %1859  ;;  %v2016_v33 = vsel %vm606_vm2, %v2014_v27, %v2015_v53 }
 0x37e   :  { %2412 = vst.msk [vmem:[#allocation3 + $0x168] sm:$0xff] %vm1049_vm8, %v2330_v36 }
 0x37f   :  { %1941 = vst.msk [vmem:[#allocation3 + $0x170] sm:$0xff] %vm573_vm5, %v1860_v49  ;;  %2736 = vrot.lane.b32.xlu1 %v1808_v15, %s10070_s7  ;;  %2604 = vrot.lane.b32.xlu0 %v12120_v28, %s10069_s26  ;;  %v1810_v49 = vsel %vm396_vm3, %v1807_v23, %v1809_v51 }
 0x381   :  { %v2856_v11 = vpop.permute.xlu1 %2855  ;;  %v2461_v56 = vpop.permute.xlu0 %2460  ;;  %v3003_v38 = vld [vmem:[#allocation3 + $0x150] sm:$0xff] }
 0x382   :  { %2940 = vst.msk [vmem:[#allocation3 + $0x158] sm:$0xff] %vm1583_vm12, %v2856_v11  ;;  %v3158_v5 = vsel %vm3030_vm13, %v3003_v38, 0  ;;  %v2017_v11 = vrot.slane %v1652_v41, 2 }
 0x383   :  { %2544 = vst.msk [vmem:[#allocation3 + $0x160] sm:$0xff] %vm1183_vm9, %v2461_v56  ;;  %2343 = vrot.lane.b32.xlu1 %v1808_v15, %s10067_s20  ;;  %2211 = vrot.lane.b32.xlu0 %v12120_v28, %s10064_s17  ;;  %v12441_v36 = vand.u32 4294901760, %v3158_v5 }
 0x384   :  { %v2018_v41 = vsel %vm606_vm2, %v2015_v53, %v2017_v11  ;;  %v195_v53 = vld [vmem:[%s14960_s0 + $0x1f0] sm:$0xff] }
 0x385   :  { %15151 = vst [vmem:[#allocation47_spill] sm:$0xff] %v12441_v36  ;;  %v2068_v46 = vpop.permute.xlu1 %2067  ;;  %v1862_v0 = vpop.permute.xlu0 %1861  ;;  %v12446_v44 = vsub.f32 %v3158_v5, %v12441_v36  ;;  %260 = vst.msk [vmem:[#allocation2 + $0x331] sm:$0xff] %vm23_vm0, %v195_v53 }
 0x386   :  { %2149 = vst.msk [vmem:[#allocation3 + $0x170] sm:$0xff] %vm783_vm6, %v2068_v46 }
 0x387   :  { %15152 = vst [vmem:[#allocation48_spill] sm:$0xff] %v12446_v44  ;;  %1942 = vst.msk [vmem:[#allocation3 + $0x178] sm:$0xff] %vm573_vm5, %v1862_v0  ;;  %2869 = vrot.lane.b32.xlu1 %v2016_v33, %s10071_s12  ;;  %2738 = vrot.lane.b32.xlu0 %v1810_v49, %s10070_s7  ;;  %v3719_v28 = vand.u32 4294901760, %v12446_v44 }
 0x389   :  { %v2591_v56 = vpop.permute.xlu1 %2590  ;;  %v2463_v27 = vpop.permute.xlu0 %2462  ;;  %9160 = vmatprep.mubr.f32.mxu0 %v3719_v28  ;;  %v3720_v23 = vsub.f32 %v12446_v44, %v3719_v28  ;;  %v3004_v51 = vld [vmem:[#allocation3 + $0x158] sm:$0xff] }
 0x38a   :  { %2674 = vst.msk [vmem:[#allocation3 + $0x160] sm:$0xff] %vm1314_vm10, %v2591_v56  ;;  %v3161_v46 = vsel %vm3030_vm13, %v3004_v51, 0 }
 0x38b   :  { %2545 = vst.msk [vmem:[#allocation3 + $0x168] sm:$0xff] %vm1183_vm9, %v2463_v27  ;;  %2345 = vrot.lane.b32.xlu1 %v1810_v49, %s10067_s20  ;;  %1875 = vrot.lane.b32.xlu0 %v1808_v15, %s10066_s19  ;;  %v3721_v0 = vand.u32 4294901760, %v3720_v23  ;;  %v12459_v38 = vand.u32 4294901760, %v3161_v46  ;;  %v196_v23 = vld [vmem:[%s14960_s0 + $0x1f8] sm:$0xff] }
 0x38c   :  { %261 = vst.msk [vmem:[#allocation2 + $0x339] sm:$0xff] %vm23_vm0, %v196_v23  ;;  %vm6794_vm0 = vcmask 1041409  }
 0x38d   :  { %v2198_v5 = vpop.permute.xlu1 %2197  ;;  %v2070_v36 = vpop.permute.xlu0 %2069  ;;  %8842 = vmatprep.mubr.f32.mxu1 %v3721_v0  ;;  %v12463_v28 = vsub.f32 %v3161_v46, %v12459_v38 }
 0x38e   :  { %2279 = vst.msk [vmem:[#allocation3 + $0x170] sm:$0xff] %vm914_vm7, %v2198_v5 }
 0x38f   :  { %15153 = vst [vmem:[#allocation49_spill] sm:$0xff] %v12463_v28  ;;  %2150 = vst.msk [vmem:[#allocation3 + $0x178] sm:$0xff] %vm783_vm6, %v2070_v36  ;;  %2871 = vrot.lane.b32.xlu1 %v2018_v41, %s10071_s12  ;;  %2476 = vrot.lane.b32.xlu0 %v2016_v33, %s10068_s23  ;;  %v3729_v15 = vand.u32 4294901760, %v12463_v28 }
 0x391   :  { %v2725_v11 = vpop.permute.xlu1 %2724  ;;  %v2593_v56 = vpop.permute.xlu0 %2592  ;;  %9161 = vmatmul.mubr.f32.gmra.mrb[42].mxu0 %v3729_v15  ;;  %v3730_v27 = vsub.f32 %v12463_v28, %v3729_v15 }
 0x392   :  { %2808 = vst.msk [vmem:[#allocation3 + $0x160] sm:$0xff] %vm1449_vm11, %v2725_v11 }
 0x393   :  { %2675 = vst.msk [vmem:[#allocation3 + $0x168] sm:$0xff] %vm1314_vm10, %v2593_v56  ;;  %2083 = vrot.lane.b32.xlu1 %v2016_v33, %s10065_s18  ;;  %1877 = vrot.lane.b32.xlu0 %v1810_v49, %s10066_s19  ;;  %v3731_v36 = vand.u32 4294901760, %v3730_v27  ;;  %v1811_v33 = vrot.slane %v12184_v48, 1  ;;  %v1812_v49 = vrot.slane %v12196_v58, 1  ;;  %v1655_v56 = vld [vmem:[#allocation2 + $0x2e0] sm:$0x3] }
 0x394   :  { %v2019_v27 = vrot.slane %v12184_v48, 2  ;;  %v1814_v23 = vrot.slane %v1655_v56, 1 }
 0x395   :  { %v2332_v51 = vpop.permute.xlu1 %2331  ;;  %v2200_v46 = vpop.permute.xlu0 %2199  ;;  %8843 = vmatmul.mubr.f32.gmra.mrb[42].mxu1 %v3731_v36  ;;  %v1813_v15 = vsel %vm396_vm3, %v1811_v33, %v1812_v49  ;;  %v2020_v36 = vrot.slane %v12196_v58, 2 }
 0x396   :  { %2413 = vst.msk [vmem:[#allocation3 + $0x170] sm:$0xff] %vm1049_vm8, %v2332_v51 }
 0x397   :  { %2280 = vst.msk [vmem:[#allocation3 + $0x178] sm:$0xff] %vm914_vm7, %v2200_v46  ;;  %2606 = vrot.lane.b32.xlu1 %v12184_v48, %s10069_s26  ;;  %2478 = vrot.lane.b32.xlu0 %v2018_v41, %s10068_s23 }
 0x399   :  { %v2858_v0 = vpop.permute.xlu1 %2857  ;;  %v2727_v5 = vpop.permute.xlu0 %2726 }
 0x39a   :  { %2941 = vst.msk [vmem:[#allocation3 + $0x160] sm:$0xff] %vm1583_vm12, %v2858_v0 }
 0x39b   :  { %2809 = vst.msk [vmem:[#allocation3 + $0x168] sm:$0xff] %vm1449_vm11, %v2727_v5  ;;  %2213 = vrot.lane.b32.xlu1 %v12184_v48, %s10064_s17  ;;  %2085 = vrot.lane.b32.xlu0 %v2018_v41, %s10065_s18  ;;  %v2021_v48 = vsel %vm606_vm2, %v2019_v27, %v2020_v36  ;;  %v1815_v5 = vsel %vm396_vm3, %v1812_v49, %v1814_v23 }
 0x39d   :  { %v2334_v53 = vpop.permute.xlu1 %2333  ;;  %v1864_v11 = vpop.permute.xlu0 %1863 }
 0x39e   :  { %2414 = vst.msk [vmem:[#allocation3 + $0x178] sm:$0xff] %vm1049_vm8, %v2334_v53 }
 0x39f   :  { %1943 = vst.msk [vmem:[#allocation3 + $0x180] sm:$0xff] %vm573_vm5, %v1864_v11  ;;  %2740 = vrot.lane.b32.xlu1 %v1813_v15, %s10070_s7  ;;  %2608 = vrot.lane.b32.xlu0 %v12196_v58, %s10069_s26 }
 0x3a1   :  { %v2860_v41 = vpop.permute.xlu1 %2859  ;;  %v2465_v51 = vpop.permute.xlu0 %2464  ;;  %v3005_v46 = vld [vmem:[#allocation3 + $0x160] sm:$0xff] }
 0x3a2   :  { %2942 = vst.msk [vmem:[#allocation3 + $0x168] sm:$0xff] %vm1583_vm12, %v2860_v41  ;;  %v3164_v33 = vsel %vm3030_vm13, %v3005_v46, 0  ;;  %v2022_v41 = vrot.slane %v1655_v56, 2 }
 0x3a3   :  { %2546 = vst.msk [vmem:[#allocation3 + $0x170] sm:$0xff] %vm1183_vm9, %v2465_v51  ;;  %2347 = vrot.lane.b32.xlu1 %v1813_v15, %s10067_s20  ;;  %2215 = vrot.lane.b32.xlu0 %v12196_v58, %s10064_s17  ;;  %v12509_v0 = vand.u32 4294901760, %v3164_v33 }
 0x3a4   :  { %v2023_v56 = vsel %vm606_vm2, %v2020_v36, %v2022_v41 }
 0x3a5   :  { %v2072_v53 = vpop.permute.xlu1 %2071  ;;  %v1866_v11 = vpop.permute.xlu0 %1865  ;;  %v12514_v28 = vsub.f32 %v3164_v33, %v12509_v0 }
 0x3a6   :  { %2151 = vst.msk [vmem:[#allocation3 + $0x180] sm:$0xff] %vm783_vm6, %v2072_v53 }
 0x3a7   :  { %15154 = vst [vmem:[#allocation50_spill] sm:$0xff] %v12514_v28  ;;  %1944 = vst.msk [vmem:[#allocation3 + $0x188] sm:$0xff] %vm573_vm5, %v1866_v11  ;;  %2873 = vrot.lane.b32.xlu1 %v2021_v48, %s10071_s12  ;;  %2742 = vrot.lane.b32.xlu0 %v1815_v5, %s10070_s7  ;;  %v3739_v58 = vand.u32 4294901760, %v12514_v28 }
 0x3a9   :  { %v2595_v51 = vpop.permute.xlu1 %2594  ;;  %v2467_v27 = vpop.permute.xlu0 %2466  ;;  %9163 = vmatprep.mubr.f32.mxu0 %v3739_v58  ;;  %v3740_v49 = vsub.f32 %v12514_v28, %v3739_v58  ;;  %v3006_v23 = vld [vmem:[#allocation3 + $0x168] sm:$0xff] }
 0x3aa   :  { %2676 = vst.msk [vmem:[#allocation3 + $0x170] sm:$0xff] %vm1314_vm10, %v2595_v51  ;;  %v3167_v46 = vsel %vm3030_vm13, %v3006_v23, 0  ;;  %v1816_v23 = vrot.slane %v12260_v57, 1 }
 0x3ab   :  { %2547 = vst.msk [vmem:[#allocation3 + $0x178] sm:$0xff] %vm1183_vm9, %v2467_v27  ;;  %2349 = vrot.lane.b32.xlu1 %v1815_v5, %s10067_s20  ;;  %1879 = vrot.lane.b32.xlu0 %v1813_v15, %s10066_s19  ;;  %v3741_v33 = vand.u32 4294901760, %v3740_v49  ;;  %v12527_v53 = vand.u32 4294901760, %v3167_v46 }
 0x3ad   :  { %15155 = vst [vmem:[#allocation51_spill] sm:$0xff] %v12527_v53  ;;  %v2202_v11 = vpop.permute.xlu1 %2201  ;;  %v2074_v44 = vpop.permute.xlu0 %2073  ;;  %8845 = vmatprep.mubr.f32.mxu1 %v3741_v33  ;;  %v12531_v58 = vsub.f32 %v3167_v46, %v12527_v53  ;;  %v1817_v46 = vrot.slane %v12272_v40, 1 }
 0x3ae   :  { %2281 = vst.msk [vmem:[#allocation3 + $0x180] sm:$0xff] %vm914_vm7, %v2202_v11 }
 0x3af   :  { %15156 = vst [vmem:[#allocation52_spill] sm:$0xff] %v12531_v58  ;;  %2152 = vst.msk [vmem:[#allocation3 + $0x188] sm:$0xff] %vm783_vm6, %v2074_v44  ;;  %2875 = vrot.lane.b32.xlu1 %v2023_v56, %s10071_s12  ;;  %2480 = vrot.lane.b32.xlu0 %v2021_v48, %s10068_s23  ;;  %v3749_v15 = vand.u32 4294901760, %v12531_v58 }
 0x3b1   :  { %v2729_v51 = vpop.permute.xlu1 %2728  ;;  %v2597_v27 = vpop.permute.xlu0 %2596  ;;  %9164 = vmatmul.mubr.f32.gmra.mrb[44].mxu0 %v3749_v15  ;;  %v3750_v36 = vsub.f32 %v12531_v58, %v3749_v15 }
 0x3b2   :  { %2810 = vst.msk [vmem:[#allocation3 + $0x170] sm:$0xff] %vm1449_vm11, %v2729_v51  ;;  %v1658_v51 = vld [vmem:[#allocation2 + $0x2f8] sm:$0x3] }
 0x3b3   :  { %2677 = vst.msk [vmem:[#allocation3 + $0x178] sm:$0xff] %vm1314_vm10, %v2597_v27  ;;  %2087 = vrot.lane.b32.xlu1 %v2021_v48, %s10065_s18  ;;  %1881 = vrot.lane.b32.xlu0 %v1815_v5, %s10066_s19  ;;  %v3751_v44 = vand.u32 4294901760, %v3750_v36  ;;  %v1818_v5 = vsel %vm396_vm3, %v1816_v23, %v1817_v46  ;;  %v2024_v27 = vrot.slane %v12260_v57, 2  ;;  %v2025_v36 = vrot.slane %v12272_v40, 2 }
 0x3b5   :  { %v2336_v41 = vpop.permute.xlu1 %2335  ;;  %v2204_v49 = vpop.permute.xlu0 %2203  ;;  %8846 = vmatmul.mubr.f32.gmra.mrb[44].mxu1 %v3751_v44  ;;  %v1819_v44 = vrot.slane %v1658_v51, 1 }
 0x3b6   :  { %2415 = vst.msk [vmem:[#allocation3 + $0x180] sm:$0xff] %vm1049_vm8, %v2336_v41 }
 0x3b7   :  { %2282 = vst.msk [vmem:[#allocation3 + $0x188] sm:$0xff] %vm914_vm7, %v2204_v49  ;;  %2610 = vrot.lane.b32.xlu1 %v12260_v57, %s10069_s26  ;;  %2482 = vrot.lane.b32.xlu0 %v2023_v56, %s10068_s23 }
 0x3b9   :  { %v2862_v48 = vpop.permute.xlu1 %2861  ;;  %v2731_v33 = vpop.permute.xlu0 %2730 }
 0x3ba   :  { %2943 = vst.msk [vmem:[#allocation3 + $0x170] sm:$0xff] %vm1583_vm12, %v2862_v48  ;;  %v3940_v48 = vand.u32 4294901760, %v10470_v60 }
 0x3bb   :  { %2811 = vst.msk [vmem:[#allocation3 + $0x178] sm:$0xff] %vm1449_vm11, %v2731_v33  ;;  %2217 = vrot.lane.b32.xlu1 %v12260_v57, %s10064_s17  ;;  %2089 = vrot.lane.b32.xlu0 %v2023_v56, %s10065_s18  ;;  %v3947_v33 = vand.u32 4294901760, %v10472_v61 }
 0x3bd   :  { %v2338_v11 = vpop.permute.xlu1 %2337  ;;  %v1868_v15 = vpop.permute.xlu0 %1867 }
 0x3be   :  { %2416 = vst.msk [vmem:[#allocation3 + $0x188] sm:$0xff] %vm1049_vm8, %v2338_v11  ;;  %v2026_v11 = vsel %vm606_vm2, %v2024_v27, %v2025_v36  ;;  %v2027_v27 = vrot.slane %v1658_v51, 2 }
 0x3bf   :  { %1945 = vst.msk [vmem:[#allocation3 + $0x190] sm:$0xff] %vm573_vm5, %v1868_v15  ;;  %2744 = vrot.lane.b32.xlu1 %v1818_v5, %s10070_s7  ;;  %2612 = vrot.lane.b32.xlu0 %v12272_v40, %s10069_s26  ;;  %v1820_v15 = vsel %vm396_vm3, %v1817_v46, %v1819_v44 }
 0x3c0   :  { %v2028_v51 = vsel %vm606_vm2, %v2025_v36, %v2027_v27 }
 0x3c1   :  { %v2864_v56 = vpop.permute.xlu1 %2863  ;;  %v2469_v41 = vpop.permute.xlu0 %2468  ;;  %v3007_v49 = vld [vmem:[#allocation3 + $0x170] sm:$0xff] }
 0x3c2   :  { %2944 = vst.msk [vmem:[#allocation3 + $0x178] sm:$0xff] %vm1583_vm12, %v2864_v56  ;;  %v3170_v23 = vsel %vm3030_vm13, %v3007_v49, 0  ;;  %v9521_v56 = vpack.c.bf16 %v3947_v33, %v3940_v48 }
 0x3c3   :  { %2548 = vst.msk [vmem:[#allocation3 + $0x180] sm:$0xff] %vm1183_vm9, %v2469_v41  ;;  %2351 = vrot.lane.b32.xlu1 %v1818_v5, %s10067_s20  ;;  %2219 = vrot.lane.b32.xlu0 %v12272_v40, %s10064_s17  ;;  %v12571_v57 = vand.u32 4294901760, %v3170_v23 }
 0x3c4   :  { %9522 = vmatprep.subr.bf16.mxu0 %v9521_v56 }
 0x3c5   :  { %15157 = vst [vmem:[#allocation53_spill] sm:$0xff] %v12571_v57  ;;  %v2076_v58 = vpop.permute.xlu1 %2075  ;;  %v1870_v41 = vpop.permute.xlu0 %1869  ;;  %v12576_v49 = vsub.f32 %v3170_v23, %v12571_v57  ;;  %9524 = vmatpush3.bf16.msra.mxu0 %v9521_v56 }
 0x3c6   :  { %2153 = vst.msk [vmem:[#allocation3 + $0x190] sm:$0xff] %vm783_vm6, %v2076_v58 }
 0x3c7   :  { %15158 = vst [vmem:[#allocation54_spill] sm:$0xff] %v12576_v49  ;;  %1946 = vst.msk [vmem:[#allocation3 + $0x198] sm:$0xff] %vm573_vm5, %v1870_v41  ;;  %2877 = vrot.lane.b32.xlu1 %v2026_v11, %s10071_s12  ;;  %2746 = vrot.lane.b32.xlu0 %v1820_v15, %s10070_s7  ;;  %v3759_v40 = vand.u32 4294901760, %v12576_v49 }
 0x3c9   :  { %v2599_v46 = vpop.permute.xlu1 %2598  ;;  %v2471_v44 = vpop.permute.xlu0 %2470  ;;  %9166 = vmatprep.mubr.f32.mxu0 %v3759_v40  ;;  %v3760_v28 = vsub.f32 %v12576_v49, %v3759_v40  ;;  %v3008_v23 = vld [vmem:[#allocation3 + $0x178] sm:$0xff] }
 0x3ca   :  { %2678 = vst.msk [vmem:[#allocation3 + $0x180] sm:$0xff] %vm1314_vm10, %v2599_v46  ;;  %v3173_v58 = vsel %vm3030_vm13, %v3008_v23, 0  ;;  %v3941_v23 = vsub.f32 %v10470_v60, %v3940_v48 }
 0x3cb   :  { %2549 = vst.msk [vmem:[#allocation3 + $0x188] sm:$0xff] %vm1183_vm9, %v2471_v44  ;;  %2353 = vrot.lane.b32.xlu1 %v1820_v15, %s10067_s20  ;;  %1883 = vrot.lane.b32.xlu0 %v1818_v5, %s10066_s19  ;;  %v3761_v41 = vand.u32 4294901760, %v3760_v28  ;;  %v12589_v57 = vand.u32 4294901760, %v3173_v58 }
 0x3cd   :  { %v2206_v56 = vpop.permute.xlu1 %2205  ;;  %v2078_v53 = vpop.permute.xlu0 %2077  ;;  %8848 = vmatprep.mubr.f32.mxu1 %v3761_v41  ;;  %v12593_v40 = vsub.f32 %v3173_v58, %v12589_v57  ;;  %v3948_v58 = vsub.f32 %v10472_v61, %v3947_v33  ;;  %v3942_v41 = vand.u32 4294901760, %v3941_v23 }
 0x3ce   :  { %2283 = vst.msk [vmem:[#allocation3 + $0x190] sm:$0xff] %vm914_vm7, %v2206_v56 }
 0x3cf   :  { %15159 = vst [vmem:[#allocation55_spill] sm:$0xff] %v12593_v40  ;;  %2154 = vst.msk [vmem:[#allocation3 + $0x198] sm:$0xff] %vm783_vm6, %v2078_v53  ;;  %2879 = vrot.lane.b32.xlu1 %v2028_v51, %s10071_s12  ;;  %2484 = vrot.lane.b32.xlu0 %v2026_v11, %s10068_s23  ;;  %v3769_v28 = vand.u32 4294901760, %v12593_v40  ;;  %v3949_v56 = vand.u32 4294901760, %v3948_v58 }
 0x3d1   :  { %v2733_v5 = vpop.permute.xlu1 %2732  ;;  %v2601_v46 = vpop.permute.xlu0 %2600  ;;  %9167 = vmatmul.mubr.f32.gmra.mrb[46].mxu0 %v3769_v28  ;;  %v3770_v36 = vsub.f32 %v12593_v40, %v3769_v28  ;;  %v9497_v60 = vpack.c.bf16 %v3949_v56, %v3942_v41 }
 0x3d2   :  { %2812 = vst.msk [vmem:[#allocation3 + $0x180] sm:$0xff] %vm1449_vm11, %v2733_v5 }
 0x3d3   :  { %2679 = vst.msk [vmem:[#allocation3 + $0x188] sm:$0xff] %vm1314_vm10, %v2601_v46  ;;  %2091 = vrot.lane.b32.xlu1 %v2026_v11, %s10065_s18  ;;  %1885 = vrot.lane.b32.xlu0 %v1820_v15, %s10066_s19  ;;  %v3771_v53 = vand.u32 4294901760, %v3770_v36  ;;  %v1821_v11 = vrot.slane %v12336_v22, 1  ;;  %v1822_v15 = vrot.slane %v12348_v29, 1  ;;  %v1661_v46 = vld [vmem:[#allocation2 + $0x310] sm:$0x3] }
 0x3d4   :  { %9498 = vmatprep.subr.bf16.mxu1 %v9497_v60  ;;  %v2029_v36 = vrot.slane %v12336_v22, 2 }
 0x3d5   :  { %v2340_v27 = vpop.permute.xlu1 %2339  ;;  %v2208_v44 = vpop.permute.xlu0 %2207  ;;  %8849 = vmatmul.mubr.f32.gmra.mrb[46].mxu1 %v3771_v53  ;;  %v1823_v61 = vsel %vm396_vm3, %v1821_v11, %v1822_v15  ;;  %v1824_v53 = vrot.slane %v1661_v46, 1 }
 0x3d6   :  { %2417 = vst.msk [vmem:[#allocation3 + $0x190] sm:$0xff] %vm1049_vm8, %v2340_v27  ;;  %9500 = vmatpush3.bf16.msra.mxu1 %v9497_v60  ;;  %v2032_v60 = vrot.slane %v1661_v46, 2 }
 0x3d7   :  { %2284 = vst.msk [vmem:[#allocation3 + $0x198] sm:$0xff] %vm914_vm7, %v2208_v44  ;;  %2614 = vrot.lane.b32.xlu1 %v12336_v22, %s10069_s26  ;;  %2486 = vrot.lane.b32.xlu0 %v2028_v51, %s10068_s23  ;;  %v1825_v41 = vsel %vm396_vm3, %v1822_v15, %v1824_v53 }
 0x3d9   :  { %v2866_v28 = vpop.permute.xlu1 %2865  ;;  %v2735_v5 = vpop.permute.xlu0 %2734 }
 0x3da   :  { %2945 = vst.msk [vmem:[#allocation3 + $0x180] sm:$0xff] %vm1583_vm12, %v2866_v28 }
 0x3db   :  { %2813 = vst.msk [vmem:[#allocation3 + $0x188] sm:$0xff] %vm1449_vm11, %v2735_v5  ;;  %2221 = vrot.lane.b32.xlu1 %v12336_v22, %s10064_s17  ;;  %2093 = vrot.lane.b32.xlu0 %v2028_v51, %s10065_s18  ;;  %v2030_v51 = vrot.slane %v12348_v29, 2 }
 0x3dd   :  { %v2342_v48 = vpop.permute.xlu1 %2341  ;;  %v1872_v33 = vpop.permute.xlu0 %1871  ;;  %v2031_v22 = vsel %vm606_vm2, %v2029_v36, %v2030_v51 }
 0x3de   :  { %2418 = vst.msk [vmem:[#allocation3 + $0x198] sm:$0xff] %vm1049_vm8, %v2342_v48 }
 0x3df   :  { %1947 = vst.msk [vmem:[#allocation3 + $0x1a0] sm:$0xff] %vm573_vm5, %v1872_v33  ;;  %2748 = vrot.lane.b32.xlu1 %v1823_v61, %s10070_s7  ;;  %2616 = vrot.lane.b32.xlu0 %v12348_v29, %s10069_s26 }
 0x3e1   :  { %v2868_v27 = vpop.permute.xlu1 %2867  ;;  %v2473_v44 = vpop.permute.xlu0 %2472  ;;  %v3009_v23 = vld [vmem:[#allocation3 + $0x180] sm:$0xff] }
 0x3e2   :  { %2946 = vst.msk [vmem:[#allocation3 + $0x188] sm:$0xff] %vm1583_vm12, %v2868_v27  ;;  %v3176_v58 = vsel %vm3030_vm13, %v3009_v23, 0  ;;  %v3954_v27 = vand.u32 4294901760, %v10494_v7 }
 0x3e3   :  { %2550 = vst.msk [vmem:[#allocation3 + $0x190] sm:$0xff] %vm1183_vm9, %v2473_v44  ;;  %2355 = vrot.lane.b32.xlu1 %v1823_v61, %s10067_s20  ;;  %2223 = vrot.lane.b32.xlu0 %v12348_v29, %s10064_s17  ;;  %v12633_v11 = vand.u32 4294901760, %v3176_v58  ;;  %v3961_v44 = vand.u32 4294901760, %v10499_v8 }
 0x3e5   :  { %v2080_v56 = vpop.permute.xlu1 %2079  ;;  %v1874_v28 = vpop.permute.xlu0 %1873  ;;  %v12638_v5 = vsub.f32 %v3176_v58, %v12633_v11  ;;  %v2033_v58 = vsel %vm606_vm2, %v2030_v51, %v2032_v60 }
 0x3e6   :  { %2155 = vst.msk [vmem:[#allocation3 + $0x1a0] sm:$0xff] %vm783_vm6, %v2080_v56  ;;  %v9525_v56 = vpack.c.bf16 %v3961_v44, %v3954_v27 }
 0x3e7   :  { %15160 = vst [vmem:[#allocation56_spill] sm:$0xff] %v12638_v5  ;;  %1948 = vst.msk [vmem:[#allocation3 + $0x1a8] sm:$0xff] %vm573_vm5, %v1874_v28  ;;  %2881 = vrot.lane.b32.xlu1 %v2031_v22, %s10071_s12  ;;  %2750 = vrot.lane.b32.xlu0 %v1825_v41, %s10070_s7  ;;  %v3779_v29 = vand.u32 4294901760, %v12638_v5 }
 0x3e8   :  { %9526 = vmatprep.subr.bf16.mxu0 %v9525_v56 }
 0x3e9   :  { %v2603_v48 = vpop.permute.xlu1 %2602  ;;  %v2475_v33 = vpop.permute.xlu0 %2474  ;;  %9169 = vmatprep.mubr.f32.mxu0 %v3779_v29  ;;  %v3780_v15 = vsub.f32 %v12638_v5, %v3779_v29  ;;  %v3010_v36 = vld [vmem:[#allocation3 + $0x188] sm:$0xff]  ;;  %9528 = vmatpush3.bf16.msra.mxu0 %v9525_v56  ;;  %v1827_v56 = vrot.slane %v12424_v16, 1 }
 0x3ea   :  { %2680 = vst.msk [vmem:[#allocation3 + $0x190] sm:$0xff] %vm1314_vm10, %v2603_v48  ;;  %v3179_v53 = vsel %vm3030_vm13, %v3010_v36, 0 }
 0x3eb   :  { %2551 = vst.msk [vmem:[#allocation3 + $0x198] sm:$0xff] %vm1183_vm9, %v2475_v33  ;;  %2357 = vrot.lane.b32.xlu1 %v1825_v41, %s10067_s20  ;;  %1887 = vrot.lane.b32.xlu0 %v1823_v61, %s10066_s19  ;;  %v3781_v46 = vand.u32 4294901760, %v3780_v15  ;;  %v12653_v23 = vand.u32 4294901760, %v3179_v53 }
 0x3ed   :  { %v2210_v28 = vpop.permute.xlu1 %2209  ;;  %v2082_v29 = vpop.permute.xlu0 %2081  ;;  %8851 = vmatprep.mubr.f32.mxu1 %v3781_v46  ;;  %v12657_v48 = vsub.f32 %v3179_v53, %v12653_v23  ;;  %v1826_v46 = vrot.slane %v12412_v34, 1 }
 0x3ee   :  { %2285 = vst.msk [vmem:[#allocation3 + $0x1a0] sm:$0xff] %vm914_vm7, %v2210_v28 }
 0x3ef   :  { %15161 = vst [vmem:[#allocation57_spill] sm:$0xff] %v12657_v48  ;;  %2156 = vst.msk [vmem:[#allocation3 + $0x1a8] sm:$0xff] %vm783_vm6, %v2082_v29  ;;  %2883 = vrot.lane.b32.xlu1 %v2033_v58, %s10071_s12  ;;  %2488 = vrot.lane.b32.xlu0 %v2031_v22, %s10068_s23  ;;  %v3789_v61 = vand.u32 4294901760, %v12657_v48 }
 0x3f1   :  { %v2737_v51 = vpop.permute.xlu1 %2736  ;;  %v2605_v60 = vpop.permute.xlu0 %2604  ;;  %9170 = vmatmul.mubr.f32.gmra.mrb[48].mxu0 %v3789_v61  ;;  %v3790_v33 = vsub.f32 %v12657_v48, %v3789_v61 }
 0x3f2   :  { %2814 = vst.msk [vmem:[#allocation3 + $0x190] sm:$0xff] %vm1449_vm11, %v2737_v51  ;;  %v1664_v51 = vld [vmem:[#allocation2 + $0x328] sm:$0x3] }
 0x3f3   :  { %2681 = vst.msk [vmem:[#allocation3 + $0x198] sm:$0xff] %vm1314_vm10, %v2605_v60  ;;  %2095 = vrot.lane.b32.xlu1 %v2031_v22, %s10065_s18  ;;  %1889 = vrot.lane.b32.xlu0 %v1825_v41, %s10066_s19  ;;  %v3791_v15 = vand.u32 4294901760, %v3790_v33  ;;  %v1828_v41 = vsel %vm396_vm3, %v1826_v46, %v1827_v56  ;;  %v2034_v60 = vrot.slane %v12412_v34, 2  ;;  %v2035_v33 = vrot.slane %v12424_v16, 2 }
 0x3f5   :  { %v2344_v36 = vpop.permute.xlu1 %2343  ;;  %v2212_v53 = vpop.permute.xlu0 %2211  ;;  %8852 = vmatmul.mubr.f32.gmra.mrb[48].mxu1 %v3791_v15  ;;  %v1829_v15 = vrot.slane %v1664_v51, 1 }
 0x3f6   :  { %2419 = vst.msk [vmem:[#allocation3 + $0x1a0] sm:$0xff] %vm1049_vm8, %v2344_v36 }
 0x3f7   :  { %2286 = vst.msk [vmem:[#allocation3 + $0x1a8] sm:$0xff] %vm914_vm7, %v2212_v53  ;;  %2618 = vrot.lane.b32.xlu1 %v12412_v34, %s10069_s26  ;;  %2490 = vrot.lane.b32.xlu0 %v2033_v58, %s10068_s23 }
 0x3f9   :  { %v2870_v22 = vpop.permute.xlu1 %2869  ;;  %v2739_v28 = vpop.permute.xlu0 %2738 }
 0x3fa   :  { %2947 = vst.msk [vmem:[#allocation3 + $0x190] sm:$0xff] %vm1583_vm12, %v2870_v22  ;;  %v3955_v22 = vsub.f32 %v10494_v7, %v3954_v27 }
 0x3fb   :  { %2815 = vst.msk [vmem:[#allocation3 + $0x198] sm:$0xff] %vm1449_vm11, %v2739_v28  ;;  %2225 = vrot.lane.b32.xlu1 %v12412_v34, %s10064_s17  ;;  %2097 = vrot.lane.b32.xlu0 %v2033_v58, %s10065_s18  ;;  %v3962_v28 = vsub.f32 %v10499_v8, %v3961_v44 }
 0x3fd   :  { %v2346_v29 = vpop.permute.xlu1 %2345  ;;  %v1876_v61 = vpop.permute.xlu0 %1875  ;;  %v3963_v48 = vand.u32 4294901760, %v3962_v28 }
 0x3fe   :  { %2420 = vst.msk [vmem:[#allocation3 + $0x1a8] sm:$0xff] %vm1049_vm8, %v2346_v29  ;;  %v2036_v29 = vsel %vm606_vm2, %v2034_v60, %v2035_v33 }
 0x3ff   :  { %1949 = vst.msk [vmem:[#allocation3 + $0x1b0] sm:$0xff] %vm573_vm5, %v1876_v61  ;;  %2752 = vrot.lane.b32.xlu1 %v1828_v41, %s10070_s7  ;;  %2620 = vrot.lane.b32.xlu0 %v12424_v16, %s10069_s26  ;;  %v1830_v61 = vsel %vm396_vm3, %v1827_v56, %v1829_v15 }
 0x401   :  { %v2872_v58 = vpop.permute.xlu1 %2871  ;;  %v2477_v36 = vpop.permute.xlu0 %2476  ;;  %v3011_v53 = vld [vmem:[#allocation3 + $0x190] sm:$0xff] }
 0x402   :  { %2948 = vst.msk [vmem:[#allocation3 + $0x198] sm:$0xff] %vm1583_vm12, %v2872_v58  ;;  %v3182_v46 = vsel %vm3030_vm13, %v3011_v53, 0  ;;  %v3956_v58 = vand.u32 4294901760, %v3955_v22 }
 0x403   :  { %2552 = vst.msk [vmem:[#allocation3 + $0x1a0] sm:$0xff] %vm1183_vm9, %v2477_v36  ;;  %2359 = vrot.lane.b32.xlu1 %v1828_v41, %s10067_s20  ;;  %2227 = vrot.lane.b32.xlu0 %v12424_v16, %s10064_s17  ;;  %v12697_v34 = vand.u32 4294901760, %v3182_v46  ;;  %v2037_v16 = vrot.slane %v1664_v51, 2 }
 0x404   :  { %v9501_v7 = vpack.c.bf16 %v3963_v48, %v3956_v58 }
 0x405   :  { %v2084_v36 = vpop.permute.xlu1 %2083  ;;  %v1878_v5 = vpop.permute.xlu0 %1877  ;;  %v12702_v53 = vsub.f32 %v3182_v46, %v12697_v34  ;;  %v2038_v15 = vsel %vm606_vm2, %v2035_v33, %v2037_v16 }
 0x406   :  { %2157 = vst.msk [vmem:[#allocation3 + $0x1b0] sm:$0xff] %vm783_vm6, %v2084_v36  ;;  %9502 = vmatprep.subr.bf16.mxu1 %v9501_v7 }
 0x407   :  { %15162 = vst [vmem:[#allocation58_spill] sm:$0xff] %v12702_v53  ;;  %1950 = vst.msk [vmem:[#allocation3 + $0x1b8] sm:$0xff] %vm573_vm5, %v1878_v5  ;;  %2885 = vrot.lane.b32.xlu1 %v2036_v29, %s10071_s12  ;;  %2754 = vrot.lane.b32.xlu0 %v1830_v61, %s10070_s7  ;;  %v3799_v8 = vand.u32 4294901760, %v12702_v53 }
 0x408   :  { %9504 = vmatpush3.bf16.msra.mxu1 %v9501_v7 }
 0x409   :  { %v2607_v27 = vpop.permute.xlu1 %2606  ;;  %v2479_v44 = vpop.permute.xlu0 %2478  ;;  %9172 = vmatprep.mubr.f32.mxu0 %v3799_v8  ;;  %v3800_v56 = vsub.f32 %v12702_v53, %v3799_v8  ;;  %v3012_v60 = vld [vmem:[#allocation3 + $0x198] sm:$0xff]  ;;  %v1665_v8 = vld [vmem:[#allocation2 + $0x330] sm:$0xff] }
 0x40a   :  { %2682 = vst.msk [vmem:[#allocation3 + $0x1a0] sm:$0xff] %vm1314_vm10, %v2607_v27  ;;  %v3185_v5 = vsel %vm3030_vm13, %v3012_v60, 0 }
 0x40b   :  { %2553 = vst.msk [vmem:[#allocation3 + $0x1a8] sm:$0xff] %vm1183_vm9, %v2479_v44  ;;  %2361 = vrot.lane.b32.xlu1 %v1830_v61, %s10067_s20  ;;  %1891 = vrot.lane.b32.xlu0 %v1828_v41, %s10066_s19  ;;  %v3801_v48 = vand.u32 4294901760, %v3800_v56  ;;  %v12715_v51 = vand.u32 4294901760, %v3185_v5  ;;  %v1666_v44 = vld [vmem:[#allocation2 + $0x338] sm:$0xff]  ;;  %v12734_v56 = vand.u32 4294901760, %v10524_v18 }
 0x40c   :  { %v2299_v60 = vrot.slane %v1666_v44, 1 }
 0x40d   :  { %v2214_v46 = vpop.permute.xlu1 %2213  ;;  %v2086_v22 = vpop.permute.xlu0 %2085  ;;  %8854 = vmatprep.mubr.f32.mxu1 %v3801_v48  ;;  %v12719_v28 = vsub.f32 %v3185_v5, %v12715_v51  ;;  %9201 = vmatprep.subr.mxu0 %v12734_v56 }
 0x40e   :  { %2287 = vst.msk [vmem:[#allocation3 + $0x1b0] sm:$0xff] %vm914_vm7, %v2214_v46  ;;  %9202 = vmatpush3.msra.mxu0 %v12734_v56 }
 0x40f   :  { %15163 = vst [vmem:[#allocation59_spill] sm:$0xff] %v12719_v28  ;;  %2158 = vst.msk [vmem:[#allocation3 + $0x1b8] sm:$0xff] %vm783_vm6, %v2086_v22  ;;  %2887 = vrot.lane.b32.xlu1 %v2038_v15, %s10071_s12  ;;  %2492 = vrot.lane.b32.xlu0 %v2036_v29, %s10068_s23  ;;  %v3809_v41 = vand.u32 4294901760, %v12719_v28 }
 0x410   :  { %9530 = vmatprep.subr.bf16.mxu0 %v10477_v62 }
 0x411   :  { %v2741_v58 = vpop.permute.xlu1 %2740  ;;  %v2609_v36 = vpop.permute.xlu0 %2608  ;;  %9173 = vmatmul.mubr.f32.gmra.mrb[50].mxu0 %v3809_v41  ;;  %v3810_v33 = vsub.f32 %v12719_v28, %v3809_v41  ;;  %v1667_v41 = vld [vmem:[#allocation2 + $0x340] sm:$0x3] }
 0x412   :  { %2816 = vst.msk [vmem:[#allocation3 + $0x1a0] sm:$0xff] %vm1449_vm11, %v2741_v58  ;;  %v2431_v58 = vrot.slane %v1665_v8, 2 }
 0x413   :  { %2683 = vst.msk [vmem:[#allocation3 + $0x1a8] sm:$0xff] %vm1314_vm10, %v2609_v36  ;;  %2099 = vrot.lane.b32.xlu1 %v2036_v29, %s10065_s18  ;;  %1893 = vrot.lane.b32.xlu0 %v1830_v61, %s10066_s19  ;;  %v3811_v7 = vand.u32 4294901760, %v3810_v33  ;;  %v2298_v29 = vrot.slane %v1665_v8, 1  ;;  %v2432_v36 = vrot.slane %v1666_v44, 2  ;;  %v2301_v33 = vrot.slane %v1667_v41, 1 }
 0x415   :  { %v2348_v16 = vpop.permute.xlu1 %2347  ;;  %v2216_v27 = vpop.permute.xlu0 %2215  ;;  %8855 = vmatmul.mubr.f32.gmra.mrb[50].mxu1 %v3811_v7  ;;  %v2300_v48 = vsel %vm396_vm3, %v2298_v29, %v2299_v60 }
 0x416   :  { %2421 = vst.msk [vmem:[#allocation3 + $0x1b0] sm:$0xff] %vm1049_vm8, %v2348_v16 }
 0x417   :  { %2288 = vst.msk [vmem:[#allocation3 + $0x1b8] sm:$0xff] %vm914_vm7, %v2216_v27  ;;  %2622 = vrot.lane.b32.xlu1 %v1665_v8, %s10069_s26  ;;  %2494 = vrot.lane.b32.xlu0 %v2038_v15, %s10068_s23 }
 0x419   :  { %v2874_v61 = vpop.permute.xlu1 %2873  ;;  %v2743_v5 = vpop.permute.xlu0 %2742 }
 0x41a   :  { %2949 = vst.msk [vmem:[#allocation3 + $0x1a0] sm:$0xff] %vm1583_vm12, %v2874_v61  ;;  %v2433_v61 = vsel %vm606_vm2, %v2431_v58, %v2432_v36 }
 0x41b   :  { %2817 = vst.msk [vmem:[#allocation3 + $0x1a8] sm:$0xff] %vm1449_vm11, %v2743_v5  ;;  %2229 = vrot.lane.b32.xlu1 %v1665_v8, %s10064_s17  ;;  %2101 = vrot.lane.b32.xlu0 %v2038_v15, %s10065_s18  ;;  %v2302_v8 = vsel %vm396_vm3, %v2299_v60, %v2301_v33 }
 0x41d   :  { %v2350_v46 = vpop.permute.xlu1 %2349  ;;  %v1880_v22 = vpop.permute.xlu0 %1879 }
 0x41e   :  { %2422 = vst.msk [vmem:[#allocation3 + $0x1b8] sm:$0xff] %vm1049_vm8, %v2350_v46 }
 0x41f   :  { %1951 = vst.msk [vmem:[#allocation3 + $0x1c0] sm:$0xff] %vm573_vm5, %v1880_v22  ;;  %2756 = vrot.lane.b32.xlu1 %v2300_v48, %s10070_s7  ;;  %2624 = vrot.lane.b32.xlu0 %v1666_v44, %s10069_s26 }
 0x421   :  { %v2876_v7 = vpop.permute.xlu1 %2875  ;;  %v2481_v16 = vpop.permute.xlu0 %2480  ;;  %v3013_v27 = vld [vmem:[#allocation3 + $0x1a0] sm:$0xff] }
 0x422   :  { %2950 = vst.msk [vmem:[#allocation3 + $0x1a8] sm:$0xff] %vm1583_vm12, %v2876_v7  ;;  %v3188_v15 = vsel %vm3030_vm13, %v3013_v27, 0 }
 0x423   :  { %2554 = vst.msk [vmem:[#allocation3 + $0x1b0] sm:$0xff] %vm1183_vm9, %v2481_v16  ;;  %2363 = vrot.lane.b32.xlu1 %v2300_v48, %s10067_s20  ;;  %2231 = vrot.lane.b32.xlu0 %v1666_v44, %s10064_s17  ;;  %v12755_v29 = vand.u32 4294901760, %v3188_v15  ;;  %v2434_v48 = vrot.slane %v1667_v41, 2 }
 0x425   :  { %v2088_v5 = vpop.permute.xlu1 %2087  ;;  %v1882_v46 = vpop.permute.xlu0 %1881  ;;  %v12760_v22 = vsub.f32 %v3188_v15, %v12755_v29  ;;  %v2435_v41 = vsel %vm606_vm2, %v2432_v36, %v2434_v48 }
 0x426   :  { %2159 = vst.msk [vmem:[#allocation3 + $0x1c0] sm:$0xff] %vm783_vm6, %v2088_v5 }
 0x427   :  { %15164 = vst [vmem:[#allocation60_spill] sm:$0xff] %v12760_v22  ;;  %1952 = vst.msk [vmem:[#allocation3 + $0x1c8] sm:$0xff] %vm573_vm5, %v1882_v46  ;;  %2889 = vrot.lane.b32.xlu1 %v2433_v61, %s10071_s12  ;;  %2758 = vrot.lane.b32.xlu0 %v2302_v8, %s10070_s7  ;;  %v3819_v44 = vand.u32 4294901760, %v12760_v22 }
 0x429   :  { %v2611_v7 = vpop.permute.xlu1 %2610  ;;  %v2483_v58 = vpop.permute.xlu0 %2482  ;;  %9175 = vmatprep.mubr.f32.mxu0 %v3819_v44  ;;  %v3820_v60 = vsub.f32 %v12760_v22, %v3819_v44  ;;  %v3014_v33 = vld [vmem:[#allocation3 + $0x1a8] sm:$0xff] }
 0x42a   :  { %2684 = vst.msk [vmem:[#allocation3 + $0x1b0] sm:$0xff] %vm1314_vm10, %v2611_v7  ;;  %v3191_v16 = vsel %vm3030_vm13, %v3014_v33, 0  ;;  %v1669_v7 = vld [vmem:[#allocation2 + $0x350] sm:$0xff]  ;;  %v1668_v22 = vld [vmem:[#allocation2 + $0x348] sm:$0xff] }
 0x42b   :  { %2555 = vst.msk [vmem:[#allocation3 + $0x1b8] sm:$0xff] %vm1183_vm9, %v2483_v58  ;;  %2496 = vrot.lane.b32.xlu1 %v2433_v61, %s10068_s23  ;;  %2365 = vrot.lane.b32.xlu0 %v2302_v8, %s10067_s20  ;;  %v3821_v27 = vand.u32 4294901760, %v3820_v60  ;;  %v12773_v15 = vand.u32 4294901760, %v3191_v16  ;;  %v1670_v58 = vld [vmem:[#allocation2 + $0x358] sm:$0x3]  ;;  %v3969_v61 = vsub.f32 %v10524_v18, %v12734_v56  ;;  %v2696_v8 = vrot.slane %v1669_v7, 1 }
 0x42c   :  { %v2695_v48 = vrot.slane %v1668_v22, 1  ;;  %v2698_v60 = vrot.slane %v1670_v58, 1  ;;  %v2829_v56 = vrot.slane %v1669_v7, 2  ;;  %v2831_v53 = vrot.slane %v1670_v58, 2 }
 0x42d   :  { %v2218_v5 = vpop.permute.xlu1 %2217  ;;  %v2090_v46 = vpop.permute.xlu0 %2089  ;;  %8857 = vmatprep.mubr.f32.mxu1 %v3821_v27  ;;  %v12777_v44 = vsub.f32 %v3191_v16, %v12773_v15  ;;  %v3970_v33 = vand.u32 4294901760, %v3969_v61 }
 0x42e   :  { %2289 = vst.msk [vmem:[#allocation3 + $0x1c0] sm:$0xff] %vm914_vm7, %v2218_v5  ;;  %v2699_v28 = vsel %vm396_vm3, %v2696_v8, %v2698_v60  ;;  %v2697_v61 = vsel %vm396_vm3, %v2695_v48, %v2696_v8 }
 0x42f   :  { %15165 = vst [vmem:[#allocation61_spill] sm:$0xff] %v12777_v44  ;;  %2160 = vst.msk [vmem:[#allocation3 + $0x1c8] sm:$0xff] %vm783_vm6, %v2090_v46  ;;  %2498 = vrot.lane.b32.xlu1 %v2435_v41, %s10068_s23  ;;  %2891 = vrot.lane.b32.xlu0 %v2435_v41, %s10071_s12  ;;  %v3829_v36 = vand.u32 4294901760, %v12777_v44  ;;  %v2828_v46 = vrot.slane %v1668_v22, 2 }
 0x430   :  { %8883 = vmatprep.subr.mxu1 %v3970_v33 }
 0x431   :  { %v2745_v16 = vpop.permute.xlu1 %2744  ;;  %v2613_v27 = vpop.permute.xlu0 %2612  ;;  %9176 = vmatmul.mubr.f32.gmra.mrb[52].mxu0 %v3829_v36  ;;  %v3830_v5 = vsub.f32 %v12777_v44, %v3829_v36  ;;  %8884 = vmatpush3.msra.mxu1 %v3970_v33 }
 0x432   :  { %2818 = vst.msk [vmem:[#allocation3 + $0x1b0] sm:$0xff] %vm1449_vm11, %v2745_v16  ;;  %9573 = vmatprep.subr.bf16.mxu1 %v10481_v63 }
 0x433   :  { %2685 = vst.msk [vmem:[#allocation3 + $0x1b8] sm:$0xff] %vm1314_vm10, %v2613_v27  ;;  %2628 = vrot.lane.b32.xlu1 %v1669_v7, %s10069_s26  ;;  %2626 = vrot.lane.b32.xlu0 %v1668_v22, %s10069_s26  ;;  %v3831_v41 = vand.u32 4294901760, %v3830_v5  ;;  %v2832_v22 = vsel %vm606_vm2, %v2829_v56, %v2831_v53  ;;  %v2830_v7 = vsel %vm606_vm2, %v2828_v46, %v2829_v56 }
 0x435   :  { %v2352_v40 = vpop.permute.xlu1 %2351  ;;  %v2220_v36 = vpop.permute.xlu0 %2219  ;;  %8858 = vmatmul.mubr.f32.gmra.mrb[52].mxu1 %v3831_v41 }
 0x436   :  { %2423 = vst.msk [vmem:[#allocation3 + $0x1c0] sm:$0xff] %vm1049_vm8, %v2352_v40 }
 0x437   :  { %2290 = vst.msk [vmem:[#allocation3 + $0x1c8] sm:$0xff] %vm914_vm7, %v2220_v36  ;;  %2762 = vrot.lane.b32.xlu1 %v2699_v28, %s10070_s7  ;;  %2760 = vrot.lane.b32.xlu0 %v2697_v61, %s10070_s7 }
 0x439   :  { %v2878_v8 = vpop.permute.xlu1 %2877  ;;  %v2747_v58 = vpop.permute.xlu0 %2746 }
 0x43a   :  { %2951 = vst.msk [vmem:[#allocation3 + $0x1b0] sm:$0xff] %vm1583_vm12, %v2878_v8 }
 0x43b   :  { %2819 = vst.msk [vmem:[#allocation3 + $0x1b8] sm:$0xff] %vm1449_vm11, %v2747_v58  ;;  %2895 = vrot.lane.b32.xlu1 %v2832_v22, %s10071_s12  ;;  %2893 = vrot.lane.b32.xlu0 %v2830_v7, %s10071_s12 }
 0x43d   :  { %v2354_v40 = vpop.permute.xlu1 %2353  ;;  %v1884_v48 = vpop.permute.xlu0 %1883 }
 0x43e   :  { %2424 = vst.msk [vmem:[#allocation3 + $0x1c8] sm:$0xff] %vm1049_vm8, %v2354_v40 }
 0x43f   :  { %1953 = vst.msk [vmem:[#allocation3 + $0x1d0] sm:$0xff] %vm573_vm5, %v1884_v48 }
 0x441   :  { %v2880_v28 = vpop.permute.xlu1 %2879  ;;  %v2485_v53 = vpop.permute.xlu0 %2484  ;;  %v3015_v60 = vld [vmem:[#allocation3 + $0x1b0] sm:$0xff] }
 0x442   :  { %2952 = vst.msk [vmem:[#allocation3 + $0x1b8] sm:$0xff] %vm1583_vm12, %v2880_v28  ;;  %v3194_v33 = vsel %vm3030_vm13, %v3015_v60, 0 }
 0x443   :  { %2556 = vst.msk [vmem:[#allocation3 + $0x1c0] sm:$0xff] %vm1183_vm9, %v2485_v53  ;;  %v12809_v16 = vand.u32 4294901760, %v3194_v33 }
 0x445   :  { %v2092_v27 = vpop.permute.xlu1 %2091  ;;  %v1886_v5 = vpop.permute.xlu0 %1885  ;;  %v12812_v56 = vsub.f32 %v3194_v33, %v12809_v16 }
 0x446   :  { %2161 = vst.msk [vmem:[#allocation3 + $0x1d0] sm:$0xff] %vm783_vm6, %v2092_v27 }
 0x447   :  { %15166 = vst [vmem:[#allocation62_spill] sm:$0xff] %v12812_v56  ;;  %1954 = vst.msk [vmem:[#allocation3 + $0x1d8] sm:$0xff] %vm573_vm5, %v1886_v5  ;;  %v3839_v41 = vand.u32 4294901760, %v12812_v56 }
 0x449   :  { %v2615_v46 = vpop.permute.xlu1 %2614  ;;  %v2487_v61 = vpop.permute.xlu0 %2486  ;;  %9178 = vmatprep.mubr.f32.mxu0 %v3839_v41  ;;  %v3840_v36 = vsub.f32 %v12812_v56, %v3839_v41  ;;  %v3016_v22 = vld [vmem:[#allocation3 + $0x1b8] sm:$0xff] }
 0x44a   :  { %2686 = vst.msk [vmem:[#allocation3 + $0x1c0] sm:$0xff] %vm1314_vm10, %v2615_v46  ;;  %v3197_v7 = vsel %vm3030_vm13, %v3016_v22, 0 }
 0x44b   :  { %2557 = vst.msk [vmem:[#allocation3 + $0x1c8] sm:$0xff] %vm1183_vm9, %v2487_v61  ;;  %v3841_v8 = vand.u32 4294901760, %v3840_v36  ;;  %v12821_v58 = vand.u32 4294901760, %v3197_v7 }
 0x44d   :  { %v2222_v40 = vpop.permute.xlu1 %2221  ;;  %v2094_v48 = vpop.permute.xlu0 %2093  ;;  %8860 = vmatprep.mubr.f32.mxu1 %v3841_v8  ;;  %v12824_v28 = vsub.f32 %v3197_v7, %v12821_v58 }
 0x44e   :  { %2291 = vst.msk [vmem:[#allocation3 + $0x1d0] sm:$0xff] %vm914_vm7, %v2222_v40 }
 0x44f   :  { %15167 = vst [vmem:[#allocation63_spill] sm:$0xff] %v12824_v28  ;;  %2162 = vst.msk [vmem:[#allocation3 + $0x1d8] sm:$0xff] %vm783_vm6, %v2094_v48  ;;  %v3849_v53 = vand.u32 4294901760, %v12824_v28 }
 0x451   :  { %v2749_v60 = vpop.permute.xlu1 %2748  ;;  %v2617_v33 = vpop.permute.xlu0 %2616  ;;  %9179 = vmatmul.mubr.f32.gmra.mrb[54].mxu0 %v3849_v53  ;;  %v3850_v27 = vsub.f32 %v12824_v28, %v3849_v53 }
 0x452   :  { %2820 = vst.msk [vmem:[#allocation3 + $0x1c0] sm:$0xff] %vm1449_vm11, %v2749_v60 }
 0x453   :  { %2687 = vst.msk [vmem:[#allocation3 + $0x1c8] sm:$0xff] %vm1314_vm10, %v2617_v33  ;;  %v3851_v5 = vand.u32 4294901760, %v3850_v27 }
 0x455   :  { %v2356_v41 = vpop.permute.xlu1 %2355  ;;  %v2224_v46 = vpop.permute.xlu0 %2223  ;;  %8861 = vmatmul.mubr.f32.gmra.mrb[54].mxu1 %v3851_v5 }
 0x456   :  { %2425 = vst.msk [vmem:[#allocation3 + $0x1d0] sm:$0xff] %vm1049_vm8, %v2356_v41 }
 0x457   :  { %2292 = vst.msk [vmem:[#allocation3 + $0x1d8] sm:$0xff] %vm914_vm7, %v2224_v46 }
 0x459   :  { %v2882_v61 = vpop.permute.xlu1 %2881  ;;  %v2751_v36 = vpop.permute.xlu0 %2750 }
 0x45a   :  { %2953 = vst.msk [vmem:[#allocation3 + $0x1c0] sm:$0xff] %vm1583_vm12, %v2882_v61 }
 0x45b   :  { %2821 = vst.msk [vmem:[#allocation3 + $0x1c8] sm:$0xff] %vm1449_vm11, %v2751_v36 }
 0x45d   :  { %v2358_v22 = vpop.permute.xlu1 %2357  ;;  %v1888_v7 = vpop.permute.xlu0 %1887 }
 0x45e   :  { %2426 = vst.msk [vmem:[#allocation3 + $0x1d8] sm:$0xff] %vm1049_vm8, %v2358_v22 }
 0x45f   :  { %1955 = vst.msk [vmem:[#allocation3 + $0x1e0] sm:$0xff] %vm573_vm5, %v1888_v7 }
 0x461   :  { %v2884_v8 = vpop.permute.xlu1 %2883  ;;  %v2489_v40 = vpop.permute.xlu0 %2488  ;;  %v3017_v48 = vld [vmem:[#allocation3 + $0x1c0] sm:$0xff] }
 0x462   :  { %2954 = vst.msk [vmem:[#allocation3 + $0x1c8] sm:$0xff] %vm1583_vm12, %v2884_v8  ;;  %v3200_v53 = vsel %vm3030_vm13, %v3017_v48, 0 }
 0x463   :  { %2558 = vst.msk [vmem:[#allocation3 + $0x1d0] sm:$0xff] %vm1183_vm9, %v2489_v40  ;;  %v12841_v60 = vand.u32 4294901760, %v3200_v53 }
 0x465   :  { %v2096_v33 = vpop.permute.xlu1 %2095  ;;  %v1890_v27 = vpop.permute.xlu0 %1889  ;;  %v12844_v5 = vsub.f32 %v3200_v53, %v12841_v60 }
 0x466   :  { %2163 = vst.msk [vmem:[#allocation3 + $0x1e0] sm:$0xff] %vm783_vm6, %v2096_v33 }
 0x467   :  { %15168 = vst [vmem:[#allocation64_spill] sm:$0xff] %v12844_v5  ;;  %1956 = vst.msk [vmem:[#allocation3 + $0x1e8] sm:$0xff] %vm573_vm5, %v1890_v27  ;;  %v3859_v41 = vand.u32 4294901760, %v12844_v5 }
 0x469   :  { %v2619_v46 = vpop.permute.xlu1 %2618  ;;  %v2491_v61 = vpop.permute.xlu0 %2490  ;;  %9181 = vmatprep.mubr.f32.mxu0 %v3859_v41  ;;  %v3860_v36 = vsub.f32 %v12844_v5, %v3859_v41  ;;  %v3018_v22 = vld [vmem:[#allocation3 + $0x1c8] sm:$0xff] }
 0x46a   :  { %2688 = vst.msk [vmem:[#allocation3 + $0x1d0] sm:$0xff] %vm1314_vm10, %v2619_v46  ;;  %v3203_v7 = vsel %vm3030_vm13, %v3018_v22, 0 }
 0x46b   :  { %2559 = vst.msk [vmem:[#allocation3 + $0x1d8] sm:$0xff] %vm1183_vm9, %v2491_v61  ;;  %v3861_v8 = vand.u32 4294901760, %v3860_v36  ;;  %v12853_v40 = vand.u32 4294901760, %v3203_v7 }
 0x46d   :  { %v2226_v48 = vpop.permute.xlu1 %2225  ;;  %v2098_v53 = vpop.permute.xlu0 %2097  ;;  %8863 = vmatprep.mubr.f32.mxu1 %v3861_v8  ;;  %v12856_v33 = vsub.f32 %v3203_v7, %v12853_v40 }
 0x46e   :  { %2293 = vst.msk [vmem:[#allocation3 + $0x1e0] sm:$0xff] %vm914_vm7, %v2226_v48 }
 0x46f   :  { %15169 = vst [vmem:[#allocation65_spill] sm:$0xff] %v12856_v33  ;;  %2164 = vst.msk [vmem:[#allocation3 + $0x1e8] sm:$0xff] %vm783_vm6, %v2098_v53  ;;  %v3869_v27 = vand.u32 4294901760, %v12856_v33 }
 0x471   :  { %v2753_v41 = vpop.permute.xlu1 %2752  ;;  %v2621_v46 = vpop.permute.xlu0 %2620  ;;  %9182 = vmatmul.mubr.f32.gmra.mrb[56].mxu0 %v3869_v27  ;;  %v3870_v61 = vsub.f32 %v12856_v33, %v3869_v27 }
 0x472   :  { %2822 = vst.msk [vmem:[#allocation3 + $0x1d0] sm:$0xff] %vm1449_vm11, %v2753_v41 }
 0x473   :  { %2689 = vst.msk [vmem:[#allocation3 + $0x1d8] sm:$0xff] %vm1314_vm10, %v2621_v46  ;;  %v3871_v36 = vand.u32 4294901760, %v3870_v61 }
 0x475   :  { %v2360_v22 = vpop.permute.xlu1 %2359  ;;  %v2228_v8 = vpop.permute.xlu0 %2227  ;;  %8864 = vmatmul.mubr.f32.gmra.mrb[56].mxu1 %v3871_v36 }
 0x476   :  { %2427 = vst.msk [vmem:[#allocation3 + $0x1e0] sm:$0xff] %vm1049_vm8, %v2360_v22 }
 0x477   :  { %2294 = vst.msk [vmem:[#allocation3 + $0x1e8] sm:$0xff] %vm914_vm7, %v2228_v8 }
 0x479   :  { %v2886_v7 = vpop.permute.xlu1 %2885  ;;  %v2755_v48 = vpop.permute.xlu0 %2754 }
 0x47a   :  { %2955 = vst.msk [vmem:[#allocation3 + $0x1d0] sm:$0xff] %vm1583_vm12, %v2886_v7 }
 0x47b   :  { %2823 = vst.msk [vmem:[#allocation3 + $0x1d8] sm:$0xff] %vm1449_vm11, %v2755_v48 }
 0x47d   :  { %v2362_v53 = vpop.permute.xlu1 %2361  ;;  %v1892_v27 = vpop.permute.xlu0 %1891 }
 0x47e   :  { %2428 = vst.msk [vmem:[#allocation3 + $0x1e8] sm:$0xff] %vm1049_vm8, %v2362_v53 }
 0x47f   :  { %1957 = vst.msk [vmem:[#allocation3 + $0x1f0] sm:$0xff] %vm573_vm5, %v1892_v27 }
 0x481   :  { %v2888_v41 = vpop.permute.xlu1 %2887  ;;  %v2493_v46 = vpop.permute.xlu0 %2492  ;;  %v3019_v61 = vld [vmem:[#allocation3 + $0x1d0] sm:$0xff] }
 0x482   :  { %2956 = vst.msk [vmem:[#allocation3 + $0x1d8] sm:$0xff] %vm1583_vm12, %v2888_v41  ;;  %v3206_v36 = vsel %vm3030_vm13, %v3019_v61, 0 }
 0x483   :  { %2560 = vst.msk [vmem:[#allocation3 + $0x1e0] sm:$0xff] %vm1183_vm9, %v2493_v46  ;;  %v12873_v22 = vand.u32 4294901760, %v3206_v36 }
 0x485   :  { %15170 = vst [vmem:[#allocation66_spill] sm:$0xff] %v12873_v22  ;;  %v2100_v8 = vpop.permute.xlu1 %2099  ;;  %v1894_v7 = vpop.permute.xlu0 %1893  ;;  %v12876_v48 = vsub.f32 %v3206_v36, %v12873_v22 }
 0x486   :  { %2165 = vst.msk [vmem:[#allocation3 + $0x1f0] sm:$0xff] %vm783_vm6, %v2100_v8 }
 0x487   :  { %15171 = vst [vmem:[#allocation67_spill] sm:$0xff] %v12876_v48  ;;  %1958 = vst.msk [vmem:[#allocation3 + $0x1f8] sm:$0xff] %vm573_vm5, %v1894_v7  ;;  %v3879_v53 = vand.u32 4294901760, %v12876_v48 }
 0x489   :  { %v2623_v27 = vpop.permute.xlu1 %2622  ;;  %v2495_v33 = vpop.permute.xlu0 %2494  ;;  %9184 = vmatprep.mubr.f32.mxu0 %v3879_v53  ;;  %v3880_v41 = vsub.f32 %v12876_v48, %v3879_v53  ;;  %v3020_v46 = vld [vmem:[#allocation3 + $0x1d8] sm:$0xff] }
 0x48a   :  { %2690 = vst.msk [vmem:[#allocation3 + $0x1e0] sm:$0xff] %vm1314_vm10, %v2623_v27  ;;  %v3209_v61 = vsel %vm3030_vm13, %v3020_v46, 0 }
 0x48b   :  { %2561 = vst.msk [vmem:[#allocation3 + $0x1e8] sm:$0xff] %vm1183_vm9, %v2495_v33  ;;  %v3881_v36 = vand.u32 4294901760, %v3880_v41  ;;  %v12885_v5 = vand.u32 4294901760, %v3209_v61 }
 0x48d   :  { %15172 = vst [vmem:[#allocation68_spill] sm:$0xff] %v12885_v5  ;;  %v2230_v8 = vpop.permute.xlu1 %2229  ;;  %v2102_v28 = vpop.permute.xlu0 %2101  ;;  %8866 = vmatprep.mubr.f32.mxu1 %v3881_v36  ;;  %v12888_v7 = vsub.f32 %v3209_v61, %v12885_v5 }
 0x48e   :  { %2295 = vst.msk [vmem:[#allocation3 + $0x1f0] sm:$0xff] %vm914_vm7, %v2230_v8 }
 0x48f   :  { %15173 = vst [vmem:[#allocation69_spill] sm:$0xff] %v12888_v7  ;;  %2166 = vst.msk [vmem:[#allocation3 + $0x1f8] sm:$0xff] %vm783_vm6, %v2102_v28  ;;  %v3889_v53 = vand.u32 4294901760, %v12888_v7 }
 0x491   :  { %v2757_v27 = vpop.permute.xlu1 %2756  ;;  %v2625_v48 = vpop.permute.xlu0 %2624  ;;  %9185 = vmatmul.mubr.f32.gmra.mrb[58].mxu0 %v3889_v53  ;;  %v3890_v33 = vsub.f32 %v12888_v7, %v3889_v53 }
 0x492   :  { %2824 = vst.msk [vmem:[#allocation3 + $0x1e0] sm:$0xff] %vm1449_vm11, %v2757_v27 }
 0x493   :  { %2691 = vst.msk [vmem:[#allocation3 + $0x1e8] sm:$0xff] %vm1314_vm10, %v2625_v48  ;;  %v3891_v41 = vand.u32 4294901760, %v3890_v33 }
 0x495   :  { %v2364_v46 = vpop.permute.xlu1 %2363  ;;  %v2232_v36 = vpop.permute.xlu0 %2231  ;;  %8867 = vmatmul.mubr.f32.gmra.mrb[58].mxu1 %v3891_v41 }
 0x496   :  { %2429 = vst.msk [vmem:[#allocation3 + $0x1f0] sm:$0xff] %vm1049_vm8, %v2364_v46 }
 0x497   :  { %2296 = vst.msk [vmem:[#allocation3 + $0x1f8] sm:$0xff] %vm914_vm7, %v2232_v36 }
 0x499   :  { %v2890_v28 = vpop.permute.xlu1 %2889  ;;  %v2759_v61 = vpop.permute.xlu0 %2758 }
 0x49a   :  { %2957 = vst.msk [vmem:[#allocation3 + $0x1e0] sm:$0xff] %vm1583_vm12, %v2890_v28 }
 0x49b   :  { %2825 = vst.msk [vmem:[#allocation3 + $0x1e8] sm:$0xff] %vm1449_vm11, %v2759_v61 }
 0x49d   :  { %v2497_v8 = vpop.permute.xlu1 %2496  ;;  %v2366_v53 = vpop.permute.xlu0 %2365 }
 0x49e   :  { %2562 = vst.msk [vmem:[#allocation3 + $0x1f0] sm:$0xff] %vm1183_vm9, %v2497_v8 }
 0x49f   :  { %2430 = vst.msk [vmem:[#allocation3 + $0x1f8] sm:$0xff] %vm1049_vm8, %v2366_v53 }
 0x4a1   :  { %v2499_v48 = vpop.permute.xlu1 %2498  ;;  %v2892_v27 = vpop.permute.xlu0 %2891  ;;  %v3021_v33 = vld [vmem:[#allocation3 + $0x1e0] sm:$0xff] }
 0x4a2   :  { %2563 = vst.msk [vmem:[#allocation3 + $0x1f8] sm:$0xff] %vm1183_vm9, %v2499_v48  ;;  %v3212_v41 = vsel %vm3030_vm13, %v3021_v33, 0 }
 0x4a3   :  { %2958 = vst.msk [vmem:[#allocation3 + $0x1e8] sm:$0xff] %vm1583_vm12, %v2892_v27  ;;  %v12905_v46 = vand.u32 4294901760, %v3212_v41 }
 0x4a5   :  { %15174 = vst [vmem:[#allocation70_spill] sm:$0xff] %v12905_v46  ;;  %v2629_v36 = vpop.permute.xlu1 %2628  ;;  %v2627_v28 = vpop.permute.xlu0 %2626  ;;  %v12908_v61 = vsub.f32 %v3212_v41, %v12905_v46 }
 0x4a6   :  { %2693 = vst.msk [vmem:[#allocation3 + $0x1f8] sm:$0xff] %vm1314_vm10, %v2629_v36  ;;  %2692 = vst.msk [vmem:[#allocation3 + $0x1f0] sm:$0xff] %vm1314_vm10, %v2627_v28 }
 0x4a7   :  { %15175 = vst [vmem:[#allocation71_spill] sm:$0xff] %v12908_v61  ;;  %v3899_v8 = vand.u32 4294901760, %v12908_v61 }
 0x4a9   :  { %v2763_v53 = vpop.permute.xlu1 %2762  ;;  %v2761_v7 = vpop.permute.xlu0 %2760  ;;  %9187 = vmatprep.mubr.f32.mxu0 %v3899_v8  ;;  %v3900_v48 = vsub.f32 %v12908_v61, %v3899_v8 }
 0x4aa   :  { %v3022_v27 = vld [vmem:[#allocation3 + $0x1e8] sm:$0xff]  ;;  %2827 = vst.msk [vmem:[#allocation3 + $0x1f8] sm:$0xff] %vm1449_vm11, %v2763_v53  ;;  %2826 = vst.msk [vmem:[#allocation3 + $0x1f0] sm:$0xff] %vm1449_vm11, %v2761_v7 }
 0x4ab   :  { %v3215_v33 = vsel %vm3030_vm13, %v3022_v27, 0  ;;  %v3901_v41 = vand.u32 4294901760, %v3900_v48 }
 0x4ac   :  { %v12917_v56 = vand.u32 4294901760, %v3215_v33 }
 0x4ad   :  { %v2896_v36 = vpop.permute.xlu1 %2895  ;;  %v2894_v44 = vpop.permute.xlu0 %2893  ;;  %8869 = vmatprep.mubr.f32.mxu1 %v3901_v41 }
 0x4ae   :  { %15176 = vst [vmem:[#allocation72_spill] sm:$0xff] %v12917_v56  ;;  %v12920_v28 = vsub.f32 %v3215_v33, %v12917_v56  ;;  %2960 = vst.msk [vmem:[#allocation3 + $0x1f8] sm:$0xff] %vm1583_vm12, %v2896_v36 }
 0x4af   :  { %2959 = vst.msk [vmem:[#allocation3 + $0x1f0] sm:$0xff] %vm1583_vm12, %v2894_v44 }
 0x4b0   :  { %15177 = vst [vmem:[#allocation73_spill] sm:$0xff] %v12920_v28  ;;  %v3909_v8 = vand.u32 4294901760, %v12920_v28 }
 0x4b2   :  { %9188 = vmatmul.mubr.f32.gmra.mrb[60].mxu0 %v3909_v8  ;;  %v3910_v7 = vsub.f32 %v12920_v28, %v3909_v8 }
 0x4b4   :  { %v3911_v53 = vand.u32 4294901760, %v3910_v7 }
 0x4b5   :  { %v3024_v27 = vld [vmem:[#allocation3 + $0x1f8] sm:$0xff] }
 0x4b6   :  { %8870 = vmatmul.mubr.f32.gmra.mrb[60].mxu1 %v3911_v53  ;;  %v3023_v48 = vld [vmem:[#allocation3 + $0x1f0] sm:$0xff]  ;;  %v3221_v41 = vsel %vm3030_vm13, %v3024_v27, 0 }
 0x4b7   :  { %v3218_v61 = vsel %vm3030_vm13, %v3023_v48, 0  ;;  %v12930_v33 = vand.u32 4294901760, %v3221_v41 }
 0x4b8   :  { %v12928_v49 = vand.u32 4294901760, %v3218_v61 }
 0x4b9   :  { %v12936_v44 = vsub.f32 %v3221_v41, %v12930_v33  ;;  %v15188_v41 = vld [vmem:[#allocation37_spill] sm:$0xff] }
 0x4ba   :  { %v12933_v36 = vsub.f32 %v3218_v61, %v12928_v49  ;;  %v15186_v61 = vld [vmem:[#allocation33_spill] sm:$0xff] }
 0x4bb   :  { %15179 = vst [vmem:[#allocation75_spill] sm:$0xff] %v12936_v44  ;;  %v3929_v7 = vand.u32 4294901760, %v12936_v44 }
 0x4bc   :  { %15178 = vst [vmem:[#allocation74_spill] sm:$0xff] %v12933_v36  ;;  %v3919_v8 = vand.u32 4294901760, %v12933_v36 }
 0x4bd   :  { %v3930_v48 = vsub.f32 %v12936_v44, %v3929_v7  ;;  %v15194_v44 = vld [vmem:[#allocation51_spill] sm:$0xff] }
 0x4be   :  { %9190 = vmatprep.mubr.f32.mxu0 %v3919_v8  ;;  %v3920_v53 = vsub.f32 %v12933_v36, %v3919_v8  ;;  %v15189_v8 = vld [vmem:[#allocation39_spill] sm:$0xff]  ;;  %v15195_v36 = vld [vmem:[#allocation53_spill] sm:$0xff] }
 0x4bf   :  { %9191 = vmatmul.mubr.f32.gmra.mrb[62].mxu0 %v3929_v7  ;;  %v3931_v28 = vand.u32 4294901760, %v3930_v48  ;;  %v15190_v7 = vld [vmem:[#allocation41_spill] sm:$0xff] }
 0x4c0   :  { %9203 = vmatprep.mubr.f32.mxu0 %v10727_v59  ;;  %v3921_v27 = vand.u32 4294901760, %v3920_v53  ;;  %v15191_v53 = vld [vmem:[#allocation43_spill] sm:$0xff]  ;;  %v15192_v48 = vld [vmem:[#allocation45_spill] sm:$0xff] }
 0x4c2   :  { %8872 = vmatprep.mubr.f32.mxu1 %v3921_v27  ;;  %v15193_v27 = vld [vmem:[#allocation47_spill] sm:$0xff] }
 0x4c3   :  { %8873 = vmatmul.mubr.f32.gmra.mrb[62].mxu1 %v3931_v28  ;;  %9204 = vmatmul.mubr.f32.vlgmr.msra.gmra.mrb[0].mxu0 %v10756_v21  ;;  %v15187_v28 = vld [vmem:[#allocation35_spill] sm:$0xff] }
 0x4c4   :  { %9532 = vmatpush3.bf16.msra.mxu0 %v10477_v62  ;;  %8885 = vmatprep.mubr.f32.mxu1 %v10727_v59  ;;  %v15180_v62 = vld [vmem:[#allocation21_spill] sm:$0xff] }
 0x4c5   :  { %9206 = vmatprep.mubr.f32.mxu0 %v10840_v13  ;;  %9534 = vmatprep.subr.bf16.mxu0 %v10501_v10 }
 0x4c7   :  { %8886 = vmatmul.mubr.f32.vlgmr.msra.gmra.mrb[0].mxu1 %v10756_v21  ;;  %9207 = vmatmul.mubr.f32.gmra.mrb[2].mxu0 %v10861_v30 }
 0x4c8   :  { %8888 = vmatprep.mubr.f32.mxu1 %v10840_v13  ;;  %9209 = vmatprep.mubr.f32.mxu0 %v10927_v47 }
 0x4c9   :  { %9576 = vmatpush3.bf16.msra.mxu1 %v10481_v63  ;;  %9536 = vmatpush3.bf16.msra.mxu0 %v10501_v10  ;;  %v15181_v63 = vld [vmem:[#allocation23_spill] sm:$0xff]  ;;  %v15182_v10 = vld [vmem:[#allocation25_spill] sm:$0xff] }
 0x4ca   :  { %9574 = vmatprep.subr.bf16.mxu1 %v10508_v12  ;;  %9307 = vmatprep.subr.mxu0 %v10510_v14 }
 0x4cb   :  { %8889 = vmatmul.mubr.f32.gmra.mrb[2].mxu1 %v10861_v30  ;;  %9210 = vmatmul.mubr.f32.gmra.mrb[4].mxu0 %v10948_v37 }
 0x4cc   :  { %8891 = vmatprep.mubr.f32.mxu1 %v10927_v47  ;;  %9212 = vmatprep.mubr.f32.mxu0 %v11009_v43 }
 0x4cd   :  { %9577 = vmatpush3.bf16.msra.mxu1 %v10508_v12  ;;  %9308 = vmatpush3.msra.mxu0 %v10510_v14  ;;  %v15183_v12 = vld [vmem:[#allocation27_spill] sm:$0xff]  ;;  %v15184_v14 = vld [vmem:[#allocation29_spill] sm:$0xff] }
 0x4ce   :  { %9575 = vmatprep.subr.mxu1 %v10524_v18 }
 0x4cf   :  { %8892 = vmatmul.mubr.f32.gmra.mrb[4].mxu1 %v10948_v37  ;;  %9213 = vmatmul.mubr.f32.gmra.mrb[6].mxu0 %v11030_v1 }
 0x4d0   :  { %8894 = vmatprep.mubr.f32.mxu1 %v11009_v43  ;;  %9215 = vmatprep.mubr.f32.mxu0 %v11091_v26 }
 0x4d1   :  { %9578 = vmatpush3.msra.mxu1 %v10524_v18  ;;  %v15185_v18 = vld [vmem:[#allocation31_spill] sm:$0xff] }
 0x4d3   :  { %8895 = vmatmul.mubr.f32.gmra.mrb[6].mxu1 %v11030_v1  ;;  %9216 = vmatmul.mubr.f32.gmra.mrb[8].mxu0 %v11112_v24 }
 0x4d4   :  { %8897 = vmatprep.mubr.f32.mxu1 %v11091_v26  ;;  %9218 = vmatprep.mubr.f32.mxu0 %v11146_v31 }
 0x4d7   :  { %8898 = vmatmul.mubr.f32.gmra.mrb[8].mxu1 %v11112_v24  ;;  %9219 = vmatmul.mubr.f32.gmra.mrb[10].mxu0 %v11148_v35 }
 0x4d8   :  { %8900 = vmatprep.mubr.f32.mxu1 %v11146_v31  ;;  %9221 = vmatprep.mubr.f32.mxu0 %v11271_v50 }
 0x4db   :  { %8901 = vmatmul.mubr.f32.gmra.mrb[10].mxu1 %v11148_v35  ;;  %9222 = vmatmul.mubr.f32.gmra.mrb[12].mxu0 %v11289_v45 }
 0x4dc   :  { %8903 = vmatprep.mubr.f32.mxu1 %v11271_v50  ;;  %9224 = vmatprep.mubr.f32.mxu0 %v11360_v6 }
 0x4df   :  { %8904 = vmatmul.mubr.f32.gmra.mrb[12].mxu1 %v11289_v45  ;;  %9225 = vmatmul.mubr.f32.gmra.mrb[14].mxu0 %v11382_v32 }
 0x4e0   :  { %8906 = vmatprep.mubr.f32.mxu1 %v11360_v6  ;;  %9227 = vmatprep.mubr.f32.mxu0 %v11440_v42 }
 0x4e3   :  { %8907 = vmatmul.mubr.f32.gmra.mrb[14].mxu1 %v11382_v32  ;;  %9228 = vmatmul.mubr.f32.gmra.mrb[16].mxu0 %v11458_v25 }
 0x4e4   :  { %8909 = vmatprep.mubr.f32.mxu1 %v11440_v42  ;;  %9230 = vmatprep.mubr.f32.mxu0 %v11516_v3 }
 0x4e7   :  { %8910 = vmatmul.mubr.f32.gmra.mrb[16].mxu1 %v11458_v25  ;;  %9231 = vmatmul.mubr.f32.gmra.mrb[18].mxu0 %v11534_v20 }
 0x4e8   :  { %8912 = vmatprep.mubr.f32.mxu1 %v11516_v3  ;;  %9233 = vmatprep.mubr.f32.mxu0 %v11590_v39 }
 0x4eb   :  { %8913 = vmatmul.mubr.f32.gmra.mrb[18].mxu1 %v11534_v20  ;;  %9234 = vmatmul.mubr.f32.gmra.mrb[20].mxu0 %v11608_v55 }
 0x4ec   :  { %8915 = vmatprep.mubr.f32.mxu1 %v11590_v39  ;;  %9236 = vmatprep.mubr.f32.mxu0 %v11676_v52 }
 0x4ef   :  { %8916 = vmatmul.mubr.f32.gmra.mrb[20].mxu1 %v11608_v55  ;;  %9237 = vmatmul.mubr.f32.gmra.mrb[22].mxu0 %v11697_v9 }
 0x4f0   :  { %8918 = vmatprep.mubr.f32.mxu1 %v11676_v52  ;;  %9239 = vmatprep.mubr.f32.mxu0 %v11757_v19 }
 0x4f3   :  { %8919 = vmatmul.mubr.f32.gmra.mrb[22].mxu1 %v11697_v9  ;;  %9240 = vmatmul.mubr.f32.gmra.mrb[24].mxu0 %v11775_v4 }
 0x4f4   :  { %8921 = vmatprep.mubr.f32.mxu1 %v11757_v19  ;;  %9242 = vmatprep.mubr.f32.mxu0 %v11833_v2 }
 0x4f7   :  { %8922 = vmatmul.mubr.f32.gmra.mrb[24].mxu1 %v11775_v4  ;;  %9243 = vmatmul.mubr.f32.gmra.mrb[26].mxu0 %v11851_v54 }
 0x4f8   :  { %8924 = vmatprep.mubr.f32.mxu1 %v11833_v2  ;;  %9245 = vmatprep.mubr.f32.mxu0 %v11909_v17 }
 0x4fb   :  { %8925 = vmatmul.mubr.f32.gmra.mrb[26].mxu1 %v11851_v54  ;;  %9246 = vmatmul.mubr.f32.gmra.mrb[28].mxu0 %v15180_v62 }
 0x4fc   :  { %8927 = vmatprep.mubr.f32.mxu1 %v11909_v17  ;;  %9248 = vmatprep.mubr.f32.mxu0 %v15181_v63 }
 0x4ff   :  { %8928 = vmatmul.mubr.f32.gmra.mrb[28].mxu1 %v15180_v62  ;;  %9249 = vmatmul.mubr.f32.gmra.mrb[30].mxu0 %v15182_v10 }
 0x500   :  { %8930 = vmatprep.mubr.f32.mxu1 %v15181_v63  ;;  %9251 = vmatprep.mubr.f32.mxu0 %v15183_v12 }
 0x503   :  { %8931 = vmatmul.mubr.f32.gmra.mrb[30].mxu1 %v15182_v10  ;;  %9252 = vmatmul.mubr.f32.gmra.mrb[32].mxu0 %v15184_v14 }
 0x504   :  { %8933 = vmatprep.mubr.f32.mxu1 %v15183_v12  ;;  %9254 = vmatprep.mubr.f32.mxu0 %v15185_v18 }
 0x507   :  { %8934 = vmatmul.mubr.f32.gmra.mrb[32].mxu1 %v15184_v14  ;;  %9255 = vmatmul.mubr.f32.gmra.mrb[34].mxu0 %v15186_v61 }
 0x508   :  { %8936 = vmatprep.mubr.f32.mxu1 %v15185_v18  ;;  %9257 = vmatprep.mubr.f32.mxu0 %v15187_v28 }
 0x50b   :  { %8937 = vmatmul.mubr.f32.gmra.mrb[34].mxu1 %v15186_v61  ;;  %9258 = vmatmul.mubr.f32.gmra.mrb[36].mxu0 %v15188_v41 }
 0x50c   :  { %8939 = vmatprep.mubr.f32.mxu1 %v15187_v28  ;;  %9260 = vmatprep.mubr.f32.mxu0 %v15189_v8 }
 0x50f   :  { %8940 = vmatmul.mubr.f32.gmra.mrb[36].mxu1 %v15188_v41  ;;  %9261 = vmatmul.mubr.f32.gmra.mrb[38].mxu0 %v15190_v7 }
 0x510   :  { %8942 = vmatprep.mubr.f32.mxu1 %v15189_v8  ;;  %9263 = vmatprep.mubr.f32.mxu0 %v15191_v53 }
 0x513   :  { %8943 = vmatmul.mubr.f32.gmra.mrb[38].mxu1 %v15190_v7  ;;  %9264 = vmatmul.mubr.f32.gmra.mrb[40].mxu0 %v15192_v48 }
 0x514   :  { %8945 = vmatprep.mubr.f32.mxu1 %v15191_v53  ;;  %9266 = vmatprep.mubr.f32.mxu0 %v15193_v27 }
 0x517   :  { %8946 = vmatmul.mubr.f32.gmra.mrb[40].mxu1 %v15192_v48  ;;  %9267 = vmatmul.mubr.f32.gmra.mrb[42].mxu0 %v12459_v38 }
 0x518   :  { %8948 = vmatprep.mubr.f32.mxu1 %v15193_v27  ;;  %9269 = vmatprep.mubr.f32.mxu0 %v12509_v0 }
 0x51b   :  { %8949 = vmatmul.mubr.f32.gmra.mrb[42].mxu1 %v12459_v38  ;;  %9270 = vmatmul.mubr.f32.gmra.mrb[44].mxu0 %v15194_v44 }
 0x51c   :  { %8951 = vmatprep.mubr.f32.mxu1 %v12509_v0  ;;  %9272 = vmatprep.mubr.f32.mxu0 %v15195_v36 }
 0x51f   :  { %8952 = vmatmul.mubr.f32.gmra.mrb[44].mxu1 %v15194_v44  ;;  %9273 = vmatmul.mubr.f32.gmra.mrb[46].mxu0 %v12589_v57 }
 0x520   :  { %8954 = vmatprep.mubr.f32.mxu1 %v15195_v36  ;;  %9275 = vmatprep.mubr.f32.mxu0 %v12633_v11 }
 0x523   :  { %8955 = vmatmul.mubr.f32.gmra.mrb[46].mxu1 %v12589_v57  ;;  %9276 = vmatmul.mubr.f32.gmra.mrb[48].mxu0 %v12653_v23 }
 0x524   :  { %8957 = vmatprep.mubr.f32.mxu1 %v12633_v11  ;;  %9278 = vmatprep.mubr.f32.mxu0 %v12697_v34 }
 0x527   :  { %8958 = vmatmul.mubr.f32.gmra.mrb[48].mxu1 %v12653_v23  ;;  %9279 = vmatmul.mubr.f32.gmra.mrb[50].mxu0 %v12715_v51 }
 0x528   :  { %8960 = vmatprep.mubr.f32.mxu1 %v12697_v34  ;;  %9281 = vmatprep.mubr.f32.mxu0 %v12755_v29 }
 0x52b   :  { %8961 = vmatmul.mubr.f32.gmra.mrb[50].mxu1 %v12715_v51  ;;  %9282 = vmatmul.mubr.f32.gmra.mrb[52].mxu0 %v12773_v15 }
 0x52c   :  { %8963 = vmatprep.mubr.f32.mxu1 %v12755_v29  ;;  %9284 = vmatprep.mubr.f32.mxu0 %v12809_v16 }
 0x52f   :  { %8964 = vmatmul.mubr.f32.gmra.mrb[52].mxu1 %v12773_v15  ;;  %9285 = vmatmul.mubr.f32.gmra.mrb[54].mxu0 %v12821_v58 }
 0x530   :  { %8966 = vmatprep.mubr.f32.mxu1 %v12809_v16  ;;  %9287 = vmatprep.mubr.f32.mxu0 %v12841_v60 }
 0x533   :  { %8967 = vmatmul.mubr.f32.gmra.mrb[54].mxu1 %v12821_v58  ;;  %9288 = vmatmul.mubr.f32.gmra.mrb[56].mxu0 %v12853_v40 }
 0x534   :  { %8969 = vmatprep.mubr.f32.mxu1 %v12841_v60  ;;  %9290 = vmatprep.mubr.f32.mxu0 %v12873_v22 }
 0x537   :  { %8970 = vmatmul.mubr.f32.gmra.mrb[56].mxu1 %v12853_v40  ;;  %9291 = vmatmul.mubr.f32.gmra.mrb[58].mxu0 %v12885_v5 }
 0x538   :  { %8972 = vmatprep.mubr.f32.mxu1 %v12873_v22  ;;  %9293 = vmatprep.mubr.f32.mxu0 %v12905_v46  ;;  %v15196_v22 = vld [vmem:[#allocation4_spill] sm:$0xff] }
 0x53b   :  { %8973 = vmatmul.mubr.f32.gmra.mrb[58].mxu1 %v12885_v5  ;;  %9294 = vmatmul.mubr.f32.gmra.mrb[60].mxu0 %v12917_v56  ;;  %v15197_v5 = vld [vmem:[#allocation5_spill] sm:$0xff] }
 0x53c   :  { %8975 = vmatprep.mubr.f32.mxu1 %v12905_v46  ;;  %9296 = vmatprep.mubr.f32.mxu0 %v12928_v49  ;;  %v15198_v46 = vld [vmem:[#allocation6_spill] sm:$0xff] }
 0x53f   :  { %8976 = vmatmul.mubr.f32.gmra.mrb[60].mxu1 %v12917_v56  ;;  %9297 = vmatmul.mubr.f32.gmra.mrb[62].mxu0 %v12930_v33  ;;  %v15199_v56 = vld [vmem:[#allocation7_spill] sm:$0xff] }
 0x540   :  { %8978 = vmatprep.mubr.f32.mxu1 %v12928_v49  ;;  %9309 = vmatprep.mubr.f32.mxu0 %v10727_v59  ;;  %v15200_v59 = vld [vmem:[#allocation8_spill] sm:$0xff] }
 0x543   :  { %8979 = vmatmul.mubr.f32.gmra.mrb[62].mxu1 %v12930_v33  ;;  %9310 = vmatmul.mubr.f32.vlgmr.msra.gmra.mrb[0].mxu0 %v10756_v21  ;;  %v15201_v21 = vld [vmem:[#allocation9_spill] sm:$0xff] }
 0x544   :  { %9009 = vmatprep.mubr.f32.mxu1 %v15196_v22  ;;  %9312 = vmatprep.mubr.f32.mxu0 %v10840_v13  ;;  %v15202_v13 = vld [vmem:[#allocation10_spill] sm:$0xff]  ;;  %v15231_v22 = vld [vmem:[#allocation55_spill] sm:$0xff] }
 0x547   :  { %9010 = vmatmul.mubr.f32.vlgmr.msra.gmra.mrb[12].mxu1 %v15197_v5  ;;  %9313 = vmatmul.mubr.f32.gmra.mrb[2].mxu0 %v10861_v30  ;;  %v15203_v30 = vld [vmem:[#allocation11_spill] sm:$0xff]  ;;  %v15230_v5 = vld [vmem:[#allocation54_spill] sm:$0xff] }
 0x548   :  { %9012 = vmatprep.mubr.f32.mxu1 %v15198_v46  ;;  %9315 = vmatprep.mubr.f32.mxu0 %v10927_v47  ;;  %v15204_v47 = vld [vmem:[#allocation12_spill] sm:$0xff] }
 0x549   :  { %v15232_v46 = vld [vmem:[#allocation56_spill] sm:$0xff] }
 0x54b   :  { %9013 = vmatmul.mubr.f32.gmra.mrb[14].mxu1 %v15199_v56  ;;  %9316 = vmatmul.mubr.f32.gmra.mrb[4].mxu0 %v10948_v37  ;;  %v15205_v37 = vld [vmem:[#allocation13_spill] sm:$0xff]  ;;  %v15229_v56 = vld [vmem:[#allocation52_spill] sm:$0xff] }
 0x54c   :  { %9015 = vmatprep.mubr.f32.mxu1 %v15200_v59  ;;  %9318 = vmatprep.mubr.f32.mxu0 %v11009_v43  ;;  %v15206_v43 = vld [vmem:[#allocation14_spill] sm:$0xff]  ;;  %v15243_v59 = vld [vmem:[#allocation69_spill] sm:$0xff] }
 0x54f   :  { %9016 = vmatmul.mubr.f32.gmra.mrb[16].mxu1 %v15201_v21  ;;  %9319 = vmatmul.mubr.f32.gmra.mrb[6].mxu0 %v11030_v1  ;;  %v15207_v1 = vld [vmem:[#allocation15_spill] sm:$0xff] }
 0x550   :  { %9018 = vmatprep.mubr.f32.mxu1 %v15202_v13  ;;  %9321 = vmatprep.mubr.f32.mxu0 %v11091_v26  ;;  %v15208_v26 = vld [vmem:[#allocation16_spill] sm:$0xff]  ;;  %v15245_v13 = vld [vmem:[#allocation73_spill] sm:$0xff] }
 0x553   :  { %9019 = vmatmul.mubr.f32.gmra.mrb[18].mxu1 %v15203_v30  ;;  %9322 = vmatmul.mubr.f32.gmra.mrb[8].mxu0 %v11112_v24  ;;  %v15209_v24 = vld [vmem:[#allocation17_spill] sm:$0xff] }
 0x554   :  { %9021 = vmatprep.mubr.f32.mxu1 %v15204_v47  ;;  %9324 = vmatprep.mubr.f32.mxu0 %v11146_v31  ;;  %v15210_v31 = vld [vmem:[#allocation18_spill] sm:$0xff] }
 0x557   :  { %9022 = vmatmul.mubr.f32.gmra.mrb[20].mxu1 %v15205_v37  ;;  %9325 = vmatmul.mubr.f32.gmra.mrb[10].mxu0 %v11148_v35  ;;  %v15211_v35 = vld [vmem:[#allocation19_spill] sm:$0xff]  ;;  %v15250_v37 = vld [vmem:[#allocation70_spill] sm:$0xff] }
 0x558   :  { %9024 = vmatprep.mubr.f32.mxu1 %v15206_v43  ;;  %9327 = vmatprep.mubr.f32.mxu0 %v11271_v50  ;;  %v15212_v50 = vld [vmem:[#allocation20_spill] sm:$0xff] }
 0x559   :  { %v15251_v43 = vld [vmem:[#allocation72_spill] sm:$0xff] }
 0x55b   :  { %9025 = vmatmul.mubr.f32.gmra.mrb[22].mxu1 %v15207_v1  ;;  %9328 = vmatmul.mubr.f32.gmra.mrb[12].mxu0 %v11289_v45  ;;  %v15213_v45 = vld [vmem:[#allocation22_spill] sm:$0xff] }
 0x55c   :  { %9027 = vmatprep.mubr.f32.mxu1 %v15208_v26  ;;  %9330 = vmatprep.mubr.f32.mxu0 %v11360_v6  ;;  %v15214_v6 = vld [vmem:[#allocation24_spill] sm:$0xff] }
 0x55f   :  { %9028 = vmatmul.mubr.f32.gmra.mrb[24].mxu1 %v15209_v24  ;;  %9331 = vmatmul.mubr.f32.gmra.mrb[14].mxu0 %v11382_v32  ;;  %v15215_v32 = vld [vmem:[#allocation26_spill] sm:$0xff] }
 0x560   :  { %9030 = vmatprep.mubr.f32.mxu1 %v15210_v31  ;;  %9333 = vmatprep.mubr.f32.mxu0 %v11440_v42  ;;  %v15216_v42 = vld [vmem:[#allocation28_spill] sm:$0xff] }
 0x563   :  { %9031 = vmatmul.mubr.f32.gmra.mrb[26].mxu1 %v15211_v35  ;;  %9334 = vmatmul.mubr.f32.gmra.mrb[16].mxu0 %v11458_v25  ;;  %v15217_v25 = vld [vmem:[#allocation30_spill] sm:$0xff] }
 0x564   :  { %9033 = vmatprep.mubr.f32.mxu1 %v15212_v50  ;;  %9336 = vmatprep.mubr.f32.mxu0 %v11516_v3  ;;  %v15218_v3 = vld [vmem:[#allocation32_spill] sm:$0xff] }
 0x567   :  { %9034 = vmatmul.mubr.f32.gmra.mrb[28].mxu1 %v15213_v45  ;;  %9337 = vmatmul.mubr.f32.gmra.mrb[18].mxu0 %v11534_v20  ;;  %v15219_v20 = vld [vmem:[#allocation34_spill] sm:$0xff] }
 0x568   :  { %9036 = vmatprep.mubr.f32.mxu1 %v15214_v6  ;;  %9339 = vmatprep.mubr.f32.mxu0 %v11590_v39  ;;  %v15220_v39 = vld [vmem:[#allocation36_spill] sm:$0xff] }
 0x56b   :  { %9037 = vmatmul.mubr.f32.gmra.mrb[30].mxu1 %v15215_v32  ;;  %9340 = vmatmul.mubr.f32.gmra.mrb[20].mxu0 %v11608_v55  ;;  %v15221_v55 = vld [vmem:[#allocation38_spill] sm:$0xff] }
 0x56c   :  { %9039 = vmatprep.mubr.f32.mxu1 %v15216_v42  ;;  %9342 = vmatprep.mubr.f32.mxu0 %v11676_v52  ;;  %v15222_v52 = vld [vmem:[#allocation40_spill] sm:$0xff] }
 0x56f   :  { %9040 = vmatmul.mubr.f32.gmra.mrb[32].mxu1 %v15217_v25  ;;  %9343 = vmatmul.mubr.f32.gmra.mrb[22].mxu0 %v11697_v9  ;;  %v15223_v9 = vld [vmem:[#allocation42_spill] sm:$0xff] }
 0x570   :  { %9042 = vmatprep.mubr.f32.mxu1 %v15218_v3  ;;  %9345 = vmatprep.mubr.f32.mxu0 %v11757_v19  ;;  %v15224_v19 = vld [vmem:[#allocation44_spill] sm:$0xff] }
 0x573   :  { %9043 = vmatmul.mubr.f32.gmra.mrb[34].mxu1 %v15219_v20  ;;  %9346 = vmatmul.mubr.f32.gmra.mrb[24].mxu0 %v11775_v4  ;;  %v15225_v4 = vld [vmem:[#allocation46_spill] sm:$0xff] }
 0x574   :  { %9045 = vmatprep.mubr.f32.mxu1 %v15220_v39  ;;  %9348 = vmatprep.mubr.f32.mxu0 %v11833_v2  ;;  %v15226_v2 = vld [vmem:[#allocation48_spill] sm:$0xff] }
 0x577   :  { %9046 = vmatmul.mubr.f32.gmra.mrb[36].mxu1 %v15221_v55  ;;  %9349 = vmatmul.mubr.f32.gmra.mrb[26].mxu0 %v11851_v54  ;;  %v15227_v54 = vld [vmem:[#allocation49_spill] sm:$0xff] }
 0x578   :  { %9048 = vmatprep.mubr.f32.mxu1 %v15222_v52  ;;  %9351 = vmatprep.mubr.f32.mxu0 %v11909_v17  ;;  %v15228_v17 = vld [vmem:[#allocation50_spill] sm:$0xff] }
 0x57b   :  { %9049 = vmatmul.mubr.f32.gmra.mrb[38].mxu1 %v15223_v9  ;;  %9352 = vmatmul.mubr.f32.gmra.mrb[28].mxu0 %v15180_v62  ;;  %v15233_v62 = vld [vmem:[#allocation57_spill] sm:$0xff] }
 0x57c   :  { %9051 = vmatprep.mubr.f32.mxu1 %v15224_v19  ;;  %9354 = vmatprep.mubr.f32.mxu0 %v15181_v63  ;;  %v15234_v63 = vld [vmem:[#allocation58_spill] sm:$0xff] }
 0x57f   :  { %9052 = vmatmul.mubr.f32.gmra.mrb[40].mxu1 %v15225_v4  ;;  %9355 = vmatmul.mubr.f32.gmra.mrb[30].mxu0 %v15182_v10  ;;  %v15235_v10 = vld [vmem:[#allocation59_spill] sm:$0xff] }
 0x580   :  { %9054 = vmatprep.mubr.f32.mxu1 %v15226_v2  ;;  %9357 = vmatprep.mubr.f32.mxu0 %v15183_v12  ;;  %v15236_v12 = vld [vmem:[#allocation60_spill] sm:$0xff] }
 0x583   :  { %9055 = vmatmul.mubr.f32.gmra.mrb[42].mxu1 %v15227_v54  ;;  %9358 = vmatmul.mubr.f32.gmra.mrb[32].mxu0 %v15184_v14  ;;  %v15237_v14 = vld [vmem:[#allocation61_spill] sm:$0xff] }
 0x584   :  { %9057 = vmatprep.mubr.f32.mxu1 %v15228_v17  ;;  %9360 = vmatprep.mubr.f32.mxu0 %v15185_v18  ;;  %v15238_v18 = vld [vmem:[#allocation62_spill] sm:$0xff] }
 0x587   :  { %9058 = vmatmul.mubr.f32.gmra.mrb[44].mxu1 %v15229_v56  ;;  %9361 = vmatmul.mubr.f32.gmra.mrb[34].mxu0 %v15186_v61 }
 0x588   :  { %9060 = vmatprep.mubr.f32.mxu1 %v15230_v5  ;;  %9363 = vmatprep.mubr.f32.mxu0 %v15187_v28 }
 0x58b   :  { %9061 = vmatmul.mubr.f32.gmra.mrb[46].mxu1 %v15231_v22  ;;  %9364 = vmatmul.mubr.f32.gmra.mrb[36].mxu0 %v15188_v41  ;;  %v15239_v41 = vld [vmem:[#allocation63_spill] sm:$0xff] }
 0x58c   :  { %9063 = vmatprep.mubr.f32.mxu1 %v15232_v46  ;;  %9366 = vmatprep.mubr.f32.mxu0 %v15189_v8  ;;  %v15240_v8 = vld [vmem:[#allocation64_spill] sm:$0xff] }
 0x58f   :  { %9064 = vmatmul.mubr.f32.gmra.mrb[48].mxu1 %v15233_v62  ;;  %9367 = vmatmul.mubr.f32.gmra.mrb[38].mxu0 %v15190_v7 }
 0x590   :  { %9066 = vmatprep.mubr.f32.mxu1 %v15234_v63  ;;  %9369 = vmatprep.mubr.f32.mxu0 %v15191_v53 }
 0x593   :  { %9067 = vmatmul.mubr.f32.gmra.mrb[50].mxu1 %v15235_v10  ;;  %9370 = vmatmul.mubr.f32.gmra.mrb[40].mxu0 %v15192_v48  ;;  %v15241_v48 = vld [vmem:[#allocation65_spill] sm:$0xff] }
 0x594   :  { %9069 = vmatprep.mubr.f32.mxu1 %v15236_v12  ;;  %9372 = vmatprep.mubr.f32.mxu0 %v15193_v27 }
 0x597   :  { %9070 = vmatmul.mubr.f32.gmra.mrb[52].mxu1 %v15237_v14  ;;  %9373 = vmatmul.mubr.f32.gmra.mrb[42].mxu0 %v12459_v38  ;;  %v15242_v38 = vld [vmem:[#allocation67_spill] sm:$0xff] }
 0x598   :  { %9072 = vmatprep.mubr.f32.mxu1 %v15238_v18  ;;  %9375 = vmatprep.mubr.f32.mxu0 %v12509_v0 }
 0x59a   :  { %v8887_v61 = vpop.f32.mrb[0].mxu1 }
 0x59b   :  { %v4029_v28 = vpop.f32.mrb[1].mxu1  ;;  %9073 = vmatmul.mubr.f32.gmra.mrb[54].mxu1 %v15239_v41  ;;  %9376 = vmatmul.mubr.f32.gmra.mrb[44].mxu0 %v15194_v44  ;;  %v15244_v44 = vld [vmem:[#allocation71_spill] sm:$0xff] }
 0x59c   :  { %9075 = vmatprep.mubr.f32.mxu1 %v15240_v8  ;;  %9378 = vmatprep.mubr.f32.mxu0 %v15195_v36 }
 0x59e   :  { %v8890_v7 = vpop.f32.mrb[2].mxu1 }
 0x59f   :  { %v4041_v53 = vpop.f32.mrb[3].mxu1  ;;  %9076 = vmatmul.mubr.f32.gmra.mrb[56].mxu1 %v15241_v48  ;;  %9379 = vmatmul.mubr.f32.gmra.mrb[46].mxu0 %v12589_v57  ;;  %v15246_v57 = vld [vmem:[#allocation74_spill] sm:$0xff] }
 0x5a0   :  { %9078 = vmatprep.mubr.f32.mxu1 %v15242_v38  ;;  %9381 = vmatprep.mubr.f32.mxu0 %v12633_v11 }
 0x5a2   :  { %v8893_v0 = vpop.f32.mrb[4].mxu1 }
 0x5a3   :  { %v4053_v27 = vpop.f32.mrb[5].mxu1  ;;  %9079 = vmatmul.mubr.f32.gmra.mrb[58].mxu1 %v15243_v59  ;;  %9382 = vmatmul.mubr.f32.gmra.mrb[48].mxu0 %v12653_v23  ;;  %v15247_v23 = vld [vmem:[#allocation75_spill] sm:$0xff] }
 0x5a4   :  { %9081 = vmatprep.mubr.f32.mxu1 %v15244_v44  ;;  %9384 = vmatprep.mubr.f32.mxu0 %v12697_v34 }
 0x5a6   :  { %v8896_v36 = vpop.f32.mrb[6].mxu1 }
 0x5a7   :  { %v13180_v21 = vpop.f32.mrb[7].mxu1  ;;  %9082 = vmatmul.mubr.f32.gmra.mrb[60].mxu1 %v15245_v13  ;;  %9385 = vmatmul.mubr.f32.gmra.mrb[50].mxu0 %v12715_v51  ;;  %v15248_v51 = vld [vmem:[#allocation66_spill] sm:$0xff] }
 0x5a8   :  { %9084 = vmatprep.mubr.f32.mxu1 %v15246_v57  ;;  %9387 = vmatprep.mubr.f32.mxu0 %v12755_v29  ;;  %v15249_v29 = vld [vmem:[#allocation68_spill] sm:$0xff] }
 0x5aa   :  { %v13186_v11 = vpop.f32.mrb[8].mxu1 }
 0x5ab   :  { %v13188_v30 = vpop.f32.mrb[9].mxu1  ;;  %9085 = vmatmul.mubr.f32.gmra.mrb[62].mxu1 %v15247_v23  ;;  %9388 = vmatmul.mubr.f32.gmra.mrb[52].mxu0 %v12773_v15  ;;  %v15063_v15 = vmov 0.0|0.0  }
 0x5ac   :  { %9390 = vmatprep.mubr.f32.mxu0 %v12809_v16  ;;  %9537 = vmatprep.subr.bf16.mxu1 %v15063_v15  ;;  %v13210_v16 = vld [vmem:[%s14962_s5] sm:$0xff] }
 0x5ae   :  { %v13193_v34 = vpop.f32.mrb[10].mxu1 }
 0x5af   :  { %v13195_v47 = vpop.f32.mrb[11].mxu1  ;;  %9391 = vmatmul.mubr.f32.gmra.mrb[54].mxu0 %v12821_v58  ;;  %v13215_v58 = vld [vmem:[%s14962_s5 + $0x8] sm:$0xff] }
 0x5b0   :  { %9393 = vmatprep.mubr.f32.mxu0 %v12841_v60  ;;  %v15066_v60 = vand.u32 4294901760, %v13210_v16 }
 0x5b3   :  { %9394 = vmatmul.mubr.f32.gmra.mrb[56].mxu0 %v12853_v40  ;;  %v15065_v40 = vand.u32 4294901760, %v13215_v58 }
 0x5b4   :  { %9396 = vmatprep.mubr.f32.mxu0 %v15248_v51 }
 0x5b7   :  { %9397 = vmatmul.mubr.f32.gmra.mrb[58].mxu0 %v15249_v29 }
 0x5b8   :  { %9399 = vmatprep.mubr.f32.mxu0 %v15250_v37 }
 0x5bb   :  { %9400 = vmatmul.mubr.f32.gmra.mrb[60].mxu0 %v15251_v43 }
 0x5bc   :  { %9402 = vmatprep.mubr.f32.mxu0 %v12928_v49  ;;  %v13223_v49 = vpack.c.bf16 %v15065_v40, %v15066_v60 }
 0x5be   :  { %9539 = vmatpush3.bf16.msra.mxu1 %v13223_v49 }
 0x5bf   :  { %9403 = vmatmul.mubr.f32.gmra.mrb[62].mxu0 %v12930_v33  ;;  %9540 = vmatprep.subr.bf16.mxu1 %v15063_v15 }
 0x616   :  { %v9311_v33 = vpop.f32.mrb[0].mxu0 }
 0x617   :  { %v13227_v1 = vadd.f32 %v9311_v33, %v8887_v61  ;;  %v6052_v26 = vpop.f32.mrb[1].mxu0 }
 0x618   :  { %v13229_v24 = vadd.f32 %v6052_v26, %v4029_v28 }
 0x619   :  { %v6436_v31 = vsel %vm6434_vm14, %v13227_v1, 0.0  ;;  %v6574_v56 = vmul.f32 %v13227_v1, %v13227_v1 }
 0x61a   :  { %v6435_v35 = vsel %vm6434_vm14, %v13229_v24, 0.0  ;;  %v9011_v50 = vpop.f32.mrb[12].mxu1  ;;  %v9314_v45 = vpop.f32.mrb[2].mxu0  ;;  %v6573_v5 = vmul.f32 %v13229_v24, %v13229_v24 }
 0x61b   :  { %v13235_v6 = vadd.f32 %v9314_v45, %v8890_v7  ;;  %v4573_v32 = vpop.f32.mrb[13].mxu1  ;;  %v6064_v42 = vpop.f32.mrb[3].mxu0  ;;  %v6437_v3 = vadd.f32 %v6436_v31, %v6435_v35  ;;  %v6638_v8 = vsel %vm6434_vm14, %v6574_v56, 0.0 }
 0x61c   :  { %v13237_v25 = vadd.f32 %v6064_v42, %v4041_v53  ;;  %v6637_v7 = vsel %vm6434_vm14, %v6573_v5, 0.0 }
 0x61d   :  { %v6440_v2 = vsel %vm6434_vm14, %v13235_v6, 0.0  ;;  %v6639_v13 = vadd.f32 %v6638_v8, %v6637_v7  ;;  %v6576_v57 = vmul.f32 %v13235_v6, %v13235_v6 }
 0x61e   :  { %v6438_v20 = vsel %vm6434_vm14, %v13237_v25, 0.0  ;;  %v13241_v39 = vpop.f32.mrb[14].mxu1  ;;  %v9317_v55 = vpop.f32.mrb[4].mxu0  ;;  %v6575_v18 = vmul.f32 %v13237_v25, %v13237_v25 }
 0x61f   :  { %v6439_v52 = vadd.f32 %v6438_v20, %v6437_v3  ;;  %v13243_v9 = vadd.f32 %v9317_v55, %v8893_v0  ;;  %v13245_v19 = vpop.f32.mrb[15].mxu1  ;;  %v6076_v4 = vpop.f32.mrb[5].mxu0  ;;  %v6642_v45 = vsel %vm6434_vm14, %v6576_v57, 0.0 }
 0x620   :  { %v13249_v54 = vadd.f32 %v6076_v4, %v4053_v27 }
 0x621   :  { %v6441_v17 = vadd.f32 %v6440_v2, %v6439_v52  ;;  %v6444_v61 = vsel %vm6434_vm14, %v13243_v9, 0.0  ;;  %v15255_v2 = vmov 0.0  }
 0x622   :  { %v6442_v22 = vsel %vm6434_vm14, %v13249_v54, 0.0  ;;  %v13257_v46 = vpop.f32.mrb[16].mxu1  ;;  %v9320_v62 = vpop.f32.mrb[6].mxu0  ;;  %9409 = vmatprep.mubr.msk.f32.mxu1 %vm10073_vm15, %v15255_v2 }
 0x623   :  { %v6443_v63 = vadd.f32 %v6442_v22, %v6441_v17  ;;  %v13259_v10 = vadd.f32 %v9320_v62, %v8896_v36  ;;  %v13261_v12 = vpop.f32.mrb[17].mxu1  ;;  %v6088_v14 = vpop.f32.mrb[7].mxu0  ;;  %v6640_v36 = vsel %vm6434_vm14, %v6575_v18, 0.0 }
 0x624   :  { %v13268_v28 = vadd.f32 %v6088_v14, %v13180_v21  ;;  %v6641_v37 = vadd.f32 %v6640_v36, %v6639_v13 }
 0x625   :  { %v6445_v41 = vadd.f32 %v6444_v61, %v6443_v63  ;;  %v6448_v23 = vsel %vm6434_vm14, %v13259_v10, 0.0 }
 0x626   :  { %v6446_v53 = vsel %vm6434_vm14, %v13268_v28, 0.0  ;;  %v9020_v48 = vpop.f32.mrb[18].mxu1  ;;  %v9323_v38 = vpop.f32.mrb[8].mxu0  ;;  %v6643_v20 = vadd.f32 %v6642_v45, %v6641_v37 }
 0x627   :  { %v6447_v0 = vadd.f32 %v6446_v53, %v6445_v41  ;;  %v13275_v27 = vadd.f32 %v9323_v38, %v13186_v11  ;;  %v4615_v59 = vpop.f32.mrb[19].mxu1  ;;  %v6100_v44 = vpop.f32.mrb[9].mxu0  ;;  %v6579_v41 = vmul.f32 %v13268_v28, %v13268_v28 }
 0x628   :  { %v13279_v21 = vadd.f32 %v6100_v44, %v13188_v30  ;;  %v6577_v30 = vmul.f32 %v13249_v54, %v13249_v54 }
 0x629   :  { %v6449_v43 = vadd.f32 %v6448_v23, %v6447_v0  ;;  %v6452_v5 = vsel %vm6434_vm14, %v13275_v27, 0.0  ;;  %v6648_v57 = vsel %vm6434_vm14, %v6579_v41, 0.0  ;;  %v6582_v41 = vmul.f32 %v13275_v27, %v13275_v27 }
 0x62a   :  { %v9023_v51 = vpop.f32.mrb[20].mxu1  ;;  %v9326_v29 = vpop.f32.mrb[10].mxu0  ;;  %v6450_v31 = vsel %vm6434_vm14, %v13279_v21, 0.0  ;;  %v6644_v17 = vsel %vm6434_vm14, %v6577_v30, 0.0 }
 0x62b   :  { %v13286_v11 = vadd.f32 %v9326_v29, %v13193_v34  ;;  %v4629_v33 = vpop.f32.mrb[21].mxu1  ;;  %v6112_v26 = vpop.f32.mrb[11].mxu0  ;;  %v6451_v55 = vadd.f32 %v6450_v31, %v6449_v43 }
 0x62c   :  { %v13293_v35 = vadd.f32 %v6112_v26, %v13195_v47  ;;  %v6578_v47 = vmul.f32 %v13243_v9, %v13243_v9 }
 0x62d   :  { %15252 = vst [vmem:[#allocation21_spill] sm:$0xff] %v13286_v11  ;;  %v6453_v63 = vadd.f32 %v6452_v5, %v6451_v55  ;;  %v6456_v29 = vsel %vm6434_vm14, %v13286_v11, 0.0 }
 0x62e   :  { %15253 = vst [vmem:[#allocation23_spill] sm:$0xff] %v13293_v35  ;;  %v9026_v42 = vpop.f32.mrb[22].mxu1  ;;  %v9329_v3 = vpop.f32.mrb[12].mxu0  ;;  %v6646_v7 = vsel %vm6434_vm14, %v6578_v47, 0.0 }
 0x62f   :  { %v13296_v52 = vadd.f32 %v9329_v3, %v9011_v50  ;;  %v4643_v34 = vpop.f32.mrb[23].mxu1  ;;  %v6124_v4 = vpop.f32.mrb[13].mxu0  ;;  %v6645_v50 = vadd.f32 %v6644_v17, %v6643_v20  ;;  %v6581_v3 = vmul.f32 %v13279_v21, %v13279_v21 }
 0x630   :  { %v13301_v56 = vadd.f32 %v6124_v4, %v4573_v32  ;;  %v6454_v32 = vsel %vm6434_vm14, %v13293_v35, 0.0 }
 0x631   :  { %15254 = vst [vmem:[#allocation25_spill] sm:$0xff] %v13296_v52  ;;  %v6647_v0 = vadd.f32 %v6646_v7, %v6645_v50  ;;  %v6455_v44 = vadd.f32 %v6454_v32, %v6453_v63  ;;  %v6652_v63 = vsel %vm6434_vm14, %v6581_v3, 0.0 }
 0x632   :  { %15256 = vst [vmem:[#allocation27_spill] sm:$0xff] %v13301_v56  ;;  %v9029_v22 = vpop.f32.mrb[24].mxu1  ;;  %v9332_v62 = vpop.f32.mrb[14].mxu0 }
 0x633   :  { %v13308_v14 = vadd.f32 %v9332_v62, %v13241_v39  ;;  %v4657_v18 = vpop.f32.mrb[25].mxu1  ;;  %v6136_v61 = vpop.f32.mrb[15].mxu0  ;;  %v6649_v26 = vadd.f32 %v6648_v57, %v6647_v0  ;;  %v6457_v30 = vadd.f32 %v6456_v29, %v6455_v44  ;;  %v6583_v57 = vmul.f32 %v13293_v35, %v13293_v35 }
 0x634   :  { %v13315_v8 = vadd.f32 %v6136_v61, %v13245_v19  ;;  %v6580_v19 = vmul.f32 %v13259_v10, %v13259_v10  ;;  %v6654_v29 = vsel %vm6434_vm14, %v6582_v41, 0.0 }
 0x635   :  { %15257 = vst [vmem:[#allocation29_spill] sm:$0xff] %v13308_v14 }
 0x636   :  { %15258 = vst [vmem:[#allocation31_spill] sm:$0xff] %v13315_v8  ;;  %v9032_v53 = vpop.f32.mrb[26].mxu1  ;;  %v9335_v38 = vpop.f32.mrb[16].mxu0  ;;  %v6650_v55 = vsel %vm6434_vm14, %v6580_v19, 0.0 }
 0x637   :  { %v13319_v39 = vadd.f32 %v9335_v38, %v13257_v46  ;;  %v4671_v36 = vpop.f32.mrb[27].mxu1  ;;  %v6148_v13 = vpop.f32.mrb[17].mxu0  ;;  %v6651_v47 = vadd.f32 %v6650_v55, %v6649_v26  ;;  %v6656_v55 = vsel %vm6434_vm14, %v6583_v57, 0.0 }
 0x638   :  { %v13323_v23 = vadd.f32 %v6148_v13, %v13261_v12  ;;  %v6458_v12 = vsel %vm6434_vm14, %v13301_v56, 0.0 }
 0x639   :  { %15259 = vst [vmem:[#allocation33_spill] sm:$0xff] %v13319_v39  ;;  %v6459_v5 = vadd.f32 %v6458_v12, %v6457_v30  ;;  %v6653_v38 = vadd.f32 %v6652_v63, %v6651_v47  ;;  %v6464_v47 = vsel %vm6434_vm14, %v13308_v14, 0.0 }
 0x63a   :  { %15260 = vst [vmem:[#allocation35_spill] sm:$0xff] %v13323_v23  ;;  %v9035_v37 = vpop.f32.mrb[28].mxu1  ;;  %v9338_v43 = vpop.f32.mrb[18].mxu0 }
 0x63b   :  { %v13329_v31 = vadd.f32 %v9338_v43, %v9020_v48  ;;  %v4685_v46 = vpop.f32.mrb[29].mxu1  ;;  %v6160_v45 = vpop.f32.mrb[19].mxu0  ;;  %v6655_v30 = vadd.f32 %v6654_v29, %v6653_v38  ;;  %v6466_v38 = vsel %vm6434_vm14, %v13323_v23, 0.0 }
 0x63c   :  { %v13335_v20 = vadd.f32 %v6160_v45, %v4615_v59  ;;  %v6460_v59 = vsel %vm6434_vm14, %v13296_v52, 0.0 }
 0x63d   :  { %v6461_v0 = vadd.f32 %v6460_v59, %v6459_v5  ;;  %v6657_v63 = vadd.f32 %v6656_v55, %v6655_v30 }
 0x63e   :  { %v9038_v4 = vpop.f32.mrb[30].mxu1  ;;  %v9341_v17 = vpop.f32.mrb[20].mxu0 }
 0x63f   :  { %v13338_v62 = vadd.f32 %v9341_v17, %v9023_v51  ;;  %v4699_v48 = vpop.f32.mrb[31].mxu1  ;;  %v6172_v50 = vpop.f32.mrb[21].mxu0 }
 0x640   :  { %v13341_v61 = vadd.f32 %v6172_v50, %v4629_v33  ;;  %v6462_v33 = vsel %vm6434_vm14, %v13315_v8, 0.0 }
 0x641   :  { %v6463_v45 = vadd.f32 %v6462_v33, %v6461_v0 }
 0x642   :  { %v9041_v32 = vpop.f32.mrb[32].mxu1  ;;  %v9344_v7 = vpop.f32.mrb[22].mxu0 }
 0x643   :  { %v13347_v44 = vadd.f32 %v9344_v7, %v9026_v42  ;;  %v4713_v51 = vpop.f32.mrb[33].mxu1  ;;  %v6184_v13 = vpop.f32.mrb[23].mxu0  ;;  %v6465_v41 = vadd.f32 %v6464_v47, %v6463_v45 }
 0x644   :  { %v13353_v19 = vadd.f32 %v6184_v13, %v4643_v34  ;;  %v6584_v34 = vmul.f32 %v13286_v11, %v13286_v11 }
 0x646   :  { %v13356_v43 = vpop.f32.mrb[34].mxu1  ;;  %v9347_v26 = vpop.f32.mrb[24].mxu0  ;;  %v6658_v13 = vsel %vm6434_vm14, %v6584_v34, 0.0  ;;  %v6468_v34 = vsel %vm6434_vm14, %v13319_v39, 0.0 }
 0x647   :  { %v13358_v3 = vadd.f32 %v9347_v26, %v9029_v22  ;;  %v13360_v42 = vpop.f32.mrb[35].mxu1  ;;  %v6196_v12 = vpop.f32.mrb[25].mxu0  ;;  %v6659_v29 = vadd.f32 %v6658_v13, %v6657_v63  ;;  %v6467_v26 = vadd.f32 %v6466_v38, %v6465_v41 }
 0x648   :  { %v13363_v17 = vadd.f32 %v6196_v12, %v4657_v18  ;;  %v6585_v18 = vmul.f32 %v13301_v56, %v13301_v56 }
 0x649   :  { %v6469_v41 = vadd.f32 %v6468_v34, %v6467_v26 }
 0x64a   :  { %v13369_v5 = vpop.f32.mrb[36].mxu1  ;;  %v9350_v50 = vpop.f32.mrb[26].mxu0  ;;  %v6660_v12 = vsel %vm6434_vm14, %v6585_v18, 0.0  ;;  %v6470_v18 = vsel %vm6434_vm14, %v13335_v20, 0.0 }
 0x64b   :  { %v13371_v22 = vadd.f32 %v9350_v50, %v9032_v53  ;;  %v13373_v59 = vpop.f32.mrb[37].mxu1  ;;  %v6208_v7 = vpop.f32.mrb[27].mxu0  ;;  %v6661_v63 = vadd.f32 %v6660_v12, %v6659_v29  ;;  %v6471_v26 = vadd.f32 %v6470_v18, %v6469_v41  ;;  %v6589_v18 = vmul.f32 %v13323_v23, %v13323_v23 }
 0x64c   :  { %v13379_v0 = vadd.f32 %v6208_v7, %v4671_v36  ;;  %v6586_v36 = vmul.f32 %v13296_v52, %v13296_v52 }
 0x64e   :  { %v13382_v57 = vpop.f32.mrb[38].mxu1  ;;  %v9353_v33 = vpop.f32.mrb[28].mxu0 }
 0x64f   :  { %v13384_v53 = vadd.f32 %v9353_v33, %v9035_v37  ;;  %v13386_v30 = vpop.f32.mrb[39].mxu1  ;;  %v6220_v45 = vpop.f32.mrb[29].mxu0  ;;  %v6662_v33 = vsel %vm6434_vm14, %v6586_v36, 0.0 }
 0x650   :  { %v13389_v55 = vadd.f32 %v6220_v45, %v4685_v46  ;;  %v6587_v46 = vmul.f32 %v13315_v8, %v13315_v8  ;;  %v6663_v29 = vadd.f32 %v6662_v33, %v6661_v63 }
 0x652   :  { %v13395_v47 = vpop.f32.mrb[40].mxu1  ;;  %v9356_v50 = vpop.f32.mrb[30].mxu0 }
 0x653   :  { %v13397_v37 = vadd.f32 %v9356_v50, %v9038_v4  ;;  %v13399_v7 = vpop.f32.mrb[41].mxu1  ;;  %v6232_v38 = vpop.f32.mrb[31].mxu0  ;;  %v6664_v50 = vsel %vm6434_vm14, %v6587_v46, 0.0 }
 0x654   :  { %v13405_v13 = vadd.f32 %v6232_v38, %v4699_v48  ;;  %v6588_v48 = vmul.f32 %v13308_v14, %v13308_v14  ;;  %v6472_v38 = vsel %vm6434_vm14, %v13329_v31, 0.0  ;;  %v6665_v46 = vadd.f32 %v6664_v50, %v6663_v29 }
 0x655   :  { %v6473_v33 = vadd.f32 %v6472_v38, %v6471_v26  ;;  %v6590_v29 = vmul.f32 %v13319_v39, %v13319_v39  ;;  %v6474_v50 = vsel %vm6434_vm14, %v13341_v61, 0.0 }
 0x656   :  { %v13408_v45 = vpop.f32.mrb[42].mxu1  ;;  %v9359_v15 = vpop.f32.mrb[32].mxu0  ;;  %v6666_v38 = vsel %vm6434_vm14, %v6588_v48, 0.0 }
 0x657   :  { %v13410_v4 = vadd.f32 %v9359_v15, %v9041_v32  ;;  %v13412_v12 = vpop.f32.mrb[43].mxu1  ;;  %v6244_v34 = vpop.f32.mrb[33].mxu0  ;;  %v6475_v56 = vadd.f32 %v6474_v50, %v6473_v33 }
 0x658   :  { %v13415_v40 = vadd.f32 %v6244_v34, %v4713_v51 }
 0x659   :  { %15261 = vst [vmem:[#allocation37_spill] sm:$0xff] %v13410_v4  ;;  %v6606_v36 = vmul.f32 %v13410_v4, %v13410_v4  ;;  %v6505_v15 = vsel %vm6434_vm14, %v13410_v4, 0.0 }
 0x65a   :  { %15262 = vst [vmem:[#allocation39_spill] sm:$0xff] %v13415_v40  ;;  %v6504_v32 = vsel %vm6434_vm14, %v13415_v40, 0.0  ;;  %v6605_v63 = vmul.f32 %v13415_v40, %v13415_v40  ;;  %v13429_v51 = vpop.f32.mrb[44].mxu1  ;;  %v9362_v41 = vpop.f32.mrb[34].mxu0 }
 0x65b   :  { %v13433_v34 = vpop.f32.mrb[45].mxu1  ;;  %v6256_v60 = vpop.f32.mrb[35].mxu0  ;;  %v6707_v14 = vsel %vm6434_vm14, %v6606_v36, 0.0  ;;  %v13438_v8 = vadd.f32 %v9362_v41, %v13356_v43  ;;  %v6506_v26 = vadd.f32 %v6505_v15, %v6504_v32  ;;  %v6667_v41 = vadd.f32 %v6666_v38, %v6665_v46 }
 0x65c   :  { %v6706_v4 = vsel %vm6434_vm14, %v6605_v63, 0.0  ;;  %v13441_v40 = vadd.f32 %v6256_v60, %v13360_v42  ;;  %v6668_v32 = vsel %vm6434_vm14, %v6589_v18, 0.0  ;;  %v6476_v38 = vsel %vm6434_vm14, %v13338_v62, 0.0 }
 0x65d   :  { %15263 = vst [vmem:[#allocation41_spill] sm:$0xff] %v13438_v8  ;;  %v6608_v36 = vmul.f32 %v13438_v8, %v13438_v8  ;;  %v6708_v39 = vadd.f32 %v6707_v14, %v6706_v4  ;;  %v6509_v14 = vsel %vm6434_vm14, %v13438_v8, 0.0 }
 0x65e   :  { %15264 = vst [vmem:[#allocation43_spill] sm:$0xff] %v13441_v40  ;;  %v6507_v63 = vsel %vm6434_vm14, %v13441_v40, 0.0  ;;  %v6607_v43 = vmul.f32 %v13441_v40, %v13441_v40  ;;  %v13454_v60 = vpop.f32.mrb[46].mxu1  ;;  %v9365_v42 = vpop.f32.mrb[36].mxu0  ;;  %v6670_v40 = vsel %vm6434_vm14, %v6590_v29, 0.0  ;;  %v6669_v29 = vadd.f32 %v6668_v32, %v6667_v41 }
 0x65f   :  { %v6508_v23 = vadd.f32 %v6507_v63, %v6506_v26  ;;  %v13457_v52 = vadd.f32 %v9365_v42, %v13369_v5  ;;  %v13459_v15 = vpop.f32.mrb[47].mxu1  ;;  %v6268_v48 = vpop.f32.mrb[37].mxu0  ;;  %v6711_v4 = vsel %vm6434_vm14, %v6608_v36, 0.0  ;;  %v6477_v36 = vadd.f32 %v6476_v38, %v6475_v56 }
 0x660   :  { %v6709_v11 = vsel %vm6434_vm14, %v6607_v43, 0.0  ;;  %v13464_v35 = vadd.f32 %v6268_v48, %v13373_v59  ;;  %v6478_v41 = vsel %vm6434_vm14, %v13353_v19, 0.0 }
 0x661   :  { %15265 = vst [vmem:[#allocation45_spill] sm:$0xff] %v13457_v52  ;;  %v6710_v5 = vadd.f32 %v6709_v11, %v6708_v39  ;;  %v6610_v46 = vmul.f32 %v13457_v52, %v13457_v52  ;;  %v6510_v26 = vadd.f32 %v6509_v14, %v6508_v23  ;;  %v6513_v32 = vsel %vm6434_vm14, %v13457_v52, 0.0 }
 0x662   :  { %15266 = vst [vmem:[#allocation47_spill] sm:$0xff] %v13464_v35  ;;  %v6511_v18 = vsel %vm6434_vm14, %v13464_v35, 0.0  ;;  %v6609_v33 = vmul.f32 %v13464_v35, %v13464_v35  ;;  %v13476_v59 = vpop.f32.mrb[48].mxu1  ;;  %v9368_v50 = vpop.f32.mrb[38].mxu0  ;;  %v6671_v52 = vadd.f32 %v6670_v40, %v6669_v29  ;;  %v6480_v29 = vsel %vm6434_vm14, %v13347_v44, 0.0 }
 0x663   :  { %v6712_v63 = vadd.f32 %v6711_v4, %v6710_v5  ;;  %v13481_v11 = vadd.f32 %v9368_v50, %v13382_v57  ;;  %v13483_v39 = vpop.f32.mrb[49].mxu1  ;;  %v6280_v23 = vpop.f32.mrb[39].mxu0  ;;  %v6512_v43 = vadd.f32 %v6511_v18, %v6510_v26  ;;  %v6715_v14 = vsel %vm6434_vm14, %v6610_v46, 0.0 }
 0x664   :  { %v6713_v42 = vsel %vm6434_vm14, %v6609_v33, 0.0  ;;  %v13487_v48 = vadd.f32 %v6280_v23, %v13386_v30  ;;  %v6592_v33 = vmul.f32 %v13329_v31, %v13329_v31  ;;  %v6591_v46 = vmul.f32 %v13335_v20, %v13335_v20 }
 0x665   :  { %15267 = vst [vmem:[#allocation51_spill] sm:$0xff] %v13481_v11  ;;  %v6714_v57 = vadd.f32 %v6713_v42, %v6712_v63  ;;  %v6612_v4 = vmul.f32 %v13481_v11, %v13481_v11  ;;  %v6514_v5 = vadd.f32 %v6513_v32, %v6512_v43  ;;  %v6479_v43 = vadd.f32 %v6478_v41, %v6477_v36 }
 0x666   :  { %15268 = vst [vmem:[#allocation53_spill] sm:$0xff] %v13487_v48  ;;  %v6515_v56 = vsel %vm6434_vm14, %v13487_v48, 0.0  ;;  %v6611_v30 = vmul.f32 %v13487_v48, %v13487_v48  ;;  %v13500_v26 = vpop.f32.mrb[50].mxu1  ;;  %v9371_v18 = vpop.f32.mrb[40].mxu0  ;;  %v6517_v35 = vsel %vm6434_vm14, %v13481_v11, 0.0  ;;  %v6672_v40 = vsel %vm6434_vm14, %v6591_v46, 0.0 }
 0x667   :  { %v6716_v50 = vadd.f32 %v6715_v14, %v6714_v57  ;;  %v13507_v38 = vadd.f32 %v9371_v18, %v13395_v47  ;;  %v13509_v63 = vpop.f32.mrb[51].mxu1  ;;  %v6292_v23 = vpop.f32.mrb[41].mxu0  ;;  %v6516_v42 = vadd.f32 %v6515_v56, %v6514_v5  ;;  %v6719_v8 = vsel %vm6434_vm14, %v6612_v4, 0.0 }
 0x668   :  { %v6717_v32 = vsel %vm6434_vm14, %v6611_v30, 0.0  ;;  %v13513_v48 = vadd.f32 %v6292_v23, %v13399_v7  ;;  %v6481_v18 = vadd.f32 %v6480_v29, %v6479_v43  ;;  %v6482_v46 = vsel %vm6434_vm14, %v13363_v17, 0.0 }
 0x669   :  { %15269 = vst [vmem:[#allocation4_spill] sm:$0xff] %v13507_v38  ;;  %v6718_v14 = vadd.f32 %v6717_v32, %v6716_v50  ;;  %v6614_v47 = vmul.f32 %v13507_v38, %v13507_v38  ;;  %v6518_v57 = vadd.f32 %v6517_v35, %v6516_v42  ;;  %v6521_v32 = vsel %vm6434_vm14, %v13507_v38, 0.0 }
 0x66a   :  { %15270 = vst [vmem:[#allocation5_spill] sm:$0xff] %v13513_v48  ;;  %v6519_v36 = vsel %vm6434_vm14, %v13513_v48, 0.0  ;;  %v6613_v41 = vmul.f32 %v13513_v48, %v13513_v48  ;;  %v13524_v5 = vpop.f32.mrb[52].mxu1  ;;  %v9374_v7 = vpop.f32.mrb[42].mxu0  ;;  %v6673_v29 = vadd.f32 %v6672_v40, %v6671_v52 }
 0x66b   :  { %v6720_v4 = vadd.f32 %v6719_v8, %v6718_v14  ;;  %v13530_v56 = vadd.f32 %v9374_v7, %v13408_v45  ;;  %v13532_v30 = vpop.f32.mrb[53].mxu1  ;;  %v6304_v35 = vpop.f32.mrb[43].mxu0  ;;  %v6520_v50 = vadd.f32 %v6519_v36, %v6518_v57  ;;  %v6723_v14 = vsel %vm6434_vm14, %v6614_v47, 0.0 }
 0x66c   :  { %v6721_v23 = vsel %vm6434_vm14, %v6613_v41, 0.0  ;;  %v13536_v42 = vadd.f32 %v6304_v35, %v13412_v12  ;;  %v6674_v41 = vsel %vm6434_vm14, %v6592_v33, 0.0 }
 0x66d   :  { %15271 = vst [vmem:[#allocation6_spill] sm:$0xff] %v13530_v56  ;;  %v6722_v8 = vadd.f32 %v6721_v23, %v6720_v4  ;;  %v6616_v45 = vmul.f32 %v13530_v56, %v13530_v56  ;;  %v6522_v7 = vadd.f32 %v6521_v32, %v6520_v50  ;;  %v6483_v50 = vadd.f32 %v6482_v46, %v6481_v18 }
 0x66e   :  { %15272 = vst [vmem:[#allocation7_spill] sm:$0xff] %v13536_v42  ;;  %v6523_v43 = vsel %vm6434_vm14, %v13536_v42, 0.0  ;;  %v6615_v12 = vmul.f32 %v13536_v42, %v13536_v42  ;;  %v13549_v57 = vpop.f32.mrb[54].mxu1  ;;  %v9377_v36 = vpop.f32.mrb[44].mxu0  ;;  %v6594_v42 = vmul.f32 %v13338_v62, %v13338_v62  ;;  %v6525_v52 = vsel %vm6434_vm14, %v13530_v56, 0.0 }
 0x66f   :  { %v6724_v35 = vadd.f32 %v6723_v14, %v6722_v8  ;;  %v13553_v4 = vadd.f32 %v9377_v36, %v13429_v51  ;;  %v13555_v23 = vpop.f32.mrb[55].mxu1  ;;  %v6316_v47 = vpop.f32.mrb[45].mxu0  ;;  %v6524_v32 = vadd.f32 %v6523_v43, %v6522_v7  ;;  %v6727_v33 = vsel %vm6434_vm14, %v6616_v45, 0.0 }
 0x670   :  { %v6725_v38 = vsel %vm6434_vm14, %v6615_v12, 0.0  ;;  %v13559_v48 = vadd.f32 %v6316_v47, %v13433_v34  ;;  %v6593_v7 = vmul.f32 %v13341_v61, %v13341_v61  ;;  %v6484_v45 = vsel %vm6434_vm14, %v13358_v3, 0.0 }
 0x671   :  { %15273 = vst [vmem:[#allocation8_spill] sm:$0xff] %v13553_v4  ;;  %v6726_v51 = vadd.f32 %v6725_v38, %v6724_v35  ;;  %v6618_v40 = vmul.f32 %v13553_v4, %v13553_v4  ;;  %v6526_v8 = vadd.f32 %v6525_v52, %v6524_v32  ;;  %v6485_v35 = vadd.f32 %v6484_v45, %v6483_v50 }
 0x672   :  { %15274 = vst [vmem:[#allocation9_spill] sm:$0xff] %v13559_v48  ;;  %v6527_v18 = vsel %vm6434_vm14, %v13559_v48, 0.0  ;;  %v6617_v34 = vmul.f32 %v13559_v48, %v13559_v48  ;;  %v13572_v46 = vpop.f32.mrb[56].mxu1  ;;  %v9380_v14 = vpop.f32.mrb[46].mxu0  ;;  %v6486_v48 = vsel %vm6434_vm14, %v13379_v0, 0.0  ;;  %v6529_v56 = vsel %vm6434_vm14, %v13553_v4, 0.0 }
 0x673   :  { %v6728_v38 = vadd.f32 %v6727_v33, %v6726_v51  ;;  %v13579_v43 = vadd.f32 %v9380_v14, %v13454_v60  ;;  %v13581_v12 = vpop.f32.mrb[57].mxu1  ;;  %v6328_v36 = vpop.f32.mrb[47].mxu0  ;;  %v6528_v47 = vadd.f32 %v6527_v18, %v6526_v8  ;;  %v6731_v51 = vsel %vm6434_vm14, %v6618_v40, 0.0 }
 0x674   :  { %v6729_v32 = vsel %vm6434_vm14, %v6617_v34, 0.0  ;;  %v13585_v52 = vadd.f32 %v6328_v36, %v13459_v15  ;;  %v6675_v34 = vadd.f32 %v6674_v41, %v6673_v29  ;;  %v6676_v45 = vsel %vm6434_vm14, %v6593_v7, 0.0 }
 0x675   :  { %15275 = vst [vmem:[#allocation10_spill] sm:$0xff] %v13579_v43  ;;  %v6730_v33 = vadd.f32 %v6729_v32, %v6728_v38  ;;  %v6620_v60 = vmul.f32 %v13579_v43, %v13579_v43  ;;  %v6530_v14 = vadd.f32 %v6529_v56, %v6528_v47  ;;  %v6487_v56 = vadd.f32 %v6486_v48, %v6485_v35 }
 0x676   :  { %15276 = vst [vmem:[#allocation11_spill] sm:$0xff] %v13585_v52  ;;  %v6531_v50 = vsel %vm6434_vm14, %v13585_v52, 0.0  ;;  %v6619_v15 = vmul.f32 %v13585_v52, %v13585_v52  ;;  %v13598_v8 = vpop.f32.mrb[58].mxu1  ;;  %v9383_v18 = vpop.f32.mrb[48].mxu0  ;;  %v6678_v52 = vsel %vm6434_vm14, %v6594_v42, 0.0  ;;  %v6533_v41 = vsel %vm6434_vm14, %v13579_v43, 0.0 }
 0x677   :  { %v6732_v36 = vadd.f32 %v6731_v51, %v6730_v33  ;;  %v13602_v38 = vadd.f32 %v9383_v18, %v13476_v59  ;;  %v13604_v32 = vpop.f32.mrb[59].mxu1  ;;  %v6340_v40 = vpop.f32.mrb[49].mxu0  ;;  %v6532_v47 = vadd.f32 %v6531_v50, %v6530_v14  ;;  %v6735_v29 = vsel %vm6434_vm14, %v6620_v60, 0.0 }
 0x678   :  { %v6733_v4 = vsel %vm6434_vm14, %v6619_v15, 0.0  ;;  %v13608_v11 = vadd.f32 %v6340_v40, %v13483_v39  ;;  %v6677_v42 = vadd.f32 %v6676_v45, %v6675_v34  ;;  %v6488_v14 = vsel %vm6434_vm14, %v13371_v22, 0.0 }
 0x679   :  { %15277 = vst [vmem:[#allocation12_spill] sm:$0xff] %v13602_v38  ;;  %v6734_v7 = vadd.f32 %v6733_v4, %v6732_v36  ;;  %v6622_v59 = vmul.f32 %v13602_v38, %v13602_v38  ;;  %v6534_v33 = vadd.f32 %v6533_v41, %v6532_v47  ;;  %v6489_v18 = vadd.f32 %v6488_v14, %v6487_v56 }
 0x67a   :  { %15278 = vst [vmem:[#allocation13_spill] sm:$0xff] %v13608_v11  ;;  %v6535_v48 = vsel %vm6434_vm14, %v13608_v11, 0.0  ;;  %v6621_v35 = vmul.f32 %v13608_v11, %v13608_v11  ;;  %v13620_v39 = vpop.f32.mrb[60].mxu1  ;;  %v9386_v51 = vpop.f32.mrb[50].mxu0  ;;  %v6490_v34 = vsel %vm6434_vm14, %v13389_v55, 0.0  ;;  %v6537_v45 = vsel %vm6434_vm14, %v13602_v38, 0.0 }
 0x67b   :  { %v6736_v50 = vadd.f32 %v6735_v29, %v6734_v7  ;;  %v13625_v4 = vadd.f32 %v9386_v51, %v13500_v26  ;;  %v13627_v60 = vpop.f32.mrb[61].mxu1  ;;  %v6352_v15 = vpop.f32.mrb[51].mxu0  ;;  %v6536_v36 = vadd.f32 %v6535_v48, %v6534_v33  ;;  %v6739_v29 = vsel %vm6434_vm14, %v6622_v59, 0.0 }
 0x67c   :  { %v6737_v40 = vsel %vm6434_vm14, %v6621_v35, 0.0  ;;  %v13631_v47 = vadd.f32 %v6352_v15, %v13509_v63  ;;  %v6596_v35 = vmul.f32 %v13347_v44, %v13347_v44  ;;  %v6595_v51 = vmul.f32 %v13353_v19, %v13353_v19 }
 0x67d   :  { %v6738_v41 = vadd.f32 %v6737_v40, %v6736_v50  ;;  %v6624_v26 = vmul.f32 %v13625_v4, %v13625_v4  ;;  %v6538_v7 = vadd.f32 %v6537_v45, %v6536_v36  ;;  %v6491_v36 = vadd.f32 %v6490_v34, %v6489_v18 }
 0x67e   :  { %15279 = vst [vmem:[#allocation14_spill] sm:$0xff] %v13631_v47  ;;  %v6539_v56 = vsel %vm6434_vm14, %v13631_v47, 0.0  ;;  %v6623_v63 = vmul.f32 %v13631_v47, %v13631_v47  ;;  %v13644_v33 = vpop.f32.mrb[62].mxu1  ;;  %v9389_v48 = vpop.f32.mrb[52].mxu0  ;;  %v6679_v38 = vadd.f32 %v6678_v52, %v6677_v42  ;;  %v6541_v11 = vsel %vm6434_vm14, %v13625_v4, 0.0 }
 0x67f   :  { %v6740_v14 = vadd.f32 %v6739_v29, %v6738_v41  ;;  %v13651_v50 = vadd.f32 %v9389_v48, %v13524_v5  ;;  %v13653_v59 = vpop.f32.mrb[63].mxu1  ;;  %v6364_v15 = vpop.f32.mrb[53].mxu0  ;;  %v6540_v40 = vadd.f32 %v6539_v56, %v6538_v7  ;;  %v6743_v43 = vsel %vm6434_vm14, %v6624_v26, 0.0 }
 0x680   :  { %v6741_v45 = vsel %vm6434_vm14, %v6623_v63, 0.0  ;;  %v13657_v47 = vadd.f32 %v6364_v15, %v13532_v30  ;;  %v6680_v30 = vsel %vm6434_vm14, %v6595_v51, 0.0  ;;  %v6492_v52 = vsel %vm6434_vm14, %v13384_v53, 0.0 }
 0x681   :  { %v6742_v41 = vadd.f32 %v6741_v45, %v6740_v14  ;;  %v6626_v5 = vmul.f32 %v13651_v50, %v13651_v50  ;;  %v6542_v29 = vadd.f32 %v6541_v11, %v6540_v40  ;;  %v6493_v63 = vadd.f32 %v6492_v52, %v6491_v36 }
 0x682   :  { %v6543_v18 = vsel %vm6434_vm14, %v13657_v47, 0.0  ;;  %v6625_v34 = vmul.f32 %v13657_v47, %v13657_v47  ;;  %v9392_v7 = vpop.f32.mrb[54].mxu0  ;;  %v6494_v15 = vsel %vm6434_vm14, %v13405_v13, 0.0  ;;  %v6545_v51 = vsel %vm6434_vm14, %v13651_v50, 0.0 }
 0x683   :  { %v6744_v42 = vadd.f32 %v6743_v43, %v6742_v41  ;;  %v13672_v26 = vadd.f32 %v9392_v7, %v13549_v57  ;;  %v6376_v56 = vpop.f32.mrb[55].mxu0  ;;  %v6544_v48 = vadd.f32 %v6543_v18, %v6542_v29  ;;  %v6747_v57 = vsel %vm6434_vm14, %v6626_v5, 0.0 }
 0x684   :  { %v6745_v11 = vsel %vm6434_vm14, %v6625_v34, 0.0  ;;  %v13676_v14 = vadd.f32 %v6376_v56, %v13555_v23  ;;  %v6682_v29 = vsel %vm6434_vm14, %v6596_v35, 0.0  ;;  %v6681_v18 = vadd.f32 %v6680_v30, %v6679_v38 }
 0x685   :  { %v6746_v40 = vadd.f32 %v6745_v11, %v6744_v42  ;;  %v6628_v43 = vmul.f32 %v13672_v26, %v13672_v26  ;;  %v6546_v45 = vadd.f32 %v6545_v51, %v6544_v48  ;;  %v6597_v42 = vmul.f32 %v13363_v17, %v13363_v17 }
 0x686   :  { %v6547_v36 = vsel %vm6434_vm14, %v13676_v14, 0.0  ;;  %v6627_v23 = vmul.f32 %v13676_v14, %v13676_v14  ;;  %v9395_v41 = vpop.f32.mrb[56].mxu0  ;;  %v6495_v11 = vadd.f32 %v6494_v15, %v6493_v63  ;;  %v6549_v51 = vsel %vm6434_vm14, %v13672_v26, 0.0 }
 0x687   :  { %v6748_v34 = vadd.f32 %v6747_v57, %v6746_v40  ;;  %v13691_v7 = vadd.f32 %v9395_v41, %v13572_v46  ;;  %v6388_v52 = vpop.f32.mrb[57].mxu0  ;;  %v6548_v5 = vadd.f32 %v6547_v36, %v6546_v45  ;;  %v6751_v38 = vsel %vm6434_vm14, %v6628_v43, 0.0 }
 0x688   :  { %v6749_v56 = vsel %vm6434_vm14, %v6627_v23, 0.0  ;;  %v13697_v48 = vadd.f32 %v6388_v52, %v13581_v12  ;;  %v6683_v12 = vadd.f32 %v6682_v29, %v6681_v18  ;;  %v6496_v43 = vsel %vm6434_vm14, %v13397_v37, 0.0 }
 0x689   :  { %15280 = vst [vmem:[#allocation15_spill] sm:$0xff] %v13691_v7  ;;  %v6750_v35 = vadd.f32 %v6749_v56, %v6748_v34  ;;  %v6630_v46 = vmul.f32 %v13691_v7, %v13691_v7  ;;  %v6550_v30 = vadd.f32 %v6549_v51, %v6548_v5  ;;  %v6684_v52 = vsel %vm6434_vm14, %v6597_v42, 0.0 }
 0x68a   :  { %15281 = vst [vmem:[#allocation16_spill] sm:$0xff] %v13697_v48  ;;  %v6551_v40 = vsel %vm6434_vm14, %v13697_v48, 0.0  ;;  %v6629_v57 = vmul.f32 %v13697_v48, %v13697_v48  ;;  %v9398_v45 = vpop.f32.mrb[58].mxu0  ;;  %v6497_v5 = vadd.f32 %v6496_v43, %v6495_v11  ;;  %v6553_v29 = vsel %vm6434_vm14, %v13691_v7, 0.0 }
 0x68b   :  { %v6752_v36 = vadd.f32 %v6751_v38, %v6750_v35  ;;  %v13709_v63 = vadd.f32 %v9398_v45, %v13598_v8  ;;  %v6400_v15 = vpop.f32.mrb[59].mxu0  ;;  %v6552_v23 = vadd.f32 %v6551_v40, %v6550_v30  ;;  %v6755_v8 = vsel %vm6434_vm14, %v6630_v46, 0.0 }
 0x68c   :  { %v6753_v41 = vsel %vm6434_vm14, %v6629_v57, 0.0  ;;  %v13715_v34 = vadd.f32 %v6400_v15, %v13604_v32  ;;  %v6598_v32 = vmul.f32 %v13358_v3, %v13358_v3  ;;  %v6685_v40 = vadd.f32 %v6684_v52, %v6683_v12 }
 0x68d   :  { %15282 = vst [vmem:[#allocation17_spill] sm:$0xff] %v13709_v63  ;;  %v6754_v18 = vadd.f32 %v6753_v41, %v6752_v36  ;;  %v6554_v56 = vadd.f32 %v6553_v29, %v6552_v23  ;;  %v6599_v36 = vmul.f32 %v13379_v0, %v13379_v0  ;;  %v6557_v15 = vsel %vm6434_vm14, %v13709_v63, 0.0 }
 0x68e   :  { %15283 = vst [vmem:[#allocation18_spill] sm:$0xff] %v13715_v34  ;;  %v6555_v51 = vsel %vm6434_vm14, %v13715_v34, 0.0  ;;  %v6631_v38 = vmul.f32 %v13715_v34, %v13715_v34  ;;  %v9401_v35 = vpop.f32.mrb[60].mxu0  ;;  %v6632_v43 = vmul.f32 %v13709_v63, %v13709_v63  ;;  %v6498_v23 = vrot.slane %v6497_v5, 4 }
 0x68f   :  { %v6756_v30 = vadd.f32 %v6755_v8, %v6754_v18  ;;  %v13728_v42 = vadd.f32 %v9401_v35, %v13620_v39  ;;  %v6412_v11 = vpop.f32.mrb[61].mxu0  ;;  %v6556_v57 = vadd.f32 %v6555_v51, %v6554_v56  ;;  %v6686_v29 = vsel %vm6434_vm14, %v6598_v32, 0.0 }
 0x690   :  { %v6757_v46 = vsel %vm6434_vm14, %v6631_v38, 0.0  ;;  %v13732_v45 = vadd.f32 %v6412_v11, %v13627_v60  ;;  %v6687_v56 = vadd.f32 %v6686_v29, %v6685_v40  ;;  %v6688_v35 = vsel %vm6434_vm14, %v6599_v36, 0.0 }
 0x691   :  { %15284 = vst [vmem:[#allocation19_spill] sm:$0xff] %v13728_v42  ;;  %v6758_v39 = vadd.f32 %v6757_v46, %v6756_v30  ;;  %v6558_v41 = vadd.f32 %v6557_v15, %v6556_v57  ;;  %v6759_v30 = vsel %vm6434_vm14, %v6632_v43, 0.0  ;;  %v6561_v11 = vsel %vm6434_vm14, %v13728_v42, 0.0 }
 0x692   :  { %15285 = vst [vmem:[#allocation20_spill] sm:$0xff] %v13732_v45  ;;  %v6559_v12 = vsel %vm6434_vm14, %v13732_v45, 0.0  ;;  %v9404_v52 = vpop.f32.mrb[62].mxu0  ;;  %v6633_v60 = vmul.f32 %v13732_v45, %v13732_v45  ;;  %v6499_v32 = vadd.f32 %v6498_v23, %v6497_v5  ;;  %v6600_v40 = vmul.f32 %v13371_v22, %v13371_v22 }
 0x693   :  { %v13746_v18 = vadd.f32 %v9404_v52, %v13644_v33  ;;  %v6424_v8 = vpop.f32.mrb[63].mxu0  ;;  %v6560_v51 = vadd.f32 %v6559_v12, %v6558_v41  ;;  %v6760_v57 = vadd.f32 %v6759_v30, %v6758_v39  ;;  %v6601_v36 = vmul.f32 %v13389_v55, %v13389_v55 }
 0x694   :  { %v13749_v38 = vadd.f32 %v6424_v8, %v13653_v59  ;;  %v6761_v15 = vsel %vm6434_vm14, %v6633_v60, 0.0  ;;  %v6689_v59 = vadd.f32 %v6688_v35, %v6687_v56  ;;  %v6634_v43 = vmul.f32 %v13728_v42, %v13728_v42 }
 0x695   :  { %15286 = vst [vmem:[#allocation22_spill] sm:$0xff] %v13746_v18  ;;  %v6562_v46 = vadd.f32 %v6561_v11, %v6560_v51  ;;  %v6565_v5 = vsel %vm6434_vm14, %v13746_v18, 0.0  ;;  %v6500_v23 = vrot.slane %v6499_v32, 2  ;;  %v6778_v39 = vlaneseq  ;;  %v13774_v11 = vld [vmem:[%s14963_s2] sm:$0x1] }
 0x696   :  { %15287 = vst [vmem:[#allocation24_spill] sm:$0xff] %v13749_v38  ;;  %v6563_v33 = vsel %vm6434_vm14, %v13749_v38, 0.0  ;;  %v6762_v12 = vadd.f32 %v6761_v15, %v6760_v57  ;;  %v6690_v29 = vsel %vm6434_vm14, %v6600_v40, 0.0  ;;  %v6635_v60 = vmul.f32 %v13749_v38, %v13749_v38 }
 0x697   :  { %v6564_v41 = vadd.f32 %v6563_v33, %v6562_v46  ;;  %v6691_v8 = vadd.f32 %v6690_v29, %v6689_v59  ;;  %v6692_v51 = vsel %vm6434_vm14, %v6601_v36, 0.0  ;;  %v6763_v35 = vsel %vm6434_vm14, %v6634_v43, 0.0 }
 0x698   :  { %v6501_v30 = vadd.f32 %v6500_v23, %v6499_v32  ;;  %v13776_v46 = vshrl.u32 %v6778_v39, 7  ;;  %v6764_v33 = vadd.f32 %v6763_v35, %v6762_v12  ;;  %v6602_v40 = vmul.f32 %v13384_v53, %v13384_v53 }
 0x699   :  { %v6566_v52 = vadd.f32 %v6565_v5, %v6564_v41  ;;  %v6765_v15 = vsel %vm6434_vm14, %v6635_v60, 0.0  ;;  %v6693_v59 = vadd.f32 %v6692_v51, %v6691_v8  ;;  %v6603_v36 = vmul.f32 %v13405_v13, %v13405_v13  ;;  %v10061_v51 = vld [vmem:[%s14962_s5] sm:$0xff] }
 0x69a   :  { %v6776_v32 = vmul.f32 256.0, %v13774_v11  ;;  %v6636_v43 = vmul.f32 %v13746_v18, %v13746_v18  ;;  %v6502_v5 = vrot.slane %v6501_v30, 1  ;;  %v13787_v23 = vsub.s32 0, %v13776_v46 }
 0x69b   :  { %v6567_v56 = vrot.slane %v6566_v52, 4  ;;  %v6766_v12 = vadd.f32 %v6765_v15, %v6764_v33  ;;  %v6696_v8 = vsel %vm6434_vm14, %v6603_v36, 0.0  ;;  %v15288_v35 = vand.u32 4294901760, %v13210_v16 }
 0x69c   :  { %v15289_v33 = vand.u32 4294901760, %v13215_v58  ;;  %v6503_v15 = vadd.f32 %v6502_v5, %v6501_v30 }
 0x69d   :  { %v6568_v57 = vadd.f32 %v6567_v56, %v6566_v52  ;;  %v6694_v52 = vsel %vm6434_vm14, %v6602_v40, 0.0  ;;  %v6767_v56 = vsel %vm6434_vm14, %v6636_v43, 0.0  ;;  %v13797_v18 = vsub.f32 %v10061_v51, %v15288_v35 }
 0x69e   :  { %v6695_v29 = vadd.f32 %v6694_v52, %v6693_v59  ;;  %v6781_v59 = vrot.slane %v6776_v32, %v13787_v23  ;;  %v6768_v36 = vadd.f32 %v6767_v56, %v6766_v12  ;;  %v6604_v43 = vmul.f32 %v13397_v37, %v13397_v37 }
 0x69f   :  { %v6569_v41 = vrot.slane %v6568_v57, 2  ;;  %v6901_v51 = vand.u32 4294901760, %v13797_v18 }
 0x6a0   :  { %v6697_v52 = vadd.f32 %v6696_v8, %v6695_v29  ;;  %v6783_v38 = vadd.f32 %v6781_v59, %v6503_v15  ;;  %v6769_v42 = vrot.slane %v6768_v36, 4  ;;  %v6698_v58 = vsel %vm6434_vm14, %v6604_v43, 0.0 }
 0x6a1   :  { %v6570_v39 = vadd.f32 %v6569_v41, %v6568_v57  ;;  %v10062_v57 = vld [vmem:[%s14962_s5 + $0x8] sm:$0xff]  ;;  %v6902_v12 = vsub.f32 %v13797_v18, %v6901_v51 }
 0x6a2   :  { %v13804_v40 = vsub.f32 %v10062_v57, %v15289_v33  ;;  %v6699_v30 = vadd.f32 %v6698_v58, %v6697_v52  ;;  %v6785_v57 = vmul.f32 2.0, %v13774_v11 }
 0x6a3   :  { %v6571_v60 = vrot.slane %v6570_v39, 1 }
 0x6a4   :  { %v6908_v35 = vand.u32 4294901760, %v13804_v40  ;;  %v6700_v56 = vrot.slane %v6699_v30, 4  ;;  %v6790_v52 = vrot.slane %v6785_v57, %v13787_v23 }
 0x6a5   :  { %v6572_v41 = vadd.f32 %v6571_v60, %v6570_v39  ;;  %v6770_v60 = vadd.f32 %v6769_v42, %v6768_v36 }
 0x6a6   :  { %v6909_v29 = vsub.f32 %v13804_v40, %v6908_v35  ;;  %v6701_v34 = vadd.f32 %v6700_v56, %v6699_v30 }
 0x6a7   :  { %v6784_v16 = vadd.f32 %v6781_v59, %v6572_v41  ;;  %v6903_v59 = vand.u32 4294901760, %v6902_v12  ;;  %v6771_v63 = vrot.slane %v6770_v60, 2 }
 0x6a8   :  { %v6702_v48 = vrot.slane %v6701_v34, 2 }
 0x6a9   :  { %v6817_v45 = vrot.slane %v6784_v16, 7  ;;  %v6910_v16 = vand.u32 4294901760, %v6909_v29  ;;  %v9544_v29 = vpack.c.bf16 %v13804_v40, %v13797_v18  ;;  %v9550_v40 = vpack.c.bf16 %v6908_v35, %v6901_v51 }
 0x6aa   :  { %v6703_v12 = vadd.f32 %v6702_v48, %v6701_v34 }
 0x6ab   :  { %v6818_v5 = vsel %vm6794_vm0, %v6817_v45, %v6783_v38  ;;  %v6795_v38 = vsel %vm6794_vm0, %v6572_v41, %v6503_v15  ;;  %v9541_v58 = vpack.c.bf16 %v6910_v16, %v6903_v59  ;;  %v6804_v15 = vmul.f32 %v6776_v32, %v13774_v11 }
 0x6ac   :  { %v6819_v39 = vsel %vm6434_vm14, %v6818_v5, 0  ;;  %v6772_v5 = vadd.f32 %v6771_v63, %v6770_v60  ;;  %v6797_v42 = vmul.f32 %v6795_v38, %v6790_v52  ;;  %v6704_v63 = vrot.slane %v6703_v12, 1 }
 0x6ad   :  { %v6888_v8 = vand.u32 4294901760, %v6819_v39 }
 0x6ae   :  { %v6773_v36 = vrot.slane %v6772_v5, 1  ;;  %v6799_v30 = vrot.slane %v6797_v42, 1  ;;  %v6705_v56 = vadd.f32 %v6704_v63, %v6703_v12  ;;  %v7753_v63 = vld [vmem:[%s14965_s4 + $0x1] sm:$0x1] }
 0x6af   :  { %v6889_v33 = vsub.f32 %v6819_v39, %v6888_v8  ;;  %v15290_v39 = vmov 0.0|0.0  }
 0x6b0   :  { %v6774_v41 = vadd.f32 %v6773_v36, %v6772_v5  ;;  %v6802_v34 = vadd.f32 %v6797_v42, %v6705_v56  ;;  %v7777_v56 = vrot.slane %v13774_v11, %v13787_v23 }
 0x6b1   :  { %v6890_v43 = vand.u32 4294901760, %v6889_v33 }
 0x6b2   :  { %v6803_v60 = vadd.f32 %v6799_v30, %v6774_v41  ;;  %v7752_v41 = vld [vmem:[%s14965_s4] sm:$0x1] }
 0x6b3   :  { %v6891_v45 = vsub.f32 %v6889_v33, %v6890_v43 }
 0x6b5   :  { %v6892_v7 = vand.u32 4294901760, %v6891_v45  ;;  %v10074_v45 = vmov 1966171168  }
 0x6b6   :  { %v7758_v38 = vunpack.c.l.s4 %v10074_v45 }
 0x6b7   :  { %9410 = vmatmul.mubr.f32.vlgmr.msra.gmra.mrb[64].mxu1 %v6892_v7  ;;  %v6809_v7 = vrot.slane %v6804_v15, %v13787_v23 }
 0x6b8   :  { %9542 = vmatpush3.bf16.msra.mxu1 %v9541_v58  ;;  %9416 = vmatprep.mubr.msk.f32.mxu1 %vm10073_vm15, %v15255_v2  ;;  %v7759_v12 = vunpack.c.0.s8 %v7758_v38 }
 0x6b9   :  { %9543 = vmatprep.subr.bf16.mxu1 %v15290_v39  ;;  %v6812_v48 = vadd.f32 %v6809_v7, %v6803_v60  ;;  %v6811_v18 = vadd.f32 %v6809_v7, %v6802_v34  ;;  %v7784_v7 = vcombine.low %v7752_v41, %v7753_v63 }
 0x6bb   :  { %v7282_v57 = vrot.slane %v6812_v48, 7 }
 0x6bd   :  { %v7283_v32 = vsel %vm6794_vm0, %v7282_v57, %v6811_v18 }
 0x6be   :  { %v7284_v59 = vsel %vm6434_vm14, %v7283_v32, 0 }
 0x6bf   :  { %9417 = vmatmul.mubr.f32.vlgmr.msra.gmra.mrb[64].mxu1 %v6888_v8 }
 0x6c0   :  { %9545 = vmatpush3.bf16.msra.mxu1 %v9544_v29  ;;  %9423 = vmatprep.mubr.msk.f32.mxu1 %vm10073_vm15, %v15255_v2 }
 0x6c1   :  { %9546 = vmatprep.subr.bf16.mxu1 %v15290_v39 }
 0x6c7   :  { %9424 = vmatmul.mubr.f32.vlgmr.msra.gmra.mrb[64].mxu1 %v6889_v33  ;;  %v7353_v33 = vand.u32 4294901760, %v7284_v59 }
 0x6c8   :  { %9548 = vmatpush3.bf16.msra.mxu1 %v13223_v49  ;;  %9430 = vmatprep.mubr.msk.f32.mxu1 %vm10073_vm15, %v15255_v2 }
 0x6c9   :  { %9549 = vmatprep.subr.bf16.mxu1 %v15290_v39  ;;  %v7354_v16 = vsub.f32 %v7284_v59, %v7353_v33 }
 0x6cb   :  { %v7355_v51 = vand.u32 4294901760, %v7354_v16 }
 0x6cd   :  { %v7356_v35 = vsub.f32 %v7354_v16, %v7355_v51 }
 0x6cf   :  { %9431 = vmatmul.mubr.f32.vlgmr.msra.gmra.mrb[64].mxu1 %v6890_v43  ;;  %v7357_v43 = vand.u32 4294901760, %v7356_v35 }
 0x6d0   :  { %9551 = vmatpush3.bf16.msra.mxu1 %v9550_v40  ;;  %9437 = vmatprep.mubr.msk.f32.mxu1 %vm10073_vm15, %v15255_v2 }
 0x6d1   :  { %9552 = vmatprep.subr.bf16.mxu1 %v15290_v39 }
 0x6d7   :  { %9438 = vmatmul.mubr.f32.vlgmr.msra.gmra.mrb[64].mxu1 %v6888_v8 }
 0x6d8   :  { %9554 = vmatpush3.bf16.msra.mxu1 %v13223_v49  ;;  %9444 = vmatprep.mubr.msk.f32.mxu1 %vm10073_vm15, %v15255_v2 }
 0x6d9   :  { %9555 = vmatprep.subr.bf16.mxu1 %v15290_v39 }
 0x6df   :  { %9445 = vmatmul.mubr.f32.vlgmr.msra.gmra.mrb[64].mxu1 %v6888_v8 }
 0x6e0   :  { %9557 = vmatpush3.bf16.msra.mxu1 %v13223_v49  ;;  %9451 = vmatprep.mubr.msk.f32.mxu1 %vm10073_vm15, %v15255_v2 }
 0x6e1   :  { %9558 = vmatprep.subr.bf16.mxu1 %v15290_v39 }
 0x6e3   :  { %9452 = vmatmul.mubr.f32.vlgmr.msra.gmra.mrb[66].mxu1 %v7357_v43 }
 0x6e4   :  { %9560 = vmatpush3.bf16.msra.mxu1 %v9541_v58  ;;  %9458 = vmatprep.mubr.msk.f32.mxu1 %vm10073_vm15, %v15255_v2 }
 0x6e5   :  { %9561 = vmatprep.subr.bf16.mxu1 %v15290_v39 }
 0x6eb   :  { %9459 = vmatmul.mubr.f32.vlgmr.msra.gmra.mrb[66].mxu1 %v7353_v33 }
 0x6ec   :  { %9563 = vmatpush3.bf16.msra.mxu1 %v9544_v29  ;;  %9465 = vmatprep.mubr.msk.f32.mxu1 %vm10073_vm15, %v15255_v2  ;;  %v13869_v29 = vsub.s32 %v7759_v12, %v13776_v46 }
 0x6ed   :  { %9564 = vmatprep.subr.bf16.mxu1 %v15290_v39 }
 0x6ee   :  { %v7791_v46 = vrot.slane %v7784_v7, %v13869_v29 }
 0x6f3   :  { %9466 = vmatmul.mubr.f32.vlgmr.msra.gmra.mrb[66].mxu1 %v7354_v16 }
 0x6f4   :  { %9566 = vmatpush3.bf16.msra.mxu1 %v13223_v49  ;;  %9472 = vmatprep.mubr.msk.f32.mxu1 %vm10073_vm15, %v15255_v2 }
 0x6f5   :  { %9567 = vmatprep.subr.bf16.mxu1 %v15290_v39 }
 0x6fb   :  { %9473 = vmatmul.mubr.f32.vlgmr.msra.gmra.mrb[66].mxu1 %v7355_v51 }
 0x6fc   :  { %9569 = vmatpush3.bf16.msra.mxu1 %v9550_v40  ;;  %9479 = vmatprep.mubr.msk.f32.mxu1 %vm10073_vm15, %v15255_v2  ;;  %v7798_v40 = vrot.slane %v7791_v46, %v13869_v29 }
 0x6fd   :  { %9570 = vmatprep.subr.bf16.mxu1 %v15290_v39  ;;  %v7750_v39 = vld [vmem:[%s14964_s3] sm:$0x1] }
 0x703   :  { %9480 = vmatmul.mubr.f32.vlgmr.msra.gmra.mrb[66].mxu1 %v7353_v33 }
 0x704   :  { %9572 = vmatpush3.bf16.msra.mxu1 %v13223_v49  ;;  %9486 = vmatprep.mubr.msk.f32.mxu1 %vm10073_vm15, %v15255_v2  ;;  %v7751_v49 = vld [vmem:[%s14964_s3 + $0x1] sm:$0x1] }
 0x705   :  { %v7756_v15 = vcombine.low %v7750_v39, %v7751_v49 }
 0x707   :  { %v7763_v60 = vrot.slane %v7756_v15, %v13869_v29 }
 0x709   :  { %v7770_v48 = vrot.slane %v7763_v60, %v13869_v29  ;;  %v15298_v60 = vld [vmem:[#allocation33_spill] sm:$0xff] }
 0x70b   :  { %9487 = vmatmul.mubr.f32.vlgmr.msra.gmra.mrb[66].mxu1 %v7353_v33 }
 0x7b2   :  { %v7276_v8 = vpop.f32.mrb[64].mxu1 }
 0x7b3   :  { %v9446_v52 = vpop.f32.mrb[65].mxu1  ;;  %v7745_v58 = vmul.f32 %v7276_v8, %v7276_v8  ;;  %v7779_v34 = vsub.f32 %v7777_v56, %v7276_v8 }
 0x7de   :  { %v7741_v5 = vpop.f32.mrb[66].mxu1 }
 0x7df   :  { %v7746_v42 = vsub.f32 %v7741_v5, %v7745_v58  ;;  %v9488_v36 = vpop.f32.mrb[67].mxu1 }
 0x7e1   :  { %v7747_v30 = vmax.f32 %v7746_v42, 0.0 }
 0x7e3   :  { %v7748_v2 = vadd.f32 1e-05, %v7747_v30 }
 0x7e5   :  { %9931 = vrsqrt.f32 %v7748_v2 }
 0x7ef   :  { %v9932_v57 = vpop.eup %9931 }
 0x7f0   :  { %v7772_v18 = vmul.f32 %v9932_v57, %v7770_v48  ;;  %v7780_v32 = vmul.f32 %v9932_v57, %v7779_v34 }
 0x7f2   :  { %v7781_v59 = vmul.f32 %v7780_v32, %v7770_v48  ;;  %v7808_v33 = vrot.slane %v7772_v18, %v13869_v29 }
 0x7f4   :  { %v7800_v16 = vadd.f32 %v7798_v40, %v7781_v59  ;;  %v7809_v51 = vcombine.high %v7808_v33, %v7808_v33  ;;  %v7816_v35 = vrot.slane %v7808_v33, %v13869_v29 }
 0x7f6   :  { %v7823_v43 = vrot.slane %v7809_v51, %v13869_v29  ;;  %v13887_v11 = vrot.slane %v7800_v16, %v13869_v29  ;;  %v7827_v52 = vrot.slane %v7816_v35, %v13787_v23  ;;  %v15304_v16 = vld [vmem:[#allocation45_spill] sm:$0xff] }
 0x7f7   :  { %v15305_v35 = vld [vmem:[#allocation53_spill] sm:$0xff] }
 0x7f8   :  { %v13891_v8 = vrot.slane %v7823_v43, %v13787_v23  ;;  %v13894_v45 = vmul.f32 %v13229_v24, %v7827_v52  ;;  %v13897_v38 = vmul.f32 %v13227_v1, %v7827_v52  ;;  %v13900_v58 = vmul.f32 %v13237_v25, %v7827_v52 }
 0x7f9   :  { %v13903_v5 = vmul.f32 %v13235_v6, %v7827_v52  ;;  %v13906_v42 = vmul.f32 %v13249_v54, %v7827_v52  ;;  %v13909_v36 = vmul.f32 %v13243_v9, %v7827_v52  ;;  %v13912_v12 = vmul.f32 %v13268_v28, %v7827_v52  ;;  %v15291_v6 = vld [vmem:[#allocation23_spill] sm:$0xff]  ;;  %v15292_v54 = vld [vmem:[#allocation21_spill] sm:$0xff] }
 0x7fa   :  { %v13915_v24 = vmul.f32 %v13259_v10, %v7827_v52  ;;  %v13918_v1 = vmul.f32 %v13279_v21, %v7827_v52  ;;  %v13921_v25 = vmul.f32 %v13275_v27, %v7827_v52  ;;  %v13924_v30 = vmul.f32 %v15291_v6, %v7827_v52  ;;  %v15293_v9 = vld [vmem:[#allocation27_spill] sm:$0xff]  ;;  %v15294_v28 = vld [vmem:[#allocation25_spill] sm:$0xff] }
 0x7fb   :  { %v13927_v39 = vmul.f32 %v15292_v54, %v7827_v52  ;;  %v13930_v49 = vmul.f32 %v15293_v9, %v7827_v52  ;;  %v13933_v2 = vmul.f32 %v15294_v28, %v7827_v52  ;;  %v15295_v10 = vld [vmem:[#allocation31_spill] sm:$0xff]  ;;  %v15296_v21 = vld [vmem:[#allocation29_spill] sm:$0xff]  ;;  %v13945_v7 = vmul.f32 %v15298_v60, %v7827_v52  ;;  %v15308_v28 = vld [vmem:[#allocation4_spill] sm:$0xff] }
 0x7fc   :  { %v13936_v15 = vmul.f32 %v15295_v10, %v7827_v52  ;;  %v13939_v41 = vmul.f32 %v15296_v21, %v7827_v52  ;;  %v15297_v27 = vld [vmem:[#allocation35_spill] sm:$0xff]  ;;  %v13948_v56 = vmul.f32 %v13335_v20, %v7827_v52  ;;  %v13951_v48 = vmul.f32 %v13329_v31, %v7827_v52  ;;  %v15307_v54 = vld [vmem:[#allocation5_spill] sm:$0xff]  ;;  %v15310_v60 = vld [vmem:[#allocation6_spill] sm:$0xff] }
 0x7fd   :  { %v13942_v63 = vmul.f32 %v15297_v27, %v7827_v52  ;;  %v13954_v46 = vmul.f32 %v13341_v61, %v7827_v52  ;;  %v13957_v34 = vmul.f32 %v13338_v62, %v7827_v52  ;;  %v13960_v57 = vmul.f32 %v13353_v19, %v7827_v52  ;;  %v15309_v21 = vld [vmem:[#allocation7_spill] sm:$0xff] }
 0x7fe   :  { %v13963_v18 = vmul.f32 %v13347_v44, %v7827_v52  ;;  %v13966_v32 = vmul.f32 %v13363_v17, %v7827_v52  ;;  %v13969_v20 = vmul.f32 %v13358_v3, %v7827_v52  ;;  %v13972_v31 = vmul.f32 %v13379_v0, %v7827_v52  ;;  %v15299_v3 = vld [vmem:[#allocation39_spill] sm:$0xff]  ;;  %v15300_v0 = vld [vmem:[#allocation37_spill] sm:$0xff] }
 0x7ff   :  { %v13975_v61 = vmul.f32 %v13371_v22, %v7827_v52  ;;  %v13978_v62 = vmul.f32 %v13389_v55, %v7827_v52  ;;  %v13981_v19 = vmul.f32 %v13384_v53, %v7827_v52  ;;  %v13984_v44 = vmul.f32 %v13405_v13, %v7827_v52  ;;  %v15301_v55 = vld [vmem:[#allocation43_spill] sm:$0xff]  ;;  %v15302_v53 = vld [vmem:[#allocation41_spill] sm:$0xff] }
 0x800   :  { %v13987_v17 = vmul.f32 %v13397_v37, %v7827_v52  ;;  %v13991_v40 = vmul.f32 %v15299_v3, %v13891_v8  ;;  %v13995_v22 = vmul.f32 %v15300_v0, %v13891_v8  ;;  %v13999_v59 = vmul.f32 %v15301_v55, %v13891_v8  ;;  %v15303_v13 = vld [vmem:[#allocation47_spill] sm:$0xff]  ;;  %v15311_v0 = vld [vmem:[#allocation9_spill] sm:$0xff] }
 0x801   :  { %v14003_v33 = vmul.f32 %v15302_v53, %v13891_v8  ;;  %v14007_v37 = vmul.f32 %v15303_v13, %v13891_v8  ;;  %v14011_v51 = vmul.f32 %v15304_v16, %v13891_v8  ;;  %v14015_v43 = vmul.f32 %v15305_v35, %v13891_v8  ;;  %v15306_v52 = vld [vmem:[#allocation51_spill] sm:$0xff]  ;;  %v15313_v53 = vld [vmem:[#allocation8_spill] sm:$0xff] }
 0x802   :  { %v14019_v6 = vmul.f32 %v15306_v52, %v13891_v8  ;;  %v14023_v9 = vmul.f32 %v15307_v54, %v13891_v8  ;;  %v14027_v10 = vmul.f32 %v15308_v28, %v13891_v8  ;;  %v14031_v27 = vmul.f32 %v15309_v21, %v13891_v8  ;;  %v15314_v16 = vld [vmem:[#allocation11_spill] sm:$0xff]  ;;  %v15315_v52 = vld [vmem:[#allocation10_spill] sm:$0xff]  ;;  %v15316_v28 = vld [vmem:[#allocation13_spill] sm:$0xff] }
 0x803   :  { %v14035_v3 = vmul.f32 %v15310_v60, %v13891_v8  ;;  %v14039_v55 = vmul.f32 %v15311_v0, %v13891_v8  ;;  %v14043_v13 = vmul.f32 %v15313_v53, %v13891_v8  ;;  %v14047_v35 = vmul.f32 %v15314_v16, %v13891_v8  ;;  %v15317_v60 = vld [vmem:[#allocation12_spill] sm:$0xff] }
 0x804   :  { %v14051_v54 = vmul.f32 %v15315_v52, %v13891_v8  ;;  %v14055_v21 = vmul.f32 %v15316_v28, %v13891_v8  ;;  %v14059_v0 = vmul.f32 %v15317_v60, %v13891_v8  ;;  %v14067_v16 = vmul.f32 %v13625_v4, %v13891_v8 }
 0x805   :  { %15312 = vst [vmem:[#allocation26_spill] sm:$0xff] %v14039_v55  ;;  %v15319_v55 = vld [vmem:[#allocation14_spill] sm:$0xff]  ;;  %v14071_v52 = vmul.f32 %v13657_v47, %v13891_v8  ;;  %v14075_v28 = vmul.f32 %v13651_v50, %v13891_v8  ;;  %v7906_v60 = vcombine.high %v13887_v11, %v13887_v11  ;;  %v14087_v4 = vmul.f32 %v13672_v26, %v13891_v8  ;;  %v15326_v47 = vld [vmem:[#allocation16_spill] sm:$0xff]  ;;  %v15328_v50 = vld [vmem:[#allocation15_spill] sm:$0xff] }
 0x806   :  { %15318 = vst [vmem:[#allocation28_spill] sm:$0xff] %v14059_v0  ;;  %v14063_v53 = vmul.f32 %v15319_v55, %v13891_v8  ;;  %15321 = vst [vmem:[#allocation32_spill] sm:$0xff] %v14067_v16  ;;  %v7913_v0 = vrot.slane %v13887_v11, %v13869_v29  ;;  %v14083_v55 = vmul.f32 %v13676_v14, %v13891_v8  ;;  %v15330_v16 = vld [vmem:[#allocation18_spill] sm:$0xff]  ;;  %v15332_v11 = vld [vmem:[#allocation17_spill] sm:$0xff] }
 0x807   :  { %15322 = vst [vmem:[#allocation34_spill] sm:$0xff] %v14071_v52  ;;  %15323 = vst [vmem:[#allocation36_spill] sm:$0xff] %v14075_v28  ;;  %v14091_v52 = vmul.f32 %v15326_v47, %v13891_v8  ;;  %v14095_v28 = vmul.f32 %v15328_v50, %v13891_v8  ;;  %v14103_v14 = vmul.f32 %v15332_v11, %v13891_v8 }
 0x808   :  { %15320 = vst [vmem:[#allocation30_spill] sm:$0xff] %v14063_v53  ;;  %15324 = vst [vmem:[#allocation38_spill] sm:$0xff] %v14083_v55  ;;  %v14099_v53 = vmul.f32 %v15330_v16, %v13891_v8  ;;  %v7920_v55 = vrot.slane %v7906_v60, %v13869_v29  ;;  %v7924_v26 = vrot.slane %v7913_v0, %v13787_v23 }
 0x809   :  { %15325 = vst [vmem:[#allocation40_spill] sm:$0xff] %v14087_v4  ;;  %15327 = vst [vmem:[#allocation42_spill] sm:$0xff] %v14091_v52  ;;  %v15333_v4 = vld [vmem:[#allocation20_spill] sm:$0xff]  ;;  %v15334_v52 = vld [vmem:[#allocation19_spill] sm:$0xff] }
 0x80a   :  { %15329 = vst [vmem:[#allocation44_spill] sm:$0xff] %v14095_v28  ;;  %15331 = vst [vmem:[#allocation46_spill] sm:$0xff] %v14099_v53  ;;  %v14109_v47 = vmul.f32 %v15333_v4, %v13891_v8  ;;  %v14113_v50 = vmul.f32 %v15334_v52, %v13891_v8  ;;  %v15335_v28 = vld [vmem:[#allocation24_spill] sm:$0xff]  ;;  %v15336_v53 = vld [vmem:[#allocation22_spill] sm:$0xff]  ;;  %v14124_v29 = vrot.slane %v7920_v55, %v13787_v23 }
 0x80b   :  { %v14117_v16 = vmul.f32 %v15335_v28, %v13891_v8  ;;  %v14121_v11 = vmul.f32 %v15336_v53, %v13891_v8  ;;  %v14127_v0 = vadd.f32 %v7924_v26, %v13894_v45  ;;  %v14130_v60 = vadd.f32 %v7924_v26, %v13897_v38 }
 0x80c   :  { %v14133_v52 = vadd.f32 %v7924_v26, %v13900_v58  ;;  %v14136_v4 = vadd.f32 %v7924_v26, %v13903_v5  ;;  %v14139_v28 = vadd.f32 %v7924_v26, %v13906_v42  ;;  %v14142_v8 = vadd.f32 %v7924_v26, %v13909_v36 }
 0x80d   :  { %v14145_v23 = vadd.f32 %v7924_v26, %v13912_v12  ;;  %v14148_v45 = vadd.f32 %v7924_v26, %v13915_v24  ;;  %v14151_v38 = vadd.f32 %v7924_v26, %v13918_v1  ;;  %v14154_v58 = vadd.f32 %v7924_v26, %v13921_v25 }
 0x80e   :  { %v14157_v5 = vadd.f32 %v7924_v26, %v13924_v30  ;;  %v14160_v42 = vadd.f32 %v7924_v26, %v13927_v39  ;;  %v14163_v36 = vadd.f32 %v7924_v26, %v13930_v49  ;;  %v14166_v12 = vadd.f32 %v7924_v26, %v13933_v2 }
 0x80f   :  { %v14169_v24 = vadd.f32 %v7924_v26, %v13936_v15  ;;  %v14172_v1 = vadd.f32 %v7924_v26, %v13939_v41  ;;  %v14175_v25 = vadd.f32 %v7924_v26, %v13942_v63  ;;  %v14178_v30 = vadd.f32 %v7924_v26, %v13945_v7  ;;  %v15342_v55 = vld [vmem:[#allocation30_spill] sm:$0xff] }
 0x810   :  { %v14181_v39 = vadd.f32 %v7924_v26, %v13948_v56  ;;  %v14184_v49 = vadd.f32 %v7924_v26, %v13951_v48  ;;  %v14187_v2 = vadd.f32 %v7924_v26, %v13954_v46  ;;  %v14190_v15 = vadd.f32 %v7924_v26, %v13957_v34 }
 0x811   :  { %v14193_v41 = vadd.f32 %v7924_v26, %v13960_v57  ;;  %v14196_v63 = vadd.f32 %v7924_v26, %v13963_v18  ;;  %v14199_v7 = vadd.f32 %v7924_v26, %v13966_v32  ;;  %v14202_v56 = vadd.f32 %v7924_v26, %v13969_v20 }
 0x812   :  { %v14205_v48 = vadd.f32 %v7924_v26, %v13972_v31  ;;  %v14208_v46 = vadd.f32 %v7924_v26, %v13975_v61  ;;  %v14211_v34 = vadd.f32 %v7924_v26, %v13978_v62  ;;  %v14214_v57 = vadd.f32 %v7924_v26, %v13981_v19 }
 0x813   :  { %v14217_v18 = vadd.f32 %v7924_v26, %v13984_v44  ;;  %v14220_v32 = vadd.f32 %v7924_v26, %v13987_v17  ;;  %v14224_v20 = vadd.f32 %v14124_v29, %v13991_v40  ;;  %v14228_v31 = vadd.f32 %v14124_v29, %v13995_v22  ;;  %v15344_v26 = vld [vmem:[#allocation32_spill] sm:$0xff] }
 0x814   :  { %v14232_v61 = vadd.f32 %v14124_v29, %v13999_v59  ;;  %v14236_v62 = vadd.f32 %v14124_v29, %v14003_v33  ;;  %v14240_v19 = vadd.f32 %v14124_v29, %v14007_v37  ;;  %v14244_v44 = vadd.f32 %v14124_v29, %v14011_v51  ;;  %v15337_v51 = vld [vmem:[#allocation26_spill] sm:$0xff] }
 0x815   :  { %v14248_v17 = vadd.f32 %v14124_v29, %v14015_v43  ;;  %v14252_v40 = vadd.f32 %v14124_v29, %v14019_v6  ;;  %v14256_v22 = vadd.f32 %v14124_v29, %v14023_v9  ;;  %v14260_v59 = vadd.f32 %v14124_v29, %v14027_v10 }
 0x816   :  { %v14264_v33 = vadd.f32 %v14124_v29, %v14031_v27  ;;  %v14268_v37 = vadd.f32 %v14124_v29, %v14035_v3  ;;  %v14272_v43 = vadd.f32 %v14124_v29, %v15337_v51  ;;  %v14276_v6 = vadd.f32 %v14124_v29, %v14043_v13  ;;  %v15340_v3 = vld [vmem:[#allocation28_spill] sm:$0xff]  ;;  %v15346_v51 = vld [vmem:[#allocation34_spill] sm:$0xff] }
 0x817   :  { %v14280_v9 = vadd.f32 %v14124_v29, %v14047_v35  ;;  %v14284_v10 = vadd.f32 %v14124_v29, %v14051_v54  ;;  %v14288_v27 = vadd.f32 %v14124_v29, %v14055_v21  ;;  %v14292_v53 = vadd.f32 %v14124_v29, %v15340_v3 }
 0x818   :  { %v14296_v13 = vadd.f32 %v14124_v29, %v15342_v55  ;;  %v14300_v35 = vadd.f32 %v14124_v29, %v15344_v26  ;;  %v14304_v54 = vadd.f32 %v14124_v29, %v15346_v51 }
 0x819   :  { %15338 = vst [vmem:[#allocation48_spill] sm:$0xff] %v14284_v10  ;;  %15339 = vst [vmem:[#allocation49_spill] sm:$0xff] %v14288_v27  ;;  %v15348_v10 = vld [vmem:[#allocation36_spill] sm:$0xff]  ;;  %v15349_v27 = vld [vmem:[#allocation38_spill] sm:$0xff] }
 0x81a   :  { %15341 = vst [vmem:[#allocation50_spill] sm:$0xff] %v14292_v53  ;;  %15343 = vst [vmem:[#allocation52_spill] sm:$0xff] %v14296_v13  ;;  %v14308_v21 = vadd.f32 %v14124_v29, %v15348_v10  ;;  %v14312_v3 = vadd.f32 %v14124_v29, %v15349_v27  ;;  %v15350_v53 = vld [vmem:[#allocation40_spill] sm:$0xff]  ;;  %v15351_v13 = vld [vmem:[#allocation42_spill] sm:$0xff]  ;;  %v14332_v27 = vadd.f32 %v14124_v29, %v14103_v14  ;;  %v7996_v14 = vmul.f32 0.5, %v14130_v60 }
 0x81b   :  { %15345 = vst [vmem:[#allocation54_spill] sm:$0xff] %v14300_v35  ;;  %15347 = vst [vmem:[#allocation55_spill] sm:$0xff] %v14304_v54  ;;  %v14316_v55 = vadd.f32 %v14124_v29, %v15350_v53  ;;  %v14320_v26 = vadd.f32 %v14124_v29, %v15351_v13  ;;  %v15353_v35 = vld [vmem:[#allocation44_spill] sm:$0xff]  ;;  %v15355_v54 = vld [vmem:[#allocation46_spill] sm:$0xff]  ;;  %v14336_v53 = vadd.f32 %v14124_v29, %v14109_v47  ;;  %v7998_v47 = vmul.f32 0.5, %v14136_v4 }
 0x81c   :  { %v14324_v51 = vadd.f32 %v14124_v29, %v15353_v35  ;;  %v14328_v10 = vadd.f32 %v14124_v29, %v15355_v54  ;;  %15357 = vst [vmem:[#allocation59_spill] sm:$0xff] %v14332_v27  ;;  %v14340_v13 = vadd.f32 %v14124_v29, %v14113_v50  ;;  %v14344_v35 = vadd.f32 %v14124_v29, %v14117_v16 }
 0x81d   :  { %15352 = vst [vmem:[#allocation56_spill] sm:$0xff] %v14320_v26  ;;  %15358 = vst [vmem:[#allocation60_spill] sm:$0xff] %v14336_v53  ;;  %v14348_v54 = vadd.f32 %v14124_v29, %v14121_v11  ;;  %v7997_v27 = vmul.f32 0.5, %v14133_v52  ;;  %v7999_v53 = vmul.f32 0.5, %v14139_v28  ;;  %v8000_v50 = vmul.f32 0.5, %v14142_v8 }
 0x81e   :  { %15354 = vst [vmem:[#allocation57_spill] sm:$0xff] %v14324_v51  ;;  %15356 = vst [vmem:[#allocation58_spill] sm:$0xff] %v14328_v10  ;;  %v7995_v10 = vmul.f32 0.5, %v14127_v0  ;;  %v14357_v16 = vmul.f32 0.5, %v14145_v23  ;;  %v14360_v11 = vmul.f32 0.5, %v14148_v45  ;;  %v14363_v29 = vmul.f32 0.5, %v14151_v38 }
 0x81f   :  { %15359 = vst [vmem:[#allocation61_spill] sm:$0xff] %v14340_v13  ;;  %15360 = vst [vmem:[#allocation62_spill] sm:$0xff] %v14344_v35  ;;  %v14366_v0 = vmul.f32 0.5, %v14154_v58  ;;  %v14369_v60 = vmul.f32 0.5, %v14157_v5  ;;  %v14373_v52 = vmul.f32 0.5, %v14160_v42  ;;  %v14377_v4 = vmul.f32 0.5, %v14163_v36 }
 0x820   :  { %15361 = vst [vmem:[#allocation63_spill] sm:$0xff] %v14348_v54  ;;  %9933 = vtanh.f32 %v7995_v10  ;;  %v14381_v28 = vmul.f32 0.5, %v14166_v12  ;;  %v14385_v23 = vmul.f32 0.5, %v14169_v24  ;;  %v14389_v38 = vmul.f32 0.5, %v14172_v1 }
 0x821   :  { %9935 = vtanh.f32 %v7996_v14  ;;  %v14393_v42 = vmul.f32 0.5, %v14175_v25  ;;  %v14397_v24 = vmul.f32 0.5, %v14178_v30  ;;  %v14401_v13 = vmul.f32 0.5, %v14181_v39 }
 0x822   :  { %9937 = vtanh.f32 %v7997_v27  ;;  %v14405_v26 = vmul.f32 0.5, %v14184_v49  ;;  %v14413_v39 = vmul.f32 0.5, %v14187_v2 }
 0x823   :  { %9939 = vtanh.f32 %v7998_v47 }
 0x824   :  { %9941 = vtanh.f32 %v7999_v53 }
 0x825   :  { %9943 = vtanh.f32 %v8000_v50 }
 0x826   :  { %9945 = vtanh.f32 %v14357_v16 }
 0x827   :  { %9947 = vtanh.f32 %v14360_v11 }
 0x828   :  { %9949 = vtanh.f32 %v14363_v29 }
 0x829   :  { %9951 = vtanh.f32 %v14366_v0 }
 0x82a   :  { %v9934_v8 = vpop.eup %9933  ;;  %9953 = vtanh.f32 %v14369_v60 }
 0x82b   :  { %v9936_v45 = vpop.eup %9935  ;;  %9955 = vtanh.f32 %v14373_v52  ;;  %v8123_v58 = vmul.f32 %v9934_v8, %v7995_v10 }
 0x82c   :  { %v9938_v5 = vpop.eup %9937  ;;  %9957 = vtanh.f32 %v14377_v4  ;;  %v8124_v36 = vmul.f32 %v9936_v45, %v7996_v14 }
 0x82d   :  { %v9940_v12 = vpop.eup %9939  ;;  %9959 = vtanh.f32 %v14381_v28  ;;  %v8125_v54 = vmul.f32 %v9938_v5, %v7997_v27  ;;  %v8187_v35 = vadd.f32 %v8123_v58, %v7995_v10  ;;  %v14439_v5 = vmul.f32 0.5, %v14196_v63 }
 0x82e   :  { %v9942_v1 = vpop.eup %9941  ;;  %9961 = vtanh.f32 %v14385_v23  ;;  %v8126_v8 = vmul.f32 %v9940_v12, %v7998_v47  ;;  %v8188_v25 = vadd.f32 %v8124_v36, %v7996_v14  ;;  %v14449_v12 = vmul.f32 0.5, %v14199_v7 }
 0x82f   :  { %v9944_v51 = vpop.eup %9943  ;;  %9963 = vtanh.f32 %v14389_v38  ;;  %v8127_v30 = vmul.f32 %v9942_v1, %v7999_v53  ;;  %v8189_v45 = vadd.f32 %v8125_v54, %v7997_v27  ;;  %8251 = vst.msk [vmem:[%s14966_s6] sm:$0xff] %vm6434_vm14, %v8187_v35  ;;  %v14421_v27 = vmul.f32 0.5, %v14190_v15 }
 0x830   :  { %v9946_v10 = vpop.eup %9945  ;;  %9965 = vtanh.f32 %v14393_v42  ;;  %v8128_v14 = vmul.f32 %v9944_v51, %v8000_v50  ;;  %v8190_v58 = vadd.f32 %v8126_v8, %v7998_v47  ;;  %8252 = vst.msk [vmem:[%s14966_s6 + $0x8] sm:$0xff] %vm6434_vm14, %v8188_v25  ;;  %v14430_v51 = vmul.f32 0.5, %v14193_v41 }
 0x831   :  { %v9948_v49 = vpop.eup %9947  ;;  %9967 = vtanh.f32 %v14397_v24  ;;  %v8129_v35 = vmul.f32 %v9946_v10, %v14357_v16  ;;  %v8191_v54 = vadd.f32 %v8127_v30, %v7999_v53  ;;  %8253 = vst.msk [vmem:[%s14966_s6 + $0x10] sm:$0xff] %vm6434_vm14, %v8189_v45  ;;  %v14459_v8 = vmul.f32 0.5, %v14202_v56 }
 0x832   :  { %v9950_v2 = vpop.eup %9949  ;;  %9969 = vtanh.f32 %v14401_v13  ;;  %v8130_v47 = vmul.f32 %v9948_v49, %v14360_v11  ;;  %v8192_v15 = vadd.f32 %v8128_v14, %v8000_v50  ;;  %8254 = vst.msk [vmem:[%s14966_s6 + $0x18] sm:$0xff] %vm6434_vm14, %v8190_v58  ;;  %v14469_v30 = vmul.f32 0.5, %v14205_v48 }
 0x833   :  { %v9952_v53 = vpop.eup %9951  ;;  %9971 = vtanh.f32 %v14405_v26  ;;  %v8131_v36 = vmul.f32 %v9950_v2, %v14363_v29  ;;  %v8193_v41 = vadd.f32 %v8129_v35, %v14357_v16  ;;  %8255 = vst.msk [vmem:[%s14966_s6 + $0x20] sm:$0xff] %vm6434_vm14, %v8191_v54  ;;  %v14479_v10 = vmul.f32 0.5, %v14208_v46 }
 0x834   :  { %v9954_v50 = vpop.eup %9953  ;;  %9973 = vtanh.f32 %v14413_v39  ;;  %v8132_v63 = vmul.f32 %v9952_v53, %v14366_v0  ;;  %v8194_v1 = vadd.f32 %v8130_v47, %v14360_v11  ;;  %8256 = vst.msk [vmem:[%s14966_s6 + $0x28] sm:$0xff] %vm6434_vm14, %v8192_v15  ;;  %v14489_v58 = vmul.f32 0.5, %v14211_v34 }
 0x835   :  { %v9956_v16 = vpop.eup %9955  ;;  %9975 = vtanh.f32 %v14421_v27  ;;  %v8133_v7 = vmul.f32 %v9954_v50, %v14369_v60  ;;  %v8195_v25 = vadd.f32 %v8131_v36, %v14363_v29  ;;  %8257 = vst.msk [vmem:[%s14966_s6 + $0x30] sm:$0xff] %vm6434_vm14, %v8193_v41  ;;  %v14499_v35 = vmul.f32 0.5, %v14214_v57 }
 0x836   :  { %v9958_v11 = vpop.eup %9957  ;;  %9977 = vtanh.f32 %v14430_v51  ;;  %v8134_v56 = vmul.f32 %v9956_v16, %v14373_v52  ;;  %v8196_v45 = vadd.f32 %v8132_v63, %v14366_v0  ;;  %8258 = vst.msk [vmem:[%s14966_s6 + $0x38] sm:$0xff] %vm6434_vm14, %v8194_v1  ;;  %v14509_v2 = vmul.f32 0.5, %v14217_v18 }
 0x837   :  { %v9960_v29 = vpop.eup %9959  ;;  %9979 = vtanh.f32 %v14439_v5  ;;  %v8135_v48 = vmul.f32 %v9958_v11, %v14377_v4  ;;  %v8197_v14 = vadd.f32 %v8133_v7, %v14369_v60  ;;  %8259 = vst.msk [vmem:[%s14966_s6 + $0x40] sm:$0xff] %vm6434_vm14, %v8195_v25  ;;  %v14519_v15 = vmul.f32 0.5, %v14220_v32 }
 0x838   :  { %v9962_v0 = vpop.eup %9961  ;;  %9981 = vtanh.f32 %v14449_v12  ;;  %v8136_v46 = vmul.f32 %v9960_v29, %v14381_v28  ;;  %v8198_v49 = vadd.f32 %v8134_v56, %v14373_v52  ;;  %8260 = vst.msk [vmem:[%s14966_s6 + $0x48] sm:$0xff] %vm6434_vm14, %v8196_v45  ;;  %v14529_v36 = vmul.f32 0.5, %v14224_v20 }
 0x839   :  { %v9964_v60 = vpop.eup %9963  ;;  %9983 = vtanh.f32 %v14459_v8  ;;  %v8137_v34 = vmul.f32 %v9962_v0, %v14385_v23  ;;  %v8199_v54 = vadd.f32 %v8135_v48, %v14377_v4  ;;  %8261 = vst.msk [vmem:[%s14966_s6 + $0x50] sm:$0xff] %vm6434_vm14, %v8197_v14  ;;  %v14539_v50 = vmul.f32 0.5, %v14228_v31 }
 0x83a   :  { %v9966_v52 = vpop.eup %9965  ;;  %9985 = vtanh.f32 %v14469_v30  ;;  %v8138_v57 = vmul.f32 %v9964_v60, %v14389_v38  ;;  %v8200_v47 = vadd.f32 %v8136_v46, %v14381_v28  ;;  %8262 = vst.msk [vmem:[%s14966_s6 + $0x58] sm:$0xff] %vm6434_vm14, %v8198_v49  ;;  %v14549_v1 = vmul.f32 0.5, %v14232_v61 }
 0x83b   :  { %v9968_v4 = vpop.eup %9967  ;;  %9987 = vtanh.f32 %v14479_v10  ;;  %v8139_v18 = vmul.f32 %v9966_v52, %v14393_v42  ;;  %v8201_v53 = vadd.f32 %v8137_v34, %v14385_v23  ;;  %8263 = vst.msk [vmem:[%s14966_s6 + $0x60] sm:$0xff] %vm6434_vm14, %v8199_v54  ;;  %v14559_v7 = vmul.f32 0.5, %v14236_v62 }
 0x83c   :  { %v9970_v28 = vpop.eup %9969  ;;  %9989 = vtanh.f32 %v14489_v58  ;;  %v8140_v32 = vmul.f32 %v9968_v4, %v14397_v24  ;;  %v8202_v41 = vadd.f32 %v8138_v57, %v14389_v38  ;;  %8264 = vst.msk [vmem:[%s14966_s6 + $0x68] sm:$0xff] %vm6434_vm14, %v8200_v47  ;;  %v14569_v11 = vmul.f32 0.5, %v14240_v19 }
 0x83d   :  { %v9972_v23 = vpop.eup %9971  ;;  %9991 = vtanh.f32 %v14499_v35  ;;  %v8141_v20 = vmul.f32 %v9970_v28, %v14401_v13  ;;  %v8203_v63 = vadd.f32 %v8139_v18, %v14393_v42  ;;  %8265 = vst.msk [vmem:[%s14966_s6 + $0x70] sm:$0xff] %vm6434_vm14, %v8201_v53  ;;  %v14579_v45 = vmul.f32 0.5, %v14244_v44 }
 0x83e   :  { %v9974_v38 = vpop.eup %9973  ;;  %9993 = vtanh.f32 %v14509_v2  ;;  %v8142_v31 = vmul.f32 %v9972_v23, %v14405_v26  ;;  %v8204_v16 = vadd.f32 %v8140_v32, %v14397_v24  ;;  %8266 = vst.msk [vmem:[%s14966_s6 + $0x78] sm:$0xff] %vm6434_vm14, %v8202_v41  ;;  %v14589_v48 = vmul.f32 0.5, %v14248_v17 }
 0x83f   :  { %v9976_v42 = vpop.eup %9975  ;;  %9995 = vtanh.f32 %v14519_v15  ;;  %v8143_v61 = vmul.f32 %v9974_v38, %v14413_v39  ;;  %v8205_v25 = vadd.f32 %v8141_v20, %v14401_v13  ;;  %8267 = vst.msk [vmem:[%s14966_s6 + $0x80] sm:$0xff] %vm6434_vm14, %v8203_v63  ;;  %v14599_v0 = vmul.f32 0.5, %v14252_v40  ;;  %v15362_v20 = vld [vmem:[#allocation48_spill] sm:$0xff] }
 0x840   :  { %v9978_v24 = vpop.eup %9977  ;;  %9997 = vtanh.f32 %v14529_v36  ;;  %v8144_v62 = vmul.f32 %v9976_v42, %v14421_v27  ;;  %v8206_v56 = vadd.f32 %v8142_v31, %v14405_v26  ;;  %8268 = vst.msk [vmem:[%s14966_s6 + $0x88] sm:$0xff] %vm6434_vm14, %v8204_v16  ;;  %v14609_v49 = vmul.f32 0.5, %v14256_v22  ;;  %v15363_v31 = vld [vmem:[#allocation49_spill] sm:$0xff] }
 0x841   :  { %v9980_v13 = vpop.eup %9979  ;;  %9999 = vtanh.f32 %v14539_v50  ;;  %v8145_v19 = vmul.f32 %v9978_v24, %v14430_v51  ;;  %v8207_v29 = vadd.f32 %v8143_v61, %v14413_v39  ;;  %8269 = vst.msk [vmem:[%s14966_s6 + $0x90] sm:$0xff] %vm6434_vm14, %v8205_v25  ;;  %v14619_v34 = vmul.f32 0.5, %v14260_v59  ;;  %v15364_v25 = vld [vmem:[#allocation50_spill] sm:$0xff] }
 0x842   :  { %v9982_v26 = vpop.eup %9981  ;;  %10001 = vtanh.f32 %v14549_v1  ;;  %v8146_v44 = vmul.f32 %v9980_v13, %v14439_v5  ;;  %v8208_v14 = vadd.f32 %v8144_v62, %v14421_v27  ;;  %8270 = vst.msk [vmem:[%s14966_s6 + $0x98] sm:$0xff] %vm6434_vm14, %v8206_v56  ;;  %v14629_v52 = vmul.f32 0.5, %v14264_v33  ;;  %v15365_v13 = vld [vmem:[#allocation52_spill] sm:$0xff] }
 0x843   :  { %v9984_v39 = vpop.eup %9983  ;;  %10003 = vtanh.f32 %v14559_v7  ;;  %v8147_v17 = vmul.f32 %v9982_v26, %v14449_v12  ;;  %v8209_v46 = vadd.f32 %v8145_v19, %v14430_v51  ;;  %8271 = vst.msk [vmem:[%s14966_s6 + $0xa0] sm:$0xff] %vm6434_vm14, %v8207_v29  ;;  %v14639_v47 = vmul.f32 0.5, %v14268_v37 }
 0x844   :  { %v9986_v27 = vpop.eup %9985  ;;  %10005 = vtanh.f32 %v14569_v11  ;;  %v8148_v40 = vmul.f32 %v9984_v39, %v14459_v8  ;;  %v8210_v60 = vadd.f32 %v8146_v44, %v14439_v5  ;;  %8272 = vst.msk [vmem:[%s14966_s6 + $0xa8] sm:$0xff] %vm6434_vm14, %v8208_v14  ;;  %v14649_v18 = vmul.f32 0.5, %v14272_v43  ;;  %v15366_v44 = vld [vmem:[#allocation54_spill] sm:$0xff] }
 0x845   :  { %v9988_v51 = vpop.eup %9987  ;;  %10007 = vtanh.f32 %v14579_v45  ;;  %v8149_v22 = vmul.f32 %v9986_v27, %v14469_v30  ;;  %v8211_v54 = vadd.f32 %v8147_v17, %v14449_v12  ;;  %8273 = vst.msk [vmem:[%s14966_s6 + $0xb0] sm:$0xff] %vm6434_vm14, %v8209_v46  ;;  %v14659_v28 = vmul.f32 0.5, %v14276_v6  ;;  %v15367_v46 = vld [vmem:[#allocation55_spill] sm:$0xff] }
 0x846   :  { %v9990_v5 = vpop.eup %9989  ;;  %10009 = vtanh.f32 %v14589_v48  ;;  %v8150_v59 = vmul.f32 %v9988_v51, %v14479_v10  ;;  %v8212_v57 = vadd.f32 %v8148_v40, %v14459_v8  ;;  %8274 = vst.msk [vmem:[%s14966_s6 + $0xb8] sm:$0xff] %vm6434_vm14, %v8210_v60  ;;  %v14669_v41 = vmul.f32 0.5, %v14280_v9 }
 0x847   :  { %v9992_v12 = vpop.eup %9991  ;;  %10011 = vtanh.f32 %v14599_v0  ;;  %v8151_v33 = vmul.f32 %v9990_v5, %v14489_v58  ;;  %v8213_v4 = vadd.f32 %v8149_v22, %v14469_v30  ;;  %8275 = vst.msk [vmem:[%s14966_s6 + $0xc0] sm:$0xff] %vm6434_vm14, %v8211_v54  ;;  %v14679_v63 = vmul.f32 0.5, %v15362_v20 }
 0x848   :  { %v9994_v8 = vpop.eup %9993  ;;  %10013 = vtanh.f32 %v14609_v49  ;;  %v8152_v37 = vmul.f32 %v9992_v12, %v14499_v35  ;;  %v8214_v53 = vadd.f32 %v8150_v59, %v14479_v10  ;;  %8276 = vst.msk [vmem:[%s14966_s6 + $0xc8] sm:$0xff] %vm6434_vm14, %v8212_v57  ;;  %v14689_v16 = vmul.f32 0.5, %v15363_v31 }
 0x849   :  { %v9996_v30 = vpop.eup %9995  ;;  %10015 = vtanh.f32 %v14619_v34  ;;  %v8153_v43 = vmul.f32 %v9994_v8, %v14509_v2  ;;  %v8215_v32 = vadd.f32 %v8151_v33, %v14489_v58  ;;  %8277 = vst.msk [vmem:[%s14966_s6 + $0xd0] sm:$0xff] %vm6434_vm14, %v8213_v4  ;;  %v14699_v24 = vmul.f32 0.5, %v15364_v25  ;;  %v15368_v33 = vld [vmem:[#allocation56_spill] sm:$0xff] }
 0x84a   :  { %v9998_v10 = vpop.eup %9997  ;;  %10017 = vtanh.f32 %v14629_v52  ;;  %v8154_v6 = vmul.f32 %v9996_v30, %v14519_v15  ;;  %v8216_v23 = vadd.f32 %v8152_v37, %v14499_v35  ;;  %8278 = vst.msk [vmem:[%s14966_s6 + $0xd8] sm:$0xff] %vm6434_vm14, %v8214_v53  ;;  %v14709_v19 = vmul.f32 0.5, %v15365_v13  ;;  %v15369_v37 = vld [vmem:[#allocation57_spill] sm:$0xff] }
 0x84b   :  { %v10000_v58 = vpop.eup %9999  ;;  %10019 = vtanh.f32 %v14639_v47  ;;  %v8155_v9 = vmul.f32 %v9998_v10, %v14529_v36  ;;  %v8217_v38 = vadd.f32 %v8153_v43, %v14509_v2  ;;  %8279 = vst.msk [vmem:[%s14966_s6 + $0xe0] sm:$0xff] %vm6434_vm14, %v8215_v32  ;;  %v14719_v14 = vmul.f32 0.5, %v15366_v44  ;;  %v15370_v32 = vld [vmem:[#allocation58_spill] sm:$0xff] }
 0x84c   :  { %v10002_v35 = vpop.eup %10001  ;;  %10021 = vtanh.f32 %v14649_v18  ;;  %v8156_v42 = vmul.f32 %v10000_v58, %v14539_v50  ;;  %v8218_v61 = vadd.f32 %v8154_v6, %v14519_v15  ;;  %8280 = vst.msk [vmem:[%s14966_s6 + $0xe8] sm:$0xff] %vm6434_vm14, %v8216_v23  ;;  %v14729_v27 = vmul.f32 0.5, %v15367_v46  ;;  %v15371_v58 = vld [vmem:[#allocation59_spill] sm:$0xff] }
 0x84d   :  { %v10004_v2 = vpop.eup %10003  ;;  %10023 = vtanh.f32 %v14659_v28  ;;  %v8157_v62 = vmul.f32 %v10002_v35, %v14549_v1  ;;  %v8219_v56 = vadd.f32 %v8155_v9, %v14529_v36  ;;  %8281 = vst.msk [vmem:[%s14966_s6 + $0xf0] sm:$0xff] %vm6434_vm14, %v8217_v38  ;;  %v14739_v51 = vmul.f32 0.5, %v14308_v21  ;;  %v15372_v35 = vld [vmem:[#allocation60_spill] sm:$0xff] }
 0x84e   :  { %v10006_v15 = vpop.eup %10005  ;;  %10025 = vtanh.f32 %v14669_v41  ;;  %v8158_v29 = vmul.f32 %v10004_v2, %v14559_v7  ;;  %v8220_v26 = vadd.f32 %v8156_v42, %v14539_v50  ;;  %8282 = vst.msk [vmem:[%s14966_s6 + $0xf8] sm:$0xff] %vm6434_vm14, %v8218_v61  ;;  %v14749_v5 = vmul.f32 0.5, %v14312_v3  ;;  %v15373_v2 = vld [vmem:[#allocation61_spill] sm:$0xff] }
 0x84f   :  { %v10008_v36 = vpop.eup %10007  ;;  %10027 = vtanh.f32 %v14679_v63  ;;  %v8159_v39 = vmul.f32 %v10006_v15, %v14569_v11  ;;  %v8221_v17 = vadd.f32 %v8157_v62, %v14549_v1  ;;  %8283 = vst.msk [vmem:[%s14966_s6 + $0x100] sm:$0xff] %vm6434_vm14, %v8219_v56  ;;  %v14759_v57 = vmul.f32 0.5, %v14316_v55  ;;  %v15374_v15 = vld [vmem:[#allocation62_spill] sm:$0xff] }
 0x850   :  { %v10010_v50 = vpop.eup %10009  ;;  %10029 = vtanh.f32 %v14689_v16  ;;  %v8160_v40 = vmul.f32 %v10008_v36, %v14579_v45  ;;  %v8222_v60 = vadd.f32 %v8158_v29, %v14559_v7  ;;  %8284 = vst.msk [vmem:[%s14966_s6 + $0x108] sm:$0xff] %vm6434_vm14, %v8220_v26  ;;  %v14769_v4 = vmul.f32 0.5, %v15368_v33  ;;  %v15375_v36 = vld [vmem:[#allocation63_spill] sm:$0xff] }
 0x851   :  { %v10012_v1 = vpop.eup %10011  ;;  %10031 = vtanh.f32 %v14699_v24  ;;  %v8161_v22 = vmul.f32 %v10010_v50, %v14589_v48  ;;  %v8223_v54 = vadd.f32 %v8159_v39, %v14569_v11  ;;  %8285 = vst.msk [vmem:[%s14966_s6 + $0x110] sm:$0xff] %vm6434_vm14, %v8221_v17  ;;  %v14779_v53 = vmul.f32 0.5, %v15369_v37 }
 0x852   :  { %v10014_v7 = vpop.eup %10013  ;;  %10033 = vtanh.f32 %v14709_v19  ;;  %v8162_v21 = vmul.f32 %v10012_v1, %v14599_v0  ;;  %v8224_v59 = vadd.f32 %v8160_v40, %v14579_v45  ;;  %8286 = vst.msk [vmem:[%s14966_s6 + $0x118] sm:$0xff] %vm6434_vm14, %v8222_v60  ;;  %v14789_v10 = vmul.f32 0.5, %v15370_v32 }
 0x853   :  { %v10016_v11 = vpop.eup %10015  ;;  %10035 = vtanh.f32 %v14719_v14  ;;  %v8163_v3 = vmul.f32 %v10014_v7, %v14609_v49  ;;  %v8225_v12 = vadd.f32 %v8161_v22, %v14589_v48  ;;  %8287 = vst.msk [vmem:[%s14966_s6 + $0x120] sm:$0xff] %vm6434_vm14, %v8223_v54  ;;  %v14799_v20 = vmul.f32 0.5, %v15371_v58 }
 0x854   :  { %v10018_v45 = vpop.eup %10017  ;;  %10037 = vtanh.f32 %v14729_v27  ;;  %v8164_v55 = vmul.f32 %v10016_v11, %v14619_v34  ;;  %v8226_v8 = vadd.f32 %v8162_v21, %v14599_v0  ;;  %8288 = vst.msk [vmem:[%s14966_s6 + $0x128] sm:$0xff] %vm6434_vm14, %v8224_v59  ;;  %v14809_v31 = vmul.f32 0.5, %v15372_v35 }
 0x855   :  { %v10020_v48 = vpop.eup %10019  ;;  %10039 = vtanh.f32 %v14739_v51  ;;  %v8165_v30 = vmul.f32 %v10018_v45, %v14629_v52  ;;  %v8227_v43 = vadd.f32 %v8163_v3, %v14609_v49  ;;  %8289 = vst.msk [vmem:[%s14966_s6 + $0x130] sm:$0xff] %vm6434_vm14, %v8225_v12  ;;  %v14819_v25 = vmul.f32 0.5, %v15373_v2 }
 0x856   :  { %v10022_v0 = vpop.eup %10021  ;;  %10041 = vtanh.f32 %v14749_v5  ;;  %v8166_v6 = vmul.f32 %v10020_v48, %v14639_v47  ;;  %v8228_v23 = vadd.f32 %v8164_v55, %v14619_v34  ;;  %8290 = vst.msk [vmem:[%s14966_s6 + $0x138] sm:$0xff] %vm6434_vm14, %v8226_v8  ;;  %v14829_v13 = vmul.f32 0.5, %v15374_v15 }
 0x857   :  { %v10024_v49 = vpop.eup %10023  ;;  %10043 = vtanh.f32 %v14759_v57  ;;  %v8167_v9 = vmul.f32 %v10022_v0, %v14649_v18  ;;  %v8229_v38 = vadd.f32 %v8165_v30, %v14629_v52  ;;  %8291 = vst.msk [vmem:[%s14966_s6 + $0x140] sm:$0xff] %vm6434_vm14, %v8227_v43  ;;  %v14839_v44 = vmul.f32 0.5, %v15375_v36 }
 0x858   :  { %v10026_v34 = vpop.eup %10025  ;;  %10045 = vtanh.f32 %v14769_v4  ;;  %v8168_v42 = vmul.f32 %v10024_v49, %v14659_v28  ;;  %v8230_v61 = vadd.f32 %v8166_v6, %v14639_v47  ;;  %8292 = vst.msk [vmem:[%s14966_s6 + $0x148] sm:$0xff] %vm6434_vm14, %v8228_v23 }
 0x859   :  { %v10028_v52 = vpop.eup %10027  ;;  %10047 = vtanh.f32 %v14779_v53  ;;  %v8169_v62 = vmul.f32 %v10026_v34, %v14669_v41  ;;  %v8231_v56 = vadd.f32 %v8167_v9, %v14649_v18  ;;  %8293 = vst.msk [vmem:[%s14966_s6 + $0x150] sm:$0xff] %vm6434_vm14, %v8229_v38 }
 0x85a   :  { %v10030_v47 = vpop.eup %10029  ;;  %10049 = vtanh.f32 %v14789_v10  ;;  %v8170_v29 = vmul.f32 %v10028_v52, %v14679_v63  ;;  %v8232_v26 = vadd.f32 %v8168_v42, %v14659_v28  ;;  %8294 = vst.msk [vmem:[%s14966_s6 + $0x158] sm:$0xff] %vm6434_vm14, %v8230_v61 }
 0x85b   :  { %v10032_v18 = vpop.eup %10031  ;;  %10051 = vtanh.f32 %v14799_v20  ;;  %v8171_v39 = vmul.f32 %v10030_v47, %v14689_v16  ;;  %v8233_v17 = vadd.f32 %v8169_v62, %v14669_v41  ;;  %8295 = vst.msk [vmem:[%s14966_s6 + $0x160] sm:$0xff] %vm6434_vm14, %v8231_v56 }
 0x85c   :  { %v10034_v28 = vpop.eup %10033  ;;  %10053 = vtanh.f32 %v14809_v31  ;;  %v8172_v50 = vmul.f32 %v10032_v18, %v14699_v24  ;;  %v8234_v46 = vadd.f32 %v8170_v29, %v14679_v63  ;;  %8296 = vst.msk [vmem:[%s14966_s6 + $0x168] sm:$0xff] %vm6434_vm14, %v8232_v26 }
 0x85d   :  { %v10036_v40 = vpop.eup %10035  ;;  %10055 = vtanh.f32 %v14819_v25  ;;  %v8173_v41 = vmul.f32 %v10034_v28, %v14709_v19  ;;  %v8235_v60 = vadd.f32 %v8171_v39, %v14689_v16  ;;  %8297 = vst.msk [vmem:[%s14966_s6 + $0x170] sm:$0xff] %vm6434_vm14, %v8233_v17 }
 0x85e   :  { %v10038_v1 = vpop.eup %10037  ;;  %10057 = vtanh.f32 %v14829_v13  ;;  %v8174_v63 = vmul.f32 %v10036_v40, %v14719_v14  ;;  %v8236_v22 = vadd.f32 %v8172_v50, %v14699_v24  ;;  %8298 = vst.msk [vmem:[%s14966_s6 + $0x178] sm:$0xff] %vm6434_vm14, %v8234_v46 }
 0x85f   :  { %v10040_v54 = vpop.eup %10039  ;;  %10059 = vtanh.f32 %v14839_v44  ;;  %v8175_v16 = vmul.f32 %v10038_v1, %v14729_v27  ;;  %v8237_v7 = vadd.f32 %v8173_v41, %v14709_v19  ;;  %8299 = vst.msk [vmem:[%s14966_s6 + $0x180] sm:$0xff] %vm6434_vm14, %v8235_v60 }
 0x860   :  { %v10042_v21 = vpop.eup %10041  ;;  %v8176_v24 = vmul.f32 %v10040_v54, %v14739_v51  ;;  %v8238_v59 = vadd.f32 %v8174_v63, %v14719_v14  ;;  %8300 = vst.msk [vmem:[%s14966_s6 + $0x188] sm:$0xff] %vm6434_vm14, %v8236_v22 }
 0x861   :  { %v10044_v11 = vpop.eup %10043  ;;  %v8177_v3 = vmul.f32 %v10042_v21, %v14749_v5  ;;  %v8239_v19 = vadd.f32 %v8175_v16, %v14729_v27  ;;  %8301 = vst.msk [vmem:[%s14966_s6 + $0x190] sm:$0xff] %vm6434_vm14, %v8237_v7 }
 0x862   :  { %v10046_v12 = vpop.eup %10045  ;;  %v8178_v45 = vmul.f32 %v10044_v11, %v14759_v57  ;;  %v8240_v14 = vadd.f32 %v8176_v24, %v14739_v51  ;;  %8302 = vst.msk [vmem:[%s14966_s6 + $0x198] sm:$0xff] %vm6434_vm14, %v8238_v59 }
 0x863   :  { %v10048_v33 = vpop.eup %10047  ;;  %v8179_v55 = vmul.f32 %v10046_v12, %v14769_v4  ;;  %v8241_v27 = vadd.f32 %v8177_v3, %v14749_v5  ;;  %8303 = vst.msk [vmem:[%s14966_s6 + $0x1a0] sm:$0xff] %vm6434_vm14, %v8239_v19 }
 0x864   :  { %v10050_v8 = vpop.eup %10049  ;;  %v8180_v48 = vmul.f32 %v10048_v33, %v14779_v53  ;;  %v8242_v51 = vadd.f32 %v8178_v45, %v14759_v57  ;;  %8304 = vst.msk [vmem:[%s14966_s6 + $0x1a8] sm:$0xff] %vm6434_vm14, %v8240_v14 }
 0x865   :  { %v10052_v37 = vpop.eup %10051  ;;  %v8181_v30 = vmul.f32 %v10050_v8, %v14789_v10  ;;  %v8243_v5 = vadd.f32 %v8179_v55, %v14769_v4  ;;  %8305 = vst.msk [vmem:[%s14966_s6 + $0x1b0] sm:$0xff] %vm6434_vm14, %v8241_v27 }
 0x866   :  { %v10054_v43 = vpop.eup %10053  ;;  %v8182_v0 = vmul.f32 %v10052_v37, %v14799_v20  ;;  %v8244_v57 = vadd.f32 %v8180_v48, %v14779_v53  ;;  %8306 = vst.msk [vmem:[%s14966_s6 + $0x1b8] sm:$0xff] %vm6434_vm14, %v8242_v51 }
 0x867   :  { %v10056_v32 = vpop.eup %10055  ;;  %v8183_v6 = vmul.f32 %v10054_v43, %v14809_v31  ;;  %v8245_v4 = vadd.f32 %v8181_v30, %v14789_v10  ;;  %8307 = vst.msk [vmem:[%s14966_s6 + $0x1c0] sm:$0xff] %vm6434_vm14, %v8243_v5 }
 0x868   :  { %v10058_v23 = vpop.eup %10057  ;;  %v8184_v49 = vmul.f32 %v10056_v32, %v14819_v25  ;;  %v8246_v53 = vadd.f32 %v8182_v0, %v14799_v20  ;;  %8308 = vst.msk [vmem:[%s14966_s6 + $0x1c8] sm:$0xff] %vm6434_vm14, %v8244_v57 }
 0x869   :  { %v10060_v58 = vpop.eup %10059  ;;  %v8185_v9 = vmul.f32 %v10058_v23, %v14829_v13  ;;  %v8247_v10 = vadd.f32 %v8183_v6, %v14809_v31  ;;  %8309 = vst.msk [vmem:[%s14966_s6 + $0x1d0] sm:$0xff] %vm6434_vm14, %v8245_v4 }
 0x86a   :  { %v8186_v38 = vmul.f32 %v10060_v58, %v14839_v44  ;;  %v8248_v34 = vadd.f32 %v8184_v49, %v14819_v25  ;;  %8310 = vst.msk [vmem:[%s14966_s6 + $0x1d8] sm:$0xff] %vm6434_vm14, %v8246_v53 }
 0x86b   :  { %v8249_v20 = vadd.f32 %v8185_v9, %v14829_v13  ;;  %8311 = vst.msk [vmem:[%s14966_s6 + $0x1e0] sm:$0xff] %vm6434_vm14, %v8247_v10 }
 0x86c   :  { %v8250_v35 = vadd.f32 %v8186_v38, %v14839_v44  ;;  %8312 = vst.msk [vmem:[%s14966_s6 + $0x1e8] sm:$0xff] %vm6434_vm14, %v8248_v34 }
 0x86d   :  { %8313 = vst.msk [vmem:[%s14966_s6 + $0x1f0] sm:$0xff] %vm6434_vm14, %v8249_v20 }
 0x86e   :  { %8314 = vst.msk [vmem:[%s14966_s6 + $0x1f8] sm:$0xff] %vm6434_vm14, %v8250_v35 }

</bundles_post_ra>
